<compile_context>
chip_gen: v7x
topology: tpu7x:2x2x1
jax: 0.10.0
libtpu: 0.0.40
codegen_flags: <defaults>
</compile_context>

<pallas_src>
import jax
import jax.numpy as jnp
from jax import lax
from jax.experimental import pallas as pl
from jax.experimental.pallas import tpu as pltpu

BN_EPS = 1e-5          # PyTorch BatchNorm2d default
H = W = 16             # latent spatial size used here
C = 128                # trunk width
CIN = 4                # latent channels
NUM_BLOCKS = 20        # resblocks
GROUP = 4              # resblocks per long skip


# --------------------------------------------------------------------------
# Fused whole-network kernel
# --------------------------------------------------------------------------
def _fused_upscaler_kernel(xcols_ref, xskip_ref, w1_ref, b1_ref,
                           rbw_ref, rbb_ref, w2_ref, b2_ref, w3_ref, b3_ref,
                           wf_ref, bf_ref,
                           o_ref,
                           act_ref, tmp_ref, res_ref):
    """Whole Upscaler forward for one image; grid axis 1 walks the 20 resblocks."""
    l = pl.program_id(1)
    HW = H * W

    def conv3x3(src_ref, w_ref, wrow0, bias):
        # 3x3 SAME conv of the zero-haloed (H+2,W+2,C) tile in `src_ref` against
        # deep-K packed bf16 weights (rows [wrow0, wrow0+9C) of w_ref,
        # row order = kw*3C + kh*C + cin).  f32 accumulation; returns (H*W, C) f32.
        acc = jnp.zeros((HW, C), jnp.float32)
        for kw in range(3):
            xs = src_ref[:, kw:kw + W, :].astype(jnp.bfloat16)      # (H+2, W, C)
            # stack the three kh row-bands along channels -> K = 3*C = 384
            win = jnp.concatenate([xs[0:H], xs[1:H + 1], xs[2:H + 2]], axis=-1)
            acc = acc + jnp.dot(
                win.reshape(HW, 3 * C),
                w_ref[wrow0 + kw * 3 * C: wrow0 + (kw + 1) * 3 * C, :],
                preferred_element_type=jnp.float32)
        return acc + bias

    # ---- prologue (l == 0): conv1 + bn1 + relu, init halos & long-skip -------
    @pl.when(l == 0)
    def _prologue():
        act_ref[...] = jnp.zeros_like(act_ref)     # zero halo (only interior is
        tmp_ref[...] = jnp.zeros_like(tmp_ref)     # ever rewritten afterwards)
        x1 = jnp.dot(xcols_ref[...].astype(jnp.bfloat16), w1_ref[...],
                     preferred_element_type=jnp.float32) + b1_ref[...]
        x1 = jnp.maximum(x1, 0.0).reshape(H, W, C)
        act_ref[1:H + 1, 1:W + 1, :] = x1
        res_ref[...] = x1

    # ---- resblock l -----------------------------------------------------------
    h = jnp.maximum(conv3x3(act_ref, rbw_ref, 0, rbb_ref[0:1, :]), 0.0)
    tmp_ref[1:H + 1, 1:W + 1, :] = h.reshape(H, W, C)
    h2 = conv3x3(tmp_ref, rbw_ref, 9 * C, rbb_ref[1:2, :]).reshape(H, W, C)
    h2 = jnp.maximum(h2 + act_ref[1:H + 1, 1:W + 1, :], 0.0)  # +residual, then ReLU
    act_ref[1:H + 1, 1:W + 1, :] = h2

    # ---- long skip every 4 resblocks ------------------------------------------
    @pl.when(l % GROUP == GROUP - 1)
    def _group_skip():
        g = act_ref[1:H + 1, 1:W + 1, :] + res_ref[...]
        act_ref[1:H + 1, 1:W + 1, :] = g
        res_ref[...] = g

    # ---- epilogue (l == last): conv2 + conv3 + conv_final + input skip --------
    @pl.when(l == NUM_BLOCKS - 1)
    def _epilogue():
        y2 = jnp.maximum(conv3x3(act_ref, w2_ref, 0, b2_ref[...]), 0.0)
        tmp_ref[1:H + 1, 1:W + 1, :] = y2.reshape(H, W, C)
        y3 = conv3x3(tmp_ref, w3_ref, 0, b3_ref[...])          # bn3, NO relu (as in forward)
        yf = jnp.dot(y3.astype(jnp.bfloat16), wf_ref[...],
                     preferred_element_type=jnp.float32) + bf_ref[...]
        o_ref[...] = (yf + xskip_ref[...]).reshape(H, W, CIN)


@jax.jit
def upscaler_forward(kp, x_nchw):
    """x_nchw: (N, 4, H, W) f32 latent batch -> (N, 4, H, W)."""
    N, cin, h, w = x_nchw.shape
    assert (cin, h, w) == (CIN, H, W)
    x = jnp.transpose(x_nchw, (0, 2, 3, 1)).astype(jnp.float32)          # NHWC
    # im2col of the zero-padded input for conv1 (row order kh, kw, cin).
    xp = jnp.pad(x, ((0, 0), (1, 1), (1, 1), (0, 0)))
    cols = [xp[:, kh:kh + H, kw:kw + W, :] for kh in range(3) for kw in range(3)]
    x_cols = jnp.concatenate(cols, axis=-1).reshape(N, H * W, 9 * CIN)
    x_skip = x.reshape(N, H * W, CIN)

    out = pl.pallas_call(
        _fused_upscaler_kernel,
        out_shape=jax.ShapeDtypeStruct((N, H, W, CIN), jnp.float32),
        grid=(N, NUM_BLOCKS),
        in_specs=[
            pl.BlockSpec((None, H * W, 9 * CIN), lambda n, l: (n, 0, 0)),  # x_cols
            pl.BlockSpec((None, H * W, CIN), lambda n, l: (n, 0, 0)),      # x_skip
            pl.BlockSpec((9 * CIN, C), lambda n, l: (0, 0)),               # w1 (bf16)
            pl.BlockSpec((1, C), lambda n, l: (0, 0)),                     # b1
            pl.BlockSpec((None, 2 * 9 * C, C), lambda n, l: (l, 0, 0)),    # rb_w (streamed/layer)
            pl.BlockSpec((None, 2, C), lambda n, l: (l, 0, 0)),            # rb_b
            pl.BlockSpec((9 * C, C), lambda n, l: (0, 0)),                 # w2 (padded to 128)
            pl.BlockSpec((1, C), lambda n, l: (0, 0)),                     # b2
            pl.BlockSpec((9 * C, C), lambda n, l: (0, 0)),                 # w3 (padded to 128)
            pl.BlockSpec((1, C), lambda n, l: (0, 0)),                     # b3
            pl.BlockSpec((C, CIN), lambda n, l: (0, 0)),                   # conv_final w
            pl.BlockSpec((1, CIN), lambda n, l: (0, 0)),                   # conv_final b
        ],
        out_specs=pl.BlockSpec((None, H, W, CIN), lambda n, l: (n, 0, 0, 0)),
        scratch_shapes=[
            pltpu.VMEM((H + 2, W + 2, C), jnp.float32),   # padded resident activation
            pltpu.VMEM((H + 2, W + 2, C), jnp.float32),   # padded temp (2nd conv input)
            pltpu.VMEM((H, W, C), jnp.float32),           # long-skip residual
        ],
        compiler_params=pltpu.CompilerParams(
            # batch -> both v7x TensorCores; layer axis carries VMEM state.
            # TODO(synk): for N == 1 inference, split H (with a 1-row halo) to
            # keep a parallel axis >= 2 on v7x.
            dimension_semantics=("parallel", "arbitrary"),
            vmem_limit_bytes=32 * 1024 * 1024),
    )(x_cols, x_skip, kp["w1"], kp["b1"], kp["rb_w"], kp["rb_b"],
      kp["w2"], kp["b2"], kp["w3"], kp["b3"], kp["wf"], kp["bf"])
    return jnp.transpose(out, (0, 3, 1, 2))                               # NCHW


# --------------------------------------------------------------------------
# Parameters (synthetic, deterministic) + packing to the kernel layout
# --------------------------------------------------------------------------
def _kaiming(key, kh, kw, cin, cout, gain=1.0):
    # kaiming_normal_(mode='fan_out', nonlinearity='relu'): std = sqrt(2/(cout*kh*kw))
    std = gain * (2.0 / (cout * kh * kw)) ** 0.5
    return std * jax.random.normal(key, (kh, kw, cin, cout), jnp.float32)


def _bn_stats(key, c):
    # Non-trivial eval-mode BN stats so the BN fold is actually exercised.
    k1, k2, k3, k4 = jax.random.split(key, 4)
    gamma = jax.random.uniform(k1, (c,), jnp.float32, 0.8, 1.2)
    beta = 0.1 * jax.random.normal(k2, (c,), jnp.float32)
    mean = 0.1 * jax.random.normal(k3, (c,), jnp.float32)
    var = jax.random.uniform(k4, (c,), jnp.float32, 0.8, 1.2)
    return gamma, beta, mean, var


def init_raw_params(key):
    keys = jax.random.split(key, 4 * NUM_BLOCKS + 16)
    ki = iter(keys)
    raw = {"conv1_w": _kaiming(next(ki), 3, 3, CIN, C), "bn1": _bn_stats(next(ki), C)}
    blocks = []
    for _ in range(NUM_BLOCKS):
        # gain=0.25 keeps the 20-deep residual stack well-conditioned for the
        # numerical check (parameter values are synthetic either way).
        blocks.append((_kaiming(next(ki), 3, 3, C, C, gain=0.25), _bn_stats(next(ki), C),
                       _kaiming(next(ki), 3, 3, C, C, gain=0.25), _bn_stats(next(ki), C)))
    raw["blocks"] = blocks
    raw["conv2_w"] = _kaiming(next(ki), 3, 3, C, 64)
    raw["bn2"] = _bn_stats(next(ki), 64)
    raw["conv3_w"] = _kaiming(next(ki), 3, 3, 64, 64)
    raw["bn3"] = _bn_stats(next(ki), 64)
    # NOTE: the PyTorch module zero-inits conv_final (forward == identity at
    # init); we use small nonzero weights so the compute path is exercised.
    raw["convf_w"] = 0.01 * jax.random.normal(next(ki), (64, CIN), jnp.float32)
    raw["convf_b"] = 0.02 * jax.random.normal(next(ki), (CIN,), jnp.float32)
    return raw


def _fold_bn(w, bn):
    gamma, beta, mean, var = bn
    scale = gamma * lax.rsqrt(var + BN_EPS)
    return (w * scale).astype(jnp.bfloat16), (beta - mean * scale).astype(jnp.float32)


def _deepk(w):
    # (3,3,Cin,Cout) -> (9*Cin, Cout), row index = kw*3*Cin + kh*Cin + cin.
    kh, kw, cin, cout = w.shape
    return jnp.transpose(w, (1, 0, 2, 3)).reshape(kh * kw * cin, cout)


def prepare_params(raw):
    """Fold BN, cast to bf16, pack to the fused-kernel layout.

    Returns (kernel_params, reference_params) sharing the same bf16-rounded
    folded weights so the check isolates kernel bugs, not dtype choices."""
    kp, rp = {}, {}

    w1, b1 = _fold_bn(raw["conv1_w"], raw["bn1"])
    kp["w1"] = w1.reshape(9 * CIN, C)         # (kh,kw,cin)-ordered im2col matrix
    kp["b1"] = b1.reshape(1, C)
    rp["w1"], rp["b1"] = w1, b1

    rbw, rbb, rblk = [], [], []
    for cw1, cbn1, cw2, cbn2 in raw["blocks"]:
        fw1, fb1 = _fold_bn(cw1, cbn1)
        fw2, fb2 = _fold_bn(cw2, cbn2)
        rbw.append(jnp.concatenate([_deepk(fw1), _deepk(fw2)], axis=0))
        rbb.append(jnp.stack([fb1, fb2], axis=0))
        rblk.append((fw1, fb1, fw2, fb2))
    kp["rb_w"] = jnp.stack(rbw, axis=0)       # (20, 2304, 128) bf16, streamed per layer
    kp["rb_b"] = jnp.stack(rbb, axis=0)       # (20, 2, 128) f32
    rp["blocks"] = rblk

    # conv2 (128->64) / conv3 (64->64): zero-pad channels to 128 lanes so the
    # tail stays lane-dense; the padded channels are provably zero end-to-end.
    w2, b2 = _fold_bn(raw["conv2_w"], raw["bn2"])
    w3, b3 = _fold_bn(raw["conv3_w"], raw["bn3"])
    kp["w2"] = _deepk(jnp.pad(w2, ((0, 0), (0, 0), (0, 0), (0, C - 64))))
    kp["b2"] = jnp.pad(b2, (0, C - 64)).reshape(1, C)
    kp["w3"] = _deepk(jnp.pad(w3, ((0, 0), (0, 0), (0, C - 64), (0, C - 64))))
    kp["b3"] = jnp.pad(b3, (0, C - 64)).reshape(1, C)
    rp["w2"], rp["b2"], rp["w3"], rp["b3"] = w2, b2, w3, b3

    wf = raw["convf_w"].astype(jnp.bfloat16)
    kp["wf"] = jnp.pad(wf, ((0, C - 64), (0, 0)))      # (128, 4) bf16
    kp["bf"] = raw["convf_b"].reshape(1, CIN)
    rp["wf"], rp["bf"] = wf, raw["convf_b"]
    return kp, rp


# --------------------------------------------------------------------------
# Pure-XLA reference (same arithmetic: bf16 matmul inputs, f32 accumulation)
# --------------------------------------------------------------------------
def upscaler_ref(rp, x_nchw):
    x = jnp.transpose(x_nchw, (0, 2, 3, 1)).astype(jnp.float32)
    inp = x

    def conv(x, w):
        return lax.conv_general_dilated(
            x.astype(jnp.bfloat16), w, (1, 1), "SAME",
            dimension_numbers=("NHWC", "HWIO", "NHWC"),
            preferred_element_type=jnp.float32)

    def cbr(x, w, b, relu=True, res=None):
        y = conv(x, w) + b
        if res is not None:
            y = y + res
        return jnp.maximum(y, 0.0) if relu else y

    x = cbr(x, rp["w1"], rp["b1"])
    for g in range(5):
        residual = x
        for i in range(GROUP):
            w1, b1, w2, b2 = rp["blocks"][g * GROUP + i]
            h = cbr(x, w1, b1)
            x = cbr(h, w2, b2, res=x)
        x = x + residual
    x = cbr(x, rp["w2"], rp["b2"])
    x = cbr(x, rp["w3"], rp["b3"], relu=False)
    y = jnp.einsum("nhwc,cd->nhwd", x.astype(jnp.bfloat16), rp["wf"],
                   preferred_element_type=jnp.float32) + rp["bf"]
    return jnp.transpose(y + inp, (0, 3, 1, 2))


if __name__ == "__main__":
    key = jax.random.PRNGKey(0)
    pkey, xkey = jax.random.split(key)
    kparams, rparams = prepare_params(init_raw_params(pkey))
    x = jax.random.normal(xkey, (2, CIN, H, W), jnp.float32)   # NCHW latent batch

    out = jax.block_until_ready(upscaler_forward(kparams, x))

    ref = jax.jit(upscaler_ref)(rparams, x)
    assert out.shape == x.shape and out.dtype == jnp.float32
    assert bool(jnp.all(jnp.isfinite(out)))
    # Both paths use bf16 matmul inputs with f32 accumulation and identical
    # bf16-rounded folded weights; remaining delta is accumulation order plus
    # rare 1-ulp bf16 rounding flips across the 44 matmul layers.
    max_err = float(jnp.max(jnp.abs(out - ref)))
    assert max_err < 5e-2, f"mismatch vs XLA reference: {max_err}"
    print("KERNEL_OK")
</pallas_src>

<mosaic_0001>
module attributes {stable_mosaic.version = 11 : i64} {
  func.func @_fused_upscaler_kernel(%arg0: i32, %arg1: i32, %arg2: memref<1x256x36xf32, #tpu.memory_space<vmem>>, %arg3: memref<1x256x4xf32, #tpu.memory_space<vmem>>, %arg4: memref<36x128xbf16, #tpu.memory_space<vmem>>, %arg5: memref<1x128xf32, #tpu.memory_space<vmem>>, %arg6: memref<1x2304x128xbf16, #tpu.memory_space<vmem>>, %arg7: memref<1x2x128xf32, #tpu.memory_space<vmem>>, %arg8: memref<1152x128xbf16, #tpu.memory_space<vmem>>, %arg9: memref<1x128xf32, #tpu.memory_space<vmem>>, %arg10: memref<1152x128xbf16, #tpu.memory_space<vmem>>, %arg11: memref<1x128xf32, #tpu.memory_space<vmem>>, %arg12: memref<128x4xbf16, #tpu.memory_space<vmem>>, %arg13: memref<1x4xf32, #tpu.memory_space<vmem>>, %arg14: memref<1x16x16x4xf32, #tpu.memory_space<vmem>>, %arg15: memref<18x18x128xf32, #tpu.memory_space<vmem>>, %arg16: memref<18x18x128xf32, #tpu.memory_space<vmem>>, %arg17: memref<16x16x128xf32, #tpu.memory_space<vmem>>) attributes {dimension_semantics = [#tpu.dimension_semantics<parallel>, #tpu.dimension_semantics<arbitrary>], iteration_bounds = array<i64: 2, 20>, scalar_prefetch = 0 : i64, scratch_operands = 3 : i64, tpu.core_type = #tpu.core_type<tc>, window_params = [{transform_indices = @transform_0, window_bounds = array<i64: 1, 256, 36>}, {transform_indices = @transform_1, window_bounds = array<i64: 1, 256, 4>}, {pipeline_mode = #tpu.pipeline_mode<synchronous>, transform_indices = @transform_2, window_bounds = array<i64: 36, 128>}, {pipeline_mode = #tpu.pipeline_mode<synchronous>, transform_indices = @transform_3, window_bounds = array<i64: 1, 128>}, {transform_indices = @transform_4, window_bounds = array<i64: 1, 2304, 128>}, {transform_indices = @transform_5, window_bounds = array<i64: 1, 2, 128>}, {pipeline_mode = #tpu.pipeline_mode<synchronous>, transform_indices = @transform_6, window_bounds = array<i64: 1152, 128>}, {pipeline_mode = #tpu.pipeline_mode<synchronous>, transform_indices = @transform_7, window_bounds = array<i64: 1, 128>}, {pipeline_mode = #tpu.pipeline_mode<synchronous>, transform_indices = @transform_8, window_bounds = array<i64: 1152, 128>}, {pipeline_mode = #tpu.pipeline_mode<synchronous>, transform_indices = @transform_9, window_bounds = array<i64: 1, 128>}, {pipeline_mode = #tpu.pipeline_mode<synchronous>, transform_indices = @transform_10, window_bounds = array<i64: 128, 4>}, {pipeline_mode = #tpu.pipeline_mode<synchronous>, transform_indices = @transform_11, window_bounds = array<i64: 1, 4>}, {transform_indices = @transform_12, window_bounds = array<i64: 1, 16, 16, 4>}]} {
    %c0_i32 = arith.constant 0 : i32
    %0 = arith.cmpi eq, %arg1, %c0_i32 : i32
    %1 = arith.extui %0 : i1 to i32
    %c0_i32_0 = arith.constant 0 : i32
    %2 = arith.cmpi ne, %1, %c0_i32_0 : i32
    scf.if %2 {
      %cst_59 = arith.constant 0.000000e+00 : f32
      %105 = vector.broadcast %cst_59 : f32 to vector<18x18x128xf32>
      %c0_60 = arith.constant 0 : index
      %c0_61 = arith.constant 0 : index
      %c0_62 = arith.constant 0 : index
      %106 = vector.load %arg15[%c0_60, %c0_61, %c0_62] : memref<18x18x128xf32, #tpu.memory_space<vmem>>, vector<18x18x128xf32>
      tpu.vector_store %arg15[%c0_60, %c0_61, %c0_62], %105 {strides = array<i32>} : memref<18x18x128xf32, #tpu.memory_space<vmem>>, vector<18x18x128xf32>,
      %cst_63 = arith.constant 0.000000e+00 : f32
      %107 = vector.broadcast %cst_63 : f32 to vector<18x18x128xf32>
      %c0_64 = arith.constant 0 : index
      %c0_65 = arith.constant 0 : index
      %c0_66 = arith.constant 0 : index
      %108 = vector.load %arg16[%c0_64, %c0_65, %c0_66] : memref<18x18x128xf32, #tpu.memory_space<vmem>>, vector<18x18x128xf32>
      tpu.vector_store %arg16[%c0_64, %c0_65, %c0_66], %107 {strides = array<i32>} : memref<18x18x128xf32, #tpu.memory_space<vmem>>, vector<18x18x128xf32>,
      %c0_67 = arith.constant 0 : index
      %c0_68 = arith.constant 0 : index
      %c0_69 = arith.constant 0 : index
      %109 = vector.load %arg2[%c0_67, %c0_68, %c0_69] : memref<1x256x36xf32, #tpu.memory_space<vmem>>, vector<1x256x36xf32>
      %110 = vector.shape_cast %109 : vector<1x256x36xf32> to vector<256x36xf32>
      %111 = arith.truncf %110 : vector<256x36xf32> to vector<256x36xbf16>
      %c0_70 = arith.constant 0 : index
      %c0_71 = arith.constant 0 : index
      %112 = vector.load %arg4[%c0_70, %c0_71] : memref<36x128xbf16, #tpu.memory_space<vmem>>, vector<36x128xbf16>
      %cst_72 = arith.constant dense<0.000000e+00> : vector<256x128xf32>
      %113 = tpu.matmul %111, %112, %cst_72 {dimension_numbers = #tpu.dot_dimension_numbers<[1], [0], [0], [1], [0, 0, 1, 1], [], []>} : vector<256x36xbf16>, vector<36x128xbf16>, vector<256x128xf32> -> vector<256x128xf32>
      %c0_73 = arith.constant 0 : index
      %c0_74 = arith.constant 0 : index
      %114 = vector.load %arg5[%c0_73, %c0_74] : memref<1x128xf32, #tpu.memory_space<vmem>>, vector<1x128xf32>
      %115 = vector.broadcast %114 : vector<1x128xf32> to vector<256x128xf32>
      %116 = arith.addf %113, %115 : vector<256x128xf32>
      %cst_75 = arith.constant 0.000000e+00 : f32
      %117 = vector.broadcast %cst_75 : f32 to vector<256x128xf32>
      %118 = arith.maximumf %116, %117 : vector<256x128xf32>
      %119 = vector.shape_cast %118 : vector<256x128xf32> to vector<16x16x128xf32>
      %c1_76 = arith.constant 1 : index
      %c1_77 = arith.constant 1 : index
      %c0_78 = arith.constant 0 : index
      %120 = vector.load %arg15[%c1_76, %c1_77, %c0_78] : memref<18x18x128xf32, #tpu.memory_space<vmem>>, vector<16x16x128xf32>
      tpu.vector_store %arg15[%c1_76, %c1_77, %c0_78], %119 {strides = array<i32>} : memref<18x18x128xf32, #tpu.memory_space<vmem>>, vector<16x16x128xf32>,
      %c0_79 = arith.constant 0 : index
      %c0_80 = arith.constant 0 : index
      %c0_81 = arith.constant 0 : index
      %121 = vector.load %arg17[%c0_79, %c0_80, %c0_81] : memref<16x16x128xf32, #tpu.memory_space<vmem>>, vector<16x16x128xf32>
      tpu.vector_store %arg17[%c0_79, %c0_80, %c0_81], %119 {strides = array<i32>} : memref<16x16x128xf32, #tpu.memory_space<vmem>>, vector<16x16x128xf32>,
    } else {
    }
    %c0 = arith.constant 0 : index
    %c0_1 = arith.constant 0 : index
    %c0_2 = arith.constant 0 : index
    %3 = vector.load %arg7[%c0, %c0_1, %c0_2] : memref<1x2x128xf32, #tpu.memory_space<vmem>>, vector<1x1x128xf32>
    %4 = vector.shape_cast %3 : vector<1x1x128xf32> to vector<1x128xf32>
    %cst = arith.constant 0.000000e+00 : f32
    %5 = vector.broadcast %cst : f32 to vector<256x128xf32>
    %c0_3 = arith.constant 0 : index
    %c0_4 = arith.constant 0 : index
    %c0_5 = arith.constant 0 : index
    %6 = vector.load %arg15[%c0_3, %c0_4, %c0_5] : memref<18x18x128xf32, #tpu.memory_space<vmem>>, vector<18x16x128xf32>
    %7 = arith.truncf %6 : vector<18x16x128xf32> to vector<18x16x128xbf16>
    %8 = vector.extract_strided_slice %7 {offsets = [0, 0, 0], sizes = [16, 16, 128], strides = [1, 1, 1]} : vector<18x16x128xbf16> to vector<16x16x128xbf16>
    %9 = vector.extract_strided_slice %7 {offsets = [1, 0, 0], sizes = [16, 16, 128], strides = [1, 1, 1]} : vector<18x16x128xbf16> to vector<16x16x128xbf16>
    %10 = vector.extract_strided_slice %7 {offsets = [2, 0, 0], sizes = [16, 16, 128], strides = [1, 1, 1]} : vector<18x16x128xbf16> to vector<16x16x128xbf16>
    %11 = tpu.concatenate %8, %9, %10 in 2 : vector<16x16x128xbf16>, vector<16x16x128xbf16>, vector<16x16x128xbf16> -> vector<16x16x384xbf16>
    %12 = vector.shape_cast %11 : vector<16x16x384xbf16> to vector<256x384xbf16>
    %c0_6 = arith.constant 0 : index
    %c0_7 = arith.constant 0 : index
    %c0_8 = arith.constant 0 : index
    %13 = vector.load %arg6[%c0_6, %c0_7, %c0_8] : memref<1x2304x128xbf16, #tpu.memory_space<vmem>>, vector<1x384x128xbf16>
    %14 = vector.shape_cast %13 : vector<1x384x128xbf16> to vector<384x128xbf16>
    %cst_9 = arith.constant dense<0.000000e+00> : vector<256x128xf32>
    %15 = tpu.matmul %12, %14, %cst_9 {dimension_numbers = #tpu.dot_dimension_numbers<[1], [0], [0], [1], [0, 0, 1, 1], [], []>} : vector<256x384xbf16>, vector<384x128xbf16>, vector<256x128xf32> -> vector<256x128xf32>
    %16 = arith.addf %5, %15 : vector<256x128xf32>
    %c0_10 = arith.constant 0 : index
    %c1 = arith.constant 1 : index
    %c0_11 = arith.constant 0 : index
    %17 = vector.load %arg15[%c0_10, %c1, %c0_11] : memref<18x18x128xf32, #tpu.memory_space<vmem>>, vector<18x16x128xf32>
    %18 = arith.truncf %17 : vector<18x16x128xf32> to vector<18x16x128xbf16>
    %19 = vector.extract_strided_slice %18 {offsets = [0, 0, 0], sizes = [16, 16, 128], strides = [1, 1, 1]} : vector<18x16x128xbf16> to vector<16x16x128xbf16>
    %20 = vector.extract_strided_slice %18 {offsets = [1, 0, 0], sizes = [16, 16, 128], strides = [1, 1, 1]} : vector<18x16x128xbf16> to vector<16x16x128xbf16>
    %21 = vector.extract_strided_slice %18 {offsets = [2, 0, 0], sizes = [16, 16, 128], strides = [1, 1, 1]} : vector<18x16x128xbf16> to vector<16x16x128xbf16>
    %22 = tpu.concatenate %19, %20, %21 in 2 : vector<16x16x128xbf16>, vector<16x16x128xbf16>, vector<16x16x128xbf16> -> vector<16x16x384xbf16>
    %23 = vector.shape_cast %22 : vector<16x16x384xbf16> to vector<256x384xbf16>
    %c0_12 = arith.constant 0 : index
    %c384 = arith.constant 384 : index
    %c0_13 = arith.constant 0 : index
    %24 = vector.load %arg6[%c0_12, %c384, %c0_13] : memref<1x2304x128xbf16, #tpu.memory_space<vmem>>, vector<1x384x128xbf16>
    %25 = vector.shape_cast %24 : vector<1x384x128xbf16> to vector<384x128xbf16>
    %cst_14 = arith.constant dense<0.000000e+00> : vector<256x128xf32>
    %26 = tpu.matmul %23, %25, %cst_14 {dimension_numbers = #tpu.dot_dimension_numbers<[1], [0], [0], [1], [0, 0, 1, 1], [], []>} : vector<256x384xbf16>, vector<384x128xbf16>, vector<256x128xf32> -> vector<256x128xf32>
    %27 = arith.addf %16, %26 : vector<256x128xf32>
    %c0_15 = arith.constant 0 : index
    %c2 = arith.constant 2 : index
    %c0_16 = arith.constant 0 : index
    %28 = vector.load %arg15[%c0_15, %c2, %c0_16] : memref<18x18x128xf32, #tpu.memory_space<vmem>>, vector<18x16x128xf32>
    %29 = arith.truncf %28 : vector<18x16x128xf32> to vector<18x16x128xbf16>
    %30 = vector.extract_strided_slice %29 {offsets = [0, 0, 0], sizes = [16, 16, 128], strides = [1, 1, 1]} : vector<18x16x128xbf16> to vector<16x16x128xbf16>
    %31 = vector.extract_strided_slice %29 {offsets = [1, 0, 0], sizes = [16, 16, 128], strides = [1, 1, 1]} : vector<18x16x128xbf16> to vector<16x16x128xbf16>
    %32 = vector.extract_strided_slice %29 {offsets = [2, 0, 0], sizes = [16, 16, 128], strides = [1, 1, 1]} : vector<18x16x128xbf16> to vector<16x16x128xbf16>
    %33 = tpu.concatenate %30, %31, %32 in 2 : vector<16x16x128xbf16>, vector<16x16x128xbf16>, vector<16x16x128xbf16> -> vector<16x16x384xbf16>
    %34 = vector.shape_cast %33 : vector<16x16x384xbf16> to vector<256x384xbf16>
    %c0_17 = arith.constant 0 : index
    %c768 = arith.constant 768 : index
    %c0_18 = arith.constant 0 : index
    %35 = vector.load %arg6[%c0_17, %c768, %c0_18] : memref<1x2304x128xbf16, #tpu.memory_space<vmem>>, vector<1x384x128xbf16>
    %36 = vector.shape_cast %35 : vector<1x384x128xbf16> to vector<384x128xbf16>
    %cst_19 = arith.constant dense<0.000000e+00> : vector<256x128xf32>
    %37 = tpu.matmul %34, %36, %cst_19 {dimension_numbers = #tpu.dot_dimension_numbers<[1], [0], [0], [1], [0, 0, 1, 1], [], []>} : vector<256x384xbf16>, vector<384x128xbf16>, vector<256x128xf32> -> vector<256x128xf32>
    %38 = arith.addf %27, %37 : vector<256x128xf32>
    %39 = vector.broadcast %4 : vector<1x128xf32> to vector<256x128xf32>
    %40 = arith.addf %38, %39 : vector<256x128xf32>
    %cst_20 = arith.constant 0.000000e+00 : f32
    %41 = vector.broadcast %cst_20 : f32 to vector<256x128xf32>
    %42 = arith.maximumf %40, %41 : vector<256x128xf32>
    %43 = vector.shape_cast %42 : vector<256x128xf32> to vector<16x16x128xf32>
    %c1_21 = arith.constant 1 : index
    %c1_22 = arith.constant 1 : index
    %c0_23 = arith.constant 0 : index
    %44 = vector.load %arg16[%c1_21, %c1_22, %c0_23] : memref<18x18x128xf32, #tpu.memory_space<vmem>>, vector<16x16x128xf32>
    tpu.vector_store %arg16[%c1_21, %c1_22, %c0_23], %43 {strides = array<i32>} : memref<18x18x128xf32, #tpu.memory_space<vmem>>, vector<16x16x128xf32>,
    %c0_24 = arith.constant 0 : index
    %c1_25 = arith.constant 1 : index
    %c0_26 = arith.constant 0 : index
    %45 = vector.load %arg7[%c0_24, %c1_25, %c0_26] : memref<1x2x128xf32, #tpu.memory_space<vmem>>, vector<1x1x128xf32>
    %46 = vector.shape_cast %45 : vector<1x1x128xf32> to vector<1x128xf32>
    %cst_27 = arith.constant 0.000000e+00 : f32
    %47 = vector.broadcast %cst_27 : f32 to vector<256x128xf32>
    %c0_28 = arith.constant 0 : index
    %c0_29 = arith.constant 0 : index
    %c0_30 = arith.constant 0 : index
    %48 = vector.load %arg16[%c0_28, %c0_29, %c0_30] : memref<18x18x128xf32, #tpu.memory_space<vmem>>, vector<18x16x128xf32>
    %49 = arith.truncf %48 : vector<18x16x128xf32> to vector<18x16x128xbf16>
    %50 = vector.extract_strided_slice %49 {offsets = [0, 0, 0], sizes = [16, 16, 128], strides = [1, 1, 1]} : vector<18x16x128xbf16> to vector<16x16x128xbf16>
    %51 = vector.extract_strided_slice %49 {offsets = [1, 0, 0], sizes = [16, 16, 128], strides = [1, 1, 1]} : vector<18x16x128xbf16> to vector<16x16x128xbf16>
    %52 = vector.extract_strided_slice %49 {offsets = [2, 0, 0], sizes = [16, 16, 128], strides = [1, 1, 1]} : vector<18x16x128xbf16> to vector<16x16x128xbf16>
    %53 = tpu.concatenate %50, %51, %52 in 2 : vector<16x16x128xbf16>, vector<16x16x128xbf16>, vector<16x16x128xbf16> -> vector<16x16x384xbf16>
    %54 = vector.shape_cast %53 : vector<16x16x384xbf16> to vector<256x384xbf16>
    %c0_31 = arith.constant 0 : index
    %c1152 = arith.constant 1152 : index
    %c0_32 = arith.constant 0 : index
    %55 = vector.load %arg6[%c0_31, %c1152, %c0_32] : memref<1x2304x128xbf16, #tpu.memory_space<vmem>>, vector<1x384x128xbf16>
    %56 = vector.shape_cast %55 : vector<1x384x128xbf16> to vector<384x128xbf16>
    %cst_33 = arith.constant dense<0.000000e+00> : vector<256x128xf32>
    %57 = tpu.matmul %54, %56, %cst_33 {dimension_numbers = #tpu.dot_dimension_numbers<[1], [0], [0], [1], [0, 0, 1, 1], [], []>} : vector<256x384xbf16>, vector<384x128xbf16>, vector<256x128xf32> -> vector<256x128xf32>
    %58 = arith.addf %47, %57 : vector<256x128xf32>
    %c0_34 = arith.constant 0 : index
    %c1_35 = arith.constant 1 : index
    %c0_36 = arith.constant 0 : index
    %59 = vector.load %arg16[%c0_34, %c1_35, %c0_36] : memref<18x18x128xf32, #tpu.memory_space<vmem>>, vector<18x16x128xf32>
    %60 = arith.truncf %59 : vector<18x16x128xf32> to vector<18x16x128xbf16>
    %61 = vector.extract_strided_slice %60 {offsets = [0, 0, 0], sizes = [16, 16, 128], strides = [1, 1, 1]} : vector<18x16x128xbf16> to vector<16x16x128xbf16>
    %62 = vector.extract_strided_slice %60 {offsets = [1, 0, 0], sizes = [16, 16, 128], strides = [1, 1, 1]} : vector<18x16x128xbf16> to vector<16x16x128xbf16>
    %63 = vector.extract_strided_slice %60 {offsets = [2, 0, 0], sizes = [16, 16, 128], strides = [1, 1, 1]} : vector<18x16x128xbf16> to vector<16x16x128xbf16>
    %64 = tpu.concatenate %61, %62, %63 in 2 : vector<16x16x128xbf16>, vector<16x16x128xbf16>, vector<16x16x128xbf16> -> vector<16x16x384xbf16>
    %65 = vector.shape_cast %64 : vector<16x16x384xbf16> to vector<256x384xbf16>
    %c0_37 = arith.constant 0 : index
    %c1536 = arith.constant 1536 : index
    %c0_38 = arith.constant 0 : index
    %66 = vector.load %arg6[%c0_37, %c1536, %c0_38] : memref<1x2304x128xbf16, #tpu.memory_space<vmem>>, vector<1x384x128xbf16>
    %67 = vector.shape_cast %66 : vector<1x384x128xbf16> to vector<384x128xbf16>
    %cst_39 = arith.constant dense<0.000000e+00> : vector<256x128xf32>
    %68 = tpu.matmul %65, %67, %cst_39 {dimension_numbers = #tpu.dot_dimension_numbers<[1], [0], [0], [1], [0, 0, 1, 1], [], []>} : vector<256x384xbf16>, vector<384x128xbf16>, vector<256x128xf32> -> vector<256x128xf32>
    %69 = arith.addf %58, %68 : vector<256x128xf32>
    %c0_40 = arith.constant 0 : index
    %c2_41 = arith.constant 2 : index
    %c0_42 = arith.constant 0 : index
    %70 = vector.load %arg16[%c0_40, %c2_41, %c0_42] : memref<18x18x128xf32, #tpu.memory_space<vmem>>, vector<18x16x128xf32>
    %71 = arith.truncf %70 : vector<18x16x128xf32> to vector<18x16x128xbf16>
    %72 = vector.extract_strided_slice %71 {offsets = [0, 0, 0], sizes = [16, 16, 128], strides = [1, 1, 1]} : vector<18x16x128xbf16> to vector<16x16x128xbf16>
    %73 = vector.extract_strided_slice %71 {offsets = [1, 0, 0], sizes = [16, 16, 128], strides = [1, 1, 1]} : vector<18x16x128xbf16> to vector<16x16x128xbf16>
    %74 = vector.extract_strided_slice %71 {offsets = [2, 0, 0], sizes = [16, 16, 128], strides = [1, 1, 1]} : vector<18x16x128xbf16> to vector<16x16x128xbf16>
    %75 = tpu.concatenate %72, %73, %74 in 2 : vector<16x16x128xbf16>, vector<16x16x128xbf16>, vector<16x16x128xbf16> -> vector<16x16x384xbf16>
    %76 = vector.shape_cast %75 : vector<16x16x384xbf16> to vector<256x384xbf16>
    %c0_43 = arith.constant 0 : index
    %c1920 = arith.constant 1920 : index
    %c0_44 = arith.constant 0 : index
    %77 = vector.load %arg6[%c0_43, %c1920, %c0_44] : memref<1x2304x128xbf16, #tpu.memory_space<vmem>>, vector<1x384x128xbf16>
    %78 = vector.shape_cast %77 : vector<1x384x128xbf16> to vector<384x128xbf16>
    %cst_45 = arith.constant dense<0.000000e+00> : vector<256x128xf32>
    %79 = tpu.matmul %76, %78, %cst_45 {dimension_numbers = #tpu.dot_dimension_numbers<[1], [0], [0], [1], [0, 0, 1, 1], [], []>} : vector<256x384xbf16>, vector<384x128xbf16>, vector<256x128xf32> -> vector<256x128xf32>
    %80 = arith.addf %69, %79 : vector<256x128xf32>
    %81 = vector.broadcast %46 : vector<1x128xf32> to vector<256x128xf32>
    %82 = arith.addf %80, %81 : vector<256x128xf32>
    %83 = vector.shape_cast %82 : vector<256x128xf32> to vector<16x16x128xf32>
    %c1_46 = arith.constant 1 : index
    %c1_47 = arith.constant 1 : index
    %c0_48 = arith.constant 0 : index
    %84 = vector.load %arg15[%c1_46, %c1_47, %c0_48] : memref<18x18x128xf32, #tpu.memory_space<vmem>>, vector<16x16x128xf32>
    %85 = arith.addf %83, %84 : vector<16x16x128xf32>
    %cst_49 = arith.constant 0.000000e+00 : f32
    %86 = vector.broadcast %cst_49 : f32 to vector<16x16x128xf32>
    %87 = arith.maximumf %85, %86 : vector<16x16x128xf32>
    %c1_50 = arith.constant 1 : index
    %c1_51 = arith.constant 1 : index
    %c0_52 = arith.constant 0 : index
    %88 = vector.load %arg15[%c1_50, %c1_51, %c0_52] : memref<18x18x128xf32, #tpu.memory_space<vmem>>, vector<16x16x128xf32>
    tpu.vector_store %arg15[%c1_50, %c1_51, %c0_52], %87 {strides = array<i32>} : memref<18x18x128xf32, #tpu.memory_space<vmem>>, vector<16x16x128xf32>,
    %c4_i32 = arith.constant 4 : i32
    %c0_i32_53 = arith.constant 0 : i32
    %89 = arith.cmpi eq, %c4_i32, %c0_i32_53 : i32
    %c1_i32 = arith.constant 1 : i32
    %90 = arith.select %89, %c1_i32, %c4_i32 : i32
    %91 = arith.remsi %arg1, %90 : i32
    %c0_i32_54 = arith.constant 0 : i32
    %92 = arith.cmpi ne, %91, %c0_i32_54 : i32
    %c0_i32_55 = arith.constant 0 : i32
    %93 = arith.cmpi slt, %91, %c0_i32_55 : i32
    %c0_i32_56 = arith.constant 0 : i32
    %94 = arith.cmpi slt, %90, %c0_i32_56 : i32
    %95 = arith.xori %93, %94 : i1
    %96 = arith.andi %95, %92 : i1
    %97 = arith.addi %91, %90 : i32
    %98 = arith.select %96, %97, %91 : i32
    %c3_i32 = arith.constant 3 : i32
    %99 = arith.cmpi eq, %98, %c3_i32 : i32
    %100 = arith.extui %99 : i1 to i32
    %c0_i32_57 = arith.constant 0 : i32
    %101 = arith.cmpi ne, %100, %c0_i32_57 : i32
    scf.if %101 {
      %c1_59 = arith.constant 1 : index
      %c1_60 = arith.constant 1 : index
      %c0_61 = arith.constant 0 : index
      %105 = vector.load %arg15[%c1_59, %c1_60, %c0_61] : memref<18x18x128xf32, #tpu.memory_space<vmem>>, vector<16x16x128xf32>
      %c0_62 = arith.constant 0 : index
      %c0_63 = arith.constant 0 : index
      %c0_64 = arith.constant 0 : index
      %106 = vector.load %arg17[%c0_62, %c0_63, %c0_64] : memref<16x16x128xf32, #tpu.memory_space<vmem>>, vector<16x16x128xf32>
      %107 = arith.addf %105, %106 : vector<16x16x128xf32>
      %c1_65 = arith.constant 1 : index
      %c1_66 = arith.constant 1 : index
      %c0_67 = arith.constant 0 : index
      %108 = vector.load %arg15[%c1_65, %c1_66, %c0_67] : memref<18x18x128xf32, #tpu.memory_space<vmem>>, vector<16x16x128xf32>
      tpu.vector_store %arg15[%c1_65, %c1_66, %c0_67], %107 {strides = array<i32>} : memref<18x18x128xf32, #tpu.memory_space<vmem>>, vector<16x16x128xf32>,
      %c0_68 = arith.constant 0 : index
      %c0_69 = arith.constant 0 : index
      %c0_70 = arith.constant 0 : index
      %109 = vector.load %arg17[%c0_68, %c0_69, %c0_70] : memref<16x16x128xf32, #tpu.memory_space<vmem>>, vector<16x16x128xf32>
      tpu.vector_store %arg17[%c0_68, %c0_69, %c0_70], %107 {strides = array<i32>} : memref<16x16x128xf32, #tpu.memory_space<vmem>>, vector<16x16x128xf32>,
    } else {
    }
    %c19_i32 = arith.constant 19 : i32
    %102 = arith.cmpi eq, %arg1, %c19_i32 : i32
    %103 = arith.extui %102 : i1 to i32
    %c0_i32_58 = arith.constant 0 : i32
    %104 = arith.cmpi ne, %103, %c0_i32_58 : i32
    scf.if %104 {
      %c0_59 = arith.constant 0 : index
      %c0_60 = arith.constant 0 : index
      %105 = vector.load %arg9[%c0_59, %c0_60] : memref<1x128xf32, #tpu.memory_space<vmem>>, vector<1x128xf32>
      %cst_61 = arith.constant 0.000000e+00 : f32
      %106 = vector.broadcast %cst_61 : f32 to vector<256x128xf32>
      %c0_62 = arith.constant 0 : index
      %c0_63 = arith.constant 0 : index
      %c0_64 = arith.constant 0 : index
      %107 = vector.load %arg15[%c0_62, %c0_63, %c0_64] : memref<18x18x128xf32, #tpu.memory_space<vmem>>, vector<18x16x128xf32>
      %108 = arith.truncf %107 : vector<18x16x128xf32> to vector<18x16x128xbf16>
      %109 = vector.extract_strided_slice %108 {offsets = [0, 0, 0], sizes = [16, 16, 128], strides = [1, 1, 1]} : vector<18x16x128xbf16> to vector<16x16x128xbf16>
      %110 = vector.extract_strided_slice %108 {offsets = [1, 0, 0], sizes = [16, 16, 128], strides = [1, 1, 1]} : vector<18x16x128xbf16> to vector<16x16x128xbf16>
      %111 = vector.extract_strided_slice %108 {offsets = [2, 0, 0], sizes = [16, 16, 128], strides = [1, 1, 1]} : vector<18x16x128xbf16> to vector<16x16x128xbf16>
      %112 = tpu.concatenate %109, %110, %111 in 2 : vector<16x16x128xbf16>, vector<16x16x128xbf16>, vector<16x16x128xbf16> -> vector<16x16x384xbf16>
      %113 = vector.shape_cast %112 : vector<16x16x384xbf16> to vector<256x384xbf16>
      %c0_65 = arith.constant 0 : index
      %c0_66 = arith.constant 0 : index
      %114 = vector.load %arg8[%c0_65, %c0_66] : memref<1152x128xbf16, #tpu.memory_space<vmem>>, vector<384x128xbf16>
      %cst_67 = arith.constant dense<0.000000e+00> : vector<256x128xf32>
      %115 = tpu.matmul %113, %114, %cst_67 {dimension_numbers = #tpu.dot_dimension_numbers<[1], [0], [0], [1], [0, 0, 1, 1], [], []>} : vector<256x384xbf16>, vector<384x128xbf16>, vector<256x128xf32> -> vector<256x128xf32>
      %116 = arith.addf %106, %115 : vector<256x128xf32>
      %c0_68 = arith.constant 0 : index
      %c1_69 = arith.constant 1 : index
      %c0_70 = arith.constant 0 : index
      %117 = vector.load %arg15[%c0_68, %c1_69, %c0_70] : memref<18x18x128xf32, #tpu.memory_space<vmem>>, vector<18x16x128xf32>
      %118 = arith.truncf %117 : vector<18x16x128xf32> to vector<18x16x128xbf16>
      %119 = vector.extract_strided_slice %118 {offsets = [0, 0, 0], sizes = [16, 16, 128], strides = [1, 1, 1]} : vector<18x16x128xbf16> to vector<16x16x128xbf16>
      %120 = vector.extract_strided_slice %118 {offsets = [1, 0, 0], sizes = [16, 16, 128], strides = [1, 1, 1]} : vector<18x16x128xbf16> to vector<16x16x128xbf16>
      %121 = vector.extract_strided_slice %118 {offsets = [2, 0, 0], sizes = [16, 16, 128], strides = [1, 1, 1]} : vector<18x16x128xbf16> to vector<16x16x128xbf16>
      %122 = tpu.concatenate %119, %120, %121 in 2 : vector<16x16x128xbf16>, vector<16x16x128xbf16>, vector<16x16x128xbf16> -> vector<16x16x384xbf16>
      %123 = vector.shape_cast %122 : vector<16x16x384xbf16> to vector<256x384xbf16>
      %c384_71 = arith.constant 384 : index
      %c0_72 = arith.constant 0 : index
      %124 = vector.load %arg8[%c384_71, %c0_72] : memref<1152x128xbf16, #tpu.memory_space<vmem>>, vector<384x128xbf16>
      %cst_73 = arith.constant dense<0.000000e+00> : vector<256x128xf32>
      %125 = tpu.matmul %123, %124, %cst_73 {dimension_numbers = #tpu.dot_dimension_numbers<[1], [0], [0], [1], [0, 0, 1, 1], [], []>} : vector<256x384xbf16>, vector<384x128xbf16>, vector<256x128xf32> -> vector<256x128xf32>
      %126 = arith.addf %116, %125 : vector<256x128xf32>
      %c0_74 = arith.constant 0 : index
      %c2_75 = arith.constant 2 : index
      %c0_76 = arith.constant 0 : index
      %127 = vector.load %arg15[%c0_74, %c2_75, %c0_76] : memref<18x18x128xf32, #tpu.memory_space<vmem>>, vector<18x16x128xf32>
      %128 = arith.truncf %127 : vector<18x16x128xf32> to vector<18x16x128xbf16>
      %129 = vector.extract_strided_slice %128 {offsets = [0, 0, 0], sizes = [16, 16, 128], strides = [1, 1, 1]} : vector<18x16x128xbf16> to vector<16x16x128xbf16>
      %130 = vector.extract_strided_slice %128 {offsets = [1, 0, 0], sizes = [16, 16, 128], strides = [1, 1, 1]} : vector<18x16x128xbf16> to vector<16x16x128xbf16>
      %131 = vector.extract_strided_slice %128 {offsets = [2, 0, 0], sizes = [16, 16, 128], strides = [1, 1, 1]} : vector<18x16x128xbf16> to vector<16x16x128xbf16>
      %132 = tpu.concatenate %129, %130, %131 in 2 : vector<16x16x128xbf16>, vector<16x16x128xbf16>, vector<16x16x128xbf16> -> vector<16x16x384xbf16>
      %133 = vector.shape_cast %132 : vector<16x16x384xbf16> to vector<256x384xbf16>
      %c768_77 = arith.constant 768 : index
      %c0_78 = arith.constant 0 : index
      %134 = vector.load %arg8[%c768_77, %c0_78] : memref<1152x128xbf16, #tpu.memory_space<vmem>>, vector<384x128xbf16>
      %cst_79 = arith.constant dense<0.000000e+00> : vector<256x128xf32>
      %135 = tpu.matmul %133, %134, %cst_79 {dimension_numbers = #tpu.dot_dimension_numbers<[1], [0], [0], [1], [0, 0, 1, 1], [], []>} : vector<256x384xbf16>, vector<384x128xbf16>, vector<256x128xf32> -> vector<256x128xf32>
      %136 = arith.addf %126, %135 : vector<256x128xf32>
      %137 = vector.broadcast %105 : vector<1x128xf32> to vector<256x128xf32>
      %138 = arith.addf %136, %137 : vector<256x128xf32>
      %cst_80 = arith.constant 0.000000e+00 : f32
      %139 = vector.broadcast %cst_80 : f32 to vector<256x128xf32>
      %140 = arith.maximumf %138, %139 : vector<256x128xf32>
      %141 = vector.shape_cast %140 : vector<256x128xf32> to vector<16x16x128xf32>
      %c1_81 = arith.constant 1 : index
      %c1_82 = arith.constant 1 : index
      %c0_83 = arith.constant 0 : index
      %142 = vector.load %arg16[%c1_81, %c1_82, %c0_83] : memref<18x18x128xf32, #tpu.memory_space<vmem>>, vector<16x16x128xf32>
      tpu.vector_store %arg16[%c1_81, %c1_82, %c0_83], %141 {strides = array<i32>} : memref<18x18x128xf32, #tpu.memory_space<vmem>>, vector<16x16x128xf32>,
      %c0_84 = arith.constant 0 : index
      %c0_85 = arith.constant 0 : index
      %143 = vector.load %arg11[%c0_84, %c0_85] : memref<1x128xf32, #tpu.memory_space<vmem>>, vector<1x128xf32>
      %cst_86 = arith.constant 0.000000e+00 : f32
      %144 = vector.broadcast %cst_86 : f32 to vector<256x128xf32>
      %c0_87 = arith.constant 0 : index
      %c0_88 = arith.constant 0 : index
      %c0_89 = arith.constant 0 : index
      %145 = vector.load %arg16[%c0_87, %c0_88, %c0_89] : memref<18x18x128xf32, #tpu.memory_space<vmem>>, vector<18x16x128xf32>
      %146 = arith.truncf %145 : vector<18x16x128xf32> to vector<18x16x128xbf16>
      %147 = vector.extract_strided_slice %146 {offsets = [0, 0, 0], sizes = [16, 16, 128], strides = [1, 1, 1]} : vector<18x16x128xbf16> to vector<16x16x128xbf16>
      %148 = vector.extract_strided_slice %146 {offsets = [1, 0, 0], sizes = [16, 16, 128], strides = [1, 1, 1]} : vector<18x16x128xbf16> to vector<16x16x128xbf16>
      %149 = vector.extract_strided_slice %146 {offsets = [2, 0, 0], sizes = [16, 16, 128], strides = [1, 1, 1]} : vector<18x16x128xbf16> to vector<16x16x128xbf16>
      %150 = tpu.concatenate %147, %148, %149 in 2 : vector<16x16x128xbf16>, vector<16x16x128xbf16>, vector<16x16x128xbf16> -> vector<16x16x384xbf16>
      %151 = vector.shape_cast %150 : vector<16x16x384xbf16> to vector<256x384xbf16>
      %c0_90 = arith.constant 0 : index
      %c0_91 = arith.constant 0 : index
      %152 = vector.load %arg10[%c0_90, %c0_91] : memref<1152x128xbf16, #tpu.memory_space<vmem>>, vector<384x128xbf16>
      %cst_92 = arith.constant dense<0.000000e+00> : vector<256x128xf32>
      %153 = tpu.matmul %151, %152, %cst_92 {dimension_numbers = #tpu.dot_dimension_numbers<[1], [0], [0], [1], [0, 0, 1, 1], [], []>} : vector<256x384xbf16>, vector<384x128xbf16>, vector<256x128xf32> -> vector<256x128xf32>
      %154 = arith.addf %144, %153 : vector<256x128xf32>
      %c0_93 = arith.constant 0 : index
      %c1_94 = arith.constant 1 : index
      %c0_95 = arith.constant 0 : index
      %155 = vector.load %arg16[%c0_93, %c1_94, %c0_95] : memref<18x18x128xf32, #tpu.memory_space<vmem>>, vector<18x16x128xf32>
      %156 = arith.truncf %155 : vector<18x16x128xf32> to vector<18x16x128xbf16>
      %157 = vector.extract_strided_slice %156 {offsets = [0, 0, 0], sizes = [16, 16, 128], strides = [1, 1, 1]} : vector<18x16x128xbf16> to vector<16x16x128xbf16>
      %158 = vector.extract_strided_slice %156 {offsets = [1, 0, 0], sizes = [16, 16, 128], strides = [1, 1, 1]} : vector<18x16x128xbf16> to vector<16x16x128xbf16>
      %159 = vector.extract_strided_slice %156 {offsets = [2, 0, 0], sizes = [16, 16, 128], strides = [1, 1, 1]} : vector<18x16x128xbf16> to vector<16x16x128xbf16>
      %160 = tpu.concatenate %157, %158, %159 in 2 : vector<16x16x128xbf16>, vector<16x16x128xbf16>, vector<16x16x128xbf16> -> vector<16x16x384xbf16>
      %161 = vector.shape_cast %160 : vector<16x16x384xbf16> to vector<256x384xbf16>
      %c384_96 = arith.constant 384 : index
      %c0_97 = arith.constant 0 : index
      %162 = vector.load %arg10[%c384_96, %c0_97] : memref<1152x128xbf16, #tpu.memory_space<vmem>>, vector<384x128xbf16>
      %cst_98 = arith.constant dense<0.000000e+00> : vector<256x128xf32>
      %163 = tpu.matmul %161, %162, %cst_98 {dimension_numbers = #tpu.dot_dimension_numbers<[1], [0], [0], [1], [0, 0, 1, 1], [], []>} : vector<256x384xbf16>, vector<384x128xbf16>, vector<256x128xf32> -> vector<256x128xf32>
      %164 = arith.addf %154, %163 : vector<256x128xf32>
      %c0_99 = arith.constant 0 : index
      %c2_100 = arith.constant 2 : index
      %c0_101 = arith.constant 0 : index
      %165 = vector.load %arg16[%c0_99, %c2_100, %c0_101] : memref<18x18x128xf32, #tpu.memory_space<vmem>>, vector<18x16x128xf32>
      %166 = arith.truncf %165 : vector<18x16x128xf32> to vector<18x16x128xbf16>
      %167 = vector.extract_strided_slice %166 {offsets = [0, 0, 0], sizes = [16, 16, 128], strides = [1, 1, 1]} : vector<18x16x128xbf16> to vector<16x16x128xbf16>
      %168 = vector.extract_strided_slice %166 {offsets = [1, 0, 0], sizes = [16, 16, 128], strides = [1, 1, 1]} : vector<18x16x128xbf16> to vector<16x16x128xbf16>
      %169 = vector.extract_strided_slice %166 {offsets = [2, 0, 0], sizes = [16, 16, 128], strides = [1, 1, 1]} : vector<18x16x128xbf16> to vector<16x16x128xbf16>
      %170 = tpu.concatenate %167, %168, %169 in 2 : vector<16x16x128xbf16>, vector<16x16x128xbf16>, vector<16x16x128xbf16> -> vector<16x16x384xbf16>
      %171 = vector.shape_cast %170 : vector<16x16x384xbf16> to vector<256x384xbf16>
      %c768_102 = arith.constant 768 : index
      %c0_103 = arith.constant 0 : index
      %172 = vector.load %arg10[%c768_102, %c0_103] : memref<1152x128xbf16, #tpu.memory_space<vmem>>, vector<384x128xbf16>
      %cst_104 = arith.constant dense<0.000000e+00> : vector<256x128xf32>
      %173 = tpu.matmul %171, %172, %cst_104 {dimension_numbers = #tpu.dot_dimension_numbers<[1], [0], [0], [1], [0, 0, 1, 1], [], []>} : vector<256x384xbf16>, vector<384x128xbf16>, vector<256x128xf32> -> vector<256x128xf32>
      %174 = arith.addf %164, %173 : vector<256x128xf32>
      %175 = vector.broadcast %143 : vector<1x128xf32> to vector<256x128xf32>
      %176 = arith.addf %174, %175 : vector<256x128xf32>
      %177 = arith.truncf %176 : vector<256x128xf32> to vector<256x128xbf16>
      %c0_105 = arith.constant 0 : index
      %c0_106 = arith.constant 0 : index
      %178 = vector.load %arg12[%c0_105, %c0_106] : memref<128x4xbf16, #tpu.memory_space<vmem>>, vector<128x4xbf16>
      %cst_107 = arith.constant dense<0.000000e+00> : vector<256x4xf32>
      %179 = tpu.matmul %177, %178, %cst_107 {dimension_numbers = #tpu.dot_dimension_numbers<[1], [0], [0], [1], [0, 0, 1, 1], [], []>} : vector<256x128xbf16>, vector<128x4xbf16>, vector<256x4xf32> -> vector<256x4xf32>
      %c0_108 = arith.constant 0 : index
      %c0_109 = arith.constant 0 : index
      %180 = vector.load %arg13[%c0_108, %c0_109] : memref<1x4xf32, #tpu.memory_space<vmem>>, vector<1x4xf32>
      %181 = vector.broadcast %180 : vector<1x4xf32> to vector<256x4xf32>
      %182 = arith.addf %179, %181 : vector<256x4xf32>
      %c0_110 = arith.constant 0 : index
      %c0_111 = arith.constant 0 : index
      %c0_112 = arith.constant 0 : index
      %183 = vector.load %arg3[%c0_110, %c0_111, %c0_112] : memref<1x256x4xf32, #tpu.memory_space<vmem>>, vector<1x256x4xf32>
      %184 = vector.shape_cast %183 : vector<1x256x4xf32> to vector<256x4xf32>
      %185 = arith.addf %182, %184 : vector<256x4xf32>
      %186 = vector.shape_cast %185 : vector<256x4xf32> to vector<16x16x4xf32>
      %c0_113 = arith.constant 0 : index
      %c0_114 = arith.constant 0 : index
      %c0_115 = arith.constant 0 : index
      %c0_116 = arith.constant 0 : index
      %187 = vector.load %arg14[%c0_113, %c0_114, %c0_115, %c0_116] : memref<1x16x16x4xf32, #tpu.memory_space<vmem>>, vector<1x16x16x4xf32>
      %188 = vector.shape_cast %187 : vector<1x16x16x4xf32> to vector<16x16x4xf32>
      %189 = vector.shape_cast %186 : vector<16x16x4xf32> to vector<1x16x16x4xf32>
      tpu.vector_store %arg14[%c0_113, %c0_114, %c0_115, %c0_116], %189 {strides = array<i32>} : memref<1x16x16x4xf32, #tpu.memory_space<vmem>>, vector<1x16x16x4xf32>,
    } else {
    }
    return
  }
  func.func @transform_0(%arg0: i32, %arg1: i32) -> (i32, i32, i32) {
    %c0_i32 = arith.constant 0 : i32
    %c0_i32_0 = arith.constant 0 : i32
    %c0_i32_1 = arith.constant 0 : i32
    return %arg0, %c0_i32, %c0_i32_0 : i32, i32, i32
  }
  func.func @transform_1(%arg0: i32, %arg1: i32) -> (i32, i32, i32) {
    %c0_i32 = arith.constant 0 : i32
    %c0_i32_0 = arith.constant 0 : i32
    %c0_i32_1 = arith.constant 0 : i32
    return %arg0, %c0_i32, %c0_i32_0 : i32, i32, i32
  }
  func.func @transform_2(%arg0: i32, %arg1: i32) -> (i32, i32) {
    %c0_i32 = arith.constant 0 : i32
    %c0_i32_0 = arith.constant 0 : i32
    %c0_i32_1 = arith.constant 0 : i32
    return %c0_i32, %c0_i32_0 : i32, i32
  }
  func.func @transform_3(%arg0: i32, %arg1: i32) -> (i32, i32) {
    %c0_i32 = arith.constant 0 : i32
    %c0_i32_0 = arith.constant 0 : i32
    %c0_i32_1 = arith.constant 0 : i32
    return %c0_i32, %c0_i32_0 : i32, i32
  }
  func.func @transform_4(%arg0: i32, %arg1: i32) -> (i32, i32, i32) {
    %c0_i32 = arith.constant 0 : i32
    %c0_i32_0 = arith.constant 0 : i32
    %c0_i32_1 = arith.constant 0 : i32
    return %arg1, %c0_i32, %c0_i32_0 : i32, i32, i32
  }
  func.func @transform_5(%arg0: i32, %arg1: i32) -> (i32, i32, i32) {
    %c0_i32 = arith.constant 0 : i32
    %c0_i32_0 = arith.constant 0 : i32
    %c0_i32_1 = arith.constant 0 : i32
    return %arg1, %c0_i32, %c0_i32_0 : i32, i32, i32
  }
  func.func @transform_6(%arg0: i32, %arg1: i32) -> (i32, i32) {
    %c0_i32 = arith.constant 0 : i32
    %c0_i32_0 = arith.constant 0 : i32
    %c0_i32_1 = arith.constant 0 : i32
    return %c0_i32, %c0_i32_0 : i32, i32
  }
  func.func @transform_7(%arg0: i32, %arg1: i32) -> (i32, i32) {
    %c0_i32 = arith.constant 0 : i32
    %c0_i32_0 = arith.constant 0 : i32
    %c0_i32_1 = arith.constant 0 : i32
    return %c0_i32, %c0_i32_0 : i32, i32
  }
  func.func @transform_8(%arg0: i32, %arg1: i32) -> (i32, i32) {
    %c0_i32 = arith.constant 0 : i32
    %c0_i32_0 = arith.constant 0 : i32
    %c0_i32_1 = arith.constant 0 : i32
    return %c0_i32, %c0_i32_0 : i32, i32
  }
  func.func @transform_9(%arg0: i32, %arg1: i32) -> (i32, i32) {
    %c0_i32 = arith.constant 0 : i32
    %c0_i32_0 = arith.constant 0 : i32
    %c0_i32_1 = arith.constant 0 : i32
    return %c0_i32, %c0_i32_0 : i32, i32
  }
  func.func @transform_10(%arg0: i32, %arg1: i32) -> (i32, i32) {
    %c0_i32 = arith.constant 0 : i32
    %c0_i32_0 = arith.constant 0 : i32
    %c0_i32_1 = arith.constant 0 : i32
    return %c0_i32, %c0_i32_0 : i32, i32
  }
  func.func @transform_11(%arg0: i32, %arg1: i32) -> (i32, i32) {
    %c0_i32 = arith.constant 0 : i32
    %c0_i32_0 = arith.constant 0 : i32
    %c0_i32_1 = arith.constant 0 : i32
    return %c0_i32, %c0_i32_0 : i32, i32
  }
  func.func @transform_12(%arg0: i32, %arg1: i32) -> (i32, i32, i32, i32) {
    %c0_i32 = arith.constant 0 : i32
    %c0_i32_0 = arith.constant 0 : i32
    %c0_i32_1 = arith.constant 0 : i32
    %c0_i32_2 = arith.constant 0 : i32
    return %arg0, %c0_i32, %c0_i32_0, %c0_i32_1 : i32, i32, i32, i32
  }
}

</mosaic_0001>

<bundles_post_ra>
// kernel: upscaler_forward.1
= control target key start
LH: loop header
LB: loop body
LE: loop exit
PB: predicated region body
PF: predicated region fallthrough
CT: control target
= control target key end

     0   :  { %s16439_s0 = inlined_call_operand.vmem [shape: f32[2,256,36], index: 0, kind: input, shape index: {}]   ;;  %s16440_s1 = inlined_call_operand.vmem [shape: f32[2,256,4], index: 1, kind: input, shape index: {}]   ;;  %s16441_s2 = inlined_call_operand.hbm [shape: bf16[36,128], index: 2, kind: input, shape index: {}]   ;;  %s16442_s3 = inlined_call_operand.hbm [shape: f32[1,128], index: 3, kind: input, shape index: {}]   ;;  %s16443_s4 = inlined_call_operand.hbm [shape: bf16[20,2304,128], index: 4, kind: input, shape index: {}]   ;;  %s16444_s5 = inlined_call_operand.hbm [shape: f32[20,2,128], index: 5, kind: input, shape index: {}]   ;;  %s16445_s6 = inlined_call_operand.hbm [shape: bf16[1152,128], index: 6, kind: input, shape index: {}]   ;;  %s16446_s7 = inlined_call_operand.hbm [shape: f32[1,128], index: 7, kind: input, shape index: {}]   ;;  %s16447_s8 = inlined_call_operand.hbm [shape: bf16[1152,128], index: 8, kind: input, shape index: {}]   ;;  %s16448_s9 = inlined_call_operand.hbm [shape: f32[1,128], index: 9, kind: input, shape index: {}]   ;;  %s16449_s10 = inlined_call_operand.vmem [shape: bf16[128,4], index: 10, kind: input, shape index: {}]   ;;  %s16450_s11 = inlined_call_operand.hbm [shape: f32[1,4], index: 11, kind: input, shape index: {}]   ;;  %s16451_s12 = inlined_call_operand.vmem [shape: f32[2,16,16,4], index: 12, kind: output, shape index: {}]  }
   0x1   :  { %16472 = sst [smem:[#allocation43_spill]] %s16439_s0 }
   0x2   :  { %16473 = sst [smem:[#allocation44_spill]] %s16440_s1 }
   0x3   :  { %16474 = sst [smem:[#allocation45_spill]] %s16441_s2 }
   0x4   :  { %16475 = sst [smem:[#allocation46_spill]] %s16442_s3 }
   0x5   :  { %16476 = sst [smem:[#allocation47_spill]] %s16443_s4 }
   0x6   :  { %16477 = sst [smem:[#allocation48_spill]] %s16444_s5 }
   0x7   :  { %16478 = sst [smem:[#allocation49_spill]] %s16446_s7 }
   0x8   :  { %16479 = sst [smem:[#allocation50_spill]] %s16448_s9 }
   0x9   :  { %16480 = sst [smem:[#allocation51_spill]] %s16449_s10 }
   0xa   :  { %16481 = sst [smem:[#allocation52_spill]] %s16451_s12 }
   0xb   :  { %17 = vsyncpa [#allocation6], 0 }
   0xc   :  { %18 = vsyncpa [#allocation8], 0 }
   0xd   :  { %19 = vsyncpa [#allocation13], 0 }
   0xe   :  { %20 = vsyncpa [#allocation16], 0  ;;  %s13412_s21 = smov 0   ;;  %s13414_s22 = smov 0  }
   0xf   :  { %s13416_s23 = smov 0   ;;  %s13418_s24 = smov 0  }
  0x10   :  { %s13420_s25 = smov 0   ;;  %s13422_s26 = smov 0  }
  0x11   :  { %s13424_s27 = smov 0   ;;  %s13426_s28 = smov 0  }
  0x12 LB: > { %16482 = sst [smem:[#allocation24_spill]] %s13317_s24  ;;  %s16452_s29 = sadd.s32 4294967295, %s13333_s28   ;;  %s13333_s28 = sphi %s13426_s28, %s26_s28   ;;  %s13329_s27 = sphi %s13424_s27, %s16557_s27   ;;  %s13325_s26 = sphi %s13422_s26, %s16556_s26   ;;  %s13321_s25 = sphi %s13420_s25, %s16555_s25   ;;  %s13317_s24 = sphi %s13418_s24, %s16554_s24   ;;  %s13313_s23 = sphi %s13416_s23, %s16553_s23   ;;  %s13309_s22 = sphi %s13414_s22, %s16552_s22   ;;  %s13305_s21 = sphi %s13412_s21, %s16551_s21  }
  0x13   : > { %16483 = sst [smem:[#allocation25_spill]] %s13321_s25  ;;  %p9179_p0 = scmp.ge.s32.totalorder %s13333_s28, 1 }
  0x14   : > { %p13456_p1 = scmp.eq.s32.totalorder %s16452_s29, 0  ;;  %p341_p2 = scmp.lt.s32.totalorder %s13333_s28, 41 }
  0x15   : > { %s13335_s14 = smov [#allocation5]   ;;  %s13336_s17 = smov [#allocation7]  }
  0x16   : > { %s16484_s30 = scalar_select %p13456_p1, 1, 0 }
  0x17   : > { %p13461_p3 = pnand %p9179_p0, %p341_p2  ;;  %s353_s15 = sshll.u32 %s13335_s14, 4  ;;  %s13465_s15 = int_to_ptr.vmem [resolvable:$true] %s353_s15 }
  0x18   : > { %s367_s18 = sshll.u32 %s13336_s17, 4  ;;  %s13337_s19 = smov [#allocation12]   ;;  %s13475_s18 = int_to_ptr.vmem [resolvable:$true] %s367_s18 }
  0x19   : > { %s16485_s13 = scalar_select %p13461_p3, 1, 0 }
  0x1a   : > { %p12574_p4 = pneg %p13461_p3  ;;  %s13477_s20 = sshll.u32 %s13337_s19, 4  ;;  %s392_s20 = int_to_ptr.vmem [resolvable:$true] %s13477_s20 }
  0x1b   : > { %16486 = sst [smem:[#allocation26_spill]] %s16485_s13  ;;  %s16488_s2 = sld [smem:[#allocation45_spill]] }
  0x1c   : > { %p13471_p5 = pnand %p12574_p4, %p13456_p1 }
  0x1e   : > { %s16487_s16 = scalar_select %p13471_p5, 1, 0 }
  0x1f   : > { %p13487_p7 = pneg %p13471_p5 }
  0x21   : > { %s12991_s14 = scalar_lea.hbm %s16488_s2, 320 }
  0x22   : > { %p12992_p6 = scmp.ne.s32.totalorder %s16488_s2, %s12991_s14  ;;  %p12998_p10 = scmp.lt.u32.totalorder %s12991_s14, %s16488_s2 }
  0x24   : > { %p12994_p8 = pnand %p13487_p7, %p12992_p6 }
  0x26   : > { %p12995_p9 = pneg %p12994_p8 }
  0x28   : > { %p13000_p11 = pnand %p12998_p10, %p12995_p9 }
  0x2a   : > { %13003 = shalt.err (!%p13000_p11)
}
  0x2b   : > { %s13004_s10 = scalar_lea.vmem %s13465_s15, 320  ;;  %p13012_p2 = scmp.lt.s32.totalorder %s13465_s15, %s13465_s15 }
  0x2c   : > { %p13005_p12 = scmp.ne.s32.totalorder %s13465_s15, %s13004_s10  ;;  %p13013_p4 = scmp.lt.s32.totalorder %s13004_s10, %s13004_s10 }
  0x2e   : > { %p13007_p13 = pnand %p13005_p12, %p13487_p7  ;;  %p13014_p6 = por %p13013_p4, %p13012_p2 }
  0x30   : > { %p13008_p0 = pneg %p13007_p13 }
  0x32   : > { %p13015_p8 = pnand %p13014_p6, %p13008_p0 }
  0x34   : > { %13018 = shalt.err (!%p13015_p8)
}
  0x35   : > { %s16461_s12 = smov 64   ;;  %s16464_s24 = smov 4  }
  0x36   : > { %12577 = dma.hbm_to_vmem [thread:$0]  (!%p13471_p5), %s16488_s2, 320, %s13465_s15, [#allocation6], %s16461_s12, %s16461_s12, %s16464_s24  }
  0x37   : > { %s16490_s3 = sld [smem:[#allocation46_spill]] }
  0x3d   : > { %s13019_s10 = scalar_lea.hbm %s16490_s3, 16 }
  0x3e   : > { %p13020_p9 = scmp.ne.s32.totalorder %s16490_s3, %s13019_s10  ;;  %p13026_p12 = scmp.lt.u32.totalorder %s13019_s10, %s16490_s3 }
  0x40   : > { %p13022_p10 = pnand %p13020_p9, %p13487_p7 }
  0x42   : > { %p13023_p11 = pneg %p13022_p10 }
  0x44   : > { %p13028_p13 = pnand %p13026_p12, %p13023_p11 }
  0x46   : > { %13031 = shalt.err (!%p13028_p13)
}
  0x47   : > { %s13032_s15 = scalar_lea.vmem %s13475_s18, 16  ;;  %s13039_s0 = scalar_lea.vmem %s13475_s18, 32 }
  0x48   : > { %p13033_p0 = scmp.ne.s32.totalorder %s13475_s18, %s13032_s15  ;;  %p13040_p6 = scmp.lt.s32.totalorder %s13475_s18, %s13475_s18 }
  0x49   : > { %p13041_p8 = scmp.lt.s32.totalorder %s13039_s0, %s13032_s15 }
  0x4a   : > { %p13035_p2 = pnand %p13033_p0, %p13487_p7 }
  0x4b   : > { %p13042_p9 = por %p13041_p8, %p13040_p6 }
  0x4c   : > { %p13036_p4 = pneg %p13035_p2 }
  0x4e   : > { %p13043_p10 = pnand %p13042_p9, %p13036_p4 }
  0x50   : > { %13046 = shalt.err (!%p13043_p10)
}
  0x51   : > { %12580 = dma.hbm_to_vmem [thread:$0]  (!%p13471_p5), %s16490_s3, 16, %s13475_s18, [#allocation8]  }
  0x52   : > { %s16491_s7 = sld [smem:[#allocation49_spill]] }
  0x58   : > { %s13047_s14 = scalar_lea.hbm %s16491_s7, 16 }
  0x59   : > { %p13048_p11 = scmp.ne.s32.totalorder %s16491_s7, %s13047_s14  ;;  %p13054_p0 = scmp.lt.u32.totalorder %s13047_s14, %s16491_s7 }
  0x5b   : > { %p13050_p12 = pnand %p13048_p11, %p13487_p7 }
  0x5d   : > { %p13051_p13 = pneg %p13050_p12 }
  0x5f   : > { %p13056_p2 = pnand %p13054_p0, %p13051_p13 }
  0x61   : > { %13059 = shalt.err (!%p13056_p2)
}
  0x62   : > { %s13060_s0 = scalar_lea.vmem %s392_s20, 16  ;;  %s13067_s18 = scalar_lea.vmem %s392_s20, 32 }
  0x63   : > { %p13061_p4 = scmp.ne.s32.totalorder %s392_s20, %s13060_s0  ;;  %p13068_p9 = scmp.lt.s32.totalorder %s392_s20, %s392_s20 }
  0x64   : > { %p13069_p10 = scmp.lt.s32.totalorder %s13067_s18, %s13060_s0 }
  0x65   : > { %p13063_p6 = pnand %p13061_p4, %p13487_p7 }
  0x66   : > { %p13070_p3 = por %p13069_p10, %p13068_p9 }
  0x67   : > { %p13064_p8 = pneg %p13063_p6 }
  0x69   : > { %p13071_p1 = pnand %p13070_p3, %p13064_p8 }
  0x6b   : > { %13074 = shalt.err (!%p13071_p1)
}
  0x6c   : > { %12586 = dma.hbm_to_vmem [thread:$0]  (!%p13471_p5), %s16491_s7, 16, %s392_s20, [#allocation13]  }
  0x6d   : > { %s13340_s13 = smov [#allocation15]   ;;  %s16492_s9 = sld [smem:[#allocation50_spill]] }
  0x6e   : > { %s415_s29 = sshll.u32 %s13340_s13, 4  ;;  %s416_s29 = int_to_ptr.vmem [resolvable:$true] %s415_s29 }
  0x73   : > { %s13075_s19 = scalar_lea.hbm %s16492_s9, 16 }
  0x74   : > { %p13076_p11 = scmp.ne.s32.totalorder %s16492_s9, %s13075_s19  ;;  %p13082_p12 = scmp.lt.u32.totalorder %s13075_s19, %s16492_s9 }
  0x76   : > { %p13078_p1 = pnand %p13076_p11, %p13487_p7 }
  0x78   : > { %p13079_p3 = pneg %p13078_p1 }
  0x7a   : > { %p13084_p13 = pnand %p13082_p12, %p13079_p3 }
  0x7c   : > { %13087 = shalt.err (!%p13084_p13)
}
  0x7d   : > { %s13088_s20 = scalar_lea.vmem %s416_s29, 16  ;;  %s13095_s5 = scalar_lea.vmem %s416_s29, 32 }
  0x7e   : > { %p13089_p0 = scmp.ne.s32.totalorder %s416_s29, %s13088_s20  ;;  %p13096_p6 = scmp.lt.s32.totalorder %s416_s29, %s416_s29 }
  0x7f   : > { %p13097_p8 = scmp.lt.s32.totalorder %s13095_s5, %s13088_s20 }
  0x80   : > { %p13091_p2 = pnand %p13089_p0, %p13487_p7 }
  0x81   : > { %p13098_p9 = por %p13097_p8, %p13096_p6 }
  0x82   : > { %p13092_p4 = pneg %p13091_p2 }
  0x84   : > { %p13099_p10 = pnand %p13098_p9, %p13092_p4 }
  0x86   : > { %13102 = shalt.err (!%p13099_p10)
}
  0x87   : > { %12592 = dma.hbm_to_vmem [thread:$0]  (!%p13471_p5), %s16492_s9, 16, %s416_s29, [#allocation16]  }
  0x88   : > { %s35_s14 = sadd.s32 1, %s13325_s26  ;;  %s38_s17 = sadd.s32 1, %s13329_s27 }
  0x89   : > { %p36_p11 = scmp.ge.s32.totalorder %s35_s14, 20  ;;  %s139_s19 = sadd.s32 1, %s13313_s23 }
  0x8a   : > { %p146_p1 = scmp.ne.s32.totalorder %s13313_s23, %s13309_s22  ;;  %p147_p3 = scmp.eq.s32.totalorder %s13333_s28, 0 }
  0x8b   : > { %s16559_s14 = smov (%p36_p11, %s35_s14), 0  ;;  %s16561_s17 = smov (!%p36_p11, %s38_s17), %s13329_s27 }
  0x8c   : > { %s136_s10 = ssub.s32 %s13325_s26, %s16559_s14  ;;  %p148_p12 = por %p147_p3, %p146_p1 }
  0x8d   : > { %p40_p13 = scmp.ge.s32.totalorder %s16561_s17, 2  ;;  %p137_p0 = scmp.eq.s32.totalorder %s136_s10, 0 }
  0x8e   : > { %p152_p2 = scmp.ne.s32.totalorder %s13309_s22, %s13305_s21  ;;  %p12610_p4 = scmp.lt.s32.totalorder %s13333_s28, 40 }
  0x8f   : > { %s16563_s17 = smov (%p40_p13, %s16561_s17), 0  ;;  %p16494_p6 = scmp.ne.s32.totalorder %s16484_s30, 0 }
  0x90   : > { %16493 = sst [smem:[#allocation27_spill]] %s16563_s17  ;;  %s456_s0 = sand.u32 1, %s13333_s28  }
  0x91   : > { %s13589_s29 = scalar_select %p137_p0, %s13313_s23, %s139_s19  }
  0x92   : > { %p13593_p8 = por %p16494_p6, %p152_p2  ;;  %s16463_s18 = sand.u32 1, %s13313_s23  }
  0x93   : > { %s12539_s20 = smul.u32 1152, %s16463_s18  ;;  %p13601_p9 = pnand %p12610_p4, %p148_p12 }
  0x94   : > { %s16495_s15 = scalar_select %p13593_p8, 1, 0 }
  0x95   : > { %s16496_s5 = scalar_select %p13601_p9, 1, 0 }
  0x96   : > { %s12540_s21 = smul.u32 18432, %s13325_s26  ;;  %s16497_s4 = sld [smem:[#allocation47_spill]] }
  0x97   : > { %s460_s10 = scalar_lea.vmem [#allocation9], %s12539_s20  ;;  %s13341_s18 = smov [#allocation11]  }
  0x98   : > { %s467_s12 = sshll.u32 %s460_s10, 4  ;;  %s13613_s24 = sshll.u32 %s13341_s18, 4  ;;  %s13611_s12 = int_to_ptr.vmem [resolvable:$true] %s467_s12  ;;  %s378_s24 = int_to_ptr.vmem [resolvable:$true] %s13613_s24 }
  0x99   : > { %s13615_s2 = scalar_lea.sflag [#allocation6], %s456_s0  ;;  %p16469_p11 = pneg %p13601_p9 }
  0x9c   : > { %s13609_s19 = scalar_lea.hbm %s16497_s4, %s12540_s21  ;;  %s13108_s20 = scalar_lea.hbm %s16497_s4, 368640 }
  0x9d   : > { %s13103_s3 = scalar_lea.hbm %s13609_s19, 18432  ;;  %p13109_p12 = scmp.lt.u32.totalorder %s13609_s19, %s16497_s4 }
  0x9e   : > { %p13104_p10 = scmp.ne.s32.totalorder %s13609_s19, %s13103_s3  ;;  %p13110_p13 = scmp.lt.u32.totalorder %s13108_s20, %s13103_s3 }
  0x9f   : > { %p13112_p2 = scmp.lt.u32.totalorder %s13103_s3, %s13609_s19 }
  0xa0   : > { %p13106_p1 = pnand %p16469_p11, %p13104_p10  ;;  %p13111_p0 = por %p13110_p13, %p13109_p12 }
  0xa2   : > { %p13107_p3 = pneg %p13106_p1  ;;  %p13113_p4 = por %p13112_p2, %p13111_p0 }
  0xa4   : > { %p13114_p6 = pnand %p13113_p4, %p13107_p3 }
  0xa6   : > { %13117 = shalt.err (!%p13114_p6)
}
  0xa7   : > { %s13118_s0 = scalar_lea.vmem %s13611_s12, 18432  ;;  %s13342_s18 = smov [#allocation9]  }
  0xa8   : > { %p13119_p10 = scmp.ne.s32.totalorder %s13611_s12, %s13118_s0  ;;  %s13123_s21 = sshll.u32 %s13342_s18, 4  ;;  %s13124_s21 = int_to_ptr.vmem [resolvable:$false] %s13123_s21 }
  0xa9   : > { %s13125_s25 = scalar_lea.vmem %s13124_s21, 36864  ;;  %p13126_p5 = scmp.lt.s32.totalorder %s13611_s12, %s13124_s21 }
  0xaa   : > { %p13121_p1 = pnand %p13119_p10, %p16469_p11  ;;  %p13127_p12 = scmp.lt.s32.totalorder %s13125_s25, %s13118_s0 }
  0xac   : > { %p13122_p8 = pneg %p13121_p1  ;;  %p13128_p13 = por %p13127_p12, %p13126_p5 }
  0xae   : > { %p13129_p0 = pnand %p13128_p13, %p13122_p8 }
  0xb0   : > { %13132 = shalt.err (!%p13129_p0)
}
  0xb1   : > { %s16498_s3 = smov 4   ;;  %s16499_s20 = smov 64  }
  0xb2   : > { %12599 = dma.hbm_to_vmem [thread:$0]  (!%p13601_p9), %s13609_s19, 18432, %s13611_s12, %s13615_s2, %s16499_s20, %s16499_s20, %s16498_s3  }
  0xb3   : > { %s13133_s18 = scalar_lea.hbm %s16445_s6, 9216 }
  0xb4   : > { %p13134_p5 = scmp.ne.s32.totalorder %s16445_s6, %s13133_s18  ;;  %p13140_p2 = scmp.lt.u32.totalorder %s13133_s18, %s16445_s6 }
  0xb6   : > { %p13136_p8 = pnand %p13134_p5, %p13487_p7 }
  0xb8   : > { %p13137_p3 = pneg %p13136_p8 }
  0xba   : > { %p13142_p4 = pnand %p13140_p2, %p13137_p3 }
  0xbc   : > { %13145 = shalt.err (!%p13142_p4)
}
  0xbd   : > { %s13146_s7 = scalar_lea.vmem %s378_s24, 9216  ;;  %p13154_p12 = scmp.lt.s32.totalorder %s378_s24, %s378_s24 }
  0xbe   : > { %p13147_p6 = scmp.ne.s32.totalorder %s378_s24, %s13146_s7  ;;  %p13155_p13 = scmp.lt.s32.totalorder %s13146_s7, %s13146_s7 }
  0xc0   : > { %p13149_p10 = pnand %p13147_p6, %p13487_p7  ;;  %p13156_p0 = por %p13155_p13, %p13154_p12 }
  0xc2   : > { %p13150_p1 = pneg %p13149_p10 }
  0xc4   : > { %p13157_p11 = pnand %p13156_p0, %p13150_p1 }
  0xc6   : > { %13160 = shalt.err (!%p13157_p11)
}
  0xc7   : > { %p16500_p5 = scmp.ne.s32.totalorder %s16487_s16, 0  ;;  %s13343_s19 = smov [#allocation14]  }
  0xc8   : > { %s401_s13 = sshll.u32 %s13343_s19, 4  ;;  %s13344_s10 = smov [#allocation17]   ;;  %s402_s13 = int_to_ptr.vmem [resolvable:$true] %s401_s13 }
  0xc9   : > { %12583 = dma.hbm_to_vmem [thread:$0]  (!%p16500_p5), %s16445_s6, 9216, %s378_s24, [#allocation8], %s16499_s20, %s16499_s20, %s16498_s3  }
  0xca   : > { %s429_s18 = sshll.u32 %s13344_s10, 4  ;;  %s13161_s21 = scalar_lea.hbm %s16447_s8, 9216  ;;  %s430_s18 = int_to_ptr.vmem [resolvable:$true] %s429_s18 }
  0xcb   : > { %p13162_p11 = scmp.ne.s32.totalorder %s16447_s8, %s13161_s21  ;;  %p13168_p2 = scmp.lt.u32.totalorder %s13161_s21, %s16447_s8 }
  0xcd   : > { %p13164_p8 = pnand %p13162_p11, %p13487_p7 }
  0xcf   : > { %p13165_p3 = pneg %p13164_p8 }
  0xd1   : > { %p13170_p4 = pnand %p13168_p2, %p13165_p3 }
  0xd3   : > { %13173 = shalt.err (!%p13170_p4)
}
  0xd4   : > { %s13174_s24 = scalar_lea.vmem %s402_s13, 9216  ;;  %p13182_p12 = scmp.lt.s32.totalorder %s402_s13, %s402_s13 }
  0xd5   : > { %p13175_p6 = scmp.ne.s32.totalorder %s402_s13, %s13174_s24  ;;  %p13183_p13 = scmp.lt.s32.totalorder %s13174_s24, %s13174_s24 }
  0xd7   : > { %p13177_p10 = pnand %p13175_p6, %p13487_p7  ;;  %p13184_p0 = por %p13183_p13, %p13182_p12 }
  0xd9   : > { %p13178_p1 = pneg %p13177_p10 }
  0xdb   : > { %p13185_p9 = pnand %p13184_p0, %p13178_p1 }
  0xdd   : > { %13188 = shalt.err (!%p13185_p9)
}
  0xde   : > { %12589 = dma.hbm_to_vmem [thread:$0]  (!%p16500_p5), %s16447_s8, 9216, %s402_s13, [#allocation13], %s16499_s20, %s16499_s20, %s16498_s3  }
  0xdf   : > { %s16501_s12 = sand.u32 1, %s13313_s23   ;;  %s13189_s7 = scalar_lea.hbm %s16450_s11, 16 }
  0xe0   : > { %s9189_s19 = sshll.u32 %s16501_s12, 1  ;;  %p13190_p9 = scmp.ne.s32.totalorder %s16450_s11, %s13189_s7 }
  0xe1   : > { %p13196_p3 = scmp.lt.u32.totalorder %s13189_s7, %s16450_s11 }
  0xe2   : > { %p13192_p11 = pnand %p13190_p9, %p13487_p7 }
  0xe4   : > { %p13193_p8 = pneg %p13192_p11 }
  0xe6   : > { %p13198_p2 = pnand %p13196_p3, %p13193_p8 }
  0xe8   : > { %13201 = shalt.err (!%p13198_p2)
}
  0xe9   : > { %s13202_s3 = scalar_lea.vmem %s430_s18, 16  ;;  %s13209_s20 = scalar_lea.vmem %s430_s18, 32 }
  0xea   : > { %p13203_p4 = scmp.ne.s32.totalorder %s430_s18, %s13202_s3  ;;  %p13210_p1 = scmp.lt.s32.totalorder %s430_s18, %s430_s18 }
  0xeb   : > { %p13211_p12 = scmp.lt.s32.totalorder %s13209_s20, %s13202_s3 }
  0xec   : > { %p13205_p6 = pnand %p13203_p4, %p13487_p7 }
  0xed   : > { %p13212_p13 = por %p13211_p12, %p13210_p1 }
  0xee   : > { %p13206_p10 = pneg %p13205_p6 }
  0xf0   : > { %p13213_p0 = pnand %p13212_p13, %p13206_p10 }
  0xf2   : > { %13216 = shalt.err (!%p13213_p0)
}
  0xf3   : > { %12595 = dma.hbm_to_vmem [thread:$0]  (!%p16500_p5), %s16450_s11, 16, %s430_s18, [#allocation16]  }
  0xf4   : > { %s9190_s17 = sshll.u32 %s13325_s26, 5  ;;  %s16502_s1 = sld [smem:[#allocation48_spill]] }
  0xf5   : > { %s481_s7 = scalar_lea.vmem [#allocation10], %s9189_s19  ;;  %p16503_p9 = scmp.ne.s32.totalorder %s16496_s5, 0 }
  0xf6   : > { %s488_s21 = sshll.u32 %s481_s7, 4  ;;  %s489_s21 = int_to_ptr.vmem [resolvable:$true] %s488_s21 }
  0xf7   : > { %p16504_p11 = pneg %p16503_p9 }
  0xfa   : > { %s13713_s0 = scalar_lea.hbm %s16502_s1, %s9190_s17  ;;  %s13222_s4 = scalar_lea.hbm %s16502_s1, 640 }
  0xfb   : > { %s13217_s16 = scalar_lea.hbm %s13713_s0, 32  ;;  %p13223_p5 = scmp.lt.u32.totalorder %s13713_s0, %s16502_s1 }
  0xfc   : > { %p13218_p7 = scmp.ne.s32.totalorder %s13713_s0, %s13217_s16  ;;  %p13224_p2 = scmp.lt.u32.totalorder %s13222_s4, %s13217_s16 }
  0xfd   : > { %p13226_p6 = scmp.lt.u32.totalorder %s13217_s16, %s13713_s0 }
  0xfe   : > { %p13220_p8 = pnand %p13218_p7, %p16504_p11  ;;  %p13225_p4 = por %p13224_p2, %p13223_p5 }
 0x100   : > { %p13221_p3 = pneg %p13220_p8  ;;  %p13227_p10 = por %p13226_p6, %p13225_p4 }
 0x102   : > { %p13228_p1 = pnand %p13227_p10, %p13221_p3 }
 0x104   : > { %13231 = shalt.err (!%p13228_p1)
}
 0x105   : > { %s13232_s19 = scalar_lea.vmem %s489_s21, 32  ;;  %p16505_p13 = pmov %p16504_p11 }
 0x106   : > { %p13233_p12 = scmp.ne.s32.totalorder %s489_s21, %s13232_s19  ;;  %s13345_s20 = smov [#allocation10]  }
 0x107   : > { %s13237_s13 = sshll.u32 %s13345_s20, 4  ;;  %s13238_s13 = int_to_ptr.vmem [resolvable:$false] %s13237_s13 }
 0x108   : > { %p13235_p0 = pnand %p13233_p12, %p16505_p13  ;;  %s13239_s9 = scalar_lea.vmem %s13238_s13, 64 }
 0x109   : > { %p13240_p11 = scmp.lt.s32.totalorder %s489_s21, %s13238_s13  ;;  %p13241_p8 = scmp.lt.s32.totalorder %s13239_s9, %s13232_s19 }
 0x10a   : > { %p13236_p7 = pneg %p13235_p0 }
 0x10b   : > { %p13242_p2 = por %p13241_p8, %p13240_p11 }
 0x10d   : > { %p13243_p5 = pnand %p13242_p2, %p13236_p7 }
 0x10f   : > { %13246 = shalt.err (!%p13243_p5)
}
 0x110   : > { %12602 = dma.hbm_to_vmem [thread:$0]  (!%p16503_p9), %s13713_s0, 32, %s489_s21, %s13615_s2  }
 0x111   : > { %s16506_s17 = sld [smem:[#allocation26_spill]] }
 0x117   : > { %p16507_p3 = scmp.ne.s32.totalorder %s16506_s17, 0 }
 0x119   : > { %497 = sbr.rel (%p16507_p3) target bundleno = 2905 (0xb59), region = 68 }
 0x120   : > { %p16508_p4 = scmp.ne.s32.totalorder %s16484_s30, 0 }
 0x122   : > { %13280 = dma.done.wait (%p16508_p4), [#allocation6], 320  }
 0x123   : > { %13282 = vsyncadd (%p16508_p4), [#allocation6], 4294966976 }
 0x124   : > { %13284 = dma.done.wait (%p16508_p4), [#allocation8], 16  }
 0x125   : > { %13286 = vsyncadd (%p16508_p4), [#allocation8], 4294967280  ;;  %s16509_s5 = sadd.s32 4294967295, %s13333_s28   ;;  %s509_s12 = sand.u32 1, %s13309_s22  }
 0x126   : > { %s507_s2 = sand.u32 1, %s16509_s5   ;;  %s12541_s10 = smul.u32 1152, %s509_s12 }
 0x127   : > { %s508_s0 = scalar_lea.sflag [#allocation6], %s507_s2  ;;  %p16510_p9 = scmp.ne.s32.totalorder %s16495_s15, 0 }
 0x128   : > { %s13748_s7 = scalar_lea.vmem [#allocation9], %s12541_s10 }
 0x129   : > { %13288 = dma.done.wait (%p16510_p9), %s508_s0, 18464  }
 0x12a   : > { %13290 = vsyncadd (%p16510_p9), %s508_s0, 4294948832  ;;  %s13754_s21 = sshll.u32 %s509_s12, 1 }
 0x12b   : > { %s520_s16 = scalar_lea.vmem [#allocation10], %s13754_s21 }
 0x12c   : > { %13292 = dma.done.wait (%p16508_p4), [#allocation8], 9216  }
 0x12d   : > { %13294 = vsyncadd (%p16508_p4), [#allocation8], 4294958080 }
 0x12e   : > { %13296 = dma.done.wait (%p16508_p4), [#allocation13], 9232  }
 0x12f   : > { %13298 = vsyncadd (%p16508_p4), [#allocation13], 4294958064 }
 0x130   : > { %13300 = dma.done.wait (%p16508_p4), [#allocation16], 32  }
 0x131   : > { %13302 = vsyncadd (%p16508_p4), [#allocation16], 4294967264  ;;  %s16511_s15 = sld [smem:[#allocation25_spill]]  ;;  %s16512_s24 = sld [smem:[#allocation43_spill]] }
 0x132   : > { %s16513_s13 = sld [smem:[#allocation44_spill]]  ;;  %s16515_s12 = sld [smem:[#allocation24_spill]] }
 0x133   : > { %s16514_s2 = sld [smem:[#allocation52_spill]] }
 0x137   : > { %p596_p6 = scmp.lt.s32.totalorder %s16511_s15, 1 }
 0x138   : > { %p9206_p10 = scmp.ne.s32.totalorder %s16515_s12, 0 }
 0x139   : > { %s16565_s15 = smov (!%p596_p6, %s16511_s15), 1  ;;  %v12692_v0 = vld [vmem:[#allocation5] sm:$0xff] (!%p9206_p10)   ;;  %v13787_v1 = vld [vmem:[#allocation5 + $0x8] sm:$0xff] (!%p9206_p10)   ;;  %vm799_vm0 = vcmask (!%p9206_p10), 293888   ;;  %v13346_v9 = vmov (!%p9206_p10), 0.0   ;;  %vm848_vm1 = vcmask (!%p9206_p10), 1041408  }
 0x13a   : > { %s9535_s18 = sshll.u32 %s16565_s15, 8  ;;  %615 = sbr.rel (%p9206_p10) target bundleno = 574 (0x23e), region = 108  ;;  %11213 = vmatprep.subr.bf16.mxu0 (!%p9206_p10), %v12692_v0  ;;  %11875 = vmatprep.subr.bf16.mxu1 (!%p9206_p10), %v12692_v0  ;;  %v13803_v6 = vld [vmem:[#allocation5 + $0x10] ss:$0 sps:$4 sm:$0x33] (!%p9206_p10)   ;;  %616 = vst [vmem:[#allocation2] sm:$0xff] (!%p9206_p10), %v13346_v9 }
 0x13b   : > { %s13774_s3 = scalar_lea.vmem %s16512_s24, %s9535_s18  ;;  %s13779_s9 = scalar_lea.vmem %s16513_s13, %s9535_s18  ;;  %11214 = vmatpush3.bf16.msra.mxu0 (!%p9206_p10), %v12692_v0  ;;  %11878 = vmatpush3.bf16.msra.mxu1 (!%p9206_p10), %v12692_v0  ;;  %617 = vst [vmem:[#allocation2 + $0x8] sm:$0xff] (!%p9206_p10), %v13346_v9  ;;  %618 = vst [vmem:[#allocation2 + $0x10] sm:$0x3] (!%p9206_p10), %v13346_v9  ;;  %v850_v15 = vsel (!%p9206_p10), %vm848_vm1, %v13803_v6, 0  ;;  %v13972_v53 = vld [vmem:[#allocation7] ss:$0 sm:$0xff] (!%p9206_p10) }
 0x13c   : > { %s13784_s30 = scalar_lea.vmem %s16514_s2, %s9535_s18  ;;  %v13790_v2 = vld [vmem:[%s13774_s3] sm:$0xff] (!%p9206_p10)  ;;  %v13793_v3 = vld [vmem:[%s13774_s3 + $0x8] sm:$0xff] (!%p9206_p10)  ;;  %11215 = vmatprep.subr.bf16.mxu0 (!%p9206_p10), %v13787_v1  ;;  %11876 = vmatprep.subr.bf16.mxu1 (!%p9206_p10), %v13787_v1  ;;  %622 = vst [vmem:[#allocation2 + $0x30] sm:$0xff] (!%p9206_p10), %v13346_v9  ;;  %623 = vst [vmem:[#allocation2 + $0x38] sm:$0xff] (!%p9206_p10), %v13346_v9 }
 0x13d   : > { %v13796_v4 = vld [vmem:[%s13774_s3 + $0x80] sm:$0xff] (!%p9206_p10)  ;;  %v13799_v5 = vld [vmem:[%s13774_s3 + $0x88] sm:$0xff] (!%p9206_p10)  ;;  %v756_v7 = vpack.c.bf16 (!%p9206_p10), %v13793_v3, %v13790_v2  ;;  %667 = vst [vmem:[#allocation2 + $0x198] sm:$0xff] (!%p9206_p10), %v13346_v9  ;;  %668 = vst [vmem:[#allocation2 + $0x1a0] sm:$0xff] (!%p9206_p10), %v13346_v9 }
 0x13e   : > { %v764_v8 = vpack.c.bf16 (!%p9206_p10), %v13799_v5, %v13796_v4  ;;  %669 = vst [vmem:[#allocation2 + $0x1a8] sm:$0x3] (!%p9206_p10), %v13346_v9  ;;  %670 = vst [vmem:[#allocation3] sm:$0xff] (!%p9206_p10), %v13346_v9  ;;  %v726_v10 = vld [vmem:[%s13774_s3 + $0x10] sm:$0xff] (!%p9206_p10)  ;;  %v727_v11 = vld [vmem:[%s13774_s3 + $0x18] sm:$0xff] (!%p9206_p10) }
 0x13f   : > { %671 = vst [vmem:[#allocation3 + $0x8] sm:$0xff] (!%p9206_p10), %v13346_v9  ;;  %672 = vst [vmem:[#allocation3 + $0x10] sm:$0x3] (!%p9206_p10), %v13346_v9  ;;  %11219 = vmatprep.mubr.msk.bf16.mxu0 (!%p9206_p10), %vm799_vm0, %v756_v7  ;;  %11216 = vmatpush3.bf16.msra.mxu0 (!%p9206_p10), %v13787_v1  ;;  %v742_v12 = vld [vmem:[%s13774_s3 + $0x90] sm:$0xff] (!%p9206_p10)  ;;  %v743_v13 = vld [vmem:[%s13774_s3 + $0x98] sm:$0xff] (!%p9206_p10)  ;;  %v757_v19 = vpack.c.bf16 (!%p9206_p10), %v727_v11, %v726_v10 }
 0x140   : > { %673 = vst [vmem:[#allocation3 + $0x18] sm:$0xff] (!%p9206_p10), %v13346_v9  ;;  %674 = vst [vmem:[#allocation3 + $0x20] sm:$0xff] (!%p9206_p10), %v13346_v9  ;;  %11235 = vmatprep.mubr.msk.bf16.mxu1 (!%p9206_p10), %vm799_vm0, %v764_v8  ;;  %11879 = vmatpush3.bf16.msra.mxu1 (!%p9206_p10), %v13787_v1  ;;  %v728_v14 = vld [vmem:[%s13774_s3 + $0x20] sm:$0xff] (!%p9206_p10)  ;;  %v729_v16 = vld [vmem:[%s13774_s3 + $0x28] sm:$0xff] (!%p9206_p10)  ;;  %v765_v20 = vpack.c.bf16 (!%p9206_p10), %v743_v13, %v742_v12 }
 0x141   : > { %675 = vst [vmem:[#allocation3 + $0x28] sm:$0x3] %v13346_v9  ;;  %676 = vst [vmem:[#allocation3 + $0x30] sm:$0xff] %v13346_v9  ;;  %12537 = vmatprep.subr.msk.bf16.mxu0 %vm848_vm1, %v13803_v6  ;;  %12538 = vmatprep.subr.msk.bf16.mxu1 %vm848_vm1, %v13803_v6  ;;  %v744_v17 = vld [vmem:[%s13774_s3 + $0xa0] sm:$0xff]  ;;  %v745_v18 = vld [vmem:[%s13774_s3 + $0xa8] sm:$0xff]  ;;  %v758_v21 = vpack.c.bf16 %v729_v16, %v728_v14 }
 0x142   : > { %677 = vst [vmem:[#allocation3 + $0x38] sm:$0xff] %v13346_v9  ;;  %678 = vst [vmem:[#allocation3 + $0x40] sm:$0x3] %v13346_v9  ;;  %v766_v22 = vpack.c.bf16 %v745_v18, %v744_v17  ;;  %v730_v23 = vld [vmem:[%s13774_s3 + $0x30] sm:$0xff]  ;;  %v731_v24 = vld [vmem:[%s13774_s3 + $0x38] sm:$0xff] }
 0x143   : > { %679 = vst [vmem:[#allocation3 + $0x48] sm:$0xff] %v13346_v9  ;;  %680 = vst [vmem:[#allocation3 + $0x50] sm:$0xff] %v13346_v9  ;;  %11218 = vmatpush3.bf16.msra.mxu0 %v850_v15  ;;  %v746_v25 = vld [vmem:[%s13774_s3 + $0xb0] sm:$0xff]  ;;  %v747_v26 = vld [vmem:[%s13774_s3 + $0xb8] sm:$0xff]  ;;  %v759_v31 = vpack.c.bf16 %v731_v24, %v730_v23 }
 0x144   : > { %681 = vst [vmem:[#allocation3 + $0x58] sm:$0x3] %v13346_v9  ;;  %682 = vst [vmem:[#allocation3 + $0x60] sm:$0xff] %v13346_v9  ;;  %11880 = vmatpush3.bf16.msra.mxu1 %v850_v15  ;;  %v732_v27 = vld [vmem:[%s13774_s3 + $0x40] sm:$0xff]  ;;  %v733_v28 = vld [vmem:[%s13774_s3 + $0x48] sm:$0xff]  ;;  %v767_v32 = vpack.c.bf16 %v747_v26, %v746_v25 }
 0x145   : > { %683 = vst [vmem:[#allocation3 + $0x68] sm:$0xff] %v13346_v9  ;;  %684 = vst [vmem:[#allocation3 + $0x70] sm:$0x3] %v13346_v9  ;;  %v748_v29 = vld [vmem:[%s13774_s3 + $0xc0] sm:$0xff]  ;;  %v749_v30 = vld [vmem:[%s13774_s3 + $0xc8] sm:$0xff]  ;;  %v760_v33 = vpack.c.bf16 %v733_v28, %v732_v27 }
 0x146   : > { %685 = vst [vmem:[#allocation3 + $0x78] sm:$0xff] %v13346_v9  ;;  %686 = vst [vmem:[#allocation3 + $0x80] sm:$0xff] %v13346_v9  ;;  %11220 = vmatmul.mubr.msk.bf16.vlgmr.msra.gmra.mrb[0].mxu0 %vm799_vm0, %v757_v19  ;;  %v768_v34 = vpack.c.bf16 %v749_v30, %v748_v29  ;;  %v734_v35 = vld [vmem:[%s13774_s3 + $0x50] sm:$0xff]  ;;  %v735_v36 = vld [vmem:[%s13774_s3 + $0x58] sm:$0xff] }
 0x147   : > { %687 = vst [vmem:[#allocation3 + $0x88] sm:$0x3] %v13346_v9  ;;  %688 = vst [vmem:[#allocation3 + $0x90] sm:$0xff] %v13346_v9  ;;  %11236 = vmatmul.mubr.msk.bf16.vlgmr.msra.gmra.mrb[0].mxu1 %vm799_vm0, %v765_v20  ;;  %11223 = vmatprep.mubr.msk.bf16.mxu0 %vm799_vm0, %v758_v21  ;;  %v750_v37 = vld [vmem:[%s13774_s3 + $0xd0] sm:$0xff]  ;;  %v751_v38 = vld [vmem:[%s13774_s3 + $0xd8] sm:$0xff]  ;;  %v761_v43 = vpack.c.bf16 %v735_v36, %v734_v35 }
 0x148   : > { %689 = vst [vmem:[#allocation3 + $0x98] sm:$0xff] %v13346_v9  ;;  %690 = vst [vmem:[#allocation3 + $0xa0] sm:$0x3] %v13346_v9  ;;  %11239 = vmatprep.mubr.msk.bf16.mxu1 %vm799_vm0, %v766_v22  ;;  %v736_v39 = vld [vmem:[%s13774_s3 + $0x60] sm:$0xff]  ;;  %v737_v40 = vld [vmem:[%s13774_s3 + $0x68] sm:$0xff]  ;;  %v769_v44 = vpack.c.bf16 %v751_v38, %v750_v37 }
 0x149   : > { %691 = vst [vmem:[#allocation3 + $0xa8] sm:$0xff] %v13346_v9  ;;  %692 = vst [vmem:[#allocation3 + $0xb0] sm:$0xff] %v13346_v9  ;;  %v752_v41 = vld [vmem:[%s13774_s3 + $0xe0] sm:$0xff]  ;;  %v753_v42 = vld [vmem:[%s13774_s3 + $0xe8] sm:$0xff]  ;;  %v762_v45 = vpack.c.bf16 %v737_v40, %v736_v39 }
 0x14a   : > { %693 = vst [vmem:[#allocation3 + $0xb8] sm:$0x3] %v13346_v9  ;;  %694 = vst [vmem:[#allocation3 + $0xc0] sm:$0xff] %v13346_v9  ;;  %v770_v46 = vpack.c.bf16 %v753_v42, %v752_v41  ;;  %v738_v47 = vld [vmem:[%s13774_s3 + $0x70] sm:$0xff]  ;;  %v739_v48 = vld [vmem:[%s13774_s3 + $0x78] sm:$0xff] }
 0x14b   : > { %695 = vst [vmem:[#allocation3 + $0xc8] sm:$0xff] %v13346_v9  ;;  %696 = vst [vmem:[#allocation3 + $0xd0] sm:$0x3] %v13346_v9  ;;  %v754_v49 = vld [vmem:[%s13774_s3 + $0xf0] sm:$0xff]  ;;  %v755_v50 = vld [vmem:[%s13774_s3 + $0xf8] sm:$0xff]  ;;  %v763_v51 = vpack.c.bf16 %v739_v48, %v738_v47 }
 0x14c   : > { %697 = vst [vmem:[#allocation3 + $0xd8] sm:$0xff] %v13346_v9  ;;  %698 = vst [vmem:[#allocation3 + $0xe0] sm:$0xff] %v13346_v9  ;;  %v771_v52 = vpack.c.bf16 %v755_v50, %v754_v49 }
 0x14d   : > { %699 = vst [vmem:[#allocation3 + $0xe8] sm:$0x3] %v13346_v9  ;;  %700 = vst [vmem:[#allocation3 + $0xf0] sm:$0xff] %v13346_v9 }
 0x14e   : > { %701 = vst [vmem:[#allocation3 + $0xf8] sm:$0xff] %v13346_v9  ;;  %702 = vst [vmem:[#allocation3 + $0x100] sm:$0x3] %v13346_v9  ;;  %11224 = vmatmul.mubr.msk.bf16.gmra.mrb[4].mxu0 %vm799_vm0, %v759_v31 }
 0x14f   : > { %703 = vst [vmem:[#allocation3 + $0x108] sm:$0xff] %v13346_v9  ;;  %704 = vst [vmem:[#allocation3 + $0x110] sm:$0xff] %v13346_v9  ;;  %11240 = vmatmul.mubr.msk.bf16.gmra.mrb[4].mxu1 %vm799_vm0, %v767_v32  ;;  %11227 = vmatprep.mubr.msk.bf16.mxu0 %vm799_vm0, %v760_v33 }
 0x150   : > { %705 = vst [vmem:[#allocation3 + $0x118] sm:$0x3] %v13346_v9  ;;  %706 = vst [vmem:[#allocation3 + $0x120] sm:$0xff] %v13346_v9  ;;  %11243 = vmatprep.mubr.msk.bf16.mxu1 %vm799_vm0, %v768_v34 }
 0x151   : > { %707 = vst [vmem:[#allocation3 + $0x128] sm:$0xff] %v13346_v9  ;;  %708 = vst [vmem:[#allocation3 + $0x130] sm:$0x3] %v13346_v9 }
 0x152   : > { %709 = vst [vmem:[#allocation3 + $0x138] sm:$0xff] %v13346_v9  ;;  %710 = vst [vmem:[#allocation3 + $0x140] sm:$0xff] %v13346_v9 }
 0x153   : > { %711 = vst [vmem:[#allocation3 + $0x148] sm:$0x3] %v13346_v9  ;;  %712 = vst [vmem:[#allocation3 + $0x150] sm:$0xff] %v13346_v9 }
 0x154   : > { %713 = vst [vmem:[#allocation3 + $0x158] sm:$0xff] %v13346_v9  ;;  %714 = vst [vmem:[#allocation3 + $0x160] sm:$0x3] %v13346_v9 }
 0x155   : > { %715 = vst [vmem:[#allocation3 + $0x168] sm:$0xff] %v13346_v9  ;;  %716 = vst [vmem:[#allocation3 + $0x170] sm:$0xff] %v13346_v9 }
 0x156   : > { %717 = vst [vmem:[#allocation3 + $0x178] sm:$0x3] %v13346_v9  ;;  %718 = vst [vmem:[#allocation3 + $0x180] sm:$0xff] %v13346_v9  ;;  %11228 = vmatmul.mubr.msk.bf16.gmra.mrb[8].mxu0 %vm799_vm0, %v761_v43 }
 0x157   : > { %719 = vst [vmem:[#allocation3 + $0x188] sm:$0xff] %v13346_v9  ;;  %720 = vst [vmem:[#allocation3 + $0x190] sm:$0x3] %v13346_v9  ;;  %11244 = vmatmul.mubr.msk.bf16.gmra.mrb[8].mxu1 %vm799_vm0, %v769_v44  ;;  %11231 = vmatprep.mubr.msk.bf16.mxu0 %vm799_vm0, %v762_v45 }
 0x158   : > { %721 = vst [vmem:[#allocation3 + $0x198] sm:$0xff] %v13346_v9  ;;  %722 = vst [vmem:[#allocation3 + $0x1a0] sm:$0xff] %v13346_v9  ;;  %11247 = vmatprep.mubr.msk.bf16.mxu1 %vm799_vm0, %v770_v46 }
 0x159   : > { %723 = vst [vmem:[#allocation3 + $0x1a8] sm:$0x3] %v13346_v9  ;;  %619 = vst [vmem:[#allocation2 + $0x18] sm:$0xff] %v13346_v9 }
 0x15a   : > { %620 = vst [vmem:[#allocation2 + $0x20] sm:$0xff] %v13346_v9  ;;  %621 = vst [vmem:[#allocation2 + $0x28] sm:$0x3] %v13346_v9 }
 0x15b   : > { %624 = vst [vmem:[#allocation2 + $0x40] sm:$0x3] %v13346_v9  ;;  %625 = vst [vmem:[#allocation2 + $0x48] sm:$0xff] %v13346_v9 }
 0x15c   : > { %626 = vst [vmem:[#allocation2 + $0x50] sm:$0xff] %v13346_v9  ;;  %627 = vst [vmem:[#allocation2 + $0x58] sm:$0x3] %v13346_v9 }
 0x15d   : > { %628 = vst [vmem:[#allocation2 + $0x60] sm:$0xff] %v13346_v9  ;;  %629 = vst [vmem:[#allocation2 + $0x68] sm:$0xff] %v13346_v9 }
 0x15e   : > { %630 = vst [vmem:[#allocation2 + $0x70] sm:$0x3] %v13346_v9  ;;  %631 = vst [vmem:[#allocation2 + $0x78] sm:$0xff] %v13346_v9  ;;  %11232 = vmatmul.mubr.msk.bf16.gmra.mrb[12].mxu0 %vm799_vm0, %v763_v51 }
 0x15f   : > { %632 = vst [vmem:[#allocation2 + $0x80] sm:$0xff] %v13346_v9  ;;  %633 = vst [vmem:[#allocation2 + $0x88] sm:$0x3] %v13346_v9  ;;  %11248 = vmatmul.mubr.msk.bf16.gmra.mrb[12].mxu1 %vm799_vm0, %v771_v52 }
 0x160   : > { %634 = vst [vmem:[#allocation2 + $0x90] sm:$0xff] %v13346_v9  ;;  %635 = vst [vmem:[#allocation2 + $0x98] sm:$0xff] %v13346_v9 }
 0x161   : > { %636 = vst [vmem:[#allocation2 + $0xa0] sm:$0x3] %v13346_v9  ;;  %637 = vst [vmem:[#allocation2 + $0xa8] sm:$0xff] %v13346_v9 }
 0x162   : > { %638 = vst [vmem:[#allocation2 + $0xb0] sm:$0xff] %v13346_v9  ;;  %639 = vst [vmem:[#allocation2 + $0xb8] sm:$0x3] %v13346_v9 }
 0x163   : > { %640 = vst [vmem:[#allocation2 + $0xc0] sm:$0xff] %v13346_v9  ;;  %641 = vst [vmem:[#allocation2 + $0xc8] sm:$0xff] %v13346_v9 }
 0x164   : > { %642 = vst [vmem:[#allocation2 + $0xd0] sm:$0x3] %v13346_v9  ;;  %643 = vst [vmem:[#allocation2 + $0xd8] sm:$0xff] %v13346_v9 }
 0x165   : > { %644 = vst [vmem:[#allocation2 + $0xe0] sm:$0xff] %v13346_v9  ;;  %645 = vst [vmem:[#allocation2 + $0xe8] sm:$0x3] %v13346_v9 }
 0x166   : > { %646 = vst [vmem:[#allocation2 + $0xf0] sm:$0xff] %v13346_v9  ;;  %647 = vst [vmem:[#allocation2 + $0xf8] sm:$0xff] %v13346_v9 }
 0x167   : > { %648 = vst [vmem:[#allocation2 + $0x100] sm:$0x3] %v13346_v9  ;;  %649 = vst [vmem:[#allocation2 + $0x108] sm:$0xff] %v13346_v9 }
 0x168   : > { %650 = vst [vmem:[#allocation2 + $0x110] sm:$0xff] %v13346_v9  ;;  %651 = vst [vmem:[#allocation2 + $0x118] sm:$0x3] %v13346_v9 }
 0x169   : > { %652 = vst [vmem:[#allocation2 + $0x120] sm:$0xff] %v13346_v9  ;;  %653 = vst [vmem:[#allocation2 + $0x128] sm:$0xff] %v13346_v9 }
 0x16a   : > { %654 = vst [vmem:[#allocation2 + $0x130] sm:$0x3] %v13346_v9  ;;  %655 = vst [vmem:[#allocation2 + $0x138] sm:$0xff] %v13346_v9 }
 0x16b   : > { %656 = vst [vmem:[#allocation2 + $0x140] sm:$0xff] %v13346_v9  ;;  %657 = vst [vmem:[#allocation2 + $0x148] sm:$0x3] %v13346_v9 }
 0x16c   : > { %658 = vst [vmem:[#allocation2 + $0x150] sm:$0xff] %v13346_v9  ;;  %659 = vst [vmem:[#allocation2 + $0x158] sm:$0xff] %v13346_v9 }
 0x16d   : > { %660 = vst [vmem:[#allocation2 + $0x160] sm:$0x3] %v13346_v9  ;;  %661 = vst [vmem:[#allocation2 + $0x168] sm:$0xff] %v13346_v9 }
 0x16e   : > { %662 = vst [vmem:[#allocation2 + $0x170] sm:$0xff] %v13346_v9  ;;  %663 = vst [vmem:[#allocation2 + $0x178] sm:$0x3] %v13346_v9 }
 0x16f   : > { %664 = vst [vmem:[#allocation2 + $0x180] sm:$0xff] %v13346_v9  ;;  %665 = vst [vmem:[#allocation2 + $0x188] sm:$0xff] %v13346_v9 }
 0x170   : > { %666 = vst [vmem:[#allocation2 + $0x190] sm:$0x3] %v13346_v9 }
 0x219   : > { %v11221_v54 = vpop.f32.mrb[0].mxu0 }
 0x21a   : > { %v11237_v55 = vpop.f32.mrb[0].mxu1  ;;  %v895_v56 = vadd.f32 %v11221_v54, %v13972_v53  ;;  %v886_v58 = vpop.f32.mrb[1].mxu0 }
 0x21b   : > { %v959_v57 = vadd.f32 %v11237_v55, %v13972_v53  ;;  %v950_v59 = vpop.f32.mrb[1].mxu1  ;;  %v887_v60 = vadd.f32 %v13972_v53, %v886_v58  ;;  %v11222_v62 = vpop.f32.mrb[2].mxu0 }
 0x21c   : > { %v951_v61 = vadd.f32 %v13972_v53, %v950_v59  ;;  %v11238_v63 = vpop.f32.mrb[2].mxu1  ;;  %v1015_v0 = vmax.f32 %v895_v56, 0.0  ;;  %v898_v2 = vadd.f32 %v11222_v62, %v13972_v53  ;;  %v889_v4 = vpop.f32.mrb[3].mxu0 }
 0x21d   : > { %v1031_v1 = vmax.f32 %v959_v57, 0.0  ;;  %v962_v3 = vadd.f32 %v11238_v63, %v13972_v53  ;;  %v953_v5 = vpop.f32.mrb[3].mxu1  ;;  %v1013_v6 = vmax.f32 %v887_v60, 0.0  ;;  %v890_v8 = vadd.f32 %v13972_v53, %v889_v4 }
 0x21e   : > { %v1029_v7 = vmax.f32 %v951_v61, 0.0  ;;  %v954_v9 = vadd.f32 %v13972_v53, %v953_v5  ;;  %1048 = vst [vmem:[#allocation2 + $0x31] sm:$0xff] %v1015_v0  ;;  %1080 = vst [vmem:[#allocation4 + $0x10] sm:$0xff] %v1015_v0  ;;  %v1016_v10 = vmax.f32 %v898_v2, 0.0 }
 0x21f   : > { %1064 = vst [vmem:[#allocation2 + $0xf1] sm:$0xff] %v1031_v1  ;;  %1096 = vst [vmem:[#allocation4 + $0x90] sm:$0xff] %v1031_v1  ;;  %v1032_v11 = vmax.f32 %v962_v3, 0.0  ;;  %v1014_v12 = vmax.f32 %v890_v8, 0.0 }
 0x220   : > { %1046 = vst [vmem:[#allocation2 + $0x19] sm:$0xff] %v1013_v6  ;;  %1078 = vst [vmem:[#allocation4] sm:$0xff] %v1013_v6  ;;  %v1030_v13 = vmax.f32 %v954_v9, 0.0 }
 0x221   : > { %1062 = vst [vmem:[#allocation2 + $0xd9] sm:$0xff] %v1029_v7  ;;  %1094 = vst [vmem:[#allocation4 + $0x80] sm:$0xff] %v1029_v7  ;;  %v11225_v14 = vpop.f32.mrb[4].mxu0 }
 0x222   : > { %1049 = vst [vmem:[#allocation2 + $0x39] sm:$0xff] %v1016_v10  ;;  %1081 = vst [vmem:[#allocation4 + $0x18] sm:$0xff] %v1016_v10  ;;  %v11241_v15 = vpop.f32.mrb[4].mxu1  ;;  %v911_v16 = vadd.f32 %v11225_v14, %v13972_v53  ;;  %v902_v18 = vpop.f32.mrb[5].mxu0 }
 0x223   : > { %1065 = vst [vmem:[#allocation2 + $0xf9] sm:$0xff] %v1032_v11  ;;  %1097 = vst [vmem:[#allocation4 + $0x98] sm:$0xff] %v1032_v11  ;;  %v975_v17 = vadd.f32 %v11241_v15, %v13972_v53  ;;  %v966_v19 = vpop.f32.mrb[5].mxu1  ;;  %v903_v20 = vadd.f32 %v13972_v53, %v902_v18  ;;  %v11226_v22 = vpop.f32.mrb[6].mxu0 }
 0x224   : > { %1047 = vst [vmem:[#allocation2 + $0x21] sm:$0xff] %v1014_v12  ;;  %1079 = vst [vmem:[#allocation4 + $0x8] sm:$0xff] %v1014_v12  ;;  %v967_v21 = vadd.f32 %v13972_v53, %v966_v19  ;;  %v11242_v23 = vpop.f32.mrb[6].mxu1  ;;  %v1019_v24 = vmax.f32 %v911_v16, 0.0  ;;  %v914_v26 = vadd.f32 %v11226_v22, %v13972_v53  ;;  %v905_v28 = vpop.f32.mrb[7].mxu0 }
 0x225   : > { %1063 = vst [vmem:[#allocation2 + $0xe1] sm:$0xff] %v1030_v13  ;;  %1095 = vst [vmem:[#allocation4 + $0x88] sm:$0xff] %v1030_v13  ;;  %v1035_v25 = vmax.f32 %v975_v17, 0.0  ;;  %v978_v27 = vadd.f32 %v11242_v23, %v13972_v53  ;;  %v969_v29 = vpop.f32.mrb[7].mxu1  ;;  %v1017_v30 = vmax.f32 %v903_v20, 0.0  ;;  %v906_v32 = vadd.f32 %v13972_v53, %v905_v28 }
 0x226   : > { %v1033_v31 = vmax.f32 %v967_v21, 0.0  ;;  %v970_v33 = vadd.f32 %v13972_v53, %v969_v29  ;;  %1052 = vst [vmem:[#allocation2 + $0x61] sm:$0xff] %v1019_v24  ;;  %1084 = vst [vmem:[#allocation4 + $0x30] sm:$0xff] %v1019_v24  ;;  %v1020_v34 = vmax.f32 %v914_v26, 0.0 }
 0x227   : > { %1068 = vst [vmem:[#allocation2 + $0x121] sm:$0xff] %v1035_v25  ;;  %1100 = vst [vmem:[#allocation4 + $0xb0] sm:$0xff] %v1035_v25  ;;  %v1036_v35 = vmax.f32 %v978_v27, 0.0  ;;  %v1018_v36 = vmax.f32 %v906_v32, 0.0 }
 0x228   : > { %1050 = vst [vmem:[#allocation2 + $0x49] sm:$0xff] %v1017_v30  ;;  %1082 = vst [vmem:[#allocation4 + $0x20] sm:$0xff] %v1017_v30  ;;  %v1034_v37 = vmax.f32 %v970_v33, 0.0 }
 0x229   : > { %1066 = vst [vmem:[#allocation2 + $0x109] sm:$0xff] %v1033_v31  ;;  %1098 = vst [vmem:[#allocation4 + $0xa0] sm:$0xff] %v1033_v31  ;;  %v11229_v38 = vpop.f32.mrb[8].mxu0 }
 0x22a   : > { %1053 = vst [vmem:[#allocation2 + $0x69] sm:$0xff] %v1020_v34  ;;  %1085 = vst [vmem:[#allocation4 + $0x38] sm:$0xff] %v1020_v34  ;;  %v11245_v39 = vpop.f32.mrb[8].mxu1  ;;  %v927_v40 = vadd.f32 %v11229_v38, %v13972_v53  ;;  %v918_v42 = vpop.f32.mrb[9].mxu0 }
 0x22b   : > { %1069 = vst [vmem:[#allocation2 + $0x129] sm:$0xff] %v1036_v35  ;;  %1101 = vst [vmem:[#allocation4 + $0xb8] sm:$0xff] %v1036_v35  ;;  %v991_v41 = vadd.f32 %v11245_v39, %v13972_v53  ;;  %v982_v43 = vpop.f32.mrb[9].mxu1  ;;  %v919_v44 = vadd.f32 %v13972_v53, %v918_v42  ;;  %v11230_v46 = vpop.f32.mrb[10].mxu0 }
 0x22c   : > { %1051 = vst [vmem:[#allocation2 + $0x51] sm:$0xff] %v1018_v36  ;;  %1083 = vst [vmem:[#allocation4 + $0x28] sm:$0xff] %v1018_v36  ;;  %v983_v45 = vadd.f32 %v13972_v53, %v982_v43  ;;  %v11246_v47 = vpop.f32.mrb[10].mxu1  ;;  %v1023_v48 = vmax.f32 %v927_v40, 0.0  ;;  %v930_v50 = vadd.f32 %v11230_v46, %v13972_v53  ;;  %v921_v52 = vpop.f32.mrb[11].mxu0 }
 0x22d   : > { %1067 = vst [vmem:[#allocation2 + $0x111] sm:$0xff] %v1034_v37  ;;  %1099 = vst [vmem:[#allocation4 + $0xa8] sm:$0xff] %v1034_v37  ;;  %v1039_v49 = vmax.f32 %v991_v41, 0.0  ;;  %v994_v51 = vadd.f32 %v11246_v47, %v13972_v53  ;;  %v985_v54 = vpop.f32.mrb[11].mxu1  ;;  %v1021_v55 = vmax.f32 %v919_v44, 0.0  ;;  %v922_v57 = vadd.f32 %v13972_v53, %v921_v52 }
 0x22e   : > { %v1037_v56 = vmax.f32 %v983_v45, 0.0  ;;  %v986_v58 = vadd.f32 %v13972_v53, %v985_v54  ;;  %1056 = vst [vmem:[#allocation2 + $0x91] sm:$0xff] %v1023_v48  ;;  %1088 = vst [vmem:[#allocation4 + $0x50] sm:$0xff] %v1023_v48  ;;  %v1024_v59 = vmax.f32 %v930_v50, 0.0 }
 0x22f   : > { %1072 = vst [vmem:[#allocation2 + $0x151] sm:$0xff] %v1039_v49  ;;  %1104 = vst [vmem:[#allocation4 + $0xd0] sm:$0xff] %v1039_v49  ;;  %v1040_v60 = vmax.f32 %v994_v51, 0.0  ;;  %v1022_v61 = vmax.f32 %v922_v57, 0.0 }
 0x230   : > { %1054 = vst [vmem:[#allocation2 + $0x79] sm:$0xff] %v1021_v55  ;;  %1086 = vst [vmem:[#allocation4 + $0x40] sm:$0xff] %v1021_v55  ;;  %v1038_v62 = vmax.f32 %v986_v58, 0.0 }
 0x231   : > { %1070 = vst [vmem:[#allocation2 + $0x139] sm:$0xff] %v1037_v56  ;;  %1102 = vst [vmem:[#allocation4 + $0xc0] sm:$0xff] %v1037_v56  ;;  %v11233_v63 = vpop.f32.mrb[12].mxu0 }
 0x232   : > { %1057 = vst [vmem:[#allocation2 + $0x99] sm:$0xff] %v1024_v59  ;;  %1089 = vst [vmem:[#allocation4 + $0x58] sm:$0xff] %v1024_v59  ;;  %v11249_v0 = vpop.f32.mrb[12].mxu1  ;;  %v943_v1 = vadd.f32 %v11233_v63, %v13972_v53  ;;  %v934_v3 = vpop.f32.mrb[13].mxu0 }
 0x233   : > { %1073 = vst [vmem:[#allocation2 + $0x159] sm:$0xff] %v1040_v60  ;;  %1105 = vst [vmem:[#allocation4 + $0xd8] sm:$0xff] %v1040_v60  ;;  %v1007_v2 = vadd.f32 %v11249_v0, %v13972_v53  ;;  %v998_v4 = vpop.f32.mrb[13].mxu1  ;;  %v935_v5 = vadd.f32 %v13972_v53, %v934_v3  ;;  %v11234_v7 = vpop.f32.mrb[14].mxu0 }
 0x234   : > { %1055 = vst [vmem:[#allocation2 + $0x81] sm:$0xff] %v1022_v61  ;;  %1087 = vst [vmem:[#allocation4 + $0x48] sm:$0xff] %v1022_v61  ;;  %v999_v6 = vadd.f32 %v13972_v53, %v998_v4  ;;  %v11250_v8 = vpop.f32.mrb[14].mxu1  ;;  %v1027_v9 = vmax.f32 %v943_v1, 0.0  ;;  %v946_v11 = vadd.f32 %v11234_v7, %v13972_v53  ;;  %v937_v13 = vpop.f32.mrb[15].mxu0 }
 0x235   : > { %1071 = vst [vmem:[#allocation2 + $0x141] sm:$0xff] %v1038_v62  ;;  %1103 = vst [vmem:[#allocation4 + $0xc8] sm:$0xff] %v1038_v62  ;;  %v1043_v10 = vmax.f32 %v1007_v2, 0.0  ;;  %v1010_v12 = vadd.f32 %v11250_v8, %v13972_v53  ;;  %v1001_v14 = vpop.f32.mrb[15].mxu1  ;;  %v1025_v15 = vmax.f32 %v935_v5, 0.0  ;;  %v938_v17 = vadd.f32 %v13972_v53, %v937_v13 }
 0x236   : > { %v1041_v16 = vmax.f32 %v999_v6, 0.0  ;;  %v1002_v18 = vadd.f32 %v13972_v53, %v1001_v14  ;;  %1060 = vst [vmem:[#allocation2 + $0xc1] sm:$0xff] %v1027_v9  ;;  %1092 = vst [vmem:[#allocation4 + $0x70] sm:$0xff] %v1027_v9  ;;  %v1028_v19 = vmax.f32 %v946_v11, 0.0 }
 0x237   : > { %1076 = vst [vmem:[#allocation2 + $0x181] sm:$0xff] %v1043_v10  ;;  %1108 = vst [vmem:[#allocation4 + $0xf0] sm:$0xff] %v1043_v10  ;;  %v1044_v20 = vmax.f32 %v1010_v12, 0.0  ;;  %v1026_v21 = vmax.f32 %v938_v17, 0.0 }
 0x238   : > { %1058 = vst [vmem:[#allocation2 + $0xa9] sm:$0xff] %v1025_v15  ;;  %1090 = vst [vmem:[#allocation4 + $0x60] sm:$0xff] %v1025_v15  ;;  %v1042_v22 = vmax.f32 %v1002_v18, 0.0 }
 0x239   : > { %1074 = vst [vmem:[#allocation2 + $0x169] sm:$0xff] %v1041_v16  ;;  %1106 = vst [vmem:[#allocation4 + $0xe0] sm:$0xff] %v1041_v16 }
 0x23a   : > { %1061 = vst [vmem:[#allocation2 + $0xc9] sm:$0xff] %v1028_v19  ;;  %1093 = vst [vmem:[#allocation4 + $0x78] sm:$0xff] %v1028_v19 }
 0x23b   : > { %1077 = vst [vmem:[#allocation2 + $0x189] sm:$0xff] %v1044_v20  ;;  %1109 = vst [vmem:[#allocation4 + $0xf8] sm:$0xff] %v1044_v20 }
 0x23c   : > { %1059 = vst [vmem:[#allocation2 + $0xb1] sm:$0xff] %v1026_v21  ;;  %1091 = vst [vmem:[#allocation4 + $0x68] sm:$0xff] %v1026_v21 }
 0x23d   : > { %1075 = vst [vmem:[#allocation2 + $0x171] sm:$0xff] %v1042_v22  ;;  %1107 = vst [vmem:[#allocation4 + $0xe8] sm:$0xff] %v1042_v22 }
 0x23e PF: > { %v12695_v53 = vld [vmem:[%s13748_s7 + $0x100] sm:$0xff]   ;;  %v12699_v26 = vld [vmem:[%s13748_s7 + $0x108] sm:$0xff]   ;;  %v12703_v30 = vld [vmem:[%s13748_s7 + $0x110] sm:$0xff]   ;;  %s16542_s10 = sld [smem:[#allocation24_spill]] }
 0x23f   : > { %v12696_v23 = vld [vmem:[%s13748_s7 + $0x40] sm:$0xff]   ;;  %9557 = vmatprep.subr.bf16.mxu0 %v12695_v53  ;;  %v12700_v27 = vld [vmem:[%s13748_s7 + $0x48] sm:$0xff]   ;;  %v12704_v31 = vld [vmem:[%s13748_s7 + $0x50] sm:$0xff]  }
 0x240   : > { %v12697_v24 = vld [vmem:[%s13748_s7 + $0xc0] sm:$0xff]   ;;  %9693 = vmatprep.subr.bf16.mxu1 %v12696_v23  ;;  %v12701_v28 = vld [vmem:[%s13748_s7 + $0xc8] sm:$0xff]   ;;  %v12705_v32 = vld [vmem:[%s13748_s7 + $0xd0] sm:$0xff]  }
 0x241   : > { %v12698_v25 = vld [vmem:[%s13748_s7] sm:$0xff]   ;;  %9558 = vmatpush3.bf16.msra.mxu0 %v12697_v24  ;;  %v12702_v29 = vld [vmem:[%s13748_s7 + $0x8] sm:$0xff]   ;;  %v12706_v33 = vld [vmem:[%s13748_s7 + $0x10] sm:$0xff]  }
 0x242   : > { %9694 = vmatpush3.bf16.msra.mxu1 %v12698_v25  ;;  %9559 = vmatprep.subr.bf16.mxu0 %v12699_v26  ;;  %v12707_v34 = vld [vmem:[%s13748_s7 + $0x118] sm:$0xff]   ;;  %v12711_v38 = vld [vmem:[%s13748_s7 + $0x120] sm:$0xff]   ;;  %v12715_v42 = vld [vmem:[%s13748_s7 + $0x128] sm:$0xff]  }
 0x243   : > { %9695 = vmatprep.subr.bf16.mxu1 %v12700_v27  ;;  %v12708_v35 = vld [vmem:[%s13748_s7 + $0x58] sm:$0xff]   ;;  %v12712_v39 = vld [vmem:[%s13748_s7 + $0x60] sm:$0xff]   ;;  %v12716_v43 = vld [vmem:[%s13748_s7 + $0x68] sm:$0xff]  }
 0x244   : > { %v12709_v36 = vld [vmem:[%s13748_s7 + $0xd8] sm:$0xff]   ;;  %v12713_v40 = vld [vmem:[%s13748_s7 + $0xe0] sm:$0xff]   ;;  %v12717_v44 = vld [vmem:[%s13748_s7 + $0xe8] sm:$0xff]   ;;  %s4851_s0 = ssub.s32 0, %s16542_s10  ;;  %p4850_p1 = scmp.lt.s32.totalorder %s16542_s10, 0 }
 0x245   : > { %9560 = vmatpush3.bf16.msra.mxu0 %v12701_v28  ;;  %v12710_v37 = vld [vmem:[%s13748_s7 + $0x18] sm:$0xff]   ;;  %v12714_v41 = vld [vmem:[%s13748_s7 + $0x20] sm:$0xff]   ;;  %v12718_v45 = vld [vmem:[%s13748_s7 + $0x28] sm:$0xff]  }
 0x246   : > { %9696 = vmatpush3.bf16.msra.mxu1 %v12702_v29  ;;  %9561 = vmatprep.subr.bf16.mxu0 %v12703_v30  ;;  %v12719_v46 = vld [vmem:[%s13748_s7 + $0x130] sm:$0xff]   ;;  %v12723_v50 = vld [vmem:[%s13748_s7 + $0x138] sm:$0xff]   ;;  %v1215_v55 = vld [vmem:[#allocation2 + $0x19] sm:$0xff] }
 0x247   : > { %9697 = vmatprep.subr.bf16.mxu1 %v12704_v31  ;;  %v12720_v47 = vld [vmem:[%s13748_s7 + $0x70] sm:$0xff]   ;;  %v12724_v51 = vld [vmem:[%s13748_s7 + $0x78] sm:$0xff]   ;;  %v1113_v57 = vld [vmem:[#allocation2 + $0x18] sm:$0xff] }
 0x248   : > { %v12721_v48 = vld [vmem:[%s13748_s7 + $0xf0] sm:$0xff]   ;;  %v12725_v52 = vld [vmem:[%s13748_s7 + $0xf8] sm:$0xff]   ;;  %v12727_v0 = vld [vmem:[%s13748_s7 + $0x140] sm:$0xff]  }
 0x249   : > { %9562 = vmatpush3.bf16.msra.mxu0 %v12705_v32  ;;  %v12722_v49 = vld [vmem:[%s13748_s7 + $0x30] sm:$0xff]   ;;  %v12726_v54 = vld [vmem:[%s13748_s7 + $0x38] sm:$0xff]   ;;  %v1218_v5 = vld [vmem:[#allocation2 + $0x39] sm:$0xff] }
 0x24a   : > { %9698 = vmatpush3.bf16.msra.mxu1 %v12706_v33  ;;  %9563 = vmatprep.subr.bf16.mxu0 %v12707_v34  ;;  %v1216_v56 = vld [vmem:[#allocation2 + $0x21] sm:$0xff]  ;;  %v1214_v61 = vld [vmem:[#allocation2 + $0x9] sm:$0xff]  ;;  %v1217_v3 = vld [vmem:[#allocation2 + $0x31] sm:$0xff] }
 0x24b   : > { %9699 = vmatprep.subr.bf16.mxu1 %v12708_v35  ;;  %v1250_v58 = vpack.c.bf16 %v1216_v56, %v1215_v55  ;;  %v1114_v59 = vld [vmem:[#allocation2 + $0x20] sm:$0xff]  ;;  %v1112_v2 = vld [vmem:[#allocation2 + $0x8] sm:$0xff]  ;;  %v1115_v6 = vld [vmem:[#allocation2 + $0x30] sm:$0xff]  ;;  %v14039_v8 = vpack.c.bf16 %v1218_v5, %v1217_v3 }
 0x24c   : > { %v1213_v60 = vld [vmem:[#allocation2 + $0x1] sm:$0xff]  ;;  %v1148_v62 = vpack.c.bf16 %v1114_v59, %v1113_v57  ;;  %v1116_v7 = vld [vmem:[#allocation2 + $0x38] sm:$0xff]  ;;  %v1219_v10 = vld [vmem:[#allocation2 + $0x49] sm:$0xff] }
 0x24d   : > { %9564 = vmatpush3.bf16.msra.mxu0 %v12709_v36  ;;  %v1249_v63 = vpack.c.bf16 %v1214_v61, %v1213_v60  ;;  %1491 = vmatprep.mubr.bf16.mxu0 %v1250_v58  ;;  %v1111_v1 = vld [vmem:[#allocation2] sm:$0xff]  ;;  %v14041_v9 = vpack.c.bf16 %v1116_v7, %v1115_v6  ;;  %v1220_v11 = vld [vmem:[#allocation2 + $0x51] sm:$0xff]  ;;  %v1117_v13 = vld [vmem:[#allocation2 + $0x48] sm:$0xff] }
 0x24e   : > { %9700 = vmatpush3.bf16.msra.mxu1 %v12710_v37  ;;  %9565 = vmatprep.subr.bf16.mxu0 %v12711_v38  ;;  %v1147_v4 = vpack.c.bf16 %v1112_v2, %v1111_v1  ;;  %v12728_v12 = vld [vmem:[%s13748_s7 + $0x148] sm:$0xff]   ;;  %v1118_v14 = vld [vmem:[#allocation2 + $0x50] sm:$0xff]  ;;  %v14046_v15 = vpack.c.bf16 %v1220_v11, %v1219_v10  ;;  %v12729_v16 = vld [vmem:[%s13748_s7 + $0x150] sm:$0xff]  }
 0x24f   : > { %9701 = vmatprep.subr.bf16.mxu1 %v12712_v39  ;;  %1957 = vmatprep.mubr.bf16.mxu1 %v1148_v62  ;;  %v14049_v17 = vpack.c.bf16 %v1118_v14, %v1117_v13  ;;  %v1221_v18 = vld [vmem:[#allocation2 + $0x61] sm:$0xff]  ;;  %v1222_v19 = vld [vmem:[#allocation2 + $0x69] sm:$0xff]  ;;  %v12731_v53 = vld [vmem:[%s13748_s7 + $0x80] sm:$0xff]  }
 0x250   : > { %v12730_v20 = vld [vmem:[%s13748_s7 + $0x158] sm:$0xff]   ;;  %v1119_v21 = vld [vmem:[#allocation2 + $0x60] sm:$0xff]  ;;  %v14055_v23 = vpack.c.bf16 %v1222_v19, %v1221_v18  ;;  %v12732_v25 = vld [vmem:[%s13748_s7 + $0x160] sm:$0xff]  }
 0x251   : > { %9566 = vmatpush3.bf16.msra.mxu0 %v12713_v40  ;;  %v1120_v22 = vld [vmem:[#allocation2 + $0x68] sm:$0xff]  ;;  %v12733_v26 = vld [vmem:[%s13748_s7 + $0x88] sm:$0xff]   ;;  %v1225_v36 = vld [vmem:[#allocation2 + $0x91] sm:$0xff] }
 0x252   : > { %9702 = vmatpush3.bf16.msra.mxu1 %v12714_v41  ;;  %9567 = vmatprep.subr.bf16.mxu0 %v12715_v42  ;;  %v14057_v24 = vpack.c.bf16 %v1120_v22, %v1119_v21  ;;  %v1223_v27 = vld [vmem:[#allocation2 + $0x79] sm:$0xff]  ;;  %v1224_v28 = vld [vmem:[#allocation2 + $0x81] sm:$0xff]  ;;  %v12737_v38 = vld [vmem:[%s13748_s7 + $0x98] sm:$0xff]  }
 0x253   : > { %9703 = vmatprep.subr.bf16.mxu1 %v12716_v43  ;;  %v12734_v29 = vld [vmem:[%s13748_s7 + $0x168] sm:$0xff]   ;;  %v14066_v32 = vpack.c.bf16 %v1224_v28, %v1223_v27  ;;  %v12735_v33 = vld [vmem:[%s13748_s7 + $0x90] sm:$0xff]   ;;  %v1123_v39 = vld [vmem:[#allocation2 + $0x90] sm:$0xff] }
 0x254   : > { %v1121_v30 = vld [vmem:[#allocation2 + $0x78] sm:$0xff]  ;;  %v1122_v31 = vld [vmem:[#allocation2 + $0x80] sm:$0xff]  ;;  %v12738_v42 = vld [vmem:[%s13748_s7 + $0x178] sm:$0xff]  }
 0x255   : > { %9568 = vmatpush3.bf16.msra.mxu0 %v12717_v44  ;;  %v14069_v34 = vpack.c.bf16 %v1122_v31, %v1121_v30  ;;  %v12736_v35 = vld [vmem:[%s13748_s7 + $0x170] sm:$0xff]   ;;  %v1226_v37 = vld [vmem:[#allocation2 + $0x99] sm:$0xff]  ;;  %v12742_v56 = vld [vmem:[%s13748_s7 + $0xb8] sm:$0xff]  }
 0x256   : > { %9704 = vmatpush3.bf16.msra.mxu1 %v12718_v45  ;;  %9569 = vmatprep.subr.bf16.mxu0 %v12719_v46  ;;  %v1124_v40 = vld [vmem:[#allocation2 + $0x98] sm:$0xff]  ;;  %v14077_v41 = vpack.c.bf16 %v1226_v37, %v1225_v36  ;;  %v1227_v45 = vld [vmem:[#allocation2 + $0xa9] sm:$0xff]  ;;  %v1229_v55 = vld [vmem:[#allocation2 + $0xc1] sm:$0xff] }
 0x257   : > { %9705 = vmatprep.subr.bf16.mxu1 %v12720_v47  ;;  %v12739_v43 = vld [vmem:[%s13748_s7 + $0xa0] sm:$0xff]   ;;  %v14081_v44 = vpack.c.bf16 %v1124_v40, %v1123_v39  ;;  %v12740_v46 = vld [vmem:[%s13748_s7 + $0xa8] sm:$0xff]   ;;  %v1230_v57 = vld [vmem:[#allocation2 + $0xc9] sm:$0xff] }
 0x258   : > { %v1228_v47 = vld [vmem:[#allocation2 + $0xb1] sm:$0xff]  ;;  %v1128_v59 = vld [vmem:[#allocation2 + $0xc8] sm:$0xff]  ;;  %v14102_v61 = vpack.c.bf16 %v1230_v57, %v1229_v55  ;;  %v1130_v2 = vld [vmem:[#allocation2 + $0xe0] sm:$0xff] }
 0x259   : > { %9570 = vmatpush3.bf16.msra.mxu0 %v12721_v48  ;;  %v1125_v48 = vld [vmem:[#allocation2 + $0xa8] sm:$0xff]  ;;  %v14100_v60 = vld [vmem:[%s13748_s7 + $0x200] sm:$0xff]   ;;  %v1138_v31 = vld [vmem:[#allocation2 + $0x140] sm:$0xff] }
 0x25a   : > { %9706 = vmatpush3.bf16.msra.mxu1 %v12722_v49  ;;  %9571 = vmatprep.subr.bf16.mxu0 %v12723_v50  ;;  %v1126_v49 = vld [vmem:[#allocation2 + $0xb0] sm:$0xff]  ;;  %v1129_v1 = vld [vmem:[#allocation2 + $0xd8] sm:$0xff]  ;;  %v1237_v21 = vld [vmem:[#allocation2 + $0x121] sm:$0xff] }
 0x25b   : > { %9707 = vmatprep.subr.bf16.mxu1 %v12724_v51  ;;  %v12743_v50 = vld [vmem:[%s13748_s7 + $0x1c0] sm:$0xff]   ;;  %v12741_v51 = vld [vmem:[%s13748_s7 + $0xb0] sm:$0xff]  }
 0x25c   : > { %v1233_v5 = vld [vmem:[#allocation2 + $0xf1] sm:$0xff]  ;;  %v1234_v6 = vld [vmem:[#allocation2 + $0xf9] sm:$0xff]  ;;  %v1235_v13 = vld [vmem:[#allocation2 + $0x109] sm:$0xff] }
 0x25d   : > { %9572 = vmatpush3.bf16.msra.mxu0 %v12725_v52  ;;  %v14090_v52 = vpack.c.bf16 %v1228_v47, %v1227_v45  ;;  %v1131_v7 = vld [vmem:[#allocation2 + $0xf0] sm:$0xff]  ;;  %v1132_v10 = vld [vmem:[#allocation2 + $0xf8] sm:$0xff]  ;;  %v14119_v11 = vpack.c.bf16 %v1234_v6, %v1233_v5  ;;  %v1143_v55 = vld [vmem:[#allocation2 + $0x180] sm:$0xff] }
 0x25e   : > { %9708 = vmatpush3.bf16.msra.mxu1 %v12726_v54  ;;  %11251 = vmatprep.subr.bf16.mxu0 %v12727_v0  ;;  %v14092_v54 = vpack.c.bf16 %v1126_v49, %v1125_v48  ;;  %v1236_v14 = vld [vmem:[#allocation2 + $0x111] sm:$0xff]  ;;  %v1238_v22 = vld [vmem:[#allocation2 + $0x129] sm:$0xff]  ;;  %v1239_v28 = vld [vmem:[#allocation2 + $0x139] sm:$0xff] }
 0x25f   : > { %11299 = vmatprep.subr.bf16.mxu1 %v12731_v53  ;;  %v1134_v18 = vld [vmem:[#allocation2 + $0x110] sm:$0xff]  ;;  %v14127_v19 = vpack.c.bf16 %v1236_v14, %v1235_v13  ;;  %v1137_v30 = vld [vmem:[#allocation2 + $0x138] sm:$0xff]  ;;  %v12764_v6 = vld [vmem:[%s13748_s7 + $0x230] sm:$0xff]  }
 0x260   : > { %1492 = vmatmul.mubr.bf16.vlgmr.msra.gmra.mrb[0].mxu0 %v1249_v63  ;;  %v1231_v63 = vld [vmem:[#allocation2 + $0xd9] sm:$0xff]  ;;  %v1241_v36 = vld [vmem:[#allocation2 + $0x151] sm:$0xff] }
 0x261   : > { %1958 = vmatmul.mubr.bf16.vlgmr.msra.gmra.mrb[0].mxu1 %v1147_v4  ;;  %11252 = vmatpush3.bf16.msra.mxu0 %v12727_v0  ;;  %v1232_v0 = vld [vmem:[#allocation2 + $0xe1] sm:$0xff]  ;;  %v14113_v4 = vpack.c.bf16 %v1130_v2, %v1129_v1  ;;  %v1242_v37 = vld [vmem:[#allocation2 + $0x159] sm:$0xff]  ;;  %v1244_v45 = vld [vmem:[#allocation2 + $0x171] sm:$0xff] }
 0x262   : > { %1499 = vmatprep.mubr.bf16.mxu0 %v14039_v8  ;;  %1965 = vmatprep.mubr.bf16.mxu1 %v14041_v9  ;;  %v14111_v3 = vpack.c.bf16 %v1232_v0, %v1231_v63  ;;  %v1140_v39 = vld [vmem:[#allocation2 + $0x158] sm:$0xff]  ;;  %v14151_v40 = vpack.c.bf16 %v1242_v37, %v1241_v36  ;;  %v1142_v47 = vld [vmem:[#allocation2 + $0x170] sm:$0xff] }
 0x263   : > { %11253 = vmatprep.subr.bf16.mxu0 %v12728_v12  ;;  %11300 = vmatpush3.bf16.msra.mxu1 %v12731_v53  ;;  %v1135_v53 = vld [vmem:[#allocation2 + $0x120] sm:$0xff]  ;;  %v12749_v2 = vld [vmem:[%s13748_s7 + $0x1d8] sm:$0xff]  }
 0x264   : > { %11301 = vmatprep.subr.bf16.mxu1 %v12733_v26  ;;  %v12745_v63 = vld [vmem:[%s13748_s7 + $0x1c8] sm:$0xff]   ;;  %v2251_v14 = vld [vmem:[#allocation2 + $0x32] sm:$0xff] }
 0x265   : > { %11254 = vmatpush3.bf16.msra.mxu0 %v12728_v12  ;;  %v14121_v12 = vpack.c.bf16 %v1132_v10, %v1131_v7  ;;  %v12754_v0 = vld [vmem:[%s13748_s7 + $0x208] sm:$0xff]   ;;  %v12763_v7 = vld [vmem:[%s13748_s7 + $0x1f8] sm:$0xff]  }
 0x266   : > { %11255 = vmatprep.subr.bf16.mxu0 %v12729_v16  ;;  %v12746_v1 = vld [vmem:[%s13748_s7 + $0x188] sm:$0xff]  }
 0x267   : > { %11302 = vmatpush3.bf16.msra.mxu1 %v12733_v26  ;;  %v14135_v26 = vpack.c.bf16 %v1238_v22, %v1237_v21  ;;  %v12755_v5 = vld [vmem:[%s13748_s7 + $0x1e8] sm:$0xff]   ;;  %v2248_v22 = vld [vmem:[#allocation2 + $0xa] sm:$0xff] }
 0x268   : > { %1500 = vmatmul.mubr.bf16.gmra.mrb[4].mxu0 %v1250_v58  ;;  %11303 = vmatprep.subr.bf16.mxu1 %v12735_v33  ;;  %v1127_v58 = vld [vmem:[#allocation2 + $0xc0] sm:$0xff] }
 0x269   : > { %1507 = vmatprep.mubr.bf16.mxu0 %v14046_v15  ;;  %1966 = vmatmul.mubr.bf16.gmra.mrb[4].mxu1 %v1148_v62  ;;  %v14104_v62 = vpack.c.bf16 %v1128_v59, %v1127_v58  ;;  %v12744_v59 = vld [vmem:[%s13748_s7 + $0x180] sm:$0xff]   ;;  %v2250_v10 = vld [vmem:[#allocation2 + $0x22] sm:$0xff] }
 0x26a   : > { %11256 = vmatpush3.bf16.msra.mxu0 %v12729_v16  ;;  %1973 = vmatprep.mubr.bf16.mxu1 %v14049_v17  ;;  %v1133_v16 = vld [vmem:[#allocation2 + $0x108] sm:$0xff]  ;;  %v2260_v36 = vld [vmem:[#allocation2 + $0x9a] sm:$0xff] }
 0x26b   : > { %11257 = vmatprep.subr.bf16.mxu0 %v12730_v20  ;;  %11304 = vmatpush3.bf16.msra.mxu1 %v12735_v33  ;;  %v2247_v21 = vld [vmem:[#allocation2 + $0x2] sm:$0xff] }
 0x26c   : > { %11305 = vmatprep.subr.bf16.mxu1 %v12737_v38 }
 0x26e   : > { %11258 = vmatpush3.bf16.msra.mxu0 %v12730_v20  ;;  %v14129_v20 = vpack.c.bf16 %v1134_v18, %v1133_v16  ;;  %v2252_v16 = vld [vmem:[#allocation2 + $0x3a] sm:$0xff] }
 0x26f   : > { %11259 = vmatprep.subr.bf16.mxu0 %v12732_v25  ;;  %11306 = vmatpush3.bf16.msra.mxu1 %v12737_v38  ;;  %v1139_v38 = vld [vmem:[#allocation2 + $0x150] sm:$0xff] }
 0x270   : > { %1508 = vmatmul.mubr.bf16.gmra.mrb[8].mxu0 %v14039_v8  ;;  %11307 = vmatprep.subr.bf16.mxu1 %v12739_v43 }
 0x271   : > { %1515 = vmatprep.mubr.bf16.mxu0 %v14055_v23  ;;  %1974 = vmatmul.mubr.bf16.gmra.mrb[8].mxu1 %v14041_v9 }
 0x272   : > { %11260 = vmatpush3.bf16.msra.mxu0 %v12732_v25  ;;  %1981 = vmatprep.mubr.bf16.mxu1 %v14057_v24  ;;  %v1136_v25 = vld [vmem:[#allocation2 + $0x128] sm:$0xff] }
 0x273   : > { %11261 = vmatprep.subr.bf16.mxu0 %v12734_v29  ;;  %11308 = vmatpush3.bf16.msra.mxu1 %v12739_v43  ;;  %v14137_v27 = vpack.c.bf16 %v1136_v25, %v1135_v53  ;;  %v1243_v43 = vld [vmem:[#allocation2 + $0x169] sm:$0xff]  ;;  %v2254_v25 = vld [vmem:[#allocation2 + $0x52] sm:$0xff] }
 0x274   : > { %11309 = vmatprep.subr.bf16.mxu1 %v12740_v46  ;;  %v14159_v48 = vpack.c.bf16 %v1244_v45, %v1243_v43  ;;  %v2253_v53 = vld [vmem:[#allocation2 + $0x4a] sm:$0xff] }
 0x275   : > { %v2264_v43 = vld [vmem:[#allocation2 + $0xca] sm:$0xff] }
 0x276   : > { %11262 = vmatpush3.bf16.msra.mxu0 %v12734_v29  ;;  %v1240_v29 = vld [vmem:[#allocation2 + $0x141] sm:$0xff] }
 0x277   : > { %11263 = vmatprep.subr.bf16.mxu0 %v12736_v35  ;;  %11310 = vmatpush3.bf16.msra.mxu1 %v12740_v46  ;;  %v14143_v33 = vpack.c.bf16 %v1240_v29, %v1239_v28  ;;  %v1141_v46 = vld [vmem:[#allocation2 + $0x168] sm:$0xff]  ;;  %v2286_v29 = vpack.c.bf16 %v2254_v25, %v2253_v53 }
 0x278   : > { %1516 = vmatmul.mubr.bf16.gmra.mrb[12].mxu0 %v14046_v15  ;;  %11311 = vmatprep.subr.bf16.mxu1 %v12741_v51  ;;  %v14161_v49 = vpack.c.bf16 %v1142_v47, %v1141_v46  ;;  %v2256_v28 = vld [vmem:[#allocation2 + $0x6a] sm:$0xff] }
 0x279   : > { %1523 = vmatprep.mubr.bf16.mxu0 %v14066_v32  ;;  %1982 = vmatmul.mubr.bf16.gmra.mrb[12].mxu1 %v14049_v17 }
 0x27a   : > { %1989 = vmatprep.mubr.bf16.mxu1 %v14069_v34  ;;  %11264 = vmatpush3.bf16.msra.mxu0 %v12736_v35  ;;  %v14145_v35 = vpack.c.bf16 %v1138_v31, %v1137_v30  ;;  %v2257_v31 = vld [vmem:[#allocation2 + $0x7a] sm:$0xff] }
 0x27b   : > { %11265 = vmatprep.subr.bf16.mxu0 %v12738_v42  ;;  %11312 = vmatpush3.bf16.msra.mxu1 %v12741_v51  ;;  %v1246_v51 = vld [vmem:[#allocation2 + $0x189] sm:$0xff] }
 0x27c   : > { %11313 = vmatprep.subr.bf16.mxu1 %v12742_v56 }
 0x27e   : > { %11266 = vmatpush3.bf16.msra.mxu0 %v12738_v42  ;;  %v14153_v42 = vpack.c.bf16 %v1140_v39, %v1139_v38  ;;  %v2261_v39 = vld [vmem:[#allocation2 + $0xaa] sm:$0xff] }
 0x27f   : > { %9829 = vmatprep.subr.bf16.mxu0 %v12743_v50  ;;  %11314 = vmatpush3.bf16.msra.mxu1 %v12742_v56  ;;  %v1245_v50 = vld [vmem:[#allocation2 + $0x181] sm:$0xff] }
 0x280   : > { %1524 = vmatmul.mubr.bf16.gmra.mrb[16].mxu0 %v14055_v23  ;;  %11347 = vmatprep.subr.bf16.mxu1 %v14100_v60  ;;  %v1144_v56 = vld [vmem:[#allocation2 + $0x188] sm:$0xff]  ;;  %v14167_v57 = vpack.c.bf16 %v1246_v51, %v1245_v50  ;;  %v2267_v51 = vld [vmem:[#allocation2 + $0xf2] sm:$0xff] }
 0x281   : > { %1531 = vmatprep.mubr.bf16.mxu0 %v14077_v41  ;;  %1990 = vmatmul.mubr.bf16.gmra.mrb[16].mxu1 %v14057_v24  ;;  %v14169_v58 = vpack.c.bf16 %v1144_v56, %v1143_v55  ;;  %v2268_v55 = vld [vmem:[#allocation2 + $0xfa] sm:$0xff] }
 0x282   : > { %1997 = vmatprep.mubr.bf16.mxu1 %v14081_v44 }
 0x288   : > { %1532 = vmatmul.mubr.bf16.gmra.mrb[20].mxu0 %v14066_v32 }
 0x289   : > { %1539 = vmatprep.mubr.bf16.mxu0 %v14090_v52  ;;  %1998 = vmatmul.mubr.bf16.gmra.mrb[20].mxu1 %v14069_v34 }
 0x28a   : > { %2005 = vmatprep.mubr.bf16.mxu1 %v14092_v54 }
 0x290   : > { %1540 = vmatmul.mubr.bf16.gmra.mrb[24].mxu0 %v14077_v41 }
 0x291   : > { %1547 = vmatprep.mubr.bf16.mxu0 %v14102_v61  ;;  %2006 = vmatmul.mubr.bf16.gmra.mrb[24].mxu1 %v14081_v44 }
 0x292   : > { %2013 = vmatprep.mubr.bf16.mxu1 %v14104_v62 }
 0x298   : > { %1548 = vmatmul.mubr.bf16.gmra.mrb[28].mxu0 %v14090_v52 }
 0x299   : > { %1555 = vmatprep.mubr.bf16.mxu0 %v14111_v3  ;;  %2014 = vmatmul.mubr.bf16.gmra.mrb[28].mxu1 %v14092_v54 }
 0x29a   : > { %2021 = vmatprep.mubr.bf16.mxu1 %v14113_v4 }
 0x2a0   : > { %1556 = vmatmul.mubr.bf16.gmra.mrb[32].mxu0 %v14102_v61 }
 0x2a1   : > { %1563 = vmatprep.mubr.bf16.mxu0 %v14119_v11  ;;  %2022 = vmatmul.mubr.bf16.gmra.mrb[32].mxu1 %v14104_v62 }
 0x2a2   : > { %2029 = vmatprep.mubr.bf16.mxu1 %v14121_v12 }
 0x2a8   : > { %1564 = vmatmul.mubr.bf16.gmra.mrb[36].mxu0 %v14111_v3 }
 0x2a9   : > { %1571 = vmatprep.mubr.bf16.mxu0 %v14127_v19  ;;  %2030 = vmatmul.mubr.bf16.gmra.mrb[36].mxu1 %v14113_v4 }
 0x2aa   : > { %2037 = vmatprep.mubr.bf16.mxu1 %v14129_v20 }
 0x2b0   : > { %1572 = vmatmul.mubr.bf16.gmra.mrb[40].mxu0 %v14119_v11 }
 0x2b1   : > { %1579 = vmatprep.mubr.bf16.mxu0 %v14135_v26  ;;  %2038 = vmatmul.mubr.bf16.gmra.mrb[40].mxu1 %v14121_v12 }
 0x2b2   : > { %2045 = vmatprep.mubr.bf16.mxu1 %v14137_v27 }
 0x2b8   : > { %1580 = vmatmul.mubr.bf16.gmra.mrb[44].mxu0 %v14127_v19 }
 0x2b9   : > { %1587 = vmatprep.mubr.bf16.mxu0 %v14143_v33  ;;  %2046 = vmatmul.mubr.bf16.gmra.mrb[44].mxu1 %v14129_v20 }
 0x2ba   : > { %2053 = vmatprep.mubr.bf16.mxu1 %v14145_v35 }
 0x2c0   : > { %1588 = vmatmul.mubr.bf16.gmra.mrb[48].mxu0 %v14135_v26 }
 0x2c1   : > { %1595 = vmatprep.mubr.bf16.mxu0 %v14151_v40  ;;  %2054 = vmatmul.mubr.bf16.gmra.mrb[48].mxu1 %v14137_v27 }
 0x2c2   : > { %2061 = vmatprep.mubr.bf16.mxu1 %v14153_v42 }
 0x2c8   : > { %1596 = vmatmul.mubr.bf16.gmra.mrb[52].mxu0 %v14143_v33 }
 0x2c9   : > { %1603 = vmatprep.mubr.bf16.mxu0 %v14159_v48  ;;  %2062 = vmatmul.mubr.bf16.gmra.mrb[52].mxu1 %v14145_v35 }
 0x2ca   : > { %2069 = vmatprep.mubr.bf16.mxu1 %v14161_v49 }
 0x2d0   : > { %1604 = vmatmul.mubr.bf16.gmra.mrb[56].mxu0 %v14151_v40 }
 0x2d1   : > { %1611 = vmatprep.mubr.bf16.mxu0 %v14167_v57  ;;  %2070 = vmatmul.mubr.bf16.gmra.mrb[56].mxu1 %v14153_v42 }
 0x2d2   : > { %2077 = vmatprep.mubr.bf16.mxu1 %v14169_v58 }
 0x2d8   : > { %1612 = vmatmul.mubr.bf16.gmra.mrb[60].mxu0 %v14159_v48 }
 0x2d9   : > { %11267 = vmatprep.mubr.bf16.mxu0 %v14039_v8  ;;  %2078 = vmatmul.mubr.bf16.gmra.mrb[60].mxu1 %v14161_v49  ;;  %v12747_v8 = vld [vmem:[%s13748_s7 + $0x1d0] sm:$0xff]  }
 0x2da   : > { %11315 = vmatprep.mubr.bf16.mxu1 %v14041_v9  ;;  %v12756_v9 = vld [vmem:[%s13748_s7 + $0x210] sm:$0xff]  }
 0x2e0   : > { %11268 = vmatmul.mubr.bf16.vlgmr.msra.gmra.mrb[64].mxu0 %v14046_v15  ;;  %v12748_v15 = vld [vmem:[%s13748_s7 + $0x190] sm:$0xff]  }
 0x2e1   : > { %9830 = vmatpush3.bf16.msra.mxu0 %v12744_v59  ;;  %11271 = vmatprep.mubr.bf16.mxu0 %v14055_v23  ;;  %v12750_v23 = vld [vmem:[%s13748_s7 + $0x198] sm:$0xff]  }
 0x2e2   : > { %11316 = vmatmul.mubr.bf16.vlgmr.msra.gmra.mrb[64].mxu1 %v14049_v17  ;;  %9831 = vmatprep.subr.bf16.mxu0 %v12745_v63  ;;  %v12758_v17 = vld [vmem:[%s13748_s7 + $0x218] sm:$0xff]  }
 0x2e3   : > { %11319 = vmatprep.mubr.bf16.mxu1 %v14057_v24  ;;  %11348 = vmatpush3.bf16.msra.mxu1 %v14100_v60  ;;  %v12751_v24 = vld [vmem:[%s13748_s7 + $0x1e0] sm:$0xff]  }
 0x2e4   : > { %11349 = vmatprep.subr.bf16.mxu1 %v12754_v0  ;;  %v12760_v60 = vld [vmem:[%s13748_s7 + $0x220] sm:$0xff]  }
 0x2e5   : > { %9832 = vmatpush3.bf16.msra.mxu0 %v12746_v1  ;;  %v14250_v1 = vpack.c.bf16 %v2268_v55, %v2267_v51 }
 0x2e6   : > { %9833 = vmatprep.subr.bf16.mxu0 %v12747_v8 }
 0x2e7   : > { %11350 = vmatpush3.bf16.msra.mxu1 %v12754_v0 }
 0x2e8   : > { %11272 = vmatmul.mubr.bf16.gmra.mrb[68].mxu0 %v14066_v32  ;;  %11351 = vmatprep.subr.bf16.mxu1 %v12756_v9  ;;  %v12753_v32 = vld [vmem:[%s13748_s7 + $0x1a0] sm:$0xff]  }
 0x2e9   : > { %11275 = vmatprep.mubr.bf16.mxu0 %v14077_v41  ;;  %9834 = vmatpush3.bf16.msra.mxu0 %v12748_v15  ;;  %v12757_v41 = vld [vmem:[%s13748_s7 + $0x1a8] sm:$0xff]  }
 0x2ea   : > { %11320 = vmatmul.mubr.bf16.gmra.mrb[68].mxu1 %v14069_v34  ;;  %9835 = vmatprep.subr.bf16.mxu0 %v12749_v2  ;;  %v12762_v34 = vld [vmem:[%s13748_s7 + $0x228] sm:$0xff]  }
 0x2eb   : > { %11323 = vmatprep.mubr.bf16.mxu1 %v14081_v44  ;;  %11352 = vmatpush3.bf16.msra.mxu1 %v12756_v9  ;;  %v12759_v44 = vld [vmem:[%s13748_s7 + $0x1f0] sm:$0xff]  }
 0x2ec   : > { %11353 = vmatprep.subr.bf16.mxu1 %v12758_v17 }
 0x2ed   : > { %9836 = vmatpush3.bf16.msra.mxu0 %v12750_v23 }
 0x2ee   : > { %9837 = vmatprep.subr.bf16.mxu0 %v12751_v24  ;;  %v2269_v24 = vld [vmem:[#allocation2 + $0x10a] sm:$0xff] }
 0x2ef   : > { %11354 = vmatpush3.bf16.msra.mxu1 %v12758_v17 }
 0x2f0   : > { %11276 = vmatmul.mubr.bf16.gmra.mrb[72].mxu0 %v14090_v52  ;;  %11355 = vmatprep.subr.bf16.mxu1 %v12760_v60  ;;  %v12761_v52 = vld [vmem:[%s13748_s7 + $0x1b0] sm:$0xff]  }
 0x2f1   : > { %11279 = vmatprep.mubr.bf16.mxu0 %v14102_v61  ;;  %9838 = vmatpush3.bf16.msra.mxu0 %v12753_v32  ;;  %v12766_v61 = vld [vmem:[%s13748_s7 + $0x238] sm:$0xff]  }
 0x2f2   : > { %11324 = vmatmul.mubr.bf16.gmra.mrb[72].mxu1 %v14092_v54  ;;  %9839 = vmatprep.subr.bf16.mxu0 %v12755_v5  ;;  %v12765_v54 = vld [vmem:[%s13748_s7 + $0x1b8] sm:$0xff]   ;;  %v2271_v5 = vld [vmem:[#allocation2 + $0x122] sm:$0xff] }
 0x2f3   : > { %11327 = vmatprep.mubr.bf16.mxu1 %v14104_v62  ;;  %11356 = vmatpush3.bf16.msra.mxu1 %v12760_v60  ;;  %v1247_v62 = vld [vmem:[#allocation2 + $0x199] sm:$0xff] }
 0x2f4   : > { %11357 = vmatprep.subr.bf16.mxu1 %v12762_v34  ;;  %v2270_v60 = vld [vmem:[#allocation2 + $0x112] sm:$0xff] }
 0x2f5   : > { %9840 = vmatpush3.bf16.msra.mxu0 %v12757_v41 }
 0x2f6   : > { %9841 = vmatprep.subr.bf16.mxu0 %v12759_v44 }
 0x2f7   : > { %11358 = vmatpush3.bf16.msra.mxu1 %v12762_v34  ;;  %v2272_v34 = vld [vmem:[#allocation2 + $0x12a] sm:$0xff] }
 0x2f8   : > { %11280 = vmatmul.mubr.bf16.gmra.mrb[76].mxu0 %v14111_v3  ;;  %11359 = vmatprep.subr.bf16.mxu1 %v12764_v6  ;;  %v1248_v3 = vld [vmem:[#allocation2 + $0x1a1] sm:$0xff] }
 0x2f9   : > { %11283 = vmatprep.mubr.bf16.mxu0 %v14119_v11  ;;  %9842 = vmatpush3.bf16.msra.mxu0 %v12761_v52  ;;  %v1145_v11 = vld [vmem:[#allocation2 + $0x198] sm:$0xff]  ;;  %v1266_v13 = vpack.c.bf16 %v1248_v3, %v1247_v62 }
 0x2fa   : > { %11328 = vmatmul.mubr.bf16.gmra.mrb[76].mxu1 %v14113_v4  ;;  %9843 = vmatprep.subr.bf16.mxu0 %v12763_v7  ;;  %v2249_v4 = vld [vmem:[#allocation2 + $0x1a] sm:$0xff]  ;;  %v14263_v7 = vpack.c.bf16 %v2270_v60, %v2269_v24  ;;  %v2282_v24 = vld [vmem:[#allocation2 + $0x1a2] sm:$0xff] }
 0x2fb   : > { %11331 = vmatprep.mubr.bf16.mxu1 %v14121_v12  ;;  %11360 = vmatpush3.bf16.msra.mxu1 %v12764_v6  ;;  %v1146_v12 = vld [vmem:[#allocation2 + $0x1a0] sm:$0xff]  ;;  %v2284_v18 = vpack.c.bf16 %v2250_v10, %v2249_v4 }
 0x2fc   : > { %11361 = vmatprep.subr.bf16.mxu1 %v12766_v61 }
 0x2fd   : > { %9844 = vmatpush3.bf16.msra.mxu0 %v12765_v54  ;;  %v14265_v54 = vpack.c.bf16 %v2272_v34, %v2271_v5 }
 0x2ff   : > { %11362 = vmatpush3.bf16.msra.mxu1 %v12766_v61 }
 0x300   : > { %11284 = vmatmul.mubr.bf16.gmra.mrb[80].mxu0 %v14127_v19  ;;  %v1164_v19 = vpack.c.bf16 %v1146_v12, %v1145_v11 }
 0x301   : > { %11287 = vmatprep.mubr.bf16.mxu0 %v14135_v26  ;;  %v2283_v26 = vpack.c.bf16 %v2248_v22, %v2247_v21 }
 0x302   : > { %11332 = vmatmul.mubr.bf16.gmra.mrb[80].mxu1 %v14129_v20  ;;  %v2285_v20 = vpack.c.bf16 %v2252_v16, %v2251_v14  ;;  %v2274_v14 = vld [vmem:[#allocation2 + $0x142] sm:$0xff] }
 0x303   : > { %11335 = vmatprep.mubr.bf16.mxu1 %v14137_v27  ;;  %v2255_v27 = vld [vmem:[#allocation2 + $0x62] sm:$0xff] }
 0x304   : > { %v14230_v30 = vpack.c.bf16 %v2256_v28, %v2255_v27 }
 0x308   : > { %11288 = vmatmul.mubr.bf16.gmra.mrb[84].mxu0 %v14143_v33  ;;  %v2258_v33 = vld [vmem:[#allocation2 + $0x82] sm:$0xff] }
 0x309   : > { %11291 = vmatprep.mubr.bf16.mxu0 %v14151_v40  ;;  %v14233_v37 = vpack.c.bf16 %v2258_v33, %v2257_v31  ;;  %v2262_v40 = vld [vmem:[#allocation2 + $0xb2] sm:$0xff] }
 0x30a   : > { %11336 = vmatmul.mubr.bf16.gmra.mrb[84].mxu1 %v14145_v35  ;;  %v2259_v35 = vld [vmem:[#allocation2 + $0x92] sm:$0xff]  ;;  %v14239_v45 = vpack.c.bf16 %v2262_v40, %v2261_v39 }
 0x30b   : > { %11339 = vmatprep.mubr.bf16.mxu1 %v14153_v42  ;;  %v14235_v38 = vpack.c.bf16 %v2260_v36, %v2259_v35  ;;  %v2263_v42 = vld [vmem:[#allocation2 + $0xc2] sm:$0xff]  ;;  %v2277_v36 = vld [vmem:[#allocation2 + $0x16a] sm:$0xff]  ;;  %v2278_v39 = vld [vmem:[#allocation2 + $0x172] sm:$0xff] }
 0x30c   : > { %v14241_v46 = vpack.c.bf16 %v2264_v43, %v2263_v42  ;;  %v2279_v42 = vld [vmem:[#allocation2 + $0x182] sm:$0xff]  ;;  %v2280_v43 = vld [vmem:[#allocation2 + $0x18a] sm:$0xff] }
 0x30d   : > { %v14297_v55 = vpack.c.bf16 %v2280_v43, %v2279_v42 }
 0x310   : > { %11292 = vmatmul.mubr.bf16.gmra.mrb[88].mxu0 %v14159_v48  ;;  %v2265_v48 = vld [vmem:[#allocation2 + $0xda] sm:$0xff] }
 0x311   : > { %11295 = vmatprep.mubr.bf16.mxu0 %v14167_v57 }
 0x312   : > { %11340 = vmatmul.mubr.bf16.gmra.mrb[88].mxu1 %v14161_v49  ;;  %v2266_v49 = vld [vmem:[#allocation2 + $0xe2] sm:$0xff] }
 0x313   : > { %11343 = vmatprep.mubr.bf16.mxu1 %v14169_v58  ;;  %v14248_v63 = vpack.c.bf16 %v2266_v49, %v2265_v48 }
 0x318   : > { %11296 = vmatmul.mubr.bf16.gmra.mrb[92].mxu0 %v1266_v13  ;;  %v2273_v13 = vld [vmem:[#allocation2 + $0x13a] sm:$0xff] }
 0x319   : > { %2525 = vmatprep.mubr.bf16.mxu0 %v2284_v18  ;;  %v14279_v25 = vpack.c.bf16 %v2274_v14, %v2273_v13 }
 0x31a   : > { %11344 = vmatmul.mubr.bf16.gmra.mrb[92].mxu1 %v1164_v19  ;;  %v2276_v19 = vld [vmem:[#allocation2 + $0x15a] sm:$0xff] }
 0x31b   : > { %11363 = vmatprep.mubr.bf16.mxu1 %v2285_v20 }
 0x320   : > { %2526 = vmatmul.mubr.bf16.vlgmr.msra.gmra.mrb[96].mxu0 %v2283_v26 }
 0x321   : > { %2533 = vmatprep.mubr.bf16.mxu0 %v2285_v20 }
 0x322   : > { %11364 = vmatmul.mubr.bf16.vlgmr.msra.gmra.mrb[64].mxu1 %v2286_v29 }
 0x323   : > { %11367 = vmatprep.mubr.bf16.mxu1 %v14230_v30 }
 0x328   : > { %2534 = vmatmul.mubr.bf16.gmra.mrb[100].mxu0 %v2284_v18  ;;  %v2275_v18 = vld [vmem:[#allocation2 + $0x152] sm:$0xff] }
 0x329   : > { %2541 = vmatprep.mubr.bf16.mxu0 %v2286_v29  ;;  %v14281_v27 = vpack.c.bf16 %v2276_v19, %v2275_v18 }
 0x32a   : > { %11368 = vmatmul.mubr.bf16.gmra.mrb[68].mxu1 %v14233_v37 }
 0x32b   : > { %11371 = vmatprep.mubr.bf16.mxu1 %v14235_v38 }
 0x330   : > { %2542 = vmatmul.mubr.bf16.gmra.mrb[104].mxu0 %v2285_v20 }
 0x331   : > { %2549 = vmatprep.mubr.bf16.mxu0 %v14230_v30 }
 0x332   : > { %11372 = vmatmul.mubr.bf16.gmra.mrb[72].mxu1 %v14239_v45 }
 0x333   : > { %v9573_v47 = vpop.f32.mrb[0].mxu0  ;;  %11375 = vmatprep.mubr.bf16.mxu1 %v14241_v46 }
 0x334   : > { %v9574_v50 = vpop.f32.mrb[1].mxu0  ;;  %v9709_v57 = vpop.f32.mrb[0].mxu1 }
 0x335   : > { %v9576_v56 = vpop.f32.mrb[2].mxu0  ;;  %v14246_v58 = vadd.f32 %v9574_v50, %v9573_v47  ;;  %v9710_v0 = vpop.f32.mrb[1].mxu1  ;;  %v14295_v50 = vpack.c.bf16 %v2278_v39, %v2277_v36  ;;  %v12767_v39 = vld [vmem:[%s13748_s7 + $0x340] sm:$0xff]  }
 0x336   : > { %v9577_v59 = vpop.f32.mrb[3].mxu0  ;;  %v14252_v8 = vadd.f32 %v9710_v0, %v9709_v57  ;;  %v9712_v9 = vpop.f32.mrb[2].mxu1  ;;  %9965 = vmatprep.subr.bf16.mxu0 %v12767_v39  ;;  %v12776_v39 = vld [vmem:[%s13748_s7 + $0x360] sm:$0xff]  }
 0x337   : > { %v14254_v15 = vadd.f32 %v9577_v59, %v9576_v56  ;;  %v9713_v2 = vpop.f32.mrb[3].mxu1 }
 0x338   : > { %2550 = vmatmul.mubr.bf16.gmra.mrb[108].mxu0 %v2286_v29  ;;  %v14257_v17 = vadd.f32 %v9713_v2, %v9712_v9 }
 0x339   : > { %2557 = vmatprep.mubr.bf16.mxu0 %v14233_v37 }
 0x33a   : > { %11376 = vmatmul.mubr.bf16.gmra.mrb[76].mxu1 %v14248_v63 }
 0x33b   : > { %v9579_v23 = vpop.f32.mrb[4].mxu0  ;;  %11379 = vmatprep.mubr.bf16.mxu1 %v14250_v1 }
 0x33c   : > { %v9580_v32 = vpop.f32.mrb[5].mxu0  ;;  %v9715_v44 = vpop.f32.mrb[4].mxu1 }
 0x33d   : > { %v9582_v41 = vpop.f32.mrb[6].mxu0  ;;  %v14261_v6 = vadd.f32 %v9580_v32, %v9579_v23  ;;  %v9716_v61 = vpop.f32.mrb[5].mxu1  ;;  %v2281_v23 = vld [vmem:[#allocation2 + $0x19a] sm:$0xff] }
 0x33e   : > { %v9583_v52 = vpop.f32.mrb[7].mxu0  ;;  %v14267_v62 = vadd.f32 %v9716_v61, %v9715_v44  ;;  %v9718_v3 = vpop.f32.mrb[6].mxu1  ;;  %v2300_v44 = vpack.c.bf16 %v2282_v24, %v2281_v23  ;;  %v12770_v24 = vld [vmem:[%s13748_s7 + $0x308] sm:$0xff]  }
 0x33f   : > { %v14269_v4 = vadd.f32 %v9583_v52, %v9582_v41  ;;  %v9719_v10 = vpop.f32.mrb[7].mxu1 }
 0x340   : > { %2558 = vmatmul.mubr.bf16.gmra.mrb[112].mxu0 %v14230_v30  ;;  %v14273_v11 = vadd.f32 %v9719_v10, %v9718_v3 }
 0x341   : > { %2565 = vmatprep.mubr.bf16.mxu0 %v14235_v38 }
 0x342   : > { %11380 = vmatmul.mubr.bf16.gmra.mrb[80].mxu1 %v14263_v7 }
 0x343   : > { %v9585_v12 = vpop.f32.mrb[8].mxu0  ;;  %11383 = vmatprep.mubr.bf16.mxu1 %v14265_v54 }
 0x344   : > { %v9586_v16 = vpop.f32.mrb[9].mxu0  ;;  %v9721_v21 = vpop.f32.mrb[8].mxu1 }
 0x345   : > { %v9588_v20 = vpop.f32.mrb[10].mxu0  ;;  %v14277_v22 = vadd.f32 %v9586_v16, %v9585_v12  ;;  %v9722_v26 = vpop.f32.mrb[9].mxu1 }
 0x346   : > { %v9589_v53 = vpop.f32.mrb[11].mxu0  ;;  %v14283_v28 = vadd.f32 %v9722_v26, %v9721_v21  ;;  %v9724_v29 = vpop.f32.mrb[10].mxu1 }
 0x347   : > { %v14285_v30 = vadd.f32 %v9589_v53, %v9588_v20  ;;  %v9725_v31 = vpop.f32.mrb[11].mxu1 }
 0x348   : > { %2566 = vmatmul.mubr.bf16.gmra.mrb[116].mxu0 %v14233_v37  ;;  %v14289_v33 = vadd.f32 %v9725_v31, %v9724_v29 }
 0x349   : > { %2573 = vmatprep.mubr.bf16.mxu0 %v14239_v45 }
 0x34a   : > { %11384 = vmatmul.mubr.bf16.gmra.mrb[84].mxu1 %v14279_v25 }
 0x34b   : > { %v9591_v35 = vpop.f32.mrb[12].mxu0  ;;  %11387 = vmatprep.mubr.bf16.mxu1 %v14281_v27 }
 0x34c   : > { %v9592_v40 = vpop.f32.mrb[13].mxu0  ;;  %v9727_v48 = vpop.f32.mrb[12].mxu1 }
 0x34d   : > { %v9594_v47 = vpop.f32.mrb[14].mxu0  ;;  %v14293_v49 = vadd.f32 %v9592_v40, %v9591_v35  ;;  %v9728_v51 = vpop.f32.mrb[13].mxu1 }
 0x34e   : > { %v9595_v37 = vpop.f32.mrb[15].mxu0  ;;  %v14299_v56 = vadd.f32 %v9728_v51, %v9727_v48  ;;  %v9730_v57 = vpop.f32.mrb[14].mxu1 }
 0x34f   : > { %v14301_v59 = vadd.f32 %v9595_v37, %v9594_v47  ;;  %v9731_v0 = vpop.f32.mrb[15].mxu1  ;;  %v12768_v47 = vld [vmem:[%s13748_s7 + $0x300] sm:$0xff]  }
 0x350   : > { %2574 = vmatmul.mubr.bf16.gmra.mrb[120].mxu0 %v14235_v38  ;;  %v14305_v9 = vadd.f32 %v9731_v0, %v9730_v57 }
 0x351   : > { %2581 = vmatprep.mubr.bf16.mxu0 %v14241_v46  ;;  %9966 = vmatpush3.bf16.msra.mxu0 %v12768_v47  ;;  %v12777_v47 = vld [vmem:[%s13748_s7 + $0x320] sm:$0xff]  }
 0x352   : > { %11388 = vmatmul.mubr.bf16.gmra.mrb[88].mxu1 %v14295_v50 }
 0x353   : > { %v9597_v2 = vpop.f32.mrb[16].mxu0  ;;  %11391 = vmatprep.mubr.bf16.mxu1 %v14297_v55 }
 0x354   : > { %v9598_v60 = vpop.f32.mrb[17].mxu0  ;;  %v9733_v5 = vpop.f32.mrb[16].mxu1 }
 0x355   : > { %v9600_v32 = vpop.f32.mrb[18].mxu0  ;;  %v14309_v34 = vadd.f32 %v9598_v60, %v9597_v2  ;;  %v9734_v38 = vpop.f32.mrb[17].mxu1  ;;  %v12769_v2 = vld [vmem:[%s13748_s7 + $0x348] sm:$0xff]  }
 0x356   : > { %v9601_v41 = vpop.f32.mrb[19].mxu0  ;;  %v14311_v52 = vadd.f32 %v9734_v38, %v9733_v5  ;;  %v9736_v61 = vpop.f32.mrb[18].mxu1  ;;  %9967 = vmatprep.subr.bf16.mxu0 %v12769_v2  ;;  %v12771_v5 = vld [vmem:[%s13748_s7 + $0x350] sm:$0xff]  }
 0x357   : > { %v14313_v3 = vadd.f32 %v9601_v41, %v9600_v32  ;;  %v9737_v10 = vpop.f32.mrb[19].mxu1  ;;  %9968 = vmatpush3.bf16.msra.mxu0 %v12770_v24  ;;  %v12778_v24 = vld [vmem:[%s13748_s7 + $0x388] sm:$0xff]  }
 0x358   : > { %2582 = vmatmul.mubr.bf16.gmra.mrb[124].mxu0 %v14239_v45  ;;  %v14317_v12 = vadd.f32 %v9737_v10, %v9736_v61  ;;  %v12772_v61 = vld [vmem:[%s13748_s7 + $0x310] sm:$0xff]   ;;  %9969 = vmatprep.subr.bf16.mxu0 %v12771_v5 }
 0x359   : > { %2589 = vmatprep.mubr.bf16.mxu0 %v14248_v63 }
 0x35a   : > { %11392 = vmatmul.mubr.bf16.gmra.mrb[92].mxu1 %v2300_v44 }
 0x35b   : > { %v9603_v13 = vpop.f32.mrb[20].mxu0  ;;  %9970 = vmatpush3.bf16.msra.mxu0 %v12772_v61  ;;  %v12781_v61 = vld [vmem:[%s13748_s7 + $0x390] sm:$0xff]  }
 0x35c   : > { %v9604_v14 = vpop.f32.mrb[21].mxu0  ;;  %v9739_v18 = vpop.f32.mrb[20].mxu1 }
 0x35d   : > { %v9606_v16 = vpop.f32.mrb[22].mxu0  ;;  %v14319_v19 = vadd.f32 %v9604_v14, %v9603_v13  ;;  %v9740_v21 = vpop.f32.mrb[21].mxu1 }
 0x35e   : > { %v9607_v20 = vpop.f32.mrb[23].mxu0  ;;  %v14321_v53 = vadd.f32 %v9740_v21, %v9739_v18  ;;  %v9742_v26 = vpop.f32.mrb[22].mxu1 }
 0x35f   : > { %v14323_v45 = vadd.f32 %v9607_v20, %v9606_v16  ;;  %v9743_v29 = vpop.f32.mrb[23].mxu1  ;;  %v12773_v20 = vld [vmem:[%s13748_s7 + $0x358] sm:$0xff]  }
 0x360   : > { %2590 = vmatmul.mubr.bf16.gmra.mrb[128].mxu0 %v14241_v46  ;;  %v14327_v31 = vadd.f32 %v9743_v29, %v9742_v26  ;;  %v12774_v26 = vld [vmem:[%s13748_s7 + $0x318] sm:$0xff]   ;;  %9971 = vmatprep.subr.bf16.mxu0 %v12773_v20  ;;  %v12783_v20 = vld [vmem:[%s13748_s7 + $0x330] sm:$0xff]  }
 0x361   : > { %2597 = vmatprep.mubr.bf16.mxu0 %v14250_v1  ;;  %9972 = vmatpush3.bf16.msra.mxu0 %v12774_v26 }
 0x362   : > { %9973 = vmatprep.subr.bf16.mxu0 %v12776_v39 }
 0x363   : > { %v9609_v35 = vpop.f32.mrb[24].mxu0 }
 0x364   : > { %v9610_v36 = vpop.f32.mrb[25].mxu0  ;;  %v9745_v42 = vpop.f32.mrb[24].mxu1 }
 0x365   : > { %v9612_v40 = vpop.f32.mrb[26].mxu0  ;;  %v14330_v43 = vadd.f32 %v9610_v36, %v9609_v35  ;;  %v9746_v37 = vpop.f32.mrb[25].mxu1  ;;  %v12775_v35 = vld [vmem:[%s13748_s7 + $0x380] sm:$0xff]   ;;  %9974 = vmatpush3.bf16.msra.mxu0 %v12777_v47  ;;  %v12785_v47 = vld [vmem:[%s13748_s7 + $0x378] sm:$0xff]  }
 0x366   : > { %v9613_v48 = vpop.f32.mrb[27].mxu0  ;;  %v14333_v46 = vadd.f32 %v9746_v37, %v9745_v42  ;;  %v9748_v51 = vpop.f32.mrb[26].mxu1  ;;  %11395 = vmatprep.subr.bf16.mxu1 %v12775_v35 }
 0x367   : > { %v14335_v57 = vadd.f32 %v9613_v48, %v9612_v40  ;;  %v9749_v0 = vpop.f32.mrb[27].mxu1  ;;  %11396 = vmatpush3.bf16.msra.mxu1 %v12775_v35 }
 0x368   : > { %2598 = vmatmul.mubr.bf16.gmra.mrb[132].mxu0 %v14248_v63  ;;  %v14340_v23 = vadd.f32 %v9749_v0, %v9748_v51  ;;  %11397 = vmatprep.subr.bf16.mxu1 %v12778_v24 }
 0x369   : > { %2605 = vmatprep.mubr.bf16.mxu0 %v14263_v7 }
 0x36b   : > { %v9615_v60 = vpop.f32.mrb[28].mxu0  ;;  %11398 = vmatpush3.bf16.msra.mxu1 %v12778_v24  ;;  %v12787_v24 = vld [vmem:[%s13748_s7 + $0x3a0] sm:$0xff]  }
 0x36c   : > { %v9616_v32 = vpop.f32.mrb[29].mxu0  ;;  %v9751_v44 = vpop.f32.mrb[28].mxu1  ;;  %11399 = vmatprep.subr.bf16.mxu1 %v12781_v61 }
 0x36d   : > { %v9618_v41 = vpop.f32.mrb[30].mxu0  ;;  %v14344_v38 = vadd.f32 %v9616_v32, %v9615_v60  ;;  %v9752_v10 = vpop.f32.mrb[29].mxu1  ;;  %v12779_v32 = vld [vmem:[%s13748_s7 + $0x368] sm:$0xff]  }
 0x36e   : > { %v9619_v63 = vpop.f32.mrb[31].mxu0  ;;  %v14347_v13 = vadd.f32 %v9752_v10, %v9751_v44  ;;  %v9754_v14 = vpop.f32.mrb[30].mxu1  ;;  %9975 = vmatprep.subr.bf16.mxu0 %v12779_v32  ;;  %v12782_v10 = vld [vmem:[%s13748_s7 + $0x370] sm:$0xff]  }
 0x36f   : > { %v14349_v16 = vadd.f32 %v9619_v63, %v9618_v41  ;;  %v9755_v18 = vpop.f32.mrb[31].mxu1  ;;  %v12780_v41 = vld [vmem:[%s13748_s7 + $0x328] sm:$0xff]   ;;  %11400 = vmatpush3.bf16.msra.mxu1 %v12781_v61 }
 0x370   : > { %2606 = vmatmul.mubr.bf16.gmra.mrb[136].mxu0 %v14250_v1  ;;  %v14354_v21 = vadd.f32 %v9755_v18, %v9754_v14 }
 0x371   : > { %2613 = vmatprep.mubr.bf16.mxu0 %v14265_v54  ;;  %9976 = vmatpush3.bf16.msra.mxu0 %v12780_v41 }
 0x372   : > { %9977 = vmatprep.subr.bf16.mxu0 %v12782_v10 }
 0x373   : > { %v9621_v29 = vpop.f32.mrb[32].mxu0 }
 0x374   : > { %v9622_v36 = vpop.f32.mrb[33].mxu0  ;;  %v9757_v1 = vpop.f32.mrb[32].mxu1 }
 0x375   : > { %v14359_v40 = vadd.f32 %v9622_v36, %v9621_v29  ;;  %v9624_v42 = vpop.f32.mrb[34].mxu0  ;;  %v9758_v37 = vpop.f32.mrb[33].mxu1  ;;  %9978 = vmatpush3.bf16.msra.mxu0 %v12783_v20 }
 0x376   : > { %v9625_v48 = vpop.f32.mrb[35].mxu0  ;;  %v14364_v0 = vadd.f32 %v9758_v37, %v9757_v1  ;;  %v9760_v2 = vpop.f32.mrb[34].mxu1  ;;  %v12786_v37 = vld [vmem:[%s13748_s7 + $0x338] sm:$0xff]   ;;  %9979 = vmatprep.subr.bf16.mxu0 %v12785_v47 }
 0x377   : > { %v14362_v51 = vadd.f32 %v9625_v48, %v9624_v42  ;;  %v9761_v60 = vpop.f32.mrb[35].mxu1  ;;  %v12784_v42 = vld [vmem:[%s13748_s7 + $0x398] sm:$0xff]  }
 0x378   : > { %2614 = vmatmul.mubr.bf16.gmra.mrb[140].mxu0 %v14263_v7  ;;  %v14370_v5 = vadd.f32 %v9761_v60, %v9760_v2  ;;  %11401 = vmatprep.subr.bf16.mxu1 %v12784_v42 }
 0x379   : > { %2621 = vmatprep.mubr.bf16.mxu0 %v14279_v25  ;;  %11402 = vmatpush3.bf16.msra.mxu1 %v12784_v42 }
 0x37a   : > { %9980 = vmatpush3.bf16.msra.mxu0 %v12786_v37  ;;  %11403 = vmatprep.subr.bf16.mxu1 %v12787_v24 }
 0x37b   : > { %v9627_v44 = vpop.f32.mrb[36].mxu0 }
 0x37c   : > { %v9628_v63 = vpop.f32.mrb[37].mxu0  ;;  %v9763_v18 = vpop.f32.mrb[36].mxu1 }
 0x37d   : > { %v14375_v14 = vadd.f32 %v9628_v63, %v9627_v44  ;;  %v9630_v7 = vpop.f32.mrb[38].mxu0  ;;  %v9764_v29 = vpop.f32.mrb[37].mxu1  ;;  %11404 = vmatpush3.bf16.msra.mxu1 %v12787_v24 }
 0x37e   : > { %v9631_v26 = vpop.f32.mrb[39].mxu0  ;;  %v14380_v36 = vadd.f32 %v9764_v29, %v9763_v18  ;;  %v9766_v39 = vpop.f32.mrb[38].mxu1  ;;  %v12788_v18 = vld [vmem:[%s13748_s7 + $0x3a8] sm:$0xff]  }
 0x37f   : > { %v14378_v35 = vadd.f32 %v9631_v26, %v9630_v7  ;;  %v9767_v1 = vpop.f32.mrb[39].mxu1  ;;  %11405 = vmatprep.subr.bf16.mxu1 %v12788_v18 }
 0x380   : > { %2622 = vmatmul.mubr.bf16.gmra.mrb[144].mxu0 %v14265_v54  ;;  %v14386_v48 = vadd.f32 %v9767_v1, %v9766_v39  ;;  %v12789_v39 = vld [vmem:[%s13748_s7 + $0x3b0] sm:$0xff]  }
 0x381   : > { %2629 = vmatprep.mubr.bf16.mxu0 %v14281_v27  ;;  %11406 = vmatpush3.bf16.msra.mxu1 %v12788_v18 }
 0x382   : > { %11407 = vmatprep.subr.bf16.mxu1 %v12789_v39 }
 0x383   : > { %v9633_v2 = vpop.f32.mrb[40].mxu0 }
 0x384   : > { %v9634_v60 = vpop.f32.mrb[41].mxu0  ;;  %v9769_v44 = vpop.f32.mrb[40].mxu1 }
 0x385   : > { %v14390_v32 = vadd.f32 %v9634_v60, %v9633_v2  ;;  %v9636_v41 = vpop.f32.mrb[42].mxu0  ;;  %v9770_v61 = vpop.f32.mrb[41].mxu1  ;;  %11408 = vmatpush3.bf16.msra.mxu1 %v12789_v39 }
 0x386   : > { %v9637_v54 = vpop.f32.mrb[43].mxu0  ;;  %v14394_v10 = vadd.f32 %v9770_v61, %v9769_v44  ;;  %v9772_v7 = vpop.f32.mrb[42].mxu1  ;;  %v12790_v44 = vld [vmem:[%s13748_s7 + $0x3b8] sm:$0xff]  }
 0x387   : > { %v14392_v63 = vadd.f32 %v9637_v54, %v9636_v41  ;;  %v9773_v20 = vpop.f32.mrb[43].mxu1  ;;  %11409 = vmatprep.subr.bf16.mxu1 %v12790_v44 }
 0x388   : > { %2630 = vmatmul.mubr.bf16.gmra.mrb[148].mxu0 %v14279_v25  ;;  %v14399_v26 = vadd.f32 %v9773_v20, %v9772_v7 }
 0x389   : > { %2637 = vmatprep.mubr.bf16.mxu0 %v14295_v50  ;;  %11410 = vmatpush3.bf16.msra.mxu1 %v12790_v44 }
 0x38a   : > { %16516 = vst [vmem:[#allocation28_spill] sm:$0xff] %v14399_v26 }
 0x38b   : > { %v9639_v29 = vpop.f32.mrb[44].mxu0 }
 0x38c   : > { %v9640_v42 = vpop.f32.mrb[45].mxu0  ;;  %v9775_v37 = vpop.f32.mrb[44].mxu1 }
 0x38d   : > { %v14402_v1 = vadd.f32 %v9640_v42, %v9639_v29  ;;  %v9642_v47 = vpop.f32.mrb[46].mxu0  ;;  %v9776_v24 = vpop.f32.mrb[45].mxu1 }
 0x38e   : > { %v9643_v2 = vpop.f32.mrb[47].mxu0  ;;  %v14406_v60 = vadd.f32 %v9776_v24, %v9775_v37  ;;  %v9778_v41 = vpop.f32.mrb[46].mxu1 }
 0x38f   : > { %v14404_v25 = vadd.f32 %v9643_v2, %v9642_v47  ;;  %v9779_v54 = vpop.f32.mrb[47].mxu1 }
 0x390   : > { %2638 = vmatmul.mubr.bf16.gmra.mrb[152].mxu0 %v14281_v27  ;;  %v14411_v61 = vadd.f32 %v9779_v54, %v9778_v41 }
 0x391   : > { %2645 = vmatprep.mubr.bf16.mxu0 %v14297_v55 }
 0x392   : > { %16517 = vst [vmem:[#allocation29_spill] sm:$0xff] %v14411_v61 }
 0x393   : > { %v9645_v7 = vpop.f32.mrb[48].mxu0 }
 0x394   : > { %v9646_v18 = vpop.f32.mrb[49].mxu0  ;;  %v9781_v39 = vpop.f32.mrb[48].mxu1 }
 0x395   : > { %v14413_v20 = vadd.f32 %v9646_v18, %v9645_v7  ;;  %v9648_v29 = vpop.f32.mrb[50].mxu0  ;;  %v9782_v47 = vpop.f32.mrb[49].mxu1 }
 0x396   : > { %v9649_v42 = vpop.f32.mrb[51].mxu0  ;;  %v14417_v2 = vadd.f32 %v9782_v47, %v9781_v39  ;;  %v9784_v27 = vpop.f32.mrb[50].mxu1 }
 0x397   : > { %16518 = vst [vmem:[#allocation30_spill] sm:$0xff] %v14413_v20  ;;  %v14415_v37 = vadd.f32 %v9649_v42, %v9648_v29  ;;  %v9785_v55 = vpop.f32.mrb[51].mxu1 }
 0x398   : > { %16520 = vst [vmem:[#allocation32_spill] sm:$0xff] %v14417_v2  ;;  %2646 = vmatmul.mubr.bf16.gmra.mrb[156].mxu0 %v14295_v50  ;;  %v14420_v24 = vadd.f32 %v9785_v55, %v9784_v27 }
 0x399   : > { %16519 = vst [vmem:[#allocation31_spill] sm:$0xff] %v14415_v37 }
 0x39a   : > { %16521 = vst [vmem:[#allocation33_spill] sm:$0xff] %v14420_v24 }
 0x39b   : > { %v9651_v41 = vpop.f32.mrb[52].mxu0 }
 0x39c   : > { %v9652_v44 = vpop.f32.mrb[53].mxu0  ;;  %v9787_v18 = vpop.f32.mrb[52].mxu1 }
 0x39d   : > { %v14422_v54 = vadd.f32 %v9652_v44, %v9651_v41  ;;  %v9654_v7 = vpop.f32.mrb[54].mxu0  ;;  %v9788_v26 = vpop.f32.mrb[53].mxu1 }
 0x39e   : > { %v9655_v20 = vpop.f32.mrb[55].mxu0  ;;  %v14426_v29 = vadd.f32 %v9788_v26, %v9787_v18  ;;  %v9790_v39 = vpop.f32.mrb[54].mxu1 }
 0x39f   : > { %16522 = vst [vmem:[#allocation34_spill] sm:$0xff] %v14422_v54  ;;  %v14424_v61 = vadd.f32 %v9655_v20, %v9654_v7  ;;  %v9791_v42 = vpop.f32.mrb[55].mxu1 }
 0x3a0   : > { %16524 = vst [vmem:[#allocation36_spill] sm:$0xff] %v14426_v29  ;;  %v14428_v47 = vadd.f32 %v9791_v42, %v9790_v39 }
 0x3a1   : > { %16523 = vst [vmem:[#allocation35_spill] sm:$0xff] %v14424_v61 }
 0x3a2   : > { %16525 = vst [vmem:[#allocation37_spill] sm:$0xff] %v14428_v47 }
 0x3a3   : > { %v9657_v50 = vpop.f32.mrb[56].mxu0 }
 0x3a4   : > { %v9658_v37 = vpop.f32.mrb[57].mxu0  ;;  %v9793_v24 = vpop.f32.mrb[56].mxu1 }
 0x3a5   : > { %v14430_v27 = vadd.f32 %v9658_v37, %v9657_v50  ;;  %v9660_v55 = vpop.f32.mrb[58].mxu0  ;;  %v9794_v44 = vpop.f32.mrb[57].mxu1 }
 0x3a6   : > { %v9661_v41 = vpop.f32.mrb[59].mxu0  ;;  %v14434_v54 = vadd.f32 %v9794_v44, %v9793_v24  ;;  %v9796_v20 = vpop.f32.mrb[58].mxu1 }
 0x3a7   : > { %16526 = vst [vmem:[#allocation38_spill] sm:$0xff] %v14430_v27  ;;  %v14432_v2 = vadd.f32 %v9661_v41, %v9660_v55  ;;  %v9797_v7 = vpop.f32.mrb[59].mxu1 }
 0x3a8   : > { %v14436_v26 = vadd.f32 %v9797_v7, %v9796_v20 }
 0x3a9   : > { %16527 = vst [vmem:[#allocation39_spill] sm:$0xff] %v14432_v2 }
 0x3aa   : > { %16528 = vst [vmem:[#allocation40_spill] sm:$0xff] %v14436_v26 }
 0x3ab   : > { %v9663_v18 = vpop.f32.mrb[60].mxu0 }
 0x3ac   : > { %v9664_v61 = vpop.f32.mrb[61].mxu0  ;;  %v9799_v47 = vpop.f32.mrb[60].mxu1 }
 0x3ad   : > { %v14438_v39 = vadd.f32 %v9664_v61, %v9663_v18  ;;  %v9666_v42 = vpop.f32.mrb[62].mxu0  ;;  %v9800_v50 = vpop.f32.mrb[61].mxu1 }
 0x3ae   : > { %v9667_v37 = vpop.f32.mrb[63].mxu0  ;;  %v14442_v29 = vadd.f32 %v9800_v50, %v9799_v47  ;;  %v9802_v55 = vpop.f32.mrb[62].mxu1 }
 0x3af   : > { %v14440_v27 = vadd.f32 %v9667_v37, %v9666_v42  ;;  %v9803_v41 = vpop.f32.mrb[63].mxu1 }
 0x3b0   : > { %v14444_v24 = vadd.f32 %v9803_v41, %v9802_v55 }
 0x3b3   : > { %v11269_v44 = vpop.f32.mrb[64].mxu0 }
 0x3b4   : > { %v1663_v20 = vadd.f32 %v11269_v44, %v14261_v6  ;;  %v1654_v7 = vpop.f32.mrb[65].mxu0 }
 0x3b5   : > { %v1655_v26 = vadd.f32 %v14246_v58, %v1654_v7  ;;  %v11270_v61 = vpop.f32.mrb[66].mxu0 }
 0x3b6   : > { %v14449_v18 = vadd.f32 %v14267_v62, %v1663_v20  ;;  %v1666_v2 = vadd.f32 %v11270_v61, %v14269_v4  ;;  %v1657_v42 = vpop.f32.mrb[67].mxu0 }
 0x3b7   : > { %v14453_v47 = vadd.f32 %v14252_v8, %v1655_v26  ;;  %v1658_v37 = vadd.f32 %v14254_v15, %v1657_v42 }
 0x3b8   : > { %v14457_v50 = vadd.f32 %v14273_v11, %v1666_v2 }
 0x3b9   : > { %v14460_v6 = vadd.f32 %v14257_v17, %v1658_v37 }
 0x3bb   : > { %v11273_v55 = vpop.f32.mrb[68].mxu0 }
 0x3bc   : > { %v1679_v58 = vadd.f32 %v11273_v55, %v14293_v49  ;;  %v1670_v41 = vpop.f32.mrb[69].mxu0 }
 0x3bd   : > { %v1671_v62 = vadd.f32 %v14277_v22, %v1670_v41  ;;  %v11274_v44 = vpop.f32.mrb[70].mxu0 }
 0x3be   : > { %v14465_v4 = vadd.f32 %v14299_v56, %v1679_v58  ;;  %v1682_v8 = vadd.f32 %v11274_v44, %v14301_v59  ;;  %v1673_v26 = vpop.f32.mrb[71].mxu0 }
 0x3bf   : > { %v14469_v15 = vadd.f32 %v14283_v28, %v1671_v62  ;;  %v1674_v11 = vadd.f32 %v14285_v30, %v1673_v26 }
 0x3c0   : > { %v14473_v17 = vadd.f32 %v14305_v9, %v1682_v8 }
 0x3c1   : > { %v14476_v49 = vadd.f32 %v14289_v33, %v1674_v11 }
 0x3c3   : > { %v11277_v2 = vpop.f32.mrb[72].mxu0 }
 0x3c4   : > { %v1695_v22 = vadd.f32 %v11277_v2, %v14319_v19  ;;  %v1686_v20 = vpop.f32.mrb[73].mxu0 }
 0x3c5   : > { %v1687_v56 = vadd.f32 %v14309_v34, %v1686_v20  ;;  %v11278_v7 = vpop.f32.mrb[74].mxu0  ;;  %v16529_v20 = vld [vmem:[#allocation29_spill] sm:$0xff] }
 0x3c6   : > { %v14481_v59 = vadd.f32 %v14321_v53, %v1695_v22  ;;  %v1698_v28 = vadd.f32 %v11278_v7, %v14323_v45  ;;  %v1689_v61 = vpop.f32.mrb[75].mxu0  ;;  %v16530_v7 = vld [vmem:[#allocation28_spill] sm:$0xff] }
 0x3c7   : > { %v14485_v30 = vadd.f32 %v14311_v52, %v1687_v56  ;;  %v1690_v9 = vadd.f32 %v14313_v3, %v1689_v61 }
 0x3c8   : > { %v14489_v33 = vadd.f32 %v14327_v31, %v1698_v28 }
 0x3c9   : > { %v14492_v19 = vadd.f32 %v14317_v12, %v1690_v9 }
 0x3cb   : > { %v11281_v42 = vpop.f32.mrb[76].mxu0 }
 0x3cc   : > { %v1711_v34 = vadd.f32 %v11281_v42, %v14344_v38  ;;  %v1702_v37 = vpop.f32.mrb[77].mxu0  ;;  %v16532_v42 = vld [vmem:[#allocation30_spill] sm:$0xff] }
 0x3cd   : > { %v1703_v53 = vadd.f32 %v14330_v43, %v1702_v37  ;;  %v11282_v55 = vpop.f32.mrb[78].mxu0  ;;  %v16533_v37 = vld [vmem:[#allocation36_spill] sm:$0xff] }
 0x3ce   : > { %v14497_v45 = vadd.f32 %v14347_v13, %v1711_v34  ;;  %v1714_v52 = vadd.f32 %v11282_v55, %v14349_v16  ;;  %v1705_v3 = vpop.f32.mrb[79].mxu0 }
 0x3cf   : > { %v14501_v31 = vadd.f32 %v14333_v46, %v1703_v53  ;;  %v1706_v12 = vadd.f32 %v14335_v57, %v1705_v3 }
 0x3d0   : > { %v14505_v58 = vadd.f32 %v14354_v21, %v1714_v52  ;;  %v16535_v52 = vld [vmem:[#allocation32_spill] sm:$0xff] }
 0x3d1   : > { %v14508_v38 = vadd.f32 %v14340_v23, %v1706_v12  ;;  %v14521_v23 = vld [vmem:[%s13748_s7 + $0x2c0] sm:$0xff]  }
 0x3d2   : > { %11443 = vmatprep.subr.bf16.mxu1 %v14521_v23  ;;  %v16536_v12 = vld [vmem:[#allocation31_spill] sm:$0xff] }
 0x3d3   : > { %v11285_v43 = vpop.f32.mrb[80].mxu0 }
 0x3d4   : > { %v1727_v41 = vadd.f32 %v11285_v43, %v14375_v14  ;;  %v1718_v13 = vpop.f32.mrb[81].mxu0 }
 0x3d5   : > { %v1719_v62 = vadd.f32 %v14359_v40, %v1718_v13  ;;  %v11286_v16 = vpop.f32.mrb[82].mxu0 }
 0x3d6   : > { %v14513_v44 = vadd.f32 %v14380_v36, %v1727_v41  ;;  %v1730_v46 = vadd.f32 %v11286_v16, %v14378_v35  ;;  %v1721_v8 = vpop.f32.mrb[83].mxu0  ;;  %v16537_v41 = vld [vmem:[#allocation37_spill] sm:$0xff] }
 0x3d7   : > { %v14517_v57 = vadd.f32 %v14364_v0, %v1719_v62  ;;  %v1722_v21 = vadd.f32 %v14362_v51, %v1721_v8  ;;  %v16538_v62 = vld [vmem:[#allocation33_spill] sm:$0xff] }
 0x3d8   : > { %v14524_v26 = vadd.f32 %v14386_v48, %v1730_v46 }
 0x3d9   : > { %v14527_v14 = vadd.f32 %v14370_v5, %v1722_v21 }
 0x3db   : > { %v11289_v40 = vpop.f32.mrb[84].mxu0 }
 0x3dc   : > { %v1743_v35 = vadd.f32 %v11289_v40, %v14402_v1  ;;  %v1734_v36 = vpop.f32.mrb[85].mxu0  ;;  %v16539_v40 = vld [vmem:[#allocation38_spill] sm:$0xff] }
 0x3dd   : > { %v1735_v0 = vadd.f32 %v14390_v32, %v1734_v36  ;;  %v11290_v11 = vpop.f32.mrb[86].mxu0  ;;  %v16531_v32 = vld [vmem:[#allocation34_spill] sm:$0xff] }
 0x3de   : > { %v14533_v51 = vadd.f32 %v14406_v60, %v1743_v35  ;;  %v1746_v2 = vadd.f32 %v11290_v11, %v14404_v25  ;;  %v1737_v48 = vpop.f32.mrb[87].mxu0  ;;  %v12795_v60 = vld [vmem:[%s13748_s7 + $0x280] sm:$0xff]  }
 0x3df   : > { %v14537_v22 = vadd.f32 %v14394_v10, %v1735_v0  ;;  %v1738_v5 = vadd.f32 %v14392_v63, %v1737_v48  ;;  %v16534_v10 = vld [vmem:[#allocation35_spill] sm:$0xff]  ;;  %10101 = vmatprep.subr.bf16.mxu0 %v12795_v60 }
 0x3e0   : > { %v14541_v56 = vadd.f32 %v16529_v20, %v1746_v2 }
 0x3e1   : > { %v14544_v1 = vadd.f32 %v16530_v7, %v1738_v5  ;;  %v16540_v5 = vld [vmem:[#allocation39_spill] sm:$0xff] }
 0x3e3   : > { %v11293_v28 = vpop.f32.mrb[88].mxu0 }
 0x3e4   : > { %v1759_v61 = vadd.f32 %v11293_v28, %v16531_v32  ;;  %v1750_v9 = vpop.f32.mrb[89].mxu0 }
 0x3e5   : > { %v1751_v34 = vadd.f32 %v16532_v42, %v1750_v9  ;;  %v11294_v25 = vpop.f32.mrb[90].mxu0 }
 0x3e6   : > { %v14550_v53 = vadd.f32 %v16533_v37, %v1759_v61  ;;  %v1762_v55 = vadd.f32 %v11294_v25, %v16534_v10  ;;  %v1753_v63 = vpop.f32.mrb[91].mxu0  ;;  %v14582_v37 = vld [vmem:[%s520_s16] ss:$0 sm:$0xff] }
 0x3e7   : > { %v14554_v3 = vadd.f32 %v16535_v52, %v1751_v34  ;;  %v1754_v43 = vadd.f32 %v16536_v12, %v1753_v63 }
 0x3e8   : > { %v14558_v13 = vadd.f32 %v16537_v41, %v1762_v55 }
 0x3e9   : > { %v14561_v16 = vadd.f32 %v16538_v62, %v1754_v43 }
 0x3eb   : > { %v11297_v46 = vpop.f32.mrb[92].mxu0 }
 0x3ec   : > { %v1775_v8 = vadd.f32 %v11297_v46, %v14438_v39  ;;  %v1766_v21 = vpop.f32.mrb[93].mxu0  ;;  %v16541_v39 = vld [vmem:[#allocation40_spill] sm:$0xff] }
 0x3ed   : > { %v1767_v35 = vadd.f32 %v16539_v40, %v1766_v21  ;;  %v11298_v36 = vpop.f32.mrb[94].mxu0  ;;  %v3051_v21 = vld [vmem:[#allocation3 + $0x1] sm:$0xff]  ;;  %v3052_v40 = vld [vmem:[#allocation3 + $0x9] sm:$0xff] }
 0x3ee   : > { %v14566_v0 = vadd.f32 %v14442_v29, %v1775_v8  ;;  %v1778_v11 = vadd.f32 %v11298_v36, %v14440_v27  ;;  %v1769_v2 = vpop.f32.mrb[95].mxu0 }
 0x3ef   : > { %v14570_v48 = vadd.f32 %v14434_v54, %v1767_v35  ;;  %v1770_v20 = vadd.f32 %v16540_v5, %v1769_v2 }
 0x3f0   : > { %v14574_v7 = vadd.f32 %v14444_v24, %v1778_v11 }
 0x3f1   : > { %v14577_v28 = vadd.f32 %v16541_v39, %v1770_v20  ;;  %v3087_v39 = vpack.c.bf16 %v3052_v40, %v3051_v21 }
 0x3f3   : > { %v9845_v32 = vpop.f32.mrb[96].mxu0 }
 0x3f4   : > { %v9846_v61 = vpop.f32.mrb[97].mxu0 }
 0x3f5   : > { %v11365_v9 = vpop.f32.mrb[64].mxu1  ;;  %v9847_v29 = vadd.f32 %v9846_v61, %v9845_v32  ;;  %v9848_v60 = vpop.f32.mrb[98].mxu0 }
 0x3f6   : > { %v2688_v42 = vpop.f32.mrb[65].mxu1  ;;  %v9849_v27 = vpop.f32.mrb[99].mxu0 }
 0x3f7   : > { %v11887_v34 = vadd.f32 %v9847_v29, %v14453_v47  ;;  %v11366_v25 = vpop.f32.mrb[66].mxu1  ;;  %v9850_v54 = vadd.f32 %v9849_v27, %v9848_v60  ;;  %v12797_v60 = vld [vmem:[%s13748_s7 + $0x240] sm:$0xff]  }
 0x3f8   : > { %v2691_v10 = vpop.f32.mrb[67].mxu1 }
 0x3f9   : > { %v11888_v24 = vadd.f32 %v11887_v34, %v2688_v42  ;;  %v11895_v55 = vadd.f32 %v9850_v54, %v14460_v6  ;;  %v12798_v42 = vld [vmem:[%s13748_s7 + $0x288] sm:$0xff]  }
 0x3fb   : > { %v2851_v63 = vadd.f32 %v11888_v24, %v14582_v37  ;;  %v11896_v52 = vadd.f32 %v11895_v55, %v2691_v10  ;;  %v9851_v12 = vpop.f32.mrb[100].mxu0 }
 0x3fc   : > { %v9852_v43 = vpop.f32.mrb[101].mxu0 }
 0x3fd   : > { %v2883_v41 = vmax.f32 %v2851_v63, 0.0  ;;  %v2852_v62 = vadd.f32 %v11896_v52, %v14582_v37  ;;  %v14587_v46 = vpop.f32.mrb[68].mxu1  ;;  %v9853_v47 = vadd.f32 %v9852_v43, %v9851_v12  ;;  %v9854_v8 = vpop.f32.mrb[102].mxu0 }
 0x3fe   : > { %v2704_v35 = vpop.f32.mrb[69].mxu1  ;;  %v9855_v36 = vpop.f32.mrb[103].mxu0 }
 0x3ff   : > { %2916 = vst [vmem:[#allocation3 + $0x19] sm:$0xff] %v2883_v41  ;;  %v2884_v6 = vmax.f32 %v2852_v62, 0.0  ;;  %v11883_v11 = vadd.f32 %v9853_v47, %v14449_v18  ;;  %v14590_v2 = vpop.f32.mrb[70].mxu1  ;;  %v9856_v5 = vadd.f32 %v9855_v36, %v9854_v8 }
 0x400   : > { %v2707_v20 = vpop.f32.mrb[71].mxu1 }
 0x401   : > { %2917 = vst [vmem:[#allocation3 + $0x21] sm:$0xff] %v2884_v6  ;;  %v11884_v32 = vadd.f32 %v11883_v11, %v11365_v9  ;;  %v11891_v61 = vadd.f32 %v9856_v5, %v14457_v50  ;;  %v3088_v29 = vpack.c.bf16 %v2884_v6, %v2883_v41  ;;  %v12799_v50 = vld [vmem:[%s13748_s7 + $0x248] sm:$0xff]   ;;  %v12802_v6 = vld [vmem:[%s13748_s7 + $0x250] sm:$0xff]   ;;  %v12803_v11 = vld [vmem:[%s13748_s7 + $0x298] sm:$0xff]  }
 0x403   : > { %v2853_v27 = vadd.f32 %v11884_v32, %v14582_v37  ;;  %v11892_v34 = vadd.f32 %v11891_v61, %v11366_v25  ;;  %v9857_v54 = vpop.f32.mrb[104].mxu0  ;;  %3329 = vmatprep.mubr.bf16.mxu0 %v3088_v29  ;;  %v12800_v25 = vld [vmem:[%s13748_s7 + $0x290] sm:$0xff]  }
 0x404   : > { %v9858_v18 = vpop.f32.mrb[105].mxu0  ;;  %3330 = vmatmul.mubr.bf16.vlgmr.msra.gmra.mrb[160].mxu0 %v3087_v39 }
 0x405   : > { %v2885_v10 = vmax.f32 %v2853_v27, 0.0  ;;  %v2854_v24 = vadd.f32 %v11892_v34, %v14582_v37  ;;  %v14597_v55 = vpop.f32.mrb[72].mxu1  ;;  %v9859_v9 = vadd.f32 %v9858_v18, %v9857_v54  ;;  %v9860_v63 = vpop.f32.mrb[106].mxu0  ;;  %10102 = vmatpush3.bf16.msra.mxu0 %v12797_v60  ;;  %v12804_v27 = vld [vmem:[%s13748_s7 + $0x258] sm:$0xff]   ;;  %v12805_v54 = vld [vmem:[%s13748_s7 + $0x2a0] sm:$0xff]  }
 0x406   : > { %v14600_v52 = vpop.f32.mrb[73].mxu1  ;;  %v9861_v12 = vpop.f32.mrb[107].mxu0  ;;  %10103 = vmatprep.subr.bf16.mxu0 %v12798_v42 }
 0x407   : > { %2918 = vst [vmem:[#allocation3 + $0x31] sm:$0xff] %v2885_v10  ;;  %v2886_v43 = vmax.f32 %v2854_v24, 0.0  ;;  %v11903_v41 = vadd.f32 %v9859_v9, %v14469_v15  ;;  %v14604_v62 = vpop.f32.mrb[74].mxu1  ;;  %v9862_v47 = vadd.f32 %v9861_v12, %v9860_v63 }
 0x408   : > { %v14606_v8 = vpop.f32.mrb[75].mxu1 }
 0x409   : > { %2919 = vst [vmem:[#allocation3 + $0x39] sm:$0xff] %v2886_v43  ;;  %v11904_v21 = vadd.f32 %v11903_v41, %v2704_v35  ;;  %v11911_v40 = vadd.f32 %v9862_v47, %v14476_v49  ;;  %v3089_v36 = vpack.c.bf16 %v2886_v43, %v2885_v10  ;;  %10104 = vmatpush3.bf16.msra.mxu0 %v12799_v50  ;;  %v12807_v43 = vld [vmem:[%s13748_s7 + $0x260] sm:$0xff]   ;;  %v12808_v41 = vld [vmem:[%s13748_s7 + $0x2a8] sm:$0xff]  }
 0x40a   : > { %10105 = vmatprep.subr.bf16.mxu0 %v12800_v25  ;;  %v12792_v25 = vld [vmem:[%s13748_s7 + $0x2c8] sm:$0xff]  }
 0x40b   : > { %v2855_v5 = vadd.f32 %v11904_v21, %v14582_v37  ;;  %v11912_v39 = vadd.f32 %v11911_v40, %v2707_v20  ;;  %v9863_v15 = vpop.f32.mrb[108].mxu0  ;;  %3337 = vmatprep.mubr.bf16.mxu0 %v3089_v36  ;;  %11411 = vmatprep.mubr.bf16.mxu1 %v3089_v36 }
 0x40c   : > { %v9864_v32 = vpop.f32.mrb[109].mxu0  ;;  %3338 = vmatmul.mubr.bf16.gmra.mrb[164].mxu0 %v3088_v29 }
 0x40d   : > { %v2887_v61 = vmax.f32 %v2855_v5, 0.0  ;;  %v2856_v35 = vadd.f32 %v11912_v39, %v14582_v37  ;;  %v14613_v60 = vpop.f32.mrb[76].mxu1  ;;  %v9865_v49 = vadd.f32 %v9864_v32, %v9863_v15  ;;  %v9866_v42 = vpop.f32.mrb[110].mxu0  ;;  %10106 = vmatpush3.bf16.msra.mxu0 %v12802_v6  ;;  %v12793_v39 = vld [vmem:[%s13748_s7 + $0x2d0] sm:$0xff]   ;;  %v12809_v15 = vld [vmem:[%s13748_s7 + $0x268] sm:$0xff]  }
 0x40e   : > { %v14616_v34 = vpop.f32.mrb[77].mxu1  ;;  %v9867_v20 = vpop.f32.mrb[111].mxu0  ;;  %10107 = vmatprep.subr.bf16.mxu0 %v12803_v11 }
 0x40f   : > { %2920 = vst [vmem:[#allocation3 + $0x49] sm:$0xff] %v2887_v61  ;;  %v2888_v18 = vmax.f32 %v2856_v35, 0.0  ;;  %v11899_v29 = vadd.f32 %v9865_v49, %v14465_v4  ;;  %v14620_v10 = vpop.f32.mrb[78].mxu1  ;;  %v9868_v24 = vadd.f32 %v9867_v20, %v9866_v42 }
 0x410   : > { %v14622_v9 = vpop.f32.mrb[79].mxu1 }
 0x411   : > { %2921 = vst [vmem:[#allocation3 + $0x51] sm:$0xff] %v2888_v18  ;;  %v11900_v63 = vadd.f32 %v11899_v29, %v14587_v46  ;;  %v11907_v50 = vadd.f32 %v9868_v24, %v14473_v17  ;;  %v3090_v12 = vpack.c.bf16 %v2888_v18, %v2887_v61  ;;  %10108 = vmatpush3.bf16.msra.mxu0 %v12804_v27  ;;  %v12794_v18 = vld [vmem:[%s13748_s7 + $0x2d8] sm:$0xff]   ;;  %v12812_v29 = vld [vmem:[%s13748_s7 + $0x270] sm:$0xff]  }
 0x412   : > { %10109 = vmatprep.subr.bf16.mxu0 %v12805_v54  ;;  %v12813_v24 = vld [vmem:[%s13748_s7 + $0x2b8] sm:$0xff]  }
 0x413   : > { %v2857_v47 = vadd.f32 %v11900_v63, %v14582_v37  ;;  %v11908_v4 = vadd.f32 %v11907_v50, %v14590_v2  ;;  %v9869_v21 = vpop.f32.mrb[112].mxu0  ;;  %3345 = vmatprep.mubr.bf16.mxu0 %v3090_v12  ;;  %11412 = vmatmul.mubr.bf16.vlgmr.msra.gmra.mrb[96].mxu1 %v3090_v12 }
 0x414   : > { %v9870_v40 = vpop.f32.mrb[113].mxu0  ;;  %3346 = vmatmul.mubr.bf16.gmra.mrb[168].mxu0 %v3089_v36  ;;  %11444 = vmatpush3.bf16.msra.mxu1 %v14521_v23  ;;  %v12810_v36 = vld [vmem:[%s13748_s7 + $0x2b0] sm:$0xff]  }
 0x415   : > { %v2889_v17 = vmax.f32 %v2857_v47, 0.0  ;;  %v2858_v46 = vadd.f32 %v11908_v4, %v14582_v37  ;;  %v14633_v6 = vpop.f32.mrb[80].mxu1  ;;  %v9871_v11 = vadd.f32 %v9870_v40, %v9869_v21  ;;  %v9872_v5 = vpop.f32.mrb[114].mxu0  ;;  %11445 = vmatprep.subr.bf16.mxu1 %v12792_v25  ;;  %10110 = vmatpush3.bf16.msra.mxu0 %v12807_v43  ;;  %v12796_v4 = vld [vmem:[%s13748_s7 + $0x2e0] sm:$0xff]   ;;  %v12814_v21 = vld [vmem:[%s13748_s7 + $0x278] sm:$0xff]  }
 0x416   : > { %v14637_v2 = vpop.f32.mrb[81].mxu1  ;;  %v9873_v32 = vpop.f32.mrb[115].mxu0  ;;  %10111 = vmatprep.subr.bf16.mxu0 %v12808_v41 }
 0x417   : > { %2922 = vst [vmem:[#allocation3 + $0x61] sm:$0xff] %v2889_v17  ;;  %v2890_v23 = vmax.f32 %v2858_v46, 0.0  ;;  %v11919_v61 = vadd.f32 %v9871_v11, %v14485_v30  ;;  %v14641_v35 = vpop.f32.mrb[82].mxu1  ;;  %v9874_v49 = vadd.f32 %v9873_v32, %v9872_v5 }
 0x418   : > { %v14643_v42 = vpop.f32.mrb[83].mxu1  ;;  %11446 = vmatpush3.bf16.msra.mxu1 %v12792_v25 }
 0x419   : > { %2923 = vst [vmem:[#allocation3 + $0x69] sm:$0xff] %v2890_v23  ;;  %v11920_v27 = vadd.f32 %v11919_v61, %v14600_v52  ;;  %v11927_v20 = vadd.f32 %v9874_v49, %v14492_v19  ;;  %v3091_v54 = vpack.c.bf16 %v2890_v23, %v2889_v17  ;;  %11447 = vmatprep.subr.bf16.mxu1 %v12793_v39 }
 0x41a   : > { %10112 = vmatpush3.bf16.msra.mxu0 %v12809_v15 }
 0x41b   : > { %10113 = vmatprep.subr.bf16.mxu0 %v12810_v36  ;;  %v2859_v30 = vadd.f32 %v11920_v27, %v14582_v37  ;;  %v11928_v63 = vadd.f32 %v11927_v20, %v14606_v8  ;;  %v9875_v50 = vpop.f32.mrb[116].mxu0  ;;  %3353 = vmatprep.mubr.bf16.mxu0 %v3091_v54  ;;  %v12801_v36 = vld [vmem:[%s13748_s7 + $0x2e8] sm:$0xff]  }
 0x41c   : > { %11415 = vmatprep.mubr.bf16.mxu1 %v3091_v54  ;;  %v9876_v25 = vpop.f32.mrb[117].mxu0  ;;  %3354 = vmatmul.mubr.bf16.gmra.mrb[172].mxu0 %v3090_v12 }
 0x41d   : > { %11448 = vmatpush3.bf16.msra.mxu1 %v12793_v39  ;;  %v2891_v19 = vmax.f32 %v2859_v30, 0.0  ;;  %v2860_v52 = vadd.f32 %v11928_v63, %v14582_v37  ;;  %v14653_v43 = vpop.f32.mrb[84].mxu1  ;;  %v9877_v41 = vadd.f32 %v9876_v25, %v9875_v50  ;;  %v9878_v47 = vpop.f32.mrb[118].mxu0 }
 0x41e   : > { %11449 = vmatprep.subr.bf16.mxu1 %v12794_v18  ;;  %10114 = vmatpush3.bf16.msra.mxu0 %v12812_v29  ;;  %v14657_v40 = vpop.f32.mrb[85].mxu1  ;;  %v9879_v8 = vpop.f32.mrb[119].mxu0  ;;  %v12806_v29 = vld [vmem:[%s13748_s7 + $0x2f0] sm:$0xff]  }
 0x41f   : > { %10115 = vmatprep.subr.bf16.mxu0 %v12813_v24  ;;  %2924 = vst [vmem:[#allocation3 + $0x79] sm:$0xff] %v2891_v19  ;;  %v2892_v17 = vmax.f32 %v2860_v52, 0.0  ;;  %v11915_v12 = vadd.f32 %v9877_v41, %v14481_v59  ;;  %v14660_v46 = vpop.f32.mrb[86].mxu1  ;;  %v9880_v11 = vadd.f32 %v9879_v8, %v9878_v47  ;;  %v12811_v47 = vld [vmem:[%s13748_s7 + $0x2f8] sm:$0xff]  }
 0x420   : > { %v14662_v5 = vpop.f32.mrb[87].mxu1 }
 0x421   : > { %11450 = vmatpush3.bf16.msra.mxu1 %v12794_v18  ;;  %2925 = vst [vmem:[#allocation3 + $0x81] sm:$0xff] %v2892_v17  ;;  %v11916_v39 = vadd.f32 %v11915_v12, %v14597_v55  ;;  %v11923_v15 = vadd.f32 %v9880_v11, %v14489_v33  ;;  %v3092_v32 = vpack.c.bf16 %v2892_v17, %v2891_v19 }
 0x422   : > { %11451 = vmatprep.subr.bf16.mxu1 %v12796_v4  ;;  %10116 = vmatpush3.bf16.msra.mxu0 %v12814_v21 }
 0x423   : > { %v2861_v23 = vadd.f32 %v11916_v39, %v14582_v37  ;;  %v11924_v59 = vadd.f32 %v11923_v15, %v14604_v62  ;;  %v9881_v61 = vpop.f32.mrb[120].mxu0  ;;  %3361 = vmatprep.mubr.bf16.mxu0 %v3092_v32  ;;  %11416 = vmatmul.mubr.bf16.gmra.mrb[100].mxu1 %v3092_v32  ;;  %v12815_v39 = vld [vmem:[%s13748_s7 + $0x400] sm:$0xff]  }
 0x424   : > { %v9882_v49 = vpop.f32.mrb[121].mxu0  ;;  %3362 = vmatmul.mubr.bf16.gmra.mrb[176].mxu0 %v3091_v54 }
 0x425   : > { %11452 = vmatpush3.bf16.msra.mxu1 %v12796_v4  ;;  %v2893_v27 = vmax.f32 %v2861_v23, 0.0  ;;  %v2862_v55 = vadd.f32 %v11924_v59, %v14582_v37  ;;  %v14670_v20 = vpop.f32.mrb[88].mxu1  ;;  %v9883_v33 = vadd.f32 %v9882_v49, %v9881_v61  ;;  %v9884_v18 = vpop.f32.mrb[122].mxu0 }
 0x426   : > { %11453 = vmatprep.subr.bf16.mxu1 %v12801_v36  ;;  %v14673_v24 = vpop.f32.mrb[89].mxu1  ;;  %v9885_v30 = vpop.f32.mrb[123].mxu0 }
 0x427   : > { %2926 = vst [vmem:[#allocation3 + $0x91] sm:$0xff] %v2893_v27  ;;  %v2894_v62 = vmax.f32 %v2862_v55, 0.0  ;;  %v11935_v63 = vadd.f32 %v9883_v33, %v14501_v31  ;;  %v14676_v50 = vpop.f32.mrb[90].mxu1  ;;  %v9886_v54 = vadd.f32 %v9885_v30, %v9884_v18 }
 0x428   : > { %v14678_v25 = vpop.f32.mrb[91].mxu1 }
 0x429   : > { %11454 = vmatpush3.bf16.msra.mxu1 %v12801_v36  ;;  %2927 = vst [vmem:[#allocation3 + $0x99] sm:$0xff] %v2894_v62  ;;  %v11936_v19 = vadd.f32 %v11935_v63, %v14616_v34  ;;  %v11943_v52 = vadd.f32 %v9886_v54, %v14508_v38  ;;  %v3093_v41 = vpack.c.bf16 %v2894_v62, %v2893_v27 }
 0x42a   : > { %11455 = vmatprep.subr.bf16.mxu1 %v12806_v29 }
 0x42b   : > { %v2863_v4 = vadd.f32 %v11936_v19, %v14582_v37  ;;  %v11944_v21 = vadd.f32 %v11943_v52, %v14622_v9  ;;  %v9887_v31 = vpop.f32.mrb[124].mxu0  ;;  %3369 = vmatprep.mubr.bf16.mxu0 %v3093_v41  ;;  %11419 = vmatprep.mubr.bf16.mxu1 %v3093_v41 }
 0x42c   : > { %v9888_v8 = vpop.f32.mrb[125].mxu0  ;;  %3370 = vmatmul.mubr.bf16.gmra.mrb[180].mxu0 %v3092_v32 }
 0x42d   : > { %11456 = vmatpush3.bf16.msra.mxu1 %v12806_v29  ;;  %v2895_v17 = vmax.f32 %v2863_v4, 0.0  ;;  %v2864_v12 = vadd.f32 %v11944_v21, %v14582_v37  ;;  %v14686_v34 = vpop.f32.mrb[92].mxu1  ;;  %v9889_v38 = vadd.f32 %v9888_v8, %v9887_v31  ;;  %v9890_v11 = vpop.f32.mrb[126].mxu0 }
 0x42e   : > { %11457 = vmatprep.subr.bf16.mxu1 %v12811_v47  ;;  %v14689_v15 = vpop.f32.mrb[93].mxu1  ;;  %v9891_v36 = vpop.f32.mrb[127].mxu0 }
 0x42f   : > { %2928 = vst [vmem:[#allocation3 + $0xa9] sm:$0xff] %v2895_v17  ;;  %v2896_v9 = vmax.f32 %v2864_v12, 0.0  ;;  %v11931_v23 = vadd.f32 %v9889_v38, %v14497_v45  ;;  %v14692_v59 = vpop.f32.mrb[94].mxu1  ;;  %v9892_v32 = vadd.f32 %v9891_v36, %v9890_v11 }
 0x430   : > { %v14694_v61 = vpop.f32.mrb[95].mxu1 }
 0x431   : > { %11458 = vmatpush3.bf16.msra.mxu1 %v12811_v47  ;;  %2929 = vst [vmem:[#allocation3 + $0xb1] sm:$0xff] %v2896_v9  ;;  %v11932_v49 = vadd.f32 %v11931_v23, %v14613_v60  ;;  %v11939_v27 = vadd.f32 %v9892_v32, %v14505_v58  ;;  %v3094_v55 = vpack.c.bf16 %v2896_v9, %v2895_v17 }
 0x432   : > { %10237 = vmatprep.subr.bf16.mxu1 %v12815_v39 }
 0x433   : > { %v2865_v33 = vadd.f32 %v11932_v49, %v14582_v37  ;;  %v11940_v18 = vadd.f32 %v11939_v27, %v14620_v10  ;;  %v9893_v29 = vpop.f32.mrb[128].mxu0  ;;  %3377 = vmatprep.mubr.bf16.mxu0 %v3094_v55  ;;  %11420 = vmatmul.mubr.bf16.gmra.mrb[104].mxu1 %v3094_v55 }
 0x434   : > { %v9894_v45 = vpop.f32.mrb[129].mxu0  ;;  %3378 = vmatmul.mubr.bf16.gmra.mrb[184].mxu0 %v3093_v41 }
 0x435   : > { %v2897_v30 = vmax.f32 %v2865_v33, 0.0  ;;  %v2866_v62 = vadd.f32 %v11940_v18, %v14582_v37  ;;  %v9895_v63 = vadd.f32 %v9894_v45, %v9893_v29  ;;  %v9896_v54 = vpop.f32.mrb[130].mxu0 }
 0x436   : > { %v9897_v19 = vpop.f32.mrb[131].mxu0 }
 0x437   : > { %2930 = vst [vmem:[#allocation3 + $0xc1] sm:$0xff] %v2897_v30  ;;  %v2898_v60 = vmax.f32 %v2866_v62, 0.0  ;;  %v11951_v58 = vadd.f32 %v9895_v63, %v14517_v57  ;;  %v9898_v52 = vadd.f32 %v9897_v19, %v9896_v54 }
 0x439   : > { %2931 = vst [vmem:[#allocation3 + $0xc9] sm:$0xff] %v2898_v60  ;;  %v11952_v47 = vadd.f32 %v11951_v58, %v14637_v2  ;;  %v11959_v10 = vadd.f32 %v9898_v52, %v14527_v14  ;;  %v3095_v4 = vpack.c.bf16 %v2898_v60, %v2897_v30 }
 0x43b   : > { %v2867_v21 = vadd.f32 %v11952_v47, %v14582_v37  ;;  %v11960_v41 = vadd.f32 %v11959_v10, %v14643_v42  ;;  %v9899_v31 = vpop.f32.mrb[132].mxu0  ;;  %3385 = vmatprep.mubr.bf16.mxu0 %v3095_v4  ;;  %11423 = vmatprep.mubr.bf16.mxu1 %v3095_v4 }
 0x43c   : > { %v9900_v8 = vpop.f32.mrb[133].mxu0  ;;  %3386 = vmatmul.mubr.bf16.gmra.mrb[188].mxu0 %v3094_v55 }
 0x43d   : > { %v2899_v17 = vmax.f32 %v2867_v21, 0.0  ;;  %v2868_v12 = vadd.f32 %v11960_v41, %v14582_v37  ;;  %v9901_v57 = vadd.f32 %v9900_v8, %v9899_v31  ;;  %v9902_v38 = vpop.f32.mrb[134].mxu0 }
 0x43e   : > { %v9903_v11 = vpop.f32.mrb[135].mxu0 }
 0x43f   : > { %2932 = vst [vmem:[#allocation3 + $0xd9] sm:$0xff] %v2899_v17  ;;  %v2900_v2 = vmax.f32 %v2868_v12, 0.0  ;;  %v11947_v14 = vadd.f32 %v9901_v57, %v14513_v44  ;;  %v9904_v39 = vadd.f32 %v9903_v11, %v9902_v38 }
 0x441   : > { %2933 = vst [vmem:[#allocation3 + $0xe1] sm:$0xff] %v2900_v2  ;;  %v11948_v36 = vadd.f32 %v11947_v14, %v14633_v6  ;;  %v11955_v42 = vadd.f32 %v9904_v39, %v14524_v26  ;;  %v3096_v9 = vpack.c.bf16 %v2900_v2, %v2899_v17 }
 0x443   : > { %v2869_v23 = vadd.f32 %v11948_v36, %v14582_v37  ;;  %v11956_v32 = vadd.f32 %v11955_v42, %v14641_v35  ;;  %v9905_v49 = vpop.f32.mrb[136].mxu0  ;;  %3393 = vmatprep.mubr.bf16.mxu0 %v3096_v9  ;;  %11424 = vmatmul.mubr.bf16.gmra.mrb[108].mxu1 %v3096_v9 }
 0x444   : > { %v9906_v27 = vpop.f32.mrb[137].mxu0  ;;  %3394 = vmatmul.mubr.bf16.gmra.mrb[192].mxu0 %v3095_v4 }
 0x445   : > { %v2901_v55 = vmax.f32 %v2869_v23, 0.0  ;;  %v2870_v33 = vadd.f32 %v11956_v32, %v14582_v37  ;;  %v9907_v44 = vadd.f32 %v9906_v27, %v9905_v49  ;;  %v9908_v18 = vpop.f32.mrb[138].mxu0 }
 0x446   : > { %v9909_v29 = vpop.f32.mrb[139].mxu0 }
 0x447   : > { %2934 = vst [vmem:[#allocation3 + $0xf1] sm:$0xff] %v2901_v55  ;;  %v2902_v6 = vmax.f32 %v2870_v33, 0.0  ;;  %v11967_v26 = vadd.f32 %v9907_v44, %v14537_v22  ;;  %v9910_v45 = vadd.f32 %v9909_v29, %v9908_v18 }
 0x449   : > { %2935 = vst [vmem:[#allocation3 + $0xf9] sm:$0xff] %v2902_v6  ;;  %v11968_v30 = vadd.f32 %v11967_v26, %v14657_v40  ;;  %v11975_v35 = vadd.f32 %v9910_v45, %v14544_v1  ;;  %v3097_v62 = vpack.c.bf16 %v2902_v6, %v2901_v55 }
 0x44b   : > { %v2871_v63 = vadd.f32 %v11968_v30, %v14582_v37  ;;  %v11976_v54 = vadd.f32 %v11975_v35, %v14662_v5  ;;  %v9911_v19 = vpop.f32.mrb[140].mxu0  ;;  %3401 = vmatprep.mubr.bf16.mxu0 %v3097_v62  ;;  %11427 = vmatprep.mubr.bf16.mxu1 %v3097_v62 }
 0x44c   : > { %v9912_v60 = vpop.f32.mrb[141].mxu0  ;;  %3402 = vmatmul.mubr.bf16.gmra.mrb[196].mxu0 %v3096_v9 }
 0x44d   : > { %v2903_v58 = vmax.f32 %v2871_v63, 0.0  ;;  %v2872_v52 = vadd.f32 %v11976_v54, %v14582_v37  ;;  %v9913_v22 = vadd.f32 %v9912_v60, %v9911_v19  ;;  %v9914_v47 = vpop.f32.mrb[142].mxu0 }
 0x44e   : > { %v9915_v10 = vpop.f32.mrb[143].mxu0 }
 0x44f   : > { %2936 = vst [vmem:[#allocation3 + $0x109] sm:$0xff] %v2903_v58  ;;  %v2904_v40 = vmax.f32 %v2872_v52, 0.0  ;;  %v11963_v1 = vadd.f32 %v9913_v22, %v14533_v51  ;;  %v9916_v4 = vadd.f32 %v9915_v10, %v9914_v47 }
 0x451   : > { %2937 = vst [vmem:[#allocation3 + $0x111] sm:$0xff] %v2904_v40  ;;  %v11964_v21 = vadd.f32 %v11963_v1, %v14653_v43  ;;  %v11971_v5 = vadd.f32 %v9916_v4, %v14541_v56  ;;  %v3098_v41 = vpack.c.bf16 %v2904_v40, %v2903_v58 }
 0x453   : > { %v2873_v31 = vadd.f32 %v11964_v21, %v14582_v37  ;;  %v11972_v8 = vadd.f32 %v11971_v5, %v14660_v46  ;;  %v9917_v17 = vpop.f32.mrb[144].mxu0  ;;  %3409 = vmatprep.mubr.bf16.mxu0 %v3098_v41  ;;  %11428 = vmatmul.mubr.bf16.gmra.mrb[112].mxu1 %v3098_v41 }
 0x454   : > { %v9918_v12 = vpop.f32.mrb[145].mxu0  ;;  %3410 = vmatmul.mubr.bf16.gmra.mrb[200].mxu0 %v3097_v62 }
 0x455   : > { %v2905_v57 = vmax.f32 %v2873_v31, 0.0  ;;  %v2874_v38 = vadd.f32 %v11972_v8, %v14582_v37  ;;  %v9919_v51 = vadd.f32 %v9918_v12, %v9917_v17  ;;  %v9920_v11 = vpop.f32.mrb[146].mxu0 }
 0x456   : > { %v9921_v2 = vpop.f32.mrb[147].mxu0 }
 0x457   : > { %2938 = vst [vmem:[#allocation3 + $0x121] sm:$0xff] %v2905_v57  ;;  %v2906_v43 = vmax.f32 %v2874_v38, 0.0  ;;  %v11983_v56 = vadd.f32 %v9919_v51, %v14554_v3  ;;  %v9922_v14 = vadd.f32 %v9921_v2, %v9920_v11  ;;  %v3085_v38 = vld [vmem:[#allocation3 + $0x199] sm:$0xff]  ;;  %v3086_v51 = vld [vmem:[#allocation3 + $0x1a1] sm:$0xff] }
 0x458   : > { %v3104_v11 = vpack.c.bf16 %v3086_v51, %v3085_v38  ;;  %v2952_v2 = vld [vmem:[#allocation3 + $0x20] sm:$0xff] }
 0x459   : > { %2939 = vst [vmem:[#allocation3 + $0x129] sm:$0xff] %v2906_v43  ;;  %v11984_v39 = vadd.f32 %v11983_v56, %v14673_v24  ;;  %v11991_v46 = vadd.f32 %v9922_v14, %v14561_v16  ;;  %v3099_v36 = vpack.c.bf16 %v2906_v43, %v2905_v57  ;;  %v2951_v43 = vld [vmem:[#allocation3 + $0x18] sm:$0xff]  ;;  %v2953_v56 = vld [vmem:[#allocation3 + $0x30] sm:$0xff] }
 0x45b   : > { %v2875_v42 = vadd.f32 %v11984_v39, %v14582_v37  ;;  %v11992_v9 = vadd.f32 %v11991_v46, %v14678_v25  ;;  %v9923_v23 = vpop.f32.mrb[148].mxu0  ;;  %3417 = vmatprep.mubr.bf16.mxu0 %v3099_v36  ;;  %11431 = vmatprep.mubr.bf16.mxu1 %v3099_v36  ;;  %v2950_v39 = vld [vmem:[#allocation3 + $0x8] sm:$0xff]  ;;  %v2956_v46 = vld [vmem:[#allocation3 + $0x50] sm:$0xff] }
 0x45c   : > { %v9924_v32 = vpop.f32.mrb[149].mxu0  ;;  %3418 = vmatmul.mubr.bf16.gmra.mrb[204].mxu0 %v3098_v41 }
 0x45d   : > { %v2907_v49 = vmax.f32 %v2875_v42, 0.0  ;;  %v2876_v27 = vadd.f32 %v11992_v9, %v14582_v37  ;;  %v9925_v3 = vadd.f32 %v9924_v32, %v9923_v23  ;;  %v9926_v55 = vpop.f32.mrb[150].mxu0  ;;  %v2958_v42 = vld [vmem:[#allocation3 + $0x68] sm:$0xff]  ;;  %v2957_v32 = vld [vmem:[#allocation3 + $0x60] sm:$0xff] }
 0x45e   : > { %v9927_v33 = vpop.f32.mrb[151].mxu0  ;;  %v2955_v9 = vld [vmem:[#allocation3 + $0x48] sm:$0xff] }
 0x45f   : > { %2940 = vst [vmem:[#allocation3 + $0x139] sm:$0xff] %v2907_v49  ;;  %v2908_v24 = vmax.f32 %v2876_v27, 0.0  ;;  %v11979_v16 = vadd.f32 %v9925_v3, %v14550_v53  ;;  %v9928_v44 = vadd.f32 %v9927_v33, %v9926_v55  ;;  %v2988_v23 = vpack.c.bf16 %v2956_v46, %v2955_v9  ;;  %v12817_v3 = vld [vmem:[%s13748_s7 + $0x408] sm:$0xff]   ;;  %v2960_v33 = vld [vmem:[#allocation3 + $0x80] sm:$0xff] }
 0x460   : > { %v14750_v27 = vpack.c.bf16 %v2958_v42, %v2957_v32  ;;  %v12818_v55 = vld [vmem:[%s13748_s7 + $0x3c8] sm:$0xff]   ;;  %v4090_v32 = vld [vmem:[#allocation3 + $0x3a] sm:$0xff] }
 0x461   : > { %2941 = vst [vmem:[#allocation3 + $0x141] sm:$0xff] %v2908_v24  ;;  %v11980_v18 = vadd.f32 %v11979_v16, %v14670_v20  ;;  %v11987_v25 = vadd.f32 %v9928_v44, %v14558_v13  ;;  %v3100_v29 = vpack.c.bf16 %v2908_v24, %v2907_v49  ;;  %v12816_v49 = vld [vmem:[%s13748_s7 + $0x3c0] sm:$0xff]   ;;  %v12819_v24 = vld [vmem:[%s13748_s7 + $0x410] sm:$0xff]  }
 0x462   : > { %v2962_v16 = vld [vmem:[#allocation3 + $0x98] sm:$0xff]  ;;  %v4086_v42 = vld [vmem:[#allocation3 + $0xa] sm:$0xff] }
 0x463   : > { %v2877_v6 = vadd.f32 %v11980_v18, %v14582_v37  ;;  %v11988_v26 = vadd.f32 %v11987_v25, %v14676_v50  ;;  %v9929_v45 = vpop.f32.mrb[152].mxu0  ;;  %3425 = vmatprep.mubr.bf16.mxu0 %v3100_v29  ;;  %11432 = vmatmul.mubr.bf16.gmra.mrb[116].mxu1 %v3100_v29  ;;  %v2959_v44 = vld [vmem:[#allocation3 + $0x78] sm:$0xff]  ;;  %v2961_v25 = vld [vmem:[#allocation3 + $0x90] sm:$0xff] }
 0x464   : > { %v9930_v30 = vpop.f32.mrb[153].mxu0  ;;  %3426 = vmatmul.mubr.bf16.gmra.mrb[208].mxu0 %v3099_v36  ;;  %v14756_v18 = vpack.c.bf16 %v2960_v33, %v2959_v44  ;;  %v4092_v33 = vld [vmem:[#allocation3 + $0x52] sm:$0xff]  ;;  %v12835_v44 = vld [vmem:[%s13748_s7 + $0x460] sm:$0xff]  }
 0x465   : > { %v2909_v35 = vmax.f32 %v2877_v6, 0.0  ;;  %v2878_v62 = vadd.f32 %v11988_v26, %v14582_v37  ;;  %v9931_v53 = vadd.f32 %v9930_v30, %v9929_v45  ;;  %v9932_v63 = vpop.f32.mrb[154].mxu0  ;;  %v14759_v6 = vpack.c.bf16 %v2962_v16, %v2961_v25  ;;  %v12821_v26 = vld [vmem:[%s13748_s7 + $0x418] sm:$0xff]   ;;  %v2964_v30 = vld [vmem:[#allocation3 + $0xb0] sm:$0xff] }
 0x466   : > { %v9933_v54 = vpop.f32.mrb[155].mxu0  ;;  %v12822_v45 = vld [vmem:[%s13748_s7 + $0x3d8] sm:$0xff]   ;;  %v4094_v25 = vld [vmem:[#allocation3 + $0x6a] sm:$0xff] }
 0x467   : > { %2942 = vst [vmem:[#allocation3 + $0x151] sm:$0xff] %v2909_v35  ;;  %v2910_v20 = vmax.f32 %v2878_v62, 0.0  ;;  %v11999_v13 = vadd.f32 %v9931_v53, %v14570_v48  ;;  %v9934_v19 = vadd.f32 %v9933_v54, %v9932_v63  ;;  %v2966_v62 = vld [vmem:[#allocation3 + $0xc8] sm:$0xff]  ;;  %v2965_v54 = vld [vmem:[#allocation3 + $0xc0] sm:$0xff] }
 0x468   : > { %v2963_v53 = vld [vmem:[#allocation3 + $0xa8] sm:$0xff]  ;;  %v12834_v16 = vld [vmem:[%s13748_s7 + $0x458] sm:$0xff]  }
 0x469   : > { %2943 = vst [vmem:[#allocation3 + $0x159] sm:$0xff] %v2910_v20  ;;  %v12000_v60 = vadd.f32 %v11999_v13, %v14689_v15  ;;  %v12007_v50 = vadd.f32 %v9934_v19, %v14577_v28  ;;  %v3101_v58 = vpack.c.bf16 %v2910_v20, %v2909_v35  ;;  %v12823_v35 = vld [vmem:[%s13748_s7 + $0x420] sm:$0xff]   ;;  %v14766_v63 = vpack.c.bf16 %v2964_v30, %v2963_v53  ;;  %v12825_v19 = vld [vmem:[%s13748_s7 + $0x428] sm:$0xff]  }
 0x46a   : > { %v12824_v20 = vld [vmem:[%s13748_s7 + $0x3e0] sm:$0xff]   ;;  %v14769_v13 = vpack.c.bf16 %v2966_v62, %v2965_v54 }
 0x46b   : > { %v2879_v52 = vadd.f32 %v12000_v60, %v14582_v37  ;;  %v12008_v22 = vadd.f32 %v12007_v50, %v14694_v61  ;;  %v9935_v47 = vpop.f32.mrb[156].mxu0  ;;  %3433 = vmatprep.mubr.bf16.mxu0 %v3101_v58  ;;  %11435 = vmatprep.mubr.bf16.mxu1 %v3101_v58  ;;  %v12826_v60 = vld [vmem:[%s13748_s7 + $0x3e8] sm:$0xff]   ;;  %v2968_v50 = vld [vmem:[#allocation3 + $0xe0] sm:$0xff] }
 0x46c   : > { %v9936_v10 = vpop.f32.mrb[157].mxu0  ;;  %3434 = vmatmul.mubr.bf16.gmra.mrb[212].mxu0 %v3100_v29  ;;  %v12820_v29 = vld [vmem:[%s13748_s7 + $0x3d0] sm:$0xff]   ;;  %v4096_v62 = vld [vmem:[#allocation3 + $0x82] sm:$0xff] }
 0x46d   : > { %v2911_v40 = vmax.f32 %v2879_v52, 0.0  ;;  %v2880_v1 = vadd.f32 %v12008_v22, %v14582_v37  ;;  %v9937_v48 = vadd.f32 %v9936_v10, %v9935_v47  ;;  %v9938_v4 = vpop.f32.mrb[158].mxu0  ;;  %v2970_v52 = vld [vmem:[#allocation3 + $0xf8] sm:$0xff]  ;;  %v2969_v10 = vld [vmem:[#allocation3 + $0xf0] sm:$0xff] }
 0x46e   : > { %v9939_v21 = vpop.f32.mrb[159].mxu0  ;;  %v2967_v22 = vld [vmem:[#allocation3 + $0xd8] sm:$0xff]  ;;  %v2977_v38 = vld [vmem:[#allocation3 + $0x150] sm:$0xff] }
 0x46f   : > { %2944 = vst [vmem:[#allocation3 + $0x169] sm:$0xff] %v2911_v40  ;;  %v2912_v15 = vmax.f32 %v2880_v1, 0.0  ;;  %v11995_v28 = vadd.f32 %v9937_v48, %v14566_v0  ;;  %v9940_v5 = vadd.f32 %v9939_v21, %v9938_v4  ;;  %v14777_v47 = vpack.c.bf16 %v2968_v50, %v2967_v22  ;;  %v12829_v48 = vld [vmem:[%s13748_s7 + $0x438] sm:$0xff]   ;;  %v2972_v21 = vld [vmem:[#allocation3 + $0x110] sm:$0xff] }
 0x470   : > { %v14780_v1 = vpack.c.bf16 %v2970_v52, %v2969_v10  ;;  %v12830_v4 = vld [vmem:[%s13748_s7 + $0x3f8] sm:$0xff]  }
 0x471   : > { %2945 = vst [vmem:[#allocation3 + $0x171] sm:$0xff] %v2912_v15  ;;  %v11996_v41 = vadd.f32 %v11995_v28, %v14686_v34  ;;  %v12003_v61 = vadd.f32 %v9940_v5, %v14574_v7  ;;  %v3102_v31 = vpack.c.bf16 %v2912_v15, %v2911_v40  ;;  %v2954_v34 = vld [vmem:[#allocation3 + $0x38] sm:$0xff]  ;;  %v12831_v15 = vld [vmem:[%s13748_s7 + $0x440] sm:$0xff]  }
 0x472   : > { %v2987_v14 = vpack.c.bf16 %v2954_v34, %v2953_v56  ;;  %v12828_v40 = vld [vmem:[%s13748_s7 + $0x3f0] sm:$0xff]   ;;  %v2974_v28 = vld [vmem:[#allocation3 + $0x128] sm:$0xff] }
 0x473   : > { %v2881_v8 = vadd.f32 %v11996_v41, %v14582_v37  ;;  %v12004_v17 = vadd.f32 %v12003_v61, %v14692_v59  ;;  %3441 = vmatprep.mubr.bf16.mxu0 %v3102_v31  ;;  %11436 = vmatmul.mubr.bf16.gmra.mrb[120].mxu1 %v3102_v31  ;;  %v2986_v59 = vpack.c.bf16 %v2952_v2, %v2951_v43  ;;  %v2971_v5 = vld [vmem:[#allocation3 + $0x108] sm:$0xff]  ;;  %v2973_v61 = vld [vmem:[#allocation3 + $0x120] sm:$0xff]  ;;  %v2983_v56 = vld [vmem:[#allocation3 + $0x198] sm:$0xff] }
 0x474   : > { %3442 = vmatmul.mubr.bf16.gmra.mrb[216].mxu0 %v3101_v58  ;;  %v12827_v58 = vld [vmem:[%s13748_s7 + $0x430] sm:$0xff]   ;;  %v14788_v41 = vpack.c.bf16 %v2972_v21, %v2971_v5  ;;  %v4099_v21 = vld [vmem:[#allocation3 + $0xaa] sm:$0xff] }
 0x475   : > { %v2913_v12 = vmax.f32 %v2881_v8, 0.0  ;;  %v2882_v57 = vadd.f32 %v12004_v17, %v14582_v37  ;;  %v2949_v37 = vld [vmem:[#allocation3] sm:$0xff]  ;;  %v2978_v17 = vld [vmem:[#allocation3 + $0x158] sm:$0xff] }
 0x476   : > { %v2985_v36 = vpack.c.bf16 %v2950_v39, %v2949_v37  ;;  %v2976_v8 = vld [vmem:[#allocation3 + $0x140] sm:$0xff]  ;;  %v14798_v51 = vpack.c.bf16 %v2978_v17, %v2977_v38  ;;  %v2979_v2 = vld [vmem:[#allocation3 + $0x168] sm:$0xff] }
 0x477   : > { %2946 = vst [vmem:[#allocation3 + $0x181] sm:$0xff] %v2913_v12  ;;  %v2914_v0 = vmax.f32 %v2882_v57, 0.0  ;;  %v4087_v37 = vld [vmem:[#allocation3 + $0x1a] sm:$0xff]  ;;  %v4088_v39 = vld [vmem:[#allocation3 + $0x22] sm:$0xff]  ;;  %v4102_v38 = vld [vmem:[#allocation3 + $0xca] sm:$0xff] }
 0x478   : > { %v4122_v46 = vpack.c.bf16 %v4088_v39, %v4087_v37  ;;  %v4098_v52 = vld [vmem:[#allocation3 + $0x9a] sm:$0xff]  ;;  %v4104_v37 = vld [vmem:[#allocation3 + $0xe2] sm:$0xff] }
 0x479   : > { %2947 = vst [vmem:[#allocation3 + $0x189] sm:$0xff] %v2914_v0  ;;  %v3103_v7 = vpack.c.bf16 %v2914_v0, %v2913_v12  ;;  %v2975_v12 = vld [vmem:[#allocation3 + $0x138] sm:$0xff]  ;;  %v2980_v0 = vld [vmem:[#allocation3 + $0x170] sm:$0xff] }
 0x47a   : > { %v14796_v57 = vpack.c.bf16 %v2976_v8, %v2975_v12  ;;  %v14804_v34 = vpack.c.bf16 %v2980_v0, %v2979_v2  ;;  %v4101_v12 = vld [vmem:[#allocation3 + $0xc2] sm:$0xff] }
 0x47b   : > { %3449 = vmatprep.mubr.bf16.mxu0 %v3103_v7  ;;  %11439 = vmatprep.mubr.bf16.mxu1 %v3103_v7 }
 0x47c   : > { %3450 = vmatmul.mubr.bf16.gmra.mrb[220].mxu0 %v3102_v31  ;;  %11440 = vmatmul.mubr.bf16.gmra.mrb[124].mxu1 %v3104_v11  ;;  %v14790_v31 = vpack.c.bf16 %v2974_v28, %v2973_v61 }
 0x47d   : > { %3795 = vmatprep.mubr.bf16.mxu0 %v2986_v59  ;;  %11459 = vmatprep.mubr.bf16.mxu1 %v2987_v14 }
 0x47e   : > { %v2981_v7 = vld [vmem:[#allocation3 + $0x180] sm:$0xff] }
 0x480   : > { %v2982_v11 = vld [vmem:[#allocation3 + $0x188] sm:$0xff] }
 0x481   : > { %v14806_v43 = vpack.c.bf16 %v2982_v11, %v2981_v7 }
 0x484   : > { %3796 = vmatmul.mubr.bf16.vlgmr.msra.gmra.mrb[224].mxu0 %v2985_v36  ;;  %11460 = vmatmul.mubr.bf16.vlgmr.msra.gmra.mrb[96].mxu1 %v2988_v23  ;;  %v4085_v36 = vld [vmem:[#allocation3 + $0x2] sm:$0xff] }
 0x485   : > { %3803 = vmatprep.mubr.bf16.mxu0 %v2987_v14  ;;  %11463 = vmatprep.mubr.bf16.mxu1 %v14750_v27  ;;  %v4121_v9 = vpack.c.bf16 %v4086_v42, %v4085_v36 }
 0x486   : > { %10238 = vmatpush3.bf16.msra.mxu1 %v12816_v49 }
 0x487   : > { %10239 = vmatprep.subr.bf16.mxu1 %v12817_v3  ;;  %v12833_v3 = vld [vmem:[%s13748_s7 + $0x450] sm:$0xff]  }
 0x48a   : > { %10240 = vmatpush3.bf16.msra.mxu1 %v12818_v55  ;;  %v4091_v55 = vld [vmem:[#allocation3 + $0x4a] sm:$0xff] }
 0x48b   : > { %10241 = vmatprep.subr.bf16.mxu1 %v12819_v24  ;;  %v14821_v24 = vpack.c.bf16 %v4092_v33, %v4091_v55 }
 0x48c   : > { %3804 = vmatmul.mubr.bf16.gmra.mrb[228].mxu0 %v2986_v59  ;;  %11464 = vmatmul.mubr.bf16.gmra.mrb[100].mxu1 %v14756_v18  ;;  %v2984_v59 = vld [vmem:[#allocation3 + $0x1a0] sm:$0xff] }
 0x48d   : > { %3811 = vmatprep.mubr.bf16.mxu0 %v2988_v23  ;;  %11467 = vmatprep.mubr.bf16.mxu1 %v14759_v6 }
 0x48e   : > { %10242 = vmatpush3.bf16.msra.mxu1 %v12820_v29 }
 0x48f   : > { %10243 = vmatprep.subr.bf16.mxu1 %v12821_v26 }
 0x492   : > { %10244 = vmatpush3.bf16.msra.mxu1 %v12822_v45  ;;  %v12837_v45 = vld [vmem:[%s13748_s7 + $0x470] sm:$0xff]  }
 0x493   : > { %10245 = vmatprep.subr.bf16.mxu1 %v12823_v35  ;;  %v4095_v35 = vld [vmem:[#allocation3 + $0x7a] sm:$0xff] }
 0x494   : > { %3812 = vmatmul.mubr.bf16.gmra.mrb[232].mxu0 %v2987_v14  ;;  %11468 = vmatmul.mubr.bf16.gmra.mrb[104].mxu1 %v14766_v63  ;;  %v3002_v14 = vpack.c.bf16 %v2984_v59, %v2983_v56  ;;  %v14871_v56 = vpack.c.bf16 %v4102_v38, %v4101_v12 }
 0x495   : > { %3819 = vmatprep.mubr.bf16.mxu0 %v14750_v27  ;;  %11471 = vmatprep.mubr.bf16.mxu1 %v14769_v13 }
 0x496   : > { %10246 = vmatpush3.bf16.msra.mxu1 %v12824_v20  ;;  %v14838_v20 = vpack.c.bf16 %v4096_v62, %v4095_v35 }
 0x497   : > { %10247 = vmatprep.subr.bf16.mxu1 %v12825_v19  ;;  %v12838_v19 = vld [vmem:[%s13748_s7 + $0x478] sm:$0xff]  }
 0x49a   : > { %10248 = vmatpush3.bf16.msra.mxu1 %v12826_v60 }
 0x49b   : > { %10249 = vmatprep.subr.bf16.mxu1 %v12827_v58  ;;  %v4097_v58 = vld [vmem:[#allocation3 + $0x92] sm:$0xff] }
 0x49c   : > { %3820 = vmatmul.mubr.bf16.gmra.mrb[236].mxu0 %v2988_v23  ;;  %11472 = vmatmul.mubr.bf16.gmra.mrb[108].mxu1 %v14777_v47  ;;  %v4089_v23 = vld [vmem:[#allocation3 + $0x32] sm:$0xff] }
 0x49d   : > { %3827 = vmatprep.mubr.bf16.mxu0 %v14756_v18  ;;  %11475 = vmatprep.mubr.bf16.mxu1 %v14780_v1  ;;  %v14814_v49 = vpack.c.bf16 %v4090_v32, %v4089_v23  ;;  %v4105_v23 = vld [vmem:[#allocation3 + $0xf2] sm:$0xff]  ;;  %v4106_v32 = vld [vmem:[#allocation3 + $0xfa] sm:$0xff] }
 0x49e   : > { %10250 = vmatpush3.bf16.msra.mxu1 %v12828_v40 }
 0x49f   : > { %10251 = vmatprep.subr.bf16.mxu1 %v12829_v48 }
 0x4a2   : > { %10252 = vmatpush3.bf16.msra.mxu1 %v12830_v4 }
 0x4a3   : > { %11491 = vmatprep.subr.bf16.mxu1 %v12831_v15 }
 0x4a4   : > { %3828 = vmatmul.mubr.bf16.gmra.mrb[240].mxu0 %v14750_v27  ;;  %11476 = vmatmul.mubr.bf16.gmra.mrb[112].mxu1 %v14788_v41  ;;  %v12832_v27 = vld [vmem:[%s13748_s7 + $0x448] sm:$0xff]  }
 0x4a5   : > { %3835 = vmatprep.mubr.bf16.mxu0 %v14759_v6  ;;  %11479 = vmatprep.mubr.bf16.mxu1 %v14790_v31 }
 0x4ac   : > { %3836 = vmatmul.mubr.bf16.gmra.mrb[244].mxu0 %v14756_v18  ;;  %11480 = vmatmul.mubr.bf16.gmra.mrb[116].mxu1 %v14796_v57  ;;  %v4093_v18 = vld [vmem:[#allocation3 + $0x62] sm:$0xff] }
 0x4ad   : > { %3843 = vmatprep.mubr.bf16.mxu0 %v14766_v63  ;;  %11483 = vmatprep.mubr.bf16.mxu1 %v14798_v51  ;;  %v14828_v29 = vpack.c.bf16 %v4094_v25, %v4093_v18  ;;  %v4107_v18 = vld [vmem:[#allocation3 + $0x10a] sm:$0xff]  ;;  %v4108_v25 = vld [vmem:[#allocation3 + $0x112] sm:$0xff] }
 0x4ae   : > { %v14898_v35 = vpack.c.bf16 %v4108_v25, %v4107_v18 }
 0x4b4   : > { %3844 = vmatmul.mubr.bf16.gmra.mrb[248].mxu0 %v14759_v6  ;;  %11484 = vmatmul.mubr.bf16.gmra.mrb[120].mxu1 %v14804_v34  ;;  %v12836_v6 = vld [vmem:[%s13748_s7 + $0x468] sm:$0xff]   ;;  %s9373_s7 = smin.u32 %s16542_s10, %s4851_s0 }
 0x4b5   : > { %3851 = vmatprep.mubr.bf16.mxu0 %v14769_v13  ;;  %11487 = vmatprep.mubr.bf16.mxu1 %v14806_v43  ;;  %s4853_s15 = sand.u32 3, %s9373_s7  }
 0x4b6   : > { %s4854_s18 = ssub.s32 0, %s4853_s15 }
 0x4b7   : > { %s16567_s18 = smov (!%p4850_p1, %s4854_s18), %s4853_s15 }
 0x4b8   : > { %p9375_p12 = scmp.lt.s32.totalorder %s16567_s18, 0  ;;  %s4860_s25 = sadd.s32 4, %s16567_s18 }
 0x4ba   : > { %s16569_s25 = smov (!%p9375_p12, %s4860_s25), %s16567_s18 }
 0x4bb   : > { %p9376_p13 = scmp.ne.s32.totalorder %s16569_s25, 3 }
 0x4bc   : > { %3852 = vmatmul.mubr.bf16.gmra.mrb[252].mxu0 %v14766_v63  ;;  %11488 = vmatmul.mubr.bf16.gmra.mrb[124].mxu1 %v3002_v14  ;;  %v4103_v14 = vld [vmem:[#allocation3 + $0xda] sm:$0xff] }
 0x4bd   : > { %3859 = vmatprep.mubr.bf16.mxu0 %v14777_v47  ;;  %4363 = vmatprep.mubr.bf16.mxu1 %v4122_v46 }
 0x4c4   : > { %3860 = vmatmul.mubr.bf16.gmra.mrb[0].mxu0 %v14769_v13  ;;  %4364 = vmatmul.mubr.bf16.vlgmr.msra.gmra.mrb[128].mxu1 %v4121_v9  ;;  %v14881_v9 = vpack.c.bf16 %v4104_v37, %v4103_v14 }
 0x4c5   : > { %3867 = vmatprep.mubr.bf16.mxu0 %v14780_v1  ;;  %4371 = vmatprep.mubr.bf16.mxu1 %v14814_v49 }
 0x4c6   : > { %11492 = vmatpush3.bf16.msra.mxu1 %v12831_v15  ;;  %v4100_v15 = vld [vmem:[#allocation3 + $0xb2] sm:$0xff] }
 0x4c7   : > { %11493 = vmatprep.subr.bf16.mxu1 %v12832_v27  ;;  %v14861_v8 = vpack.c.bf16 %v4100_v15, %v4099_v21  ;;  %v4112_v21 = vld [vmem:[#allocation3 + $0x142] sm:$0xff] }
 0x4ca   : > { %11494 = vmatpush3.bf16.msra.mxu1 %v12832_v27 }
 0x4cb   : > { %11495 = vmatprep.subr.bf16.mxu1 %v12833_v3 }
 0x4cc   : > { %3868 = vmatmul.mubr.bf16.gmra.mrb[4].mxu0 %v14777_v47  ;;  %4372 = vmatmul.mubr.bf16.gmra.mrb[132].mxu1 %v4122_v46 }
 0x4cd   : > { %3875 = vmatprep.mubr.bf16.mxu0 %v14788_v41  ;;  %4379 = vmatprep.mubr.bf16.mxu1 %v14821_v24 }
 0x4ce   : > { %11496 = vmatpush3.bf16.msra.mxu1 %v12833_v3 }
 0x4cf   : > { %11497 = vmatprep.subr.bf16.mxu1 %v12834_v16 }
 0x4d2   : > { %11498 = vmatpush3.bf16.msra.mxu1 %v12834_v16  ;;  %v14890_v16 = vpack.c.bf16 %v4106_v32, %v4105_v23  ;;  %v4116_v23 = vld [vmem:[#allocation3 + $0x172] sm:$0xff] }
 0x4d3   : > { %11499 = vmatprep.subr.bf16.mxu1 %v12835_v44 }
 0x4d4   : > { %3876 = vmatmul.mubr.bf16.gmra.mrb[8].mxu0 %v14780_v1  ;;  %4380 = vmatmul.mubr.bf16.gmra.mrb[136].mxu1 %v14814_v49  ;;  %v14851_v1 = vpack.c.bf16 %v4098_v52, %v4097_v58 }
 0x4d5   : > { %3883 = vmatprep.mubr.bf16.mxu0 %v14790_v31  ;;  %4387 = vmatprep.mubr.bf16.mxu1 %v14828_v29 }
 0x4d6   : > { %11500 = vmatpush3.bf16.msra.mxu1 %v12835_v44 }
 0x4d7   : > { %v9981_v26 = vpop.f32.mrb[160].mxu0  ;;  %11501 = vmatprep.subr.bf16.mxu1 %v12836_v6 }
 0x4d8   : > { %v9982_v30 = vpop.f32.mrb[161].mxu0 }
 0x4d9   : > { %v14836_v53 = vadd.f32 %v9982_v30, %v9981_v26  ;;  %v9984_v63 = vpop.f32.mrb[162].mxu0 }
 0x4da   : > { %v9985_v54 = vpop.f32.mrb[163].mxu0  ;;  %11502 = vmatpush3.bf16.msra.mxu1 %v12836_v6 }
 0x4db   : > { %v14840_v13 = vadd.f32 %v9985_v54, %v9984_v63  ;;  %11503 = vmatprep.subr.bf16.mxu1 %v12837_v45  ;;  %v4109_v54 = vld [vmem:[#allocation3 + $0x122] sm:$0xff] }
 0x4dc   : > { %3884 = vmatmul.mubr.bf16.gmra.mrb[12].mxu0 %v14788_v41  ;;  %4388 = vmatmul.mubr.bf16.gmra.mrb[140].mxu1 %v14821_v24 }
 0x4dd   : > { %3891 = vmatprep.mubr.bf16.mxu0 %v14796_v57  ;;  %4395 = vmatprep.mubr.bf16.mxu1 %v14838_v20 }
 0x4de   : > { %11504 = vmatpush3.bf16.msra.mxu1 %v12837_v45 }
 0x4df   : > { %v9987_v60 = vpop.f32.mrb[164].mxu0  ;;  %11505 = vmatprep.subr.bf16.mxu1 %v12838_v19 }
 0x4e0   : > { %v9988_v50 = vpop.f32.mrb[165].mxu0 }
 0x4e1   : > { %v14847_v22 = vadd.f32 %v9988_v50, %v9987_v60  ;;  %v9990_v47 = vpop.f32.mrb[166].mxu0 }
 0x4e2   : > { %v9991_v10 = vpop.f32.mrb[167].mxu0  ;;  %11506 = vmatpush3.bf16.msra.mxu1 %v12838_v19  ;;  %v4110_v19 = vld [vmem:[#allocation3 + $0x12a] sm:$0xff] }
 0x4e3   : > { %v14849_v40 = vadd.f32 %v9991_v10, %v9990_v47  ;;  %v14906_v47 = vpack.c.bf16 %v4110_v19, %v4109_v54 }
 0x4e4   : > { %3892 = vmatmul.mubr.bf16.gmra.mrb[16].mxu0 %v14790_v31  ;;  %4396 = vmatmul.mubr.bf16.gmra.mrb[144].mxu1 %v14828_v29 }
 0x4e5   : > { %3899 = vmatprep.mubr.bf16.mxu0 %v14798_v51  ;;  %4403 = vmatprep.mubr.bf16.mxu1 %v14851_v1 }
 0x4e7   : > { %v9993_v48 = vpop.f32.mrb[168].mxu0 }
 0x4e8   : > { %v9994_v4 = vpop.f32.mrb[169].mxu0 }
 0x4e9   : > { %v14857_v28 = vadd.f32 %v9994_v4, %v9993_v48  ;;  %v9996_v5 = vpop.f32.mrb[170].mxu0  ;;  %v4111_v4 = vld [vmem:[#allocation3 + $0x13a] sm:$0xff] }
 0x4ea   : > { %v9997_v41 = vpop.f32.mrb[171].mxu0 }
 0x4eb   : > { %v14859_v61 = vadd.f32 %v9997_v41, %v9996_v5 }
 0x4ec   : > { %3900 = vmatmul.mubr.bf16.gmra.mrb[20].mxu0 %v14796_v57  ;;  %4404 = vmatmul.mubr.bf16.gmra.mrb[148].mxu1 %v14838_v20 }
 0x4ed   : > { %3907 = vmatprep.mubr.bf16.mxu0 %v14804_v34  ;;  %4411 = vmatprep.mubr.bf16.mxu1 %v14861_v8 }
 0x4ef   : > { %v9999_v31 = vpop.f32.mrb[172].mxu0 }
 0x4f0   : > { %v10000_v17 = vpop.f32.mrb[173].mxu0 }
 0x4f1   : > { %v14867_v0 = vadd.f32 %v10000_v17, %v9999_v31  ;;  %v10002_v11 = vpop.f32.mrb[174].mxu0  ;;  %v14914_v17 = vpack.c.bf16 %v4112_v21, %v4111_v4 }
 0x4f2   : > { %v10003_v2 = vpop.f32.mrb[175].mxu0 }
 0x4f3   : > { %v14869_v7 = vadd.f32 %v10003_v2, %v10002_v11  ;;  %v4113_v11 = vld [vmem:[#allocation3 + $0x152] sm:$0xff]  ;;  %v4114_v2 = vld [vmem:[#allocation3 + $0x15a] sm:$0xff] }
 0x4f4   : > { %3908 = vmatmul.mubr.bf16.gmra.mrb[24].mxu0 %v14798_v51  ;;  %4412 = vmatmul.mubr.bf16.gmra.mrb[152].mxu1 %v14851_v1 }
 0x4f5   : > { %3915 = vmatprep.mubr.bf16.mxu0 %v14806_v43  ;;  %4419 = vmatprep.mubr.bf16.mxu1 %v14871_v56 }
 0x4f7   : > { %v10005_v57 = vpop.f32.mrb[176].mxu0 }
 0x4f8   : > { %v10006_v59 = vpop.f32.mrb[177].mxu0 }
 0x4f9   : > { %v14877_v39 = vadd.f32 %v10006_v59, %v10005_v57  ;;  %v10008_v46 = vpop.f32.mrb[178].mxu0 }
 0x4fa   : > { %v10009_v36 = vpop.f32.mrb[179].mxu0 }
 0x4fb   : > { %v14879_v42 = vadd.f32 %v10009_v36, %v10008_v46  ;;  %v14922_v46 = vpack.c.bf16 %v4114_v2, %v4113_v11 }
 0x4fc   : > { %3916 = vmatmul.mubr.bf16.gmra.mrb[28].mxu0 %v14804_v34  ;;  %4420 = vmatmul.mubr.bf16.gmra.mrb[156].mxu1 %v14861_v8 }
 0x4fd   : > { %4427 = vmatprep.mubr.bf16.mxu1 %v14881_v9 }
 0x4ff   : > { %v10011_v51 = vpop.f32.mrb[180].mxu0 }
 0x500   : > { %v10012_v43 = vpop.f32.mrb[181].mxu0 }
 0x501   : > { %v14886_v27 = vadd.f32 %v10012_v43, %v10011_v51  ;;  %v10014_v3 = vpop.f32.mrb[182].mxu0  ;;  %v4115_v43 = vld [vmem:[#allocation3 + $0x16a] sm:$0xff] }
 0x502   : > { %v10015_v55 = vpop.f32.mrb[183].mxu0 }
 0x503   : > { %v14888_v33 = vadd.f32 %v10015_v55, %v10014_v3 }
 0x504   : > { %4428 = vmatmul.mubr.bf16.gmra.mrb[160].mxu1 %v14871_v56 }
 0x505   : > { %4435 = vmatprep.mubr.bf16.mxu1 %v14890_v16 }
 0x507   : > { %v10017_v34 = vpop.f32.mrb[184].mxu0 }
 0x508   : > { %v10018_v44 = vpop.f32.mrb[185].mxu0 }
 0x509   : > { %v14894_v6 = vadd.f32 %v10018_v44, %v10017_v34  ;;  %v10020_v26 = vpop.f32.mrb[186].mxu0  ;;  %v14930_v44 = vpack.c.bf16 %v4116_v23, %v4115_v43 }
 0x50a   : > { %v10021_v45 = vpop.f32.mrb[187].mxu0 }
 0x50b   : > { %v14896_v30 = vadd.f32 %v10021_v45, %v10020_v26  ;;  %v4117_v26 = vld [vmem:[#allocation3 + $0x182] sm:$0xff]  ;;  %v4118_v45 = vld [vmem:[#allocation3 + $0x18a] sm:$0xff] }
 0x50c   : > { %4436 = vmatmul.mubr.bf16.gmra.mrb[164].mxu1 %v14881_v9 }
 0x50d   : > { %4443 = vmatprep.mubr.bf16.mxu1 %v14898_v35 }
 0x50f   : > { %v10023_v62 = vpop.f32.mrb[188].mxu0 }
 0x510   : > { %v10024_v63 = vpop.f32.mrb[189].mxu0 }
 0x511   : > { %v14902_v60 = vadd.f32 %v10024_v63, %v10023_v62  ;;  %v10026_v50 = vpop.f32.mrb[190].mxu0 }
 0x512   : > { %v10027_v58 = vpop.f32.mrb[191].mxu0 }
 0x513   : > { %v14904_v52 = vadd.f32 %v10027_v58, %v10026_v50  ;;  %v14938_v50 = vpack.c.bf16 %v4118_v45, %v4117_v26 }
 0x514   : > { %4444 = vmatmul.mubr.bf16.gmra.mrb[168].mxu1 %v14890_v16 }
 0x515   : > { %4451 = vmatprep.mubr.bf16.mxu1 %v14906_v47 }
 0x517   : > { %v10029_v10 = vpop.f32.mrb[192].mxu0 }
 0x518   : > { %v10030_v48 = vpop.f32.mrb[193].mxu0 }
 0x519   : > { %v14910_v15 = vadd.f32 %v10030_v48, %v10029_v10  ;;  %v10032_v5 = vpop.f32.mrb[194].mxu0 }
 0x51a   : > { %v10033_v41 = vpop.f32.mrb[195].mxu0 }
 0x51b   : > { %v14912_v31 = vadd.f32 %v10033_v41, %v10032_v5 }
 0x51c   : > { %4452 = vmatmul.mubr.bf16.gmra.mrb[172].mxu1 %v14898_v35 }
 0x51d   : > { %4459 = vmatprep.mubr.bf16.mxu1 %v14914_v17 }
 0x51f   : > { %v10035_v12 = vpop.f32.mrb[196].mxu0 }
 0x520   : > { %v10036_v38 = vpop.f32.mrb[197].mxu0 }
 0x521   : > { %v14918_v57 = vadd.f32 %v10036_v38, %v10035_v12  ;;  %v10038_v59 = vpop.f32.mrb[198].mxu0 }
 0x522   : > { %v10039_v14 = vpop.f32.mrb[199].mxu0 }
 0x523   : > { %v14920_v37 = vadd.f32 %v10039_v14, %v10038_v59 }
 0x524   : > { %4460 = vmatmul.mubr.bf16.gmra.mrb[176].mxu1 %v14906_v47 }
 0x525   : > { %4467 = vmatprep.mubr.bf16.mxu1 %v14922_v46 }
 0x527   : > { %v10041_v36 = vpop.f32.mrb[200].mxu0 }
 0x528   : > { %v10042_v51 = vpop.f32.mrb[201].mxu0 }
 0x529   : > { %v14926_v32 = vadd.f32 %v10042_v51, %v10041_v36  ;;  %v10044_v3 = vpop.f32.mrb[202].mxu0 }
 0x52a   : > { %v10045_v55 = vpop.f32.mrb[203].mxu0 }
 0x52b   : > { %v14928_v34 = vadd.f32 %v10045_v55, %v10044_v3 }
 0x52c   : > { %4468 = vmatmul.mubr.bf16.gmra.mrb[180].mxu1 %v14914_v17 }
 0x52d   : > { %4475 = vmatprep.mubr.bf16.mxu1 %v14930_v44 }
 0x52f   : > { %v10047_v18 = vpop.f32.mrb[204].mxu0 }
 0x530   : > { %v10048_v25 = vpop.f32.mrb[205].mxu0 }
 0x531   : > { %v14934_v62 = vadd.f32 %v10048_v25, %v10047_v18  ;;  %v10050_v63 = vpop.f32.mrb[206].mxu0 }
 0x532   : > { %v10051_v54 = vpop.f32.mrb[207].mxu0 }
 0x533   : > { %v14936_v19 = vadd.f32 %v10051_v54, %v10050_v63 }
 0x534   : > { %4476 = vmatmul.mubr.bf16.gmra.mrb[184].mxu1 %v14922_v46 }
 0x535   : > { %4483 = vmatprep.mubr.bf16.mxu1 %v14938_v50 }
 0x537   : > { %v10053_v58 = vpop.f32.mrb[208].mxu0 }
 0x538   : > { %v10054_v10 = vpop.f32.mrb[209].mxu0 }
 0x539   : > { %v14942_v48 = vadd.f32 %v10054_v10, %v10053_v58  ;;  %v10056_v4 = vpop.f32.mrb[210].mxu0 }
 0x53a   : > { %v10057_v21 = vpop.f32.mrb[211].mxu0 }
 0x53b   : > { %v14944_v5 = vadd.f32 %v10057_v21, %v10056_v4 }
 0x53c   : > { %4484 = vmatmul.mubr.bf16.gmra.mrb[188].mxu1 %v14930_v44 }
 0x53d   : > { %11507 = vmatprep.mubr.bf16.mxu1 %v14814_v49 }
 0x53f   : > { %v10059_v41 = vpop.f32.mrb[212].mxu0 }
 0x540   : > { %v10060_v12 = vpop.f32.mrb[213].mxu0 }
 0x541   : > { %v14948_v38 = vadd.f32 %v10060_v12, %v10059_v41  ;;  %v10062_v11 = vpop.f32.mrb[214].mxu0 }
 0x542   : > { %v10063_v2 = vpop.f32.mrb[215].mxu0 }
 0x543   : > { %v14950_v59 = vadd.f32 %v10063_v2, %v10062_v11 }
 0x544   : > { %11508 = vmatmul.mubr.bf16.vlgmr.msra.gmra.mrb[96].mxu1 %v14821_v24 }
 0x545   : > { %11511 = vmatprep.mubr.bf16.mxu1 %v14828_v29 }
 0x547   : > { %v10065_v14 = vpop.f32.mrb[216].mxu0 }
 0x548   : > { %v10066_v36 = vpop.f32.mrb[217].mxu0 }
 0x549   : > { %v14954_v51 = vadd.f32 %v10066_v36, %v10065_v14  ;;  %v10068_v43 = vpop.f32.mrb[218].mxu0 }
 0x54a   : > { %v10069_v23 = vpop.f32.mrb[219].mxu0 }
 0x54b   : > { %v14956_v3 = vadd.f32 %v10069_v23, %v10068_v43 }
 0x54c   : > { %11512 = vmatmul.mubr.bf16.gmra.mrb[100].mxu1 %v14838_v20 }
 0x54d   : > { %11515 = vmatprep.mubr.bf16.mxu1 %v14851_v1 }
 0x54f   : > { %v10071_v49 = vpop.f32.mrb[220].mxu0 }
 0x550   : > { %v10072_v55 = vpop.f32.mrb[221].mxu0 }
 0x551   : > { %v14960_v18 = vadd.f32 %v10072_v55, %v10071_v49  ;;  %v10074_v25 = vpop.f32.mrb[222].mxu0 }
 0x552   : > { %v10075_v24 = vpop.f32.mrb[223].mxu0 }
 0x553   : > { %v14962_v26 = vadd.f32 %v10075_v24, %v10074_v25 }
 0x554   : > { %11516 = vmatmul.mubr.bf16.gmra.mrb[104].mxu1 %v14861_v8 }
 0x555   : > { %11519 = vmatprep.mubr.bf16.mxu1 %v14871_v56 }
 0x557   : > { %v10117_v29 = vpop.f32.mrb[224].mxu0 }
 0x558   : > { %v10118_v45 = vpop.f32.mrb[225].mxu0 }
 0x559   : > { %v10119_v63 = vadd.f32 %v10118_v45, %v10117_v29  ;;  %v10120_v54 = vpop.f32.mrb[226].mxu0 }
 0x55a   : > { %v10121_v58 = vpop.f32.mrb[227].mxu0 }
 0x55b   : > { %v14967_v20 = vadd.f32 %v10119_v63, %v14836_v53  ;;  %v10122_v1 = vadd.f32 %v10121_v58, %v10120_v54 }
 0x55c   : > { %11520 = vmatmul.mubr.bf16.gmra.mrb[108].mxu1 %v14881_v9 }
 0x55d   : > { %v14971_v10 = vadd.f32 %v10122_v1, %v14840_v13  ;;  %11523 = vmatprep.mubr.bf16.mxu1 %v14890_v16 }
 0x55f   : > { %v10123_v4 = vpop.f32.mrb[228].mxu0 }
 0x560   : > { %v10124_v8 = vpop.f32.mrb[229].mxu0 }
 0x561   : > { %v10125_v21 = vadd.f32 %v10124_v8, %v10123_v4  ;;  %v10126_v56 = vpop.f32.mrb[230].mxu0 }
 0x562   : > { %v10127_v41 = vpop.f32.mrb[231].mxu0 }
 0x563   : > { %v14975_v12 = vadd.f32 %v10125_v21, %v14847_v22  ;;  %v10128_v11 = vadd.f32 %v10127_v41, %v10126_v56 }
 0x564   : > { %11524 = vmatmul.mubr.bf16.gmra.mrb[112].mxu1 %v14898_v35 }
 0x565   : > { %v14979_v53 = vadd.f32 %v10128_v11, %v14849_v40  ;;  %11527 = vmatprep.mubr.bf16.mxu1 %v14906_v47 }
 0x567   : > { %v10129_v13 = vpop.f32.mrb[232].mxu0 }
 0x568   : > { %v10130_v9 = vpop.f32.mrb[233].mxu0 }
 0x569   : > { %v10131_v2 = vadd.f32 %v10130_v9, %v10129_v13  ;;  %v10132_v16 = vpop.f32.mrb[234].mxu0 }
 0x56a   : > { %v10133_v14 = vpop.f32.mrb[235].mxu0 }
 0x56b   : > { %v14983_v36 = vadd.f32 %v10131_v2, %v14857_v28  ;;  %v10134_v43 = vadd.f32 %v10133_v14, %v10132_v16 }
 0x56c   : > { %11528 = vmatmul.mubr.bf16.gmra.mrb[116].mxu1 %v14914_v17  ;;  %v4120_v17 = vld [vmem:[#allocation3 + $0x1a2] sm:$0xff] }
 0x56d   : > { %v14987_v22 = vadd.f32 %v10134_v43, %v14859_v61  ;;  %11531 = vmatprep.mubr.bf16.mxu1 %v14922_v46  ;;  %v4119_v61 = vld [vmem:[#allocation3 + $0x19a] sm:$0xff] }
 0x56e   : > { %v4138_v29 = vpack.c.bf16 %v4120_v17, %v4119_v61 }
 0x56f   : > { %v10135_v40 = vpop.f32.mrb[236].mxu0 }
 0x570   : > { %v10136_v35 = vpop.f32.mrb[237].mxu0 }
 0x571   : > { %v10137_v23 = vadd.f32 %v10136_v35, %v10135_v40  ;;  %v10138_v47 = vpop.f32.mrb[238].mxu0 }
 0x572   : > { %v10139_v49 = vpop.f32.mrb[239].mxu0 }
 0x573   : > { %v14991_v55 = vadd.f32 %v10137_v23, %v14867_v0  ;;  %v10140_v25 = vadd.f32 %v10139_v49, %v10138_v47 }
 0x574   : > { %11532 = vmatmul.mubr.bf16.gmra.mrb[120].mxu1 %v14930_v44 }
 0x575   : > { %v14995_v28 = vadd.f32 %v10140_v25, %v14869_v7  ;;  %11535 = vmatprep.mubr.bf16.mxu1 %v14938_v50 }
 0x577   : > { %v10141_v24 = vpop.f32.mrb[240].mxu0 }
 0x578   : > { %v10142_v46 = vpop.f32.mrb[241].mxu0 }
 0x579   : > { %v10143_v45 = vadd.f32 %v10142_v46, %v10141_v24  ;;  %v10144_v63 = vpop.f32.mrb[242].mxu0 }
 0x57a   : > { %v10145_v54 = vpop.f32.mrb[243].mxu0 }
 0x57b   : > { %v14999_v58 = vadd.f32 %v10143_v45, %v14877_v39  ;;  %v10146_v0 = vadd.f32 %v10145_v54, %v10144_v63 }
 0x57c   : > { %11536 = vmatmul.mubr.bf16.gmra.mrb[124].mxu1 %v4138_v29 }
 0x57d   : > { %v15002_v44 = vadd.f32 %v10146_v0, %v14879_v42 }
 0x57f   : > { %v10147_v7 = vpop.f32.mrb[244].mxu0 }
 0x580   : > { %v10148_v1 = vpop.f32.mrb[245].mxu0 }
 0x581   : > { %v10149_v4 = vadd.f32 %v10148_v1, %v10147_v7  ;;  %v10150_v50 = vpop.f32.mrb[246].mxu0 }
 0x582   : > { %v10151_v8 = vpop.f32.mrb[247].mxu0 }
 0x583   : > { %v15005_v21 = vadd.f32 %v10149_v4, %v14886_v27  ;;  %v10152_v56 = vadd.f32 %v10151_v8, %v10150_v50 }
 0x585   : > { %v15008_v41 = vadd.f32 %v10152_v56, %v14888_v33 }
 0x587   : > { %v10153_v11 = vpop.f32.mrb[248].mxu0 }
 0x588   : > { %v10154_v39 = vpop.f32.mrb[249].mxu0 }
 0x589   : > { %v10155_v13 = vadd.f32 %v10154_v39, %v10153_v11  ;;  %v10156_v9 = vpop.f32.mrb[250].mxu0 }
 0x58a   : > { %v10157_v2 = vpop.f32.mrb[251].mxu0 }
 0x58b   : > { %v15011_v42 = vadd.f32 %v10155_v13, %v14894_v6  ;;  %v10158_v16 = vadd.f32 %v10157_v2, %v10156_v9 }
 0x58d   : > { %v15014_v14 = vadd.f32 %v10158_v16, %v14896_v30 }
 0x58f   : > { %v10159_v43 = vpop.f32.mrb[252].mxu0 }
 0x590   : > { %v10160_v40 = vpop.f32.mrb[253].mxu0 }
 0x591   : > { %v10161_v27 = vadd.f32 %v10160_v40, %v10159_v43  ;;  %v10162_v35 = vpop.f32.mrb[254].mxu0 }
 0x592   : > { %v10163_v23 = vpop.f32.mrb[255].mxu0 }
 0x593   : > { %v15017_v33 = vadd.f32 %v10161_v27, %v14902_v60  ;;  %v10164_v47 = vadd.f32 %v10163_v23, %v10162_v35 }
 0x595   : > { %v15020_v49 = vadd.f32 %v10164_v47, %v14904_v52 }
 0x597   : > { %v10165_v25 = vpop.f32.mrb[0].mxu0  ;;  %v10253_v61 = vpop.f32.mrb[128].mxu1 }
 0x598   : > { %v10166_v6 = vpop.f32.mrb[1].mxu0  ;;  %v10254_v17 = vpop.f32.mrb[129].mxu1 }
 0x599   : > { %v10167_v24 = vadd.f32 %v10166_v6, %v10165_v25  ;;  %v10255_v46 = vadd.f32 %v10254_v17, %v10253_v61  ;;  %v10168_v30 = vpop.f32.mrb[2].mxu0  ;;  %v10256_v29 = vpop.f32.mrb[130].mxu1 }
 0x59a   : > { %v10169_v45 = vpop.f32.mrb[3].mxu0  ;;  %v10257_v63 = vpop.f32.mrb[131].mxu1 }
 0x59b   : > { %v15023_v54 = vadd.f32 %v10167_v24, %v14910_v15  ;;  %v10170_v0 = vadd.f32 %v10169_v45, %v10168_v30  ;;  %v10258_v60 = vadd.f32 %v10257_v63, %v10256_v29  ;;  %v15026_v7 = vadd.f32 %v14967_v20, %v10255_v46 }
 0x59d   : > { %v15029_v52 = vadd.f32 %v10170_v0, %v14912_v31  ;;  %v15032_v1 = vadd.f32 %v14971_v10, %v10258_v60 }
 0x59f   : > { %v10171_v4 = vpop.f32.mrb[4].mxu0  ;;  %v10259_v50 = vpop.f32.mrb[132].mxu1 }
 0x5a0   : > { %v10172_v8 = vpop.f32.mrb[5].mxu0  ;;  %v10260_v56 = vpop.f32.mrb[133].mxu1 }
 0x5a1   : > { %v10173_v11 = vadd.f32 %v10172_v8, %v10171_v4  ;;  %v10261_v39 = vadd.f32 %v10260_v56, %v10259_v50  ;;  %v10174_v13 = vpop.f32.mrb[6].mxu0  ;;  %v10262_v15 = vpop.f32.mrb[134].mxu1 }
 0x5a2   : > { %v10175_v9 = vpop.f32.mrb[7].mxu0  ;;  %v10263_v2 = vpop.f32.mrb[135].mxu1 }
 0x5a3   : > { %v15035_v16 = vadd.f32 %v10173_v11, %v14918_v57  ;;  %v10176_v20 = vadd.f32 %v10175_v9, %v10174_v13  ;;  %v10264_v43 = vadd.f32 %v10263_v2, %v10262_v15  ;;  %v15038_v31 = vadd.f32 %v14975_v12, %v10261_v39 }
 0x5a5   : > { %v15041_v10 = vadd.f32 %v10176_v20, %v14920_v37  ;;  %v15044_v40 = vadd.f32 %v14979_v53, %v10264_v43 }
 0x5a7   : > { %v10177_v27 = vpop.f32.mrb[8].mxu0  ;;  %v10265_v35 = vpop.f32.mrb[136].mxu1 }
 0x5a8   : > { %v10178_v23 = vpop.f32.mrb[9].mxu0  ;;  %v10266_v47 = vpop.f32.mrb[137].mxu1 }
 0x5a9   : > { %v10179_v25 = vadd.f32 %v10178_v23, %v10177_v27  ;;  %v10267_v61 = vadd.f32 %v10266_v47, %v10265_v35  ;;  %v10180_v6 = vpop.f32.mrb[10].mxu0  ;;  %v10268_v57 = vpop.f32.mrb[138].mxu1 }
 0x5aa   : > { %v10181_v17 = vpop.f32.mrb[11].mxu0  ;;  %v10269_v24 = vpop.f32.mrb[139].mxu1 }
 0x5ab   : > { %v15047_v46 = vadd.f32 %v10179_v25, %v14926_v32  ;;  %v10182_v12 = vadd.f32 %v10181_v17, %v10180_v6  ;;  %v10270_v30 = vadd.f32 %v10269_v24, %v10268_v57  ;;  %v15050_v37 = vadd.f32 %v14983_v36, %v10267_v61 }
 0x5ad   : > { %v15053_v53 = vadd.f32 %v10182_v12, %v14928_v34  ;;  %v15056_v29 = vadd.f32 %v14987_v22, %v10270_v30 }
 0x5af   : > { %v10183_v45 = vpop.f32.mrb[12].mxu0  ;;  %v10271_v63 = vpop.f32.mrb[140].mxu1 }
 0x5b0   : > { %v10184_v0 = vpop.f32.mrb[13].mxu0  ;;  %v10272_v60 = vpop.f32.mrb[141].mxu1 }
 0x5b1   : > { %v10185_v4 = vadd.f32 %v10184_v0, %v10183_v45  ;;  %v10273_v50 = vadd.f32 %v10272_v60, %v10271_v63  ;;  %v10186_v8 = vpop.f32.mrb[14].mxu0  ;;  %v10274_v32 = vpop.f32.mrb[142].mxu1 }
 0x5b2   : > { %v10187_v56 = vpop.f32.mrb[15].mxu0  ;;  %v10275_v11 = vpop.f32.mrb[143].mxu1 }
 0x5b3   : > { %v15059_v39 = vadd.f32 %v10185_v4, %v14934_v62  ;;  %v10188_v36 = vadd.f32 %v10187_v56, %v10186_v8  ;;  %v10276_v13 = vadd.f32 %v10275_v11, %v10274_v32  ;;  %v15062_v34 = vadd.f32 %v14991_v55, %v10273_v50 }
 0x5b5   : > { %v15065_v22 = vadd.f32 %v10188_v36, %v14936_v19  ;;  %v15068_v15 = vadd.f32 %v14995_v28, %v10276_v13 }
 0x5b7   : > { %v10189_v9 = vpop.f32.mrb[16].mxu0  ;;  %v10277_v2 = vpop.f32.mrb[144].mxu1 }
 0x5b8   : > { %v10190_v20 = vpop.f32.mrb[17].mxu0  ;;  %v10278_v43 = vpop.f32.mrb[145].mxu1 }
 0x5b9   : > { %v10191_v27 = vadd.f32 %v10190_v20, %v10189_v9  ;;  %v10279_v35 = vadd.f32 %v10278_v43, %v10277_v2  ;;  %v10192_v23 = vpop.f32.mrb[18].mxu0  ;;  %v10280_v62 = vpop.f32.mrb[146].mxu1 }
 0x5ba   : > { %v10193_v47 = vpop.f32.mrb[19].mxu0  ;;  %v10281_v25 = vpop.f32.mrb[147].mxu1 }
 0x5bb   : > { %v15071_v61 = vadd.f32 %v10191_v27, %v14942_v48  ;;  %v10194_v55 = vadd.f32 %v10193_v47, %v10192_v23  ;;  %v10282_v6 = vadd.f32 %v10281_v25, %v10280_v62  ;;  %v15074_v19 = vadd.f32 %v14999_v58, %v10279_v35 }
 0x5bd   : > { %v15077_v28 = vadd.f32 %v10194_v55, %v14944_v5  ;;  %v15080_v57 = vadd.f32 %v15002_v44, %v10282_v6 }
 0x5bf   : > { %v10195_v17 = vpop.f32.mrb[20].mxu0  ;;  %v10283_v24 = vpop.f32.mrb[148].mxu1 }
 0x5c0   : > { %v10196_v12 = vpop.f32.mrb[21].mxu0  ;;  %v10284_v30 = vpop.f32.mrb[149].mxu1 }
 0x5c1   : > { %v10197_v45 = vadd.f32 %v10196_v12, %v10195_v17  ;;  %v10285_v63 = vadd.f32 %v10284_v30, %v10283_v24  ;;  %v10198_v0 = vpop.f32.mrb[22].mxu0  ;;  %v10286_v48 = vpop.f32.mrb[150].mxu1 }
 0x5c2   : > { %v10199_v60 = vpop.f32.mrb[23].mxu0  ;;  %v10287_v4 = vpop.f32.mrb[151].mxu1 }
 0x5c3   : > { %v15083_v50 = vadd.f32 %v10197_v45, %v14948_v38  ;;  %v10200_v58 = vadd.f32 %v10199_v60, %v10198_v0  ;;  %v10288_v8 = vadd.f32 %v10287_v4, %v10286_v48  ;;  %v15086_v5 = vadd.f32 %v15005_v21, %v10285_v63 }
 0x5c5   : > { %v15089_v44 = vadd.f32 %v10200_v58, %v14950_v59  ;;  %v15092_v32 = vadd.f32 %v15008_v41, %v10288_v8 }
 0x5c7   : > { %v10201_v56 = vpop.f32.mrb[24].mxu0  ;;  %v10289_v11 = vpop.f32.mrb[152].mxu1 }
 0x5c8   : > { %v10202_v36 = vpop.f32.mrb[25].mxu0  ;;  %v10290_v13 = vpop.f32.mrb[153].mxu1 }
 0x5c9   : > { %v10203_v9 = vadd.f32 %v10202_v36, %v10201_v56  ;;  %v10291_v2 = vadd.f32 %v10290_v13, %v10289_v11  ;;  %v10204_v20 = vpop.f32.mrb[26].mxu0  ;;  %v10292_v38 = vpop.f32.mrb[154].mxu1 }
 0x5ca   : > { %v10205_v43 = vpop.f32.mrb[27].mxu0  ;;  %v10293_v27 = vpop.f32.mrb[155].mxu1 }
 0x5cb   : > { %v15095_v35 = vadd.f32 %v10203_v9, %v14954_v51  ;;  %v10206_v21 = vadd.f32 %v10205_v43, %v10204_v20  ;;  %v10294_v23 = vadd.f32 %v10293_v27, %v10292_v38  ;;  %v15098_v59 = vadd.f32 %v15011_v42, %v10291_v2 }
 0x5cd   : > { %v15101_v41 = vadd.f32 %v10206_v21, %v14956_v3  ;;  %v15104_v62 = vadd.f32 %v15014_v14, %v10294_v23 }
 0x5cf   : > { %v10207_v47 = vpop.f32.mrb[28].mxu0  ;;  %v10295_v25 = vpop.f32.mrb[156].mxu1 }
 0x5d0   : > { %v10208_v55 = vpop.f32.mrb[29].mxu0  ;;  %v10296_v6 = vpop.f32.mrb[157].mxu1 }
 0x5d1   : > { %v10209_v51 = vadd.f32 %v10208_v55, %v10207_v47  ;;  %v10297_v17 = vadd.f32 %v10296_v6, %v10295_v25  ;;  %v10210_v24 = vpop.f32.mrb[30].mxu0  ;;  %v10298_v12 = vpop.f32.mrb[158].mxu1 }
 0x5d2   : > { %v10211_v30 = vpop.f32.mrb[31].mxu0  ;;  %v10299_v42 = vpop.f32.mrb[159].mxu1 }
 0x5d3   : > { %v15107_v45 = vadd.f32 %v10209_v51, %v14960_v18  ;;  %v10212_v3 = vadd.f32 %v10211_v30, %v10210_v24  ;;  %v10300_v63 = vadd.f32 %v10299_v42, %v10298_v12  ;;  %v15110_v14 = vadd.f32 %v15017_v33, %v10297_v17 }
 0x5d5   : > { %v15113_v0 = vadd.f32 %v10212_v3, %v14962_v26  ;;  %v15116_v48 = vadd.f32 %v15020_v49, %v10300_v63 }
 0x5d7   : > { %v10301_v60 = vpop.f32.mrb[160].mxu1 }
 0x5d8   : > { %v10302_v4 = vpop.f32.mrb[161].mxu1 }
 0x5d9   : > { %v10303_v18 = vadd.f32 %v10302_v4, %v10301_v60  ;;  %v10304_v58 = vpop.f32.mrb[162].mxu1 }
 0x5da   : > { %v10305_v8 = vpop.f32.mrb[163].mxu1 }
 0x5db   : > { %v10306_v56 = vadd.f32 %v10305_v8, %v10304_v58  ;;  %v15122_v33 = vadd.f32 %v15023_v54, %v10303_v18 }
 0x5dd   : > { %v15125_v26 = vadd.f32 %v15029_v52, %v10306_v56 }
 0x5df   : > { %v10307_v49 = vpop.f32.mrb[164].mxu1 }
 0x5e0   : > { %v10308_v11 = vpop.f32.mrb[165].mxu1 }
 0x5e1   : > { %v10309_v36 = vadd.f32 %v10308_v11, %v10307_v49  ;;  %v10310_v13 = vpop.f32.mrb[166].mxu1 }
 0x5e2   : > { %v10311_v9 = vpop.f32.mrb[167].mxu1 }
 0x5e3   : > { %v10312_v2 = vadd.f32 %v10311_v9, %v10310_v13  ;;  %v15130_v20 = vadd.f32 %v15035_v16, %v10309_v36 }
 0x5e5   : > { %v15133_v38 = vadd.f32 %v15041_v10, %v10312_v2 }
 0x5e7   : > { %v10313_v54 = vpop.f32.mrb[168].mxu1 }
 0x5e8   : > { %v10314_v43 = vpop.f32.mrb[169].mxu1 }
 0x5e9   : > { %v10315_v27 = vadd.f32 %v10314_v43, %v10313_v54  ;;  %v10316_v21 = vpop.f32.mrb[170].mxu1 }
 0x5ea   : > { %v10317_v52 = vpop.f32.mrb[171].mxu1 }
 0x5eb   : > { %v10318_v23 = vadd.f32 %v10317_v52, %v10316_v21  ;;  %v15136_v47 = vadd.f32 %v15047_v46, %v10315_v27 }
 0x5ed   : > { %v15139_v25 = vadd.f32 %v15053_v53, %v10318_v23 }
 0x5ef   : > { %v10319_v55 = vpop.f32.mrb[172].mxu1 }
 0x5f0   : > { %v10320_v6 = vpop.f32.mrb[173].mxu1 }
 0x5f1   : > { %v10321_v51 = vadd.f32 %v10320_v6, %v10319_v55  ;;  %v10322_v16 = vpop.f32.mrb[174].mxu1 }
 0x5f2   : > { %v10323_v17 = vpop.f32.mrb[175].mxu1 }
 0x5f3   : > { %v10324_v24 = vadd.f32 %v10323_v17, %v10322_v16  ;;  %v15142_v10 = vadd.f32 %v15059_v39, %v10321_v51  ;;  %v15173_v51 = vld [vmem:[%s520_s16 + $0x1] ss:$0 sm:$0xff] }
 0x5f4   : > { %v4724_v17 = vld [vmem:[#allocation2 + $0x31] sm:$0xff] }
 0x5f5   : > { %v15145_v12 = vadd.f32 %v15065_v22, %v10324_v24 }
 0x5f7   : > { %v10325_v30 = vpop.f32.mrb[176].mxu1 }
 0x5f8   : > { %v10326_v42 = vpop.f32.mrb[177].mxu1 }
 0x5f9   : > { %v10327_v3 = vadd.f32 %v10326_v42, %v10325_v30  ;;  %v10328_v46 = vpop.f32.mrb[178].mxu1 }
 0x5fa   : > { %v10329_v63 = vpop.f32.mrb[179].mxu1 }
 0x5fb   : > { %v10330_v60 = vadd.f32 %v10329_v63, %v10328_v46  ;;  %v15148_v53 = vadd.f32 %v15071_v61, %v10327_v3  ;;  %v4722_v3 = vld [vmem:[#allocation2 + $0x19] sm:$0xff] }
 0x5fc   : > { %v4725_v63 = vld [vmem:[#allocation2 + $0x39] sm:$0xff] }
 0x5fd   : > { %v15151_v4 = vadd.f32 %v15077_v28, %v10330_v60 }
 0x5ff   : > { %v10331_v18 = vpop.f32.mrb[180].mxu1 }
 0x600   : > { %v10332_v58 = vpop.f32.mrb[181].mxu1 }
 0x601   : > { %v10333_v8 = vadd.f32 %v10332_v58, %v10331_v18  ;;  %v10334_v39 = vpop.f32.mrb[182].mxu1 }
 0x602   : > { %v10335_v56 = vpop.f32.mrb[183].mxu1 }
 0x603   : > { %v10336_v49 = vadd.f32 %v10335_v56, %v10334_v39  ;;  %v15154_v22 = vadd.f32 %v15083_v50, %v10333_v8 }
 0x605   : > { %v15157_v11 = vadd.f32 %v15089_v44, %v10336_v49 }
 0x607   : > { %v10337_v36 = vpop.f32.mrb[184].mxu1 }
 0x608   : > { %v10338_v13 = vpop.f32.mrb[185].mxu1 }
 0x609   : > { %v10339_v61 = vadd.f32 %v10338_v13, %v10337_v36  ;;  %v10340_v9 = vpop.f32.mrb[186].mxu1 }
 0x60a   : > { %v10341_v2 = vpop.f32.mrb[187].mxu1 }
 0x60b   : > { %v10342_v28 = vadd.f32 %v10341_v2, %v10340_v9  ;;  %v15160_v54 = vadd.f32 %v15095_v35, %v10339_v61 }
 0x60d   : > { %v15163_v43 = vadd.f32 %v15101_v41, %v10342_v28 }
 0x60f   : > { %v10343_v27 = vpop.f32.mrb[188].mxu1 }
 0x610   : > { %v10344_v21 = vpop.f32.mrb[189].mxu1 }
 0x611   : > { %v10345_v50 = vadd.f32 %v10344_v21, %v10343_v27  ;;  %v10346_v52 = vpop.f32.mrb[190].mxu1 }
 0x612   : > { %v10347_v23 = vpop.f32.mrb[191].mxu1 }
 0x613   : > { %v10348_v44 = vadd.f32 %v10347_v23, %v10346_v52  ;;  %v15166_v55 = vadd.f32 %v15107_v45, %v10345_v50  ;;  %v4726_v50 = vld [vmem:[#allocation2 + $0x49] sm:$0xff] }
 0x615   : > { %v15169_v6 = vadd.f32 %v15113_v0, %v10348_v44 }
 0x617   : > { %v11509_v35 = vpop.f32.mrb[96].mxu1 }
 0x618   : > { %v12011_v16 = vadd.f32 %v15038_v31, %v11509_v35  ;;  %v4526_v41 = vpop.f32.mrb[97].mxu1  ;;  %v4723_v31 = vld [vmem:[#allocation2 + $0x21] sm:$0xff]  ;;  %v4729_v35 = vld [vmem:[#allocation2 + $0x69] sm:$0xff] }
 0x619   : > { %v12014_v24 = vadd.f32 %v15026_v7, %v4526_v41  ;;  %v11510_v30 = vpop.f32.mrb[98].mxu1 }
 0x61a   : > { %v4691_v42 = vadd.f32 %v12011_v16, %v15173_v51  ;;  %v12017_v45 = vadd.f32 %v15044_v40, %v11510_v30  ;;  %v4529_v46 = vpop.f32.mrb[99].mxu1 }
 0x61b   : > { %v4689_v0 = vadd.f32 %v12014_v24, %v15173_v51  ;;  %v12020_v60 = vadd.f32 %v15032_v1, %v4529_v46  ;;  %v4728_v1 = vld [vmem:[#allocation2 + $0x61] sm:$0xff] }
 0x61c   : > { %v4756_v18 = vadd.f32 %v4724_v17, %v4691_v42  ;;  %v4692_v58 = vadd.f32 %v12017_v45, %v15173_v51  ;;  %v4727_v17 = vld [vmem:[#allocation2 + $0x51] sm:$0xff] }
 0x61d   : > { %v4754_v8 = vadd.f32 %v4722_v3, %v4689_v0  ;;  %v4690_v39 = vadd.f32 %v12020_v60, %v15173_v51 }
 0x61e   : > { %v4788_v7 = vmax.f32 %v4756_v18, 0.0  ;;  %v4757_v56 = vadd.f32 %v4725_v63, %v4692_v58 }
 0x61f   : > { %v4786_v49 = vmax.f32 %v4754_v8, 0.0  ;;  %v4755_v36 = vadd.f32 %v4723_v31, %v4690_v39  ;;  %v11513_v13 = vpop.f32.mrb[100].mxu1  ;;  %v4730_v8 = vld [vmem:[#allocation2 + $0x79] sm:$0xff] }
 0x620   : > { %4820 = vst [vmem:[#allocation2 + $0x31] sm:$0xff] %v4788_v7  ;;  %v4789_v40 = vmax.f32 %v4757_v56, 0.0  ;;  %v12023_v61 = vadd.f32 %v15062_v34, %v11513_v13  ;;  %v4542_v9 = vpop.f32.mrb[101].mxu1 }
 0x621   : > { %4818 = vst [vmem:[#allocation2 + $0x19] sm:$0xff] %v4786_v49  ;;  %v4787_v2 = vmax.f32 %v4755_v36, 0.0  ;;  %v12026_v28 = vadd.f32 %v15050_v37, %v4542_v9  ;;  %v11514_v27 = vpop.f32.mrb[102].mxu1  ;;  %v4733_v49 = vld [vmem:[#allocation2 + $0x99] sm:$0xff] }
 0x622   : > { %4821 = vst [vmem:[#allocation2 + $0x39] sm:$0xff] %v4789_v40  ;;  %v4695_v21 = vadd.f32 %v12023_v61, %v15173_v51  ;;  %v12029_v52 = vadd.f32 %v15068_v15, %v11514_v27  ;;  %v4545_v23 = vpop.f32.mrb[103].mxu1  ;;  %v4731_v40 = vld [vmem:[#allocation2 + $0x81] sm:$0xff] }
 0x623   : > { %4819 = vst [vmem:[#allocation2 + $0x21] sm:$0xff] %v4787_v2  ;;  %v4693_v44 = vadd.f32 %v12026_v28, %v15173_v51  ;;  %v12032_v34 = vadd.f32 %v15056_v29, %v4545_v23  ;;  %v4732_v29 = vld [vmem:[#allocation2 + $0x91] sm:$0xff] }
 0x624   : > { %v4760_v16 = vadd.f32 %v4728_v1, %v4695_v21  ;;  %v4696_v41 = vadd.f32 %v12029_v52, %v15173_v51 }
 0x625   : > { %v4758_v24 = vadd.f32 %v4726_v50, %v4693_v44  ;;  %v4694_v37 = vadd.f32 %v12032_v34, %v15173_v51  ;;  %v4734_v34 = vld [vmem:[#allocation2 + $0xa9] sm:$0xff] }
 0x626   : > { %v4792_v30 = vmax.f32 %v4760_v16, 0.0  ;;  %v4761_v42 = vadd.f32 %v4729_v35, %v4696_v41 }
 0x627   : > { %v4790_v3 = vmax.f32 %v4758_v24, 0.0  ;;  %v4759_v45 = vadd.f32 %v4727_v17, %v4694_v37  ;;  %v11517_v46 = vpop.f32.mrb[104].mxu1  ;;  %v4737_v24 = vld [vmem:[#allocation2 + $0xc9] sm:$0xff] }
 0x628   : > { %4824 = vst [vmem:[#allocation2 + $0x61] sm:$0xff] %v4792_v30  ;;  %v4793_v15 = vmax.f32 %v4761_v42, 0.0  ;;  %v12035_v0 = vadd.f32 %v15086_v5, %v11517_v46  ;;  %v4558_v63 = vpop.f32.mrb[105].mxu1  ;;  %v4735_v42 = vld [vmem:[#allocation2 + $0xb1] sm:$0xff] }
 0x629   : > { %4822 = vst [vmem:[#allocation2 + $0x49] sm:$0xff] %v4790_v3  ;;  %v4791_v60 = vmax.f32 %v4759_v45, 0.0  ;;  %v12038_v18 = vadd.f32 %v15074_v19, %v4558_v63  ;;  %v11518_v58 = vpop.f32.mrb[106].mxu1 }
 0x62a   : > { %4825 = vst [vmem:[#allocation2 + $0x69] sm:$0xff] %v4793_v15  ;;  %v4699_v31 = vadd.f32 %v12035_v0, %v15173_v51  ;;  %v12041_v39 = vadd.f32 %v15092_v32, %v11518_v58  ;;  %v4561_v7 = vpop.f32.mrb[107].mxu1 }
 0x62b   : > { %4823 = vst [vmem:[#allocation2 + $0x51] sm:$0xff] %v4791_v60  ;;  %v4697_v56 = vadd.f32 %v12038_v18, %v15173_v51  ;;  %v12044_v5 = vadd.f32 %v15080_v57, %v4561_v7  ;;  %v4736_v57 = vld [vmem:[#allocation2 + $0xc1] sm:$0xff] }
 0x62c   : > { %v4764_v36 = vadd.f32 %v4732_v29, %v4699_v31  ;;  %v4700_v13 = vadd.f32 %v12041_v39, %v15173_v51  ;;  %v4738_v39 = vld [vmem:[#allocation2 + $0xd9] sm:$0xff] }
 0x62d   : > { %v4762_v61 = vadd.f32 %v4730_v8, %v4697_v56  ;;  %v4698_v19 = vadd.f32 %v12044_v5, %v15173_v51  ;;  %v4741_v5 = vld [vmem:[#allocation2 + $0xf9] sm:$0xff] }
 0x62e   : > { %v4796_v9 = vmax.f32 %v4764_v36, 0.0  ;;  %v4765_v2 = vadd.f32 %v4733_v49, %v4700_v13 }
 0x62f   : > { %v4794_v1 = vmax.f32 %v4762_v61, 0.0  ;;  %v4763_v28 = vadd.f32 %v4731_v40, %v4698_v19  ;;  %v11521_v27 = vpop.f32.mrb[108].mxu1  ;;  %v4739_v40 = vld [vmem:[#allocation2 + $0xe1] sm:$0xff] }
 0x630   : > { %4828 = vst [vmem:[#allocation2 + $0x91] sm:$0xff] %v4796_v9  ;;  %v4797_v32 = vmax.f32 %v4765_v2, 0.0  ;;  %v12047_v21 = vadd.f32 %v15110_v14, %v11521_v27  ;;  %v4574_v50 = vpop.f32.mrb[109].mxu1 }
 0x631   : > { %4826 = vst [vmem:[#allocation2 + $0x79] sm:$0xff] %v4794_v1  ;;  %v4795_v52 = vmax.f32 %v4763_v28, 0.0  ;;  %v12050_v23 = vadd.f32 %v15098_v59, %v4574_v50  ;;  %v11522_v44 = vpop.f32.mrb[110].mxu1 }
 0x632   : > { %4829 = vst [vmem:[#allocation2 + $0x99] sm:$0xff] %v4797_v32  ;;  %v4703_v35 = vadd.f32 %v12047_v21, %v15173_v51  ;;  %v12053_v16 = vadd.f32 %v15116_v48, %v11522_v44  ;;  %v4577_v41 = vpop.f32.mrb[111].mxu1 }
 0x633   : > { %4827 = vst [vmem:[#allocation2 + $0x81] sm:$0xff] %v4795_v52  ;;  %v4701_v17 = vadd.f32 %v12050_v23, %v15173_v51  ;;  %v12056_v14 = vadd.f32 %v15104_v62, %v4577_v41  ;;  %v4740_v62 = vld [vmem:[#allocation2 + $0xf1] sm:$0xff]  ;;  %v4742_v23 = vld [vmem:[#allocation2 + $0x109] sm:$0xff] }
 0x634   : > { %v4768_v37 = vadd.f32 %v4736_v57, %v4703_v35  ;;  %v4704_v30 = vadd.f32 %v12053_v16, %v15173_v51  ;;  %v4745_v16 = vld [vmem:[#allocation2 + $0x129] sm:$0xff] }
 0x635   : > { %v4766_v3 = vadd.f32 %v4734_v34, %v4701_v17  ;;  %v4702_v59 = vadd.f32 %v12056_v14, %v15173_v51 }
 0x636   : > { %v4800_v45 = vmax.f32 %v4768_v37, 0.0  ;;  %v4769_v46 = vadd.f32 %v4737_v24, %v4704_v30  ;;  %v4743_v24 = vld [vmem:[#allocation2 + $0x111] sm:$0xff] }
 0x637   : > { %v4798_v15 = vmax.f32 %v4766_v3, 0.0  ;;  %v4767_v0 = vadd.f32 %v4735_v42, %v4702_v59  ;;  %v11525_v63 = vpop.f32.mrb[112].mxu1 }
 0x638   : > { %4832 = vst [vmem:[#allocation2 + $0xc1] sm:$0xff] %v4800_v45  ;;  %v4801_v48 = vmax.f32 %v4769_v46, 0.0  ;;  %v12059_v60 = vadd.f32 %v15130_v20, %v11525_v63  ;;  %v4590_v29 = vpop.f32.mrb[113].mxu1 }
 0x639   : > { %4830 = vst [vmem:[#allocation2 + $0xa9] sm:$0xff] %v4798_v15  ;;  %v4799_v18 = vmax.f32 %v4767_v0, 0.0  ;;  %v12062_v58 = vadd.f32 %v15122_v33, %v4590_v29  ;;  %v11526_v31 = vpop.f32.mrb[114].mxu1 }
 0x63a   : > { %4833 = vst [vmem:[#allocation2 + $0xc9] sm:$0xff] %v4801_v48  ;;  %v4707_v8 = vadd.f32 %v12059_v60, %v15173_v51  ;;  %v12065_v7 = vadd.f32 %v15133_v38, %v11526_v31  ;;  %v4593_v56 = vpop.f32.mrb[115].mxu1  ;;  %v4746_v60 = vld [vmem:[#allocation2 + $0x139] sm:$0xff] }
 0x63b   : > { %4831 = vst [vmem:[#allocation2 + $0xb1] sm:$0xff] %v4799_v18  ;;  %v4705_v49 = vadd.f32 %v12062_v58, %v15173_v51  ;;  %v12068_v20 = vadd.f32 %v15125_v26, %v4593_v56  ;;  %v4744_v26 = vld [vmem:[#allocation2 + $0x121] sm:$0xff]  ;;  %v4749_v58 = vld [vmem:[#allocation2 + $0x159] sm:$0xff] }
 0x63c   : > { %v4772_v36 = vadd.f32 %v4740_v62, %v4707_v8  ;;  %v4708_v13 = vadd.f32 %v12065_v7, %v15173_v51 }
 0x63d   : > { %v4770_v61 = vadd.f32 %v4738_v39, %v4705_v49  ;;  %v4706_v33 = vadd.f32 %v12068_v20, %v15173_v51  ;;  %v4747_v39 = vld [vmem:[#allocation2 + $0x141] sm:$0xff] }
 0x63e   : > { %v4804_v19 = vmax.f32 %v4772_v36, 0.0  ;;  %v4773_v9 = vadd.f32 %v4741_v5, %v4708_v13 }
 0x63f   : > { %v4802_v2 = vmax.f32 %v4770_v61, 0.0  ;;  %v4771_v1 = vadd.f32 %v4739_v40, %v4706_v33  ;;  %v11529_v28 = vpop.f32.mrb[116].mxu1 }
 0x640   : > { %4836 = vst [vmem:[#allocation2 + $0xf1] sm:$0xff] %v4804_v19  ;;  %v4805_v38 = vmax.f32 %v4773_v9, 0.0  ;;  %v12071_v27 = vadd.f32 %v15142_v10, %v11529_v28  ;;  %v4606_v32 = vpop.f32.mrb[117].mxu1 }
 0x641   : > { %4834 = vst [vmem:[#allocation2 + $0xd9] sm:$0xff] %v4802_v2  ;;  %v4803_v21 = vmax.f32 %v4771_v1, 0.0  ;;  %v12074_v50 = vadd.f32 %v15136_v47, %v4606_v32  ;;  %v11530_v52 = vpop.f32.mrb[118].mxu1  ;;  %v4750_v2 = vld [vmem:[#allocation2 + $0x169] sm:$0xff] }
 0x642   : > { %4837 = vst [vmem:[#allocation2 + $0xf9] sm:$0xff] %v4805_v38  ;;  %v4711_v57 = vadd.f32 %v12071_v27, %v15173_v51  ;;  %v12077_v44 = vadd.f32 %v15145_v12, %v11530_v52  ;;  %v4609_v35 = vpop.f32.mrb[119].mxu1  ;;  %v4753_v27 = vld [vmem:[#allocation2 + $0x189] sm:$0xff] }
 0x643   : > { %4835 = vst [vmem:[#allocation2 + $0xe1] sm:$0xff] %v4803_v21  ;;  %v4709_v34 = vadd.f32 %v12074_v50, %v15173_v51  ;;  %v12080_v10 = vadd.f32 %v15139_v25, %v4609_v35  ;;  %v4748_v25 = vld [vmem:[#allocation2 + $0x151] sm:$0xff] }
 0x644   : > { %v4776_v41 = vadd.f32 %v4744_v26, %v4711_v57  ;;  %v4712_v17 = vadd.f32 %v12077_v44, %v15173_v51  ;;  %v4751_v26 = vld [vmem:[#allocation2 + $0x171] sm:$0xff] }
 0x645   : > { %v4774_v14 = vadd.f32 %v4742_v23, %v4709_v34  ;;  %v4710_v47 = vadd.f32 %v12080_v10, %v15173_v51  ;;  %v4898_v34 = vld [vmem:[#allocation4] sm:$0xff] (!%p9376_p13) }
 0x646   : > { %v4808_v37 = vmax.f32 %v4776_v41, 0.0  ;;  %v4777_v30 = vadd.f32 %v4745_v16, %v4712_v17  ;;  %v4867_v16 = vld [vmem:[#allocation2 + $0x21] sm:$0xff] (!%p9376_p13)  ;;  %v4868_v17 = vld [vmem:[#allocation2 + $0x31] sm:$0xff] (!%p9376_p13) }
 0x647   : > { %v4806_v42 = vmax.f32 %v4774_v14, 0.0  ;;  %v4775_v3 = vadd.f32 %v4743_v24, %v4710_v47  ;;  %v11533_v59 = vpop.f32.mrb[120].mxu1  ;;  %v4899_v41 = vld [vmem:[#allocation4 + $0x8] sm:$0xff] (!%p9376_p13)  ;;  %v4869_v47 = vld [vmem:[#allocation2 + $0x39] sm:$0xff] (!%p9376_p13) }
 0x648   : > { %4840 = vst [vmem:[#allocation2 + $0x121] sm:$0xff] %v4808_v37  ;;  %v4809_v12 = vmax.f32 %v4777_v30, 0.0  ;;  %v12083_v45 = vadd.f32 %v15154_v22, %v11533_v59  ;;  %v4622_v46 = vpop.f32.mrb[121].mxu1  ;;  %v4931_v24 = vadd.f32 (!%p9376_p13), %v4899_v41, %v4867_v16  ;;  %v4901_v37 = vld [vmem:[#allocation4 + $0x18] sm:$0xff] (!%p9376_p13)  ;;  %v4870_v30 = vld [vmem:[#allocation2 + $0x49] sm:$0xff] (!%p9376_p13) }
 0x649   : > { %4838 = vst [vmem:[#allocation2 + $0x109] sm:$0xff] %v4806_v42  ;;  %v4807_v15 = vmax.f32 %v4775_v3, 0.0  ;;  %v12086_v0 = vadd.f32 %v15148_v53, %v4622_v46  ;;  %v11534_v63 = vpop.f32.mrb[122].mxu1  ;;  %v4933_v42 = vadd.f32 (!%p9376_p13), %v4901_v37, %v4869_v47  ;;  %v4902_v3 = vld [vmem:[#allocation4 + $0x20] sm:$0xff] (!%p9376_p13)  ;;  %v4871_v59 = vld [vmem:[#allocation2 + $0x51] sm:$0xff] (!%p9376_p13) }
 0x64a   : > { %4841 = vst [vmem:[#allocation2 + $0x129] sm:$0xff] %v4809_v12  ;;  %v4715_v48 = vadd.f32 %v12083_v45, %v15173_v51  ;;  %v12089_v29 = vadd.f32 %v15157_v11, %v11534_v63  ;;  %v4625_v18 = vpop.f32.mrb[123].mxu1  ;;  %v4903_v12 = vld [vmem:[#allocation4 + $0x28] sm:$0xff] (!%p9376_p13)  ;;  %4963 = vst [vmem:[#allocation2 + $0x21] sm:$0xff] (!%p9376_p13), %v4931_v24  ;;  %v4934_v45 = vadd.f32 (!%p9376_p13), %v4902_v3, %v4870_v30  ;;  %v4922_v47 = vld [vmem:[#allocation4 + $0xc0] sm:$0xff] (!%p9376_p13) }
 0x64b   : > { %4839 = vst [vmem:[#allocation2 + $0x111] sm:$0xff] %v4807_v15  ;;  %v4713_v62 = vadd.f32 %v12086_v0, %v15173_v51  ;;  %v12092_v22 = vadd.f32 %v15151_v4, %v4625_v18  ;;  %v4752_v4 = vld [vmem:[#allocation2 + $0x181] sm:$0xff]  ;;  %4995 = vst [vmem:[#allocation4 + $0x8] sm:$0xff] (!%p9376_p13), %v4931_v24  ;;  %v4935_v46 = vadd.f32 (!%p9376_p13), %v4903_v12, %v4871_v59  ;;  %v4873_v0 = vld [vmem:[#allocation2 + $0x69] sm:$0xff] (!%p9376_p13) }
 0x64c   : > { %v4780_v31 = vadd.f32 %v4748_v25, %v4715_v48  ;;  %v4716_v8 = vadd.f32 %v12089_v29, %v15173_v51  ;;  %v4872_v15 = vld [vmem:[#allocation2 + $0x61] sm:$0xff] (!%p9376_p13)  ;;  %v4904_v25 = vld [vmem:[#allocation4 + $0x30] sm:$0xff] (!%p9376_p13)  ;;  %4965 = vst [vmem:[#allocation2 + $0x39] sm:$0xff] (!%p9376_p13), %v4933_v42  ;;  %4997 = vst [vmem:[#allocation4 + $0x18] sm:$0xff] (!%p9376_p13), %v4933_v42 }
 0x64d   : > { %v4778_v7 = vadd.f32 %v4746_v60, %v4713_v62  ;;  %v4714_v53 = vadd.f32 %v12092_v22, %v15173_v51  ;;  %v4936_v63 = vadd.f32 (!%p9376_p13), %v4904_v25, %v4872_v15  ;;  %v4905_v48 = vld [vmem:[#allocation4 + $0x38] sm:$0xff] (!%p9376_p13)  ;;  %v4906_v29 = vld [vmem:[#allocation4 + $0x40] sm:$0xff] (!%p9376_p13)  ;;  %4966 = vst [vmem:[#allocation2 + $0x49] sm:$0xff] (!%p9376_p13), %v4934_v45  ;;  %4998 = vst [vmem:[#allocation4 + $0x20] sm:$0xff] (!%p9376_p13), %v4934_v45 }
 0x64e   : > { %v4812_v56 = vmax.f32 %v4780_v31, 0.0  ;;  %v4781_v49 = vadd.f32 %v4749_v58, %v4716_v8  ;;  %v4874_v60 = vld [vmem:[#allocation2 + $0x79] sm:$0xff] (!%p9376_p13)  ;;  %4967 = vst [vmem:[#allocation2 + $0x51] sm:$0xff] (!%p9376_p13), %v4935_v46  ;;  %4999 = vst [vmem:[#allocation4 + $0x28] sm:$0xff] (!%p9376_p13), %v4935_v46  ;;  %v4937_v18 = vadd.f32 (!%p9376_p13), %v4905_v48, %v4873_v0  ;;  %v4875_v58 = vld [vmem:[#allocation2 + $0x81] sm:$0xff] (!%p9376_p13) }
 0x64f   : > { %v4810_v5 = vmax.f32 %v4778_v7, 0.0  ;;  %v4779_v20 = vadd.f32 %v4747_v39, %v4714_v53  ;;  %v11537_v36 = vpop.f32.mrb[124].mxu1  ;;  %v4938_v62 = vadd.f32 (!%p9376_p13), %v4906_v29, %v4874_v60  ;;  %v4907_v22 = vld [vmem:[#allocation4 + $0x48] sm:$0xff] (!%p9376_p13)  ;;  %v4876_v31 = vld [vmem:[#allocation2 + $0x91] sm:$0xff] (!%p9376_p13)  ;;  %4968 = vst [vmem:[#allocation2 + $0x61] sm:$0xff] (!%p9376_p13), %v4936_v63  ;;  %5000 = vst [vmem:[#allocation4 + $0x30] sm:$0xff] (!%p9376_p13), %v4936_v63 }
 0x650   : > { %4844 = vst [vmem:[#allocation2 + $0x151] sm:$0xff] %v4812_v56  ;;  %v4813_v11 = vmax.f32 %v4781_v49, 0.0  ;;  %v12095_v13 = vadd.f32 %v15166_v55, %v11537_v36  ;;  %v4638_v40 = vpop.f32.mrb[125].mxu1  ;;  %v4939_v8 = vadd.f32 (!%p9376_p13), %v4907_v22, %v4875_v58  ;;  %v4908_v39 = vld [vmem:[#allocation4 + $0x50] sm:$0xff] (!%p9376_p13)  ;;  %v4877_v7 = vld [vmem:[#allocation2 + $0x99] sm:$0xff] (!%p9376_p13)  ;;  %4969 = vst [vmem:[#allocation2 + $0x69] sm:$0xff] (!%p9376_p13), %v4937_v18 }
 0x651   : > { %4842 = vst [vmem:[#allocation2 + $0x139] sm:$0xff] %v4810_v5  ;;  %v4811_v61 = vmax.f32 %v4779_v20, 0.0  ;;  %v12098_v33 = vadd.f32 %v15160_v54, %v4638_v40  ;;  %v11538_v19 = vpop.f32.mrb[126].mxu1  ;;  %v4909_v53 = vld [vmem:[#allocation4 + $0x58] sm:$0xff] (!%p9376_p13)  ;;  %5001 = vst [vmem:[#allocation4 + $0x38] sm:$0xff] (!%p9376_p13), %v4937_v18  ;;  %v4940_v56 = vadd.f32 (!%p9376_p13), %v4908_v39, %v4876_v31  ;;  %v4878_v5 = vld [vmem:[#allocation2 + $0xa9] sm:$0xff] (!%p9376_p13) }
 0x652   : > { %4845 = vst [vmem:[#allocation2 + $0x159] sm:$0xff] %v4813_v11  ;;  %v4719_v9 = vadd.f32 %v12095_v13, %v15173_v51  ;;  %v12101_v1 = vadd.f32 %v15169_v6, %v11538_v19  ;;  %v4641_v28 = vpop.f32.mrb[127].mxu1  ;;  %4970 = vst [vmem:[#allocation2 + $0x79] sm:$0xff] (!%p9376_p13), %v4938_v62  ;;  %v4941_v49 = vadd.f32 (!%p9376_p13), %v4909_v53, %v4877_v7  ;;  %v4910_v20 = vld [vmem:[#allocation4 + $0x60] sm:$0xff] (!%p9376_p13)  ;;  %v4879_v36 = vld [vmem:[#allocation2 + $0xb1] sm:$0xff] (!%p9376_p13) }
 0x653   : > { %4843 = vst [vmem:[#allocation2 + $0x141] sm:$0xff] %v4811_v61  ;;  %v4717_v38 = vadd.f32 %v12098_v33, %v15173_v51  ;;  %v12104_v55 = vadd.f32 %v15163_v43, %v4641_v28  ;;  %v4866_v43 = vld [vmem:[#allocation2 + $0x19] sm:$0xff] (!%p9376_p13)  ;;  %5002 = vst [vmem:[#allocation4 + $0x40] sm:$0xff] (!%p9376_p13), %v4938_v62  ;;  %v4942_v11 = vadd.f32 (!%p9376_p13), %v4910_v20, %v4878_v5  ;;  %v4911_v13 = vld [vmem:[#allocation4 + $0x68] sm:$0xff] (!%p9376_p13) }
 0x654   : > { %v4784_v32 = vadd.f32 %v4752_v4, %v4719_v9  ;;  %v4720_v21 = vadd.f32 %v12101_v1, %v15173_v51  ;;  %v4930_v10 = vadd.f32 (!%p9376_p13), %v4898_v34, %v4866_v43  ;;  %4971 = vst [vmem:[#allocation2 + $0x81] sm:$0xff] (!%p9376_p13), %v4939_v8  ;;  %5003 = vst [vmem:[#allocation4 + $0x48] sm:$0xff] (!%p9376_p13), %v4939_v8  ;;  %v4880_v40 = vld [vmem:[#allocation2 + $0xc1] sm:$0xff] (!%p9376_p13)  ;;  %v4912_v61 = vld [vmem:[#allocation4 + $0x70] sm:$0xff] (!%p9376_p13) }
 0x655   : > { %v4782_v50 = vadd.f32 %v4750_v2, %v4717_v38  ;;  %v4718_v54 = vadd.f32 %v12104_v55, %v15173_v51  ;;  %4865 = sbr.rel (%p9376_p13) target bundleno = 1647 (0x66f), region = 112  ;;  %v4900_v51 = vld [vmem:[#allocation4 + $0x10] sm:$0xff] (!%p9376_p13)  ;;  %4972 = vst [vmem:[#allocation2 + $0x91] sm:$0xff] (!%p9376_p13), %v4940_v56  ;;  %5004 = vst [vmem:[#allocation4 + $0x50] sm:$0xff] (!%p9376_p13), %v4940_v56  ;;  %v4943_v4 = vadd.f32 (!%p9376_p13), %v4911_v13, %v4879_v36  ;;  %v4913_v9 = vld [vmem:[#allocation4 + $0x78] sm:$0xff] (!%p9376_p13) }
 0x656   : > { %v4816_v52 = vmax.f32 %v4784_v32, 0.0  ;;  %v4785_v57 = vadd.f32 %v4753_v27, %v4720_v21  ;;  %v4932_v14 = vadd.f32 (!%p9376_p13), %v4900_v51, %v4868_v17  ;;  %4962 = vst [vmem:[#allocation2 + $0x19] sm:$0xff] (!%p9376_p13), %v4930_v10  ;;  %4994 = vst [vmem:[#allocation4] sm:$0xff] (!%p9376_p13), %v4930_v10  ;;  %v4944_v33 = vadd.f32 (!%p9376_p13), %v4912_v61, %v4880_v40  ;;  %v4881_v19 = vld [vmem:[#allocation2 + $0xc9] sm:$0xff] (!%p9376_p13)  ;;  %v4882_v2 = vld [vmem:[#allocation2 + $0xd9] sm:$0xff] (!%p9376_p13) }
 0x657   : > { %v4814_v23 = vmax.f32 %v4782_v50, 0.0  ;;  %v4783_v44 = vadd.f32 %v4751_v26, %v4718_v54  ;;  %4973 = vst [vmem:[#allocation2 + $0x99] sm:$0xff] (!%p9376_p13), %v4941_v49  ;;  %5005 = vst [vmem:[#allocation4 + $0x58] sm:$0xff] (!%p9376_p13), %v4941_v49  ;;  %v4945_v1 = vadd.f32 (!%p9376_p13), %v4913_v9, %v4881_v19  ;;  %v4914_v28 = vld [vmem:[#allocation4 + $0x80] sm:$0xff] (!%p9376_p13)  ;;  %v4915_v27 = vld [vmem:[#allocation4 + $0x88] sm:$0xff] (!%p9376_p13) }
 0x658   : > { %4848 = vst [vmem:[#allocation2 + $0x181] sm:$0xff] %v4816_v52  ;;  %v4817_v6 = vmax.f32 %v4785_v57, 0.0  ;;  %4964 = vst [vmem:[#allocation2 + $0x31] sm:$0xff] (!%p9376_p13), %v4932_v14  ;;  %v4883_v38 = vld [vmem:[#allocation2 + $0xe1] sm:$0xff] (!%p9376_p13)  ;;  %v4946_v55 = vadd.f32 (!%p9376_p13), %v4914_v28, %v4882_v2  ;;  %v4884_v21 = vld [vmem:[#allocation2 + $0xf1] sm:$0xff] (!%p9376_p13) }
 0x659   : > { %4846 = vst [vmem:[#allocation2 + $0x169] sm:$0xff] %v4814_v23  ;;  %v4815_v35 = vmax.f32 %v4783_v44, 0.0  ;;  %4996 = vst [vmem:[#allocation4 + $0x10] sm:$0xff] (!%p9376_p13), %v4932_v14  ;;  %v4947_v32 = vadd.f32 (!%p9376_p13), %v4915_v27, %v4883_v38  ;;  %v4916_v26 = vld [vmem:[#allocation4 + $0x90] sm:$0xff] (!%p9376_p13)  ;;  %v4885_v50 = vld [vmem:[#allocation2 + $0xf9] sm:$0xff] (!%p9376_p13) }
 0x65a   : > { %4849 = vst [vmem:[#allocation2 + $0x189] sm:$0xff] %v4817_v6  ;;  %4974 = vst [vmem:[#allocation2 + $0xa9] sm:$0xff] (!%p9376_p13), %v4942_v11  ;;  %v4948_v54 = vadd.f32 (!%p9376_p13), %v4916_v26, %v4884_v21  ;;  %v4917_v52 = vld [vmem:[#allocation4 + $0x98] sm:$0xff] (!%p9376_p13)  ;;  %v4886_v57 = vld [vmem:[#allocation2 + $0x109] sm:$0xff] (!%p9376_p13) }
 0x65b   : > { %4847 = vst [vmem:[#allocation2 + $0x171] sm:$0xff] %v4815_v35  ;;  %5006 = vst [vmem:[#allocation4 + $0x60] sm:$0xff] (!%p9376_p13), %v4942_v11  ;;  %v4918_v23 = vld [vmem:[#allocation4 + $0xa0] sm:$0xff] (!%p9376_p13)  ;;  %v4949_v44 = vadd.f32 (!%p9376_p13), %v4917_v52, %v4885_v50  ;;  %v4887_v35 = vld [vmem:[#allocation2 + $0x111] sm:$0xff] (!%p9376_p13) }
 0x65c   : > { %4975 = vst [vmem:[#allocation2 + $0xb1] sm:$0xff] %v4943_v4  ;;  %5007 = vst [vmem:[#allocation4 + $0x68] sm:$0xff] %v4943_v4  ;;  %v4950_v6 = vadd.f32 %v4918_v23, %v4886_v57  ;;  %v4919_v43 = vld [vmem:[#allocation4 + $0xa8] sm:$0xff]  ;;  %v4920_v10 = vld [vmem:[#allocation4 + $0xb0] sm:$0xff] }
 0x65d   : > { %4976 = vst [vmem:[#allocation2 + $0xc1] sm:$0xff] %v4944_v33  ;;  %5008 = vst [vmem:[#allocation4 + $0x70] sm:$0xff] %v4944_v33  ;;  %v4888_v34 = vld [vmem:[#allocation2 + $0x121] sm:$0xff]  ;;  %v4951_v16 = vadd.f32 %v4919_v43, %v4887_v35  ;;  %v4889_v41 = vld [vmem:[#allocation2 + $0x129] sm:$0xff] }
 0x65e   : > { %4977 = vst [vmem:[#allocation2 + $0xc9] sm:$0xff] %v4945_v1  ;;  %5009 = vst [vmem:[#allocation4 + $0x78] sm:$0xff] %v4945_v1  ;;  %v4921_v17 = vld [vmem:[#allocation4 + $0xb8] sm:$0xff]  ;;  %v4952_v51 = vadd.f32 %v4920_v10, %v4888_v34  ;;  %v4891_v37 = vld [vmem:[#allocation2 + $0x141] sm:$0xff] }
 0x65f   : > { %4978 = vst [vmem:[#allocation2 + $0xd9] sm:$0xff] %v4946_v55  ;;  %5010 = vst [vmem:[#allocation4 + $0x80] sm:$0xff] %v4946_v55  ;;  %v4953_v24 = vadd.f32 %v4921_v17, %v4889_v41  ;;  %v4890_v14 = vld [vmem:[#allocation2 + $0x139] sm:$0xff]  ;;  %v4923_v42 = vld [vmem:[#allocation4 + $0xc8] sm:$0xff] }
 0x660   : > { %4979 = vst [vmem:[#allocation2 + $0xe1] sm:$0xff] %v4947_v32  ;;  %5011 = vst [vmem:[#allocation4 + $0x88] sm:$0xff] %v4947_v32  ;;  %v4954_v30 = vadd.f32 %v4922_v47, %v4890_v14  ;;  %v4892_v3 = vld [vmem:[#allocation2 + $0x151] sm:$0xff]  ;;  %v4955_v12 = vadd.f32 %v4923_v42, %v4891_v37  ;;  %v4893_v46 = vld [vmem:[#allocation2 + $0x159] sm:$0xff] }
 0x661   : > { %4980 = vst [vmem:[#allocation2 + $0xf1] sm:$0xff] %v4948_v54  ;;  %5012 = vst [vmem:[#allocation4 + $0x90] sm:$0xff] %v4948_v54  ;;  %v4924_v59 = vld [vmem:[#allocation4 + $0xd0] sm:$0xff]  ;;  %v4925_v15 = vld [vmem:[#allocation4 + $0xd8] sm:$0xff] }
 0x662   : > { %4981 = vst [vmem:[#allocation2 + $0xf9] sm:$0xff] %v4949_v44  ;;  %5013 = vst [vmem:[#allocation4 + $0x98] sm:$0xff] %v4949_v44  ;;  %v4956_v45 = vadd.f32 %v4924_v59, %v4892_v3  ;;  %v4894_v25 = vld [vmem:[#allocation2 + $0x169] sm:$0xff]  ;;  %v4957_v0 = vadd.f32 %v4925_v15, %v4893_v46  ;;  %v4926_v63 = vld [vmem:[#allocation4 + $0xe0] sm:$0xff] }
 0x663   : > { %4982 = vst [vmem:[#allocation2 + $0x109] sm:$0xff] %v4950_v6  ;;  %5014 = vst [vmem:[#allocation4 + $0xa0] sm:$0xff] %v4950_v6  ;;  %v4895_v48 = vld [vmem:[#allocation2 + $0x171] sm:$0xff]  ;;  %v4927_v60 = vld [vmem:[#allocation4 + $0xe8] sm:$0xff]  ;;  %v4958_v29 = vadd.f32 %v4926_v63, %v4894_v25 }
 0x664   : > { %4983 = vst [vmem:[#allocation2 + $0x111] sm:$0xff] %v4951_v16  ;;  %5015 = vst [vmem:[#allocation4 + $0xa8] sm:$0xff] %v4951_v16  ;;  %v4959_v18 = vadd.f32 %v4927_v60, %v4895_v48  ;;  %v4896_v62 = vld [vmem:[#allocation2 + $0x181] sm:$0xff]  ;;  %v4928_v58 = vld [vmem:[#allocation4 + $0xf0] sm:$0xff] }
 0x665   : > { %4984 = vst [vmem:[#allocation2 + $0x121] sm:$0xff] %v4952_v51  ;;  %5016 = vst [vmem:[#allocation4 + $0xb0] sm:$0xff] %v4952_v51  ;;  %v4897_v22 = vld [vmem:[#allocation2 + $0x189] sm:$0xff]  ;;  %v4960_v31 = vadd.f32 %v4928_v58, %v4896_v62  ;;  %v4929_v8 = vld [vmem:[#allocation4 + $0xf8] sm:$0xff] }
 0x666   : > { %4985 = vst [vmem:[#allocation2 + $0x129] sm:$0xff] %v4953_v24  ;;  %5017 = vst [vmem:[#allocation4 + $0xb8] sm:$0xff] %v4953_v24  ;;  %v4961_v39 = vadd.f32 %v4929_v8, %v4897_v22 }
 0x667   : > { %4986 = vst [vmem:[#allocation2 + $0x139] sm:$0xff] %v4954_v30  ;;  %5018 = vst [vmem:[#allocation4 + $0xc0] sm:$0xff] %v4954_v30 }
 0x668   : > { %4987 = vst [vmem:[#allocation2 + $0x141] sm:$0xff] %v4955_v12  ;;  %5019 = vst [vmem:[#allocation4 + $0xc8] sm:$0xff] %v4955_v12 }
 0x669   : > { %4988 = vst [vmem:[#allocation2 + $0x151] sm:$0xff] %v4956_v45  ;;  %5020 = vst [vmem:[#allocation4 + $0xd0] sm:$0xff] %v4956_v45 }
 0x66a   : > { %4989 = vst [vmem:[#allocation2 + $0x159] sm:$0xff] %v4957_v0  ;;  %5021 = vst [vmem:[#allocation4 + $0xd8] sm:$0xff] %v4957_v0 }
 0x66b   : > { %4990 = vst [vmem:[#allocation2 + $0x169] sm:$0xff] %v4958_v29  ;;  %5022 = vst [vmem:[#allocation4 + $0xe0] sm:$0xff] %v4958_v29 }
 0x66c   : > { %4991 = vst [vmem:[#allocation2 + $0x171] sm:$0xff] %v4959_v18  ;;  %5023 = vst [vmem:[#allocation4 + $0xe8] sm:$0xff] %v4959_v18 }
 0x66d   : > { %4992 = vst [vmem:[#allocation2 + $0x181] sm:$0xff] %v4960_v31  ;;  %5024 = vst [vmem:[#allocation4 + $0xf0] sm:$0xff] %v4960_v31 }
 0x66e   : > { %4993 = vst [vmem:[#allocation2 + $0x189] sm:$0xff] %v4961_v39  ;;  %5025 = vst [vmem:[#allocation4 + $0xf8] sm:$0xff] %v4961_v39 }
 0x66f PF: > { %s16543_s21 = sld [smem:[#allocation24_spill]] }
 0x675   : > { %p9377_p0 = scmp.ne.s32.totalorder %s16543_s21, 19 }
 0x677   : > { %5029 = sbr.rel (%p9377_p0) target bundleno = 2905 (0xb59), region = 116 }
 0x67e   : > { %v12839_v7 = vld [vmem:[#allocation11 + $0x100] sm:$0xff]   ;;  %v12842_v49 = vld [vmem:[#allocation11 + $0x108] sm:$0xff]   ;;  %v12845_v36 = vld [vmem:[#allocation11 + $0x110] sm:$0xff]   ;;  %s16548_s24 = sld [smem:[#allocation51_spill]]  ;;  %vm8956_vm2 = vcmask 31744  }
 0x67f   : > { %v15241_v53 = vld [vmem:[#allocation11 + $0x140] sm:$0xff]   ;;  %10373 = vmatprep.subr.bf16.mxu0 %v12839_v7  ;;  %v15245_v5 = vld [vmem:[#allocation11 + $0x148] sm:$0xff]   ;;  %v15248_v11 = vld [vmem:[#allocation11 + $0x150] sm:$0xff]  }
 0x680   : > { %v12841_v56 = vld [vmem:[#allocation11 + $0xc0] sm:$0xff]   ;;  %12201 = vmatprep.subr.bf16.mxu1 %v15241_v53  ;;  %v12844_v20 = vld [vmem:[#allocation11 + $0xc8] sm:$0xff]   ;;  %v12847_v13 = vld [vmem:[#allocation11 + $0xd0] sm:$0xff]  }
 0x681   : > { %10374 = vmatpush3.bf16.msra.mxu0 %v12841_v56  ;;  %12209 = vmatpush3.bf16.msra.mxu1 %v15241_v53  ;;  %v12848_v40 = vld [vmem:[#allocation11 + $0x118] sm:$0xff]   ;;  %v12851_v33 = vld [vmem:[#allocation11 + $0x120] sm:$0xff]   ;;  %v12854_v2 = vld [vmem:[#allocation11 + $0x128] sm:$0xff]  }
 0x682   : > { %10375 = vmatprep.subr.bf16.mxu0 %v12842_v49  ;;  %12202 = vmatprep.subr.bf16.mxu1 %v15245_v5  ;;  %v15252_v61 = vld [vmem:[#allocation11 + $0x158] sm:$0xff]   ;;  %v15256_v19 = vld [vmem:[#allocation11 + $0x160] sm:$0xff]   ;;  %v15260_v1 = vld [vmem:[#allocation11 + $0x168] sm:$0xff]  }
 0x683   : > { %v12850_v4 = vld [vmem:[#allocation11 + $0xd8] sm:$0xff]   ;;  %v12853_v9 = vld [vmem:[#allocation11 + $0xe0] sm:$0xff]   ;;  %v12856_v28 = vld [vmem:[#allocation11 + $0xe8] sm:$0xff]  }
 0x684   : > { %v12857_v38 = vld [vmem:[#allocation11 + $0x130] sm:$0xff]   ;;  %v5135_v32 = vld [vmem:[#allocation2 + $0x19] sm:$0xff]  ;;  %v5136_v21 = vld [vmem:[#allocation2 + $0x21] sm:$0xff]  ;;  %s16549_s3 = smov %s16548_s24 }
 0x685   : > { %10376 = vmatpush3.bf16.msra.mxu0 %v12844_v20  ;;  %12210 = vmatpush3.bf16.msra.mxu1 %v15245_v5  ;;  %v15264_v27 = vld [vmem:[#allocation11 + $0x170] sm:$0xff]   ;;  %v12860_v50 = vld [vmem:[#allocation11 + $0x138] sm:$0xff]   ;;  %v5170_v52 = vpack.c.bf16 %v5136_v21, %v5135_v32  ;;  %v5133_v6 = vld [vmem:[#allocation2 + $0x1] sm:$0xff] }
 0x686   : > { %10377 = vmatprep.subr.bf16.mxu0 %v12845_v36  ;;  %12203 = vmatprep.subr.bf16.mxu1 %v15248_v11  ;;  %v12859_v55 = vld [vmem:[#allocation11 + $0xf0] sm:$0xff]   ;;  %v15268_v54 = vld [vmem:[#allocation11 + $0x178] sm:$0xff]   ;;  %v12863_v16 = vld [vmem:[#allocation11 + $0x40] sm:$0xff]  }
 0x687   : > { %v5153_v26 = vld [vmem:[#allocation2 + $0xf1] sm:$0xff]  ;;  %v5154_v57 = vld [vmem:[#allocation2 + $0xf9] sm:$0xff]  ;;  %v5134_v35 = vld [vmem:[#allocation2 + $0x9] sm:$0xff]  ;;  %5411 = vmatprep.mubr.bf16.mxu0 %v5170_v52 }
 0x688   : > { %v12862_v23 = vld [vmem:[#allocation11 + $0xf8] sm:$0xff]   ;;  %v15270_v44 = vpack.c.bf16 %v5154_v57, %v5153_v26  ;;  %v5155_v43 = vld [vmem:[#allocation2 + $0x109] sm:$0xff]  ;;  %v5169_v41 = vpack.c.bf16 %v5134_v35, %v5133_v6  ;;  %v5157_v24 = vld [vmem:[#allocation2 + $0x121] sm:$0xff] }
 0x689   : > { %10378 = vmatpush3.bf16.msra.mxu0 %v12847_v13  ;;  %12211 = vmatpush3.bf16.msra.mxu1 %v15248_v11  ;;  %v5156_v34 = vld [vmem:[#allocation2 + $0x111] sm:$0xff]  ;;  %v5138_v51 = vld [vmem:[#allocation2 + $0x39] sm:$0xff]  ;;  %v5158_v14 = vld [vmem:[#allocation2 + $0x129] sm:$0xff] }
 0x68a   : > { %10379 = vmatprep.subr.bf16.mxu0 %v12848_v40  ;;  %12204 = vmatprep.subr.bf16.mxu1 %v15252_v61  ;;  %v5137_v10 = vld [vmem:[#allocation2 + $0x31] sm:$0xff]  ;;  %v15275_v17 = vpack.c.bf16 %v5156_v34, %v5155_v43  ;;  %v12864_v47 = vld [vmem:[#allocation11] sm:$0xff]   ;;  %v12865_v37 = vld [vmem:[#allocation11 + $0x48] sm:$0xff]   ;;  %v15281_v42 = vpack.c.bf16 %v5158_v14, %v5157_v24 }
 0x68b   : > { %11571 = vmatprep.mubr.bf16.mxu1 %v15270_v44  ;;  %v15279_v30 = vpack.c.bf16 %v5138_v51, %v5137_v10  ;;  %v12866_v3 = vld [vmem:[#allocation11 + $0x8] sm:$0xff]   ;;  %v5159_v59 = vld [vmem:[#allocation2 + $0x139] sm:$0xff]  ;;  %v12867_v45 = vld [vmem:[#allocation11 + $0x50] sm:$0xff]  }
 0x68c   : > { %v5160_v12 = vld [vmem:[#allocation2 + $0x141] sm:$0xff]  ;;  %v5139_v46 = vld [vmem:[#allocation2 + $0x49] sm:$0xff]  ;;  %v5140_v15 = vld [vmem:[#allocation2 + $0x51] sm:$0xff] }
 0x68d   : > { %10380 = vmatpush3.bf16.msra.mxu0 %v12850_v4  ;;  %12212 = vmatpush3.bf16.msra.mxu1 %v15252_v61  ;;  %v5161_v25 = vld [vmem:[#allocation2 + $0x151] sm:$0xff]  ;;  %v5162_v0 = vld [vmem:[#allocation2 + $0x159] sm:$0xff]  ;;  %v15288_v63 = vpack.c.bf16 %v5160_v12, %v5159_v59  ;;  %v15290_v60 = vpack.c.bf16 %v5140_v15, %v5139_v46  ;;  %v5163_v58 = vld [vmem:[#allocation2 + $0x169] sm:$0xff] }
 0x68e   : > { %10381 = vmatprep.subr.bf16.mxu0 %v12851_v33  ;;  %12205 = vmatprep.subr.bf16.mxu1 %v15256_v19  ;;  %v12868_v48 = vld [vmem:[#allocation11 + $0x10] sm:$0xff]   ;;  %v12869_v29 = vld [vmem:[#allocation11 + $0x58] sm:$0xff]   ;;  %v15293_v18 = vpack.c.bf16 %v5162_v0, %v5161_v25  ;;  %v12871_v31 = vld [vmem:[#allocation11 + $0x60] sm:$0xff]  }
 0x68f   : > { %v12870_v62 = vld [vmem:[#allocation11 + $0x18] sm:$0xff]   ;;  %v5141_v8 = vld [vmem:[#allocation2 + $0x61] sm:$0xff]  ;;  %v5142_v39 = vld [vmem:[#allocation2 + $0x69] sm:$0xff] }
 0x690   : > { %v5164_v22 = vld [vmem:[#allocation2 + $0x171] sm:$0xff]  ;;  %v5165_v7 = vld [vmem:[#allocation2 + $0x181] sm:$0xff]  ;;  %v5143_v33 = vld [vmem:[#allocation2 + $0x79] sm:$0xff] }
 0x691   : > { %10382 = vmatpush3.bf16.msra.mxu0 %v12853_v9  ;;  %12213 = vmatpush3.bf16.msra.mxu1 %v15256_v19  ;;  %v15300_v56 = vpack.c.bf16 %v5164_v22, %v5163_v58  ;;  %v12872_v49 = vld [vmem:[#allocation11 + $0x20] sm:$0xff]   ;;  %v12873_v20 = vld [vmem:[#allocation11 + $0x68] sm:$0xff]   ;;  %v12875_v4 = vld [vmem:[#allocation11 + $0x70] sm:$0xff]  }
 0x692   : > { %10383 = vmatprep.subr.bf16.mxu0 %v12854_v2  ;;  %12206 = vmatprep.subr.bf16.mxu1 %v15260_v1  ;;  %v12874_v13 = vld [vmem:[#allocation11 + $0x28] sm:$0xff]   ;;  %v5033_v2 = vld [vmem:[#allocation2 + $0x18] sm:$0xff]  ;;  %v5035_v6 = vld [vmem:[#allocation2 + $0x30] sm:$0xff] }
 0x693   : > { %v5168_v40 = vld [vmem:[#allocation2 + $0x1a1] sm:$0xff]  ;;  %v12877_v32 = vld [vmem:[#allocation11 + $0x78] sm:$0xff]   ;;  %v5150_v12 = vld [vmem:[#allocation2 + $0xc9] sm:$0xff] }
 0x694   : > { %v5144_v9 = vld [vmem:[#allocation2 + $0x81] sm:$0xff]  ;;  %v12878_v26 = vld [vmem:[#allocation11 + $0x38] sm:$0xff]   ;;  %v12885_v22 = vld [vmem:[#allocation11 + $0xb0] sm:$0xff]  }
 0x695   : > { %10384 = vmatpush3.bf16.msra.mxu0 %v12856_v28  ;;  %12214 = vmatpush3.bf16.msra.mxu1 %v15260_v1  ;;  %v5034_v28 = vld [vmem:[#allocation2 + $0x20] sm:$0xff]  ;;  %v5145_v57 = vld [vmem:[#allocation2 + $0x91] sm:$0xff]  ;;  %v5037_v24 = vld [vmem:[#allocation2 + $0x48] sm:$0xff] }
 0x696   : > { %10385 = vmatprep.subr.bf16.mxu0 %v12857_v38  ;;  %12207 = vmatprep.subr.bf16.mxu1 %v15264_v27  ;;  %v12876_v38 = vld [vmem:[#allocation11 + $0x30] sm:$0xff]   ;;  %v5068_v21 = vpack.c.bf16 %v5034_v28, %v5033_v2  ;;  %v5036_v35 = vld [vmem:[#allocation2 + $0x38] sm:$0xff]  ;;  %v12880_v10 = vld [vmem:[#allocation11 + $0x88] sm:$0xff]  }
 0x697   : > { %v5148_v51 = vld [vmem:[#allocation2 + $0xb1] sm:$0xff]  ;;  %v5149_v59 = vld [vmem:[#allocation2 + $0xc1] sm:$0xff] }
 0x698   : > { %v5038_v14 = vld [vmem:[#allocation2 + $0x50] sm:$0xff]  ;;  %v5040_v46 = vld [vmem:[#allocation2 + $0x68] sm:$0xff]  ;;  %v15338_v15 = vpack.c.bf16 %v5150_v12, %v5149_v59  ;;  %v5042_v58 = vld [vmem:[#allocation2 + $0x80] sm:$0xff] }
 0x699   : > { %10386 = vmatpush3.bf16.msra.mxu0 %v12859_v55  ;;  %12215 = vmatpush3.bf16.msra.mxu1 %v15264_v27  ;;  %v15314_v55 = vpack.c.bf16 %v5144_v9, %v5143_v33  ;;  %v12884_v0 = vld [vmem:[#allocation11 + $0xa8] sm:$0xff]   ;;  %v5049_v2 = vld [vmem:[#allocation2 + $0xd8] sm:$0xff] }
 0x69a   : > { %10387 = vmatprep.subr.bf16.mxu0 %v12860_v50  ;;  %12208 = vmatprep.subr.bf16.mxu1 %v15268_v54  ;;  %v5031_v50 = vld [vmem:[#allocation2] sm:$0xff]  ;;  %v5048_v33 = vld [vmem:[#allocation2 + $0xc8] sm:$0xff] }
 0x69b   : > { %v5050_v28 = vld [vmem:[#allocation2 + $0xe0] sm:$0xff] }
 0x69c   : > { %v6169_v12 = vld [vmem:[#allocation2 + $0x1a] sm:$0xff] }
 0x69d   : > { %10388 = vmatpush3.bf16.msra.mxu0 %v12862_v23  ;;  %12216 = vmatpush3.bf16.msra.mxu1 %v15268_v54  ;;  %v5146_v23 = vld [vmem:[#allocation2 + $0x99] sm:$0xff] }
 0x69e   : > { %10509 = vmatprep.subr.bf16.mxu1 %v12863_v16  ;;  %11539 = vmatprep.subr.bf16.mxu0 %v15241_v53  ;;  %v15321_v34 = vpack.c.bf16 %v5146_v23, %v5145_v57  ;;  %v15323_v16 = vpack.c.bf16 %v5036_v35, %v5035_v6  ;;  %v5058_v57 = vld [vmem:[#allocation2 + $0x140] sm:$0xff]  ;;  %v5059_v23 = vld [vmem:[#allocation2 + $0x150] sm:$0xff] }
 0x69f   : > { %v12887_v6 = vld [vmem:[#allocation11 + $0x180] sm:$0xff]   ;;  %v12888_v35 = vld [vmem:[#allocation11 + $0x1c8] sm:$0xff]  }
 0x6a0   : > { %5412 = vmatmul.mubr.bf16.vlgmr.msra.gmra.mrb[0].mxu0 %v5169_v41  ;;  %11572 = vmatmul.mubr.bf16.vlgmr.msra.gmra.mrb[0].mxu1 %v15275_v17  ;;  %v5147_v41 = vld [vmem:[#allocation2 + $0xa9] sm:$0xff] }
 0x6a1   : > { %10510 = vmatpush3.bf16.msra.mxu1 %v12864_v47  ;;  %11540 = vmatpush3.bf16.msra.mxu0 %v15241_v53  ;;  %v5166_v53 = vld [vmem:[#allocation2 + $0x189] sm:$0xff]  ;;  %v12886_v47 = vld [vmem:[#allocation11 + $0x1c0] sm:$0xff]  }
 0x6a2   : > { %10511 = vmatprep.subr.bf16.mxu1 %v12865_v37  ;;  %5419 = vmatprep.mubr.bf16.mxu0 %v15279_v30  ;;  %v15305_v36 = vpack.c.bf16 %v5166_v53, %v5165_v7  ;;  %v15333_v37 = vpack.c.bf16 %v5038_v14, %v5037_v24  ;;  %v5043_v7 = vld [vmem:[#allocation2 + $0x90] sm:$0xff]  ;;  %v5044_v53 = vld [vmem:[#allocation2 + $0x98] sm:$0xff]  ;;  %v5063_v14 = vld [vmem:[#allocation2 + $0x180] sm:$0xff] }
 0x6a3   : > { %11575 = vmatprep.mubr.bf16.mxu1 %v15281_v42  ;;  %11541 = vmatprep.subr.bf16.mxu0 %v15245_v5 }
 0x6a5   : > { %10512 = vmatpush3.bf16.msra.mxu1 %v12866_v3  ;;  %11542 = vmatpush3.bf16.msra.mxu0 %v15245_v5  ;;  %v15303_v5 = vpack.c.bf16 %v5142_v39, %v5141_v8  ;;  %v12882_v3 = vld [vmem:[#allocation11 + $0x98] sm:$0xff]  }
 0x6a6   : > { %10513 = vmatprep.subr.bf16.mxu1 %v12867_v45  ;;  %11543 = vmatprep.subr.bf16.mxu0 %v15248_v11  ;;  %v5039_v45 = vld [vmem:[#allocation2 + $0x60] sm:$0xff]  ;;  %v12894_v39 = vld [vmem:[#allocation11 + $0xb8] sm:$0xff]  }
 0x6a7   : > { %v15340_v25 = vpack.c.bf16 %v5040_v46, %v5039_v45  ;;  %v6170_v45 = vld [vmem:[#allocation2 + $0x22] sm:$0xff]  ;;  %v12900_v46 = vld [vmem:[#allocation11 + $0x1b0] sm:$0xff]  }
 0x6a8   : > { %5420 = vmatmul.mubr.bf16.gmra.mrb[4].mxu0 %v5170_v52  ;;  %11576 = vmatmul.mubr.bf16.gmra.mrb[4].mxu1 %v15288_v63  ;;  %v5032_v52 = vld [vmem:[#allocation2 + $0x8] sm:$0xff] }
 0x6a9   : > { %10514 = vmatpush3.bf16.msra.mxu1 %v12868_v48  ;;  %5427 = vmatprep.mubr.bf16.mxu0 %v15290_v60  ;;  %v5067_v43 = vpack.c.bf16 %v5032_v52, %v5031_v50  ;;  %v5151_v48 = vld [vmem:[#allocation2 + $0xd9] sm:$0xff]  ;;  %v5056_v52 = vld [vmem:[#allocation2 + $0x128] sm:$0xff] }
 0x6aa   : > { %10515 = vmatprep.subr.bf16.mxu1 %v12869_v29  ;;  %11579 = vmatprep.mubr.bf16.mxu1 %v15293_v18  ;;  %v5152_v29 = vld [vmem:[#allocation2 + $0xe1] sm:$0xff] }
 0x6ab   : > { %11544 = vmatpush3.bf16.msra.mxu0 %v15248_v11  ;;  %v5167_v11 = vld [vmem:[#allocation2 + $0x199] sm:$0xff] }
 0x6ac   : > { %11545 = vmatprep.subr.bf16.mxu0 %v15252_v61  ;;  %v5055_v50 = vld [vmem:[#allocation2 + $0x120] sm:$0xff] }
 0x6ad   : > { %10516 = vmatpush3.bf16.msra.mxu1 %v12870_v62  ;;  %v5041_v62 = vld [vmem:[#allocation2 + $0x78] sm:$0xff] }
 0x6ae   : > { %10517 = vmatprep.subr.bf16.mxu1 %v12871_v31  ;;  %v15346_v31 = vpack.c.bf16 %v5152_v29, %v5151_v48  ;;  %v15348_v8 = vpack.c.bf16 %v5042_v58, %v5041_v62  ;;  %v6168_v48 = vld [vmem:[#allocation2 + $0xa] sm:$0xff]  ;;  %v6171_v29 = vld [vmem:[#allocation2 + $0x32] sm:$0xff]  ;;  %v6172_v62 = vld [vmem:[#allocation2 + $0x3a] sm:$0xff] }
 0x6af   : > { %11546 = vmatpush3.bf16.msra.mxu0 %v15252_v61  ;;  %v5186_v61 = vpack.c.bf16 %v5168_v40, %v5167_v11  ;;  %v5046_v11 = vld [vmem:[#allocation2 + $0xb0] sm:$0xff] }
 0x6b0   : > { %5428 = vmatmul.mubr.bf16.gmra.mrb[8].mxu0 %v15279_v30  ;;  %11580 = vmatmul.mubr.bf16.gmra.mrb[8].mxu1 %v15300_v56 }
 0x6b1   : > { %10518 = vmatpush3.bf16.msra.mxu1 %v12872_v49  ;;  %5435 = vmatprep.mubr.bf16.mxu0 %v15303_v5  ;;  %v15354_v49 = vld [vmem:[#allocation11 + $0x200] sm:$0xff]  }
 0x6b2   : > { %10519 = vmatprep.subr.bf16.mxu1 %v12873_v20  ;;  %11583 = vmatprep.mubr.bf16.mxu1 %v15305_v36  ;;  %v15356_v20 = vpack.c.bf16 %v5044_v53, %v5043_v7  ;;  %v12905_v7 = vld [vmem:[#allocation11 + $0x210] sm:$0xff]  }
 0x6b3   : > { %11547 = vmatprep.subr.bf16.mxu0 %v15256_v19 }
 0x6b4   : > { %11548 = vmatpush3.bf16.msra.mxu0 %v15256_v19  ;;  %v12879_v19 = vld [vmem:[#allocation11 + $0x80] sm:$0xff]  }
 0x6b5   : > { %10520 = vmatpush3.bf16.msra.mxu1 %v12874_v13  ;;  %11549 = vmatprep.subr.bf16.mxu0 %v15260_v1  ;;  %v5045_v13 = vld [vmem:[#allocation2 + $0xa8] sm:$0xff] }
 0x6b6   : > { %10521 = vmatprep.subr.bf16.mxu1 %v12875_v4  ;;  %v15363_v40 = vpack.c.bf16 %v5046_v11, %v5045_v13  ;;  %v5047_v4 = vld [vmem:[#allocation2 + $0xc0] sm:$0xff]  ;;  %v12906_v13 = vld [vmem:[#allocation11 + $0x218] sm:$0xff]  }
 0x6b7   : > { %v15369_v9 = vpack.c.bf16 %v5048_v33, %v5047_v4  ;;  %v12908_v4 = vld [vmem:[#allocation11 + $0x228] sm:$0xff]   ;;  %v12909_v33 = vld [vmem:[#allocation11 + $0x230] sm:$0xff]  }
 0x6b8   : > { %5436 = vmatmul.mubr.bf16.gmra.mrb[12].mxu0 %v15290_v60  ;;  %11584 = vmatmul.mubr.bf16.gmra.mrb[12].mxu1 %v5186_v61  ;;  %v15375_v61 = vpack.c.bf16 %v5050_v28, %v5049_v2  ;;  %v12910_v28 = vld [vmem:[#allocation11 + $0x238] sm:$0xff]  }
 0x6b9   : > { %10522 = vmatpush3.bf16.msra.mxu1 %v12876_v38  ;;  %5443 = vmatprep.mubr.bf16.mxu0 %v15314_v55  ;;  %v5051_v38 = vld [vmem:[#allocation2 + $0xf0] sm:$0xff] }
 0x6ba   : > { %10523 = vmatprep.subr.bf16.mxu1 %v12877_v32  ;;  %5877 = vmatprep.mubr.bf16.mxu1 %v5068_v21  ;;  %v5052_v32 = vld [vmem:[#allocation2 + $0xf8] sm:$0xff] }
 0x6bb   : > { %11550 = vmatpush3.bf16.msra.mxu0 %v15260_v1  ;;  %v12881_v1 = vld [vmem:[#allocation11 + $0x90] sm:$0xff]  }
 0x6bc   : > { %11551 = vmatprep.subr.bf16.mxu0 %v15264_v27 }
 0x6bd   : > { %10524 = vmatpush3.bf16.msra.mxu1 %v12878_v26  ;;  %v5054_v26 = vld [vmem:[#allocation2 + $0x110] sm:$0xff] }
 0x6be   : > { %11587 = vmatprep.subr.bf16.mxu1 %v12879_v19 }
 0x6bf   : > { %11552 = vmatpush3.bf16.msra.mxu0 %v15264_v27  ;;  %v15331_v27 = vpack.c.bf16 %v5148_v51, %v5147_v41  ;;  %v12891_v41 = vld [vmem:[#allocation11 + $0x190] sm:$0xff]   ;;  %v12892_v51 = vld [vmem:[#allocation11 + $0x1d8] sm:$0xff]  }
 0x6c0   : > { %5444 = vmatmul.mubr.bf16.gmra.mrb[16].mxu0 %v15303_v5  ;;  %5878 = vmatmul.mubr.bf16.vlgmr.msra.gmra.mrb[16].mxu1 %v5067_v43 }
 0x6c1   : > { %11588 = vmatpush3.bf16.msra.mxu1 %v12879_v19  ;;  %5451 = vmatprep.mubr.bf16.mxu0 %v15321_v34  ;;  %v5057_v19 = vld [vmem:[#allocation2 + $0x138] sm:$0xff] }
 0x6c2   : > { %5885 = vmatprep.mubr.bf16.mxu1 %v15323_v16  ;;  %11589 = vmatprep.subr.bf16.mxu1 %v12880_v10 }
 0x6c3   : > { %11553 = vmatprep.subr.bf16.mxu0 %v15268_v54 }
 0x6c4   : > { %11554 = vmatpush3.bf16.msra.mxu0 %v15268_v54  ;;  %v12883_v54 = vld [vmem:[#allocation11 + $0xa0] sm:$0xff]  }
 0x6c5   : > { %11590 = vmatpush3.bf16.msra.mxu1 %v12880_v10  ;;  %10645 = vmatprep.subr.bf16.mxu0 %v12886_v47  ;;  %v5062_v10 = vld [vmem:[#allocation2 + $0x170] sm:$0xff]  ;;  %v12896_v47 = vld [vmem:[#allocation11 + $0x1a0] sm:$0xff]  }
 0x6c6   : > { %11591 = vmatprep.subr.bf16.mxu1 %v12881_v1 }
 0x6c8   : > { %5452 = vmatmul.mubr.bf16.gmra.mrb[20].mxu0 %v15314_v55  ;;  %5886 = vmatmul.mubr.bf16.gmra.mrb[20].mxu1 %v5068_v21  ;;  %v5053_v21 = vld [vmem:[#allocation2 + $0x108] sm:$0xff] }
 0x6c9   : > { %5459 = vmatprep.mubr.bf16.mxu0 %v15331_v27  ;;  %5893 = vmatprep.mubr.bf16.mxu1 %v15333_v37 }
 0x6ca   : > { %11592 = vmatpush3.bf16.msra.mxu1 %v12881_v1  ;;  %v5064_v1 = vld [vmem:[#allocation2 + $0x188] sm:$0xff] }
 0x6cb   : > { %11593 = vmatprep.subr.bf16.mxu1 %v12882_v3  ;;  %v15417_v59 = vpack.c.bf16 %v5064_v1, %v5063_v14  ;;  %v6189_v1 = vld [vmem:[#allocation2 + $0x10a] sm:$0xff] }
 0x6ce   : > { %11594 = vmatpush3.bf16.msra.mxu1 %v12882_v3  ;;  %v12897_v3 = vld [vmem:[#allocation11 + $0x1e8] sm:$0xff]  }
 0x6cf   : > { %11595 = vmatprep.subr.bf16.mxu1 %v12883_v54 }
 0x6d0   : > { %5460 = vmatmul.mubr.bf16.gmra.mrb[24].mxu0 %v15321_v34  ;;  %5894 = vmatmul.mubr.bf16.gmra.mrb[24].mxu1 %v15323_v16 }
 0x6d1   : > { %5467 = vmatprep.mubr.bf16.mxu0 %v15338_v15  ;;  %5901 = vmatprep.mubr.bf16.mxu1 %v15340_v25 }
 0x6d2   : > { %11596 = vmatpush3.bf16.msra.mxu1 %v12883_v54  ;;  %v12901_v54 = vld [vmem:[#allocation11 + $0x1f8] sm:$0xff]  }
 0x6d3   : > { %11597 = vmatprep.subr.bf16.mxu1 %v12884_v0 }
 0x6d6   : > { %11598 = vmatpush3.bf16.msra.mxu1 %v12884_v0  ;;  %v6204_v0 = vpack.c.bf16 %v6170_v45, %v6169_v12 }
 0x6d7   : > { %11599 = vmatprep.subr.bf16.mxu1 %v12885_v22 }
 0x6d8   : > { %5468 = vmatmul.mubr.bf16.gmra.mrb[28].mxu0 %v15331_v27  ;;  %5902 = vmatmul.mubr.bf16.gmra.mrb[28].mxu1 %v15333_v37 }
 0x6d9   : > { %5475 = vmatprep.mubr.bf16.mxu0 %v15346_v31  ;;  %5909 = vmatprep.mubr.bf16.mxu1 %v15348_v8 }
 0x6da   : > { %11600 = vmatpush3.bf16.msra.mxu1 %v12885_v22  ;;  %v15426_v22 = vpack.c.bf16 %v6172_v62, %v6171_v29 }
 0x6db   : > { %11601 = vmatprep.subr.bf16.mxu1 %v12894_v39 }
 0x6de   : > { %11602 = vmatpush3.bf16.msra.mxu1 %v12894_v39  ;;  %v12904_v39 = vld [vmem:[#allocation11 + $0x208] sm:$0xff]  }
 0x6df   : > { %11635 = vmatprep.subr.bf16.mxu1 %v15354_v49 }
 0x6e0   : > { %5476 = vmatmul.mubr.bf16.gmra.mrb[32].mxu0 %v15338_v15  ;;  %5910 = vmatmul.mubr.bf16.gmra.mrb[32].mxu1 %v15340_v25 }
 0x6e1   : > { %5483 = vmatprep.mubr.bf16.mxu0 %v15270_v44  ;;  %5917 = vmatprep.mubr.bf16.mxu1 %v15356_v20 }
 0x6e8   : > { %5484 = vmatmul.mubr.bf16.gmra.mrb[36].mxu0 %v15346_v31  ;;  %5918 = vmatmul.mubr.bf16.gmra.mrb[36].mxu1 %v15348_v8 }
 0x6e9   : > { %5491 = vmatprep.mubr.bf16.mxu0 %v15275_v17  ;;  %5925 = vmatprep.mubr.bf16.mxu1 %v15363_v40 }
 0x6f0   : > { %5492 = vmatmul.mubr.bf16.gmra.mrb[40].mxu0 %v15270_v44  ;;  %5926 = vmatmul.mubr.bf16.gmra.mrb[40].mxu1 %v15356_v20  ;;  %v15381_v44 = vpack.c.bf16 %v5052_v32, %v5051_v38  ;;  %v6182_v32 = vld [vmem:[#allocation2 + $0xb2] sm:$0xff] }
 0x6f1   : > { %5499 = vmatprep.mubr.bf16.mxu0 %v15281_v42  ;;  %5933 = vmatprep.mubr.bf16.mxu1 %v15369_v9 }
 0x6f8   : > { %5500 = vmatmul.mubr.bf16.gmra.mrb[44].mxu0 %v15275_v17  ;;  %5934 = vmatmul.mubr.bf16.gmra.mrb[44].mxu1 %v15363_v40  ;;  %v15387_v17 = vpack.c.bf16 %v5054_v26, %v5053_v21  ;;  %v6184_v26 = vld [vmem:[#allocation2 + $0xca] sm:$0xff] }
 0x6f9   : > { %5507 = vmatprep.mubr.bf16.mxu0 %v15288_v63  ;;  %5941 = vmatprep.mubr.bf16.mxu1 %v15375_v61 }
 0x700   : > { %5508 = vmatmul.mubr.bf16.gmra.mrb[48].mxu0 %v15281_v42  ;;  %5942 = vmatmul.mubr.bf16.gmra.mrb[48].mxu1 %v15369_v9  ;;  %v15393_v42 = vpack.c.bf16 %v5056_v52, %v5055_v50  ;;  %v5065_v50 = vld [vmem:[#allocation2 + $0x198] sm:$0xff]  ;;  %v5066_v52 = vld [vmem:[#allocation2 + $0x1a0] sm:$0xff] }
 0x701   : > { %5515 = vmatprep.mubr.bf16.mxu0 %v15293_v18  ;;  %5949 = vmatprep.mubr.bf16.mxu1 %v15381_v44 }
 0x708   : > { %5516 = vmatmul.mubr.bf16.gmra.mrb[52].mxu0 %v15288_v63  ;;  %5950 = vmatmul.mubr.bf16.gmra.mrb[52].mxu1 %v15375_v61  ;;  %v15399_v63 = vpack.c.bf16 %v5058_v57, %v5057_v19  ;;  %v6186_v19 = vld [vmem:[#allocation2 + $0xe2] sm:$0xff] }
 0x709   : > { %5523 = vmatprep.mubr.bf16.mxu0 %v15300_v56  ;;  %5957 = vmatprep.mubr.bf16.mxu1 %v15387_v17 }
 0x710   : > { %5524 = vmatmul.mubr.bf16.gmra.mrb[56].mxu0 %v15293_v18  ;;  %5958 = vmatmul.mubr.bf16.gmra.mrb[56].mxu1 %v15381_v44  ;;  %v5060_v18 = vld [vmem:[#allocation2 + $0x158] sm:$0xff] }
 0x711   : > { %5531 = vmatprep.mubr.bf16.mxu0 %v15305_v36  ;;  %5965 = vmatprep.mubr.bf16.mxu1 %v15393_v42  ;;  %v15405_v43 = vpack.c.bf16 %v5060_v18, %v5059_v23  ;;  %v12889_v36 = vld [vmem:[#allocation11 + $0x188] sm:$0xff]   ;;  %v5084_v23 = vpack.c.bf16 %v5066_v52, %v5065_v50 }
 0x718   : > { %5532 = vmatmul.mubr.bf16.gmra.mrb[60].mxu0 %v15300_v56  ;;  %5966 = vmatmul.mubr.bf16.gmra.mrb[60].mxu1 %v15387_v17  ;;  %v5061_v56 = vld [vmem:[#allocation2 + $0x168] sm:$0xff] }
 0x719   : > { %11555 = vmatprep.mubr.bf16.mxu0 %v15279_v30  ;;  %5973 = vmatprep.mubr.bf16.mxu1 %v15399_v63  ;;  %v12890_v30 = vld [vmem:[#allocation11 + $0x1d0] sm:$0xff]   ;;  %v15411_v24 = vpack.c.bf16 %v5062_v10, %v5061_v56  ;;  %v6188_v56 = vld [vmem:[#allocation2 + $0xfa] sm:$0xff] }
 0x720   : > { %11556 = vmatmul.mubr.bf16.vlgmr.msra.gmra.mrb[64].mxu0 %v15290_v60  ;;  %5974 = vmatmul.mubr.bf16.gmra.mrb[64].mxu1 %v15393_v42  ;;  %v12893_v60 = vld [vmem:[#allocation11 + $0x198] sm:$0xff]  }
 0x721   : > { %10646 = vmatpush3.bf16.msra.mxu0 %v12887_v6  ;;  %11559 = vmatprep.mubr.bf16.mxu0 %v15303_v5  ;;  %v12895_v5 = vld [vmem:[#allocation11 + $0x1e0] sm:$0xff]  }
 0x722   : > { %10647 = vmatprep.subr.bf16.mxu0 %v12888_v35  ;;  %5981 = vmatprep.mubr.bf16.mxu1 %v15405_v43 }
 0x725   : > { %10648 = vmatpush3.bf16.msra.mxu0 %v12889_v36 }
 0x726   : > { %10649 = vmatprep.subr.bf16.mxu0 %v12890_v30  ;;  %v6187_v30 = vld [vmem:[#allocation2 + $0xf2] sm:$0xff] }
 0x728   : > { %11560 = vmatmul.mubr.bf16.gmra.mrb[68].mxu0 %v15314_v55  ;;  %5982 = vmatmul.mubr.bf16.gmra.mrb[68].mxu1 %v15399_v63  ;;  %v12898_v55 = vld [vmem:[#allocation11 + $0x1a8] sm:$0xff]  }
 0x729   : > { %10650 = vmatpush3.bf16.msra.mxu0 %v12891_v41  ;;  %11563 = vmatprep.mubr.bf16.mxu0 %v15321_v34  ;;  %v12899_v34 = vld [vmem:[#allocation11 + $0x1f0] sm:$0xff]  }
 0x72a   : > { %10651 = vmatprep.subr.bf16.mxu0 %v12892_v51  ;;  %5989 = vmatprep.mubr.bf16.mxu1 %v15411_v24 }
 0x72d   : > { %10652 = vmatpush3.bf16.msra.mxu0 %v12893_v60 }
 0x72e   : > { %10653 = vmatprep.subr.bf16.mxu0 %v12895_v5 }
 0x730   : > { %11564 = vmatmul.mubr.bf16.gmra.mrb[72].mxu0 %v15331_v27  ;;  %5990 = vmatmul.mubr.bf16.gmra.mrb[72].mxu1 %v15405_v43  ;;  %v12902_v27 = vld [vmem:[#allocation11 + $0x1b8] sm:$0xff]  }
 0x731   : > { %10654 = vmatpush3.bf16.msra.mxu0 %v12896_v47  ;;  %11567 = vmatprep.mubr.bf16.mxu0 %v15338_v15  ;;  %v6167_v15 = vld [vmem:[#allocation2 + $0x2] sm:$0xff]  ;;  %v6190_v47 = vld [vmem:[#allocation2 + $0x112] sm:$0xff] }
 0x732   : > { %10655 = vmatprep.subr.bf16.mxu0 %v12897_v3  ;;  %5997 = vmatprep.mubr.bf16.mxu1 %v15417_v59  ;;  %v6203_v58 = vpack.c.bf16 %v6168_v48, %v6167_v15 }
 0x735   : > { %10656 = vmatpush3.bf16.msra.mxu0 %v12898_v55 }
 0x736   : > { %10657 = vmatprep.subr.bf16.mxu0 %v12899_v34  ;;  %v6214_v34 = vpack.c.bf16 %v6190_v47, %v6189_v1 }
 0x738   : > { %11568 = vmatmul.mubr.bf16.gmra.mrb[76].mxu0 %v15346_v31  ;;  %5998 = vmatmul.mubr.bf16.gmra.mrb[76].mxu1 %v15411_v24  ;;  %v6174_v31 = vld [vmem:[#allocation2 + $0x52] sm:$0xff] }
 0x739   : > { %10658 = vmatpush3.bf16.msra.mxu0 %v12900_v46  ;;  %11603 = vmatprep.mubr.bf16.mxu1 %v15323_v16  ;;  %v6173_v16 = vld [vmem:[#allocation2 + $0x4a] sm:$0xff] }
 0x73a   : > { %10659 = vmatprep.subr.bf16.mxu0 %v12901_v54  ;;  %6445 = vmatprep.mubr.bf16.mxu0 %v6204_v0  ;;  %v15432_v53 = vpack.c.bf16 %v6174_v31, %v6173_v16  ;;  %v6191_v54 = vld [vmem:[#allocation2 + $0x122] sm:$0xff] }
 0x73b   : > { %v6194_v16 = vld [vmem:[#allocation2 + $0x142] sm:$0xff] }
 0x73d   : > { %10660 = vmatpush3.bf16.msra.mxu0 %v12902_v27 }
 0x740   : > { %11604 = vmatmul.mubr.bf16.vlgmr.msra.gmra.mrb[80].mxu1 %v15333_v37  ;;  %6446 = vmatmul.mubr.bf16.vlgmr.msra.gmra.mrb[80].mxu0 %v6203_v58  ;;  %v6175_v37 = vld [vmem:[#allocation2 + $0x62] sm:$0xff] }
 0x741   : > { %11636 = vmatpush3.bf16.msra.mxu1 %v15354_v49  ;;  %11607 = vmatprep.mubr.bf16.mxu1 %v15340_v25  ;;  %v6176_v25 = vld [vmem:[#allocation2 + $0x6a] sm:$0xff]  ;;  %v12907_v49 = vld [vmem:[#allocation11 + $0x220] sm:$0xff]  }
 0x742   : > { %6453 = vmatprep.mubr.bf16.mxu0 %v15426_v22  ;;  %11637 = vmatprep.subr.bf16.mxu1 %v12904_v39  ;;  %v15437_v11 = vpack.c.bf16 %v6176_v25, %v6175_v37 }
 0x745   : > { %11638 = vmatpush3.bf16.msra.mxu1 %v12904_v39  ;;  %v6193_v39 = vld [vmem:[#allocation2 + $0x13a] sm:$0xff] }
 0x746   : > { %11639 = vmatprep.subr.bf16.mxu1 %v12905_v7 }
 0x748   : > { %11608 = vmatmul.mubr.bf16.gmra.mrb[84].mxu1 %v15348_v8  ;;  %6454 = vmatmul.mubr.bf16.gmra.mrb[84].mxu0 %v6204_v0  ;;  %v6177_v8 = vld [vmem:[#allocation2 + $0x7a] sm:$0xff]  ;;  %v6192_v0 = vld [vmem:[#allocation2 + $0x12a] sm:$0xff] }
 0x749   : > { %11611 = vmatprep.mubr.bf16.mxu1 %v15356_v20  ;;  %6461 = vmatprep.mubr.bf16.mxu0 %v15432_v53  ;;  %v6178_v20 = vld [vmem:[#allocation2 + $0x82] sm:$0xff]  ;;  %v6215_v29 = vpack.c.bf16 %v6192_v0, %v6191_v54 }
 0x74a   : > { %11640 = vmatpush3.bf16.msra.mxu1 %v12905_v7  ;;  %v15443_v2 = vpack.c.bf16 %v6178_v20, %v6177_v8  ;;  %v12912_v0 = vld [vmem:[#allocation14 + $0xc0] sm:$0xff]  }
 0x74b   : > { %11641 = vmatprep.subr.bf16.mxu1 %v12906_v13 }
 0x74e   : > { %11642 = vmatpush3.bf16.msra.mxu1 %v12906_v13 }
 0x74f   : > { %11643 = vmatprep.subr.bf16.mxu1 %v12907_v49 }
 0x750   : > { %11612 = vmatmul.mubr.bf16.gmra.mrb[88].mxu1 %v15363_v40  ;;  %6462 = vmatmul.mubr.bf16.gmra.mrb[88].mxu0 %v15426_v22  ;;  %v6179_v40 = vld [vmem:[#allocation2 + $0x92] sm:$0xff] }
 0x751   : > { %11615 = vmatprep.mubr.bf16.mxu1 %v15369_v9  ;;  %6469 = vmatprep.mubr.bf16.mxu0 %v15437_v11  ;;  %v6180_v9 = vld [vmem:[#allocation2 + $0x9a] sm:$0xff] }
 0x752   : > { %11644 = vmatpush3.bf16.msra.mxu1 %v12907_v49  ;;  %v6209_v38 = vpack.c.bf16 %v6180_v9, %v6179_v40  ;;  %v6196_v40 = vld [vmem:[#allocation2 + $0x15a] sm:$0xff] }
 0x753   : > { %11645 = vmatprep.subr.bf16.mxu1 %v12908_v4 }
 0x756   : > { %11646 = vmatpush3.bf16.msra.mxu1 %v12908_v4 }
 0x757   : > { %11647 = vmatprep.subr.bf16.mxu1 %v12909_v33 }
 0x758   : > { %11616 = vmatmul.mubr.bf16.gmra.mrb[92].mxu1 %v15375_v61  ;;  %6470 = vmatmul.mubr.bf16.gmra.mrb[92].mxu0 %v15432_v53  ;;  %v6181_v61 = vld [vmem:[#allocation2 + $0xaa] sm:$0xff] }
 0x759   : > { %11619 = vmatprep.mubr.bf16.mxu1 %v15381_v44  ;;  %6477 = vmatprep.mubr.bf16.mxu0 %v15443_v2  ;;  %v15452_v21 = vpack.c.bf16 %v6182_v32, %v6181_v61  ;;  %v6183_v44 = vld [vmem:[#allocation2 + $0xc2] sm:$0xff] }
 0x75a   : > { %11648 = vmatpush3.bf16.msra.mxu1 %v12909_v33 }
 0x75b   : > { %11649 = vmatprep.subr.bf16.mxu1 %v12910_v28 }
 0x75e   : > { %11650 = vmatpush3.bf16.msra.mxu1 %v12910_v28  ;;  %v6195_v28 = vld [vmem:[#allocation2 + $0x152] sm:$0xff] }
 0x760   : > { %11620 = vmatmul.mubr.bf16.gmra.mrb[0].mxu1 %v15387_v17  ;;  %6478 = vmatmul.mubr.bf16.gmra.mrb[96].mxu0 %v15437_v11  ;;  %v6211_v17 = vpack.c.bf16 %v6184_v26, %v6183_v44 }
 0x761   : > { %11623 = vmatprep.mubr.bf16.mxu1 %v15393_v42  ;;  %6485 = vmatprep.mubr.bf16.mxu0 %v6209_v38  ;;  %v6185_v42 = vld [vmem:[#allocation2 + $0xda] sm:$0xff] }
 0x762   : > { %v6212_v6 = vpack.c.bf16 %v6186_v19, %v6185_v42 }
 0x768   : > { %11624 = vmatmul.mubr.bf16.gmra.mrb[4].mxu1 %v15399_v63  ;;  %6486 = vmatmul.mubr.bf16.gmra.mrb[100].mxu0 %v15443_v2 }
 0x769   : > { %11627 = vmatprep.mubr.bf16.mxu1 %v15405_v43  ;;  %6493 = vmatprep.mubr.bf16.mxu0 %v15452_v21 }
 0x770   : > { %11628 = vmatmul.mubr.bf16.gmra.mrb[8].mxu1 %v15411_v24  ;;  %6494 = vmatmul.mubr.bf16.gmra.mrb[104].mxu0 %v6209_v38  ;;  %v6213_v24 = vpack.c.bf16 %v6188_v56, %v6187_v30 }
 0x771   : > { %11631 = vmatprep.mubr.bf16.mxu1 %v15417_v59  ;;  %6501 = vmatprep.mubr.bf16.mxu0 %v6211_v17 }
 0x773   : > { %v10389_v57 = vpop.f32.mrb[0].mxu0 }
 0x774   : > { %v10390_v63 = vpop.f32.mrb[1].mxu0 }
 0x775   : > { %v10392_v18 = vpop.f32.mrb[2].mxu0  ;;  %v15460_v35 = vadd.f32 %v10390_v63, %v10389_v57  ;;  %v6197_v63 = vld [vmem:[#allocation2 + $0x16a] sm:$0xff] }
 0x776   : > { %v10393_v43 = vpop.f32.mrb[3].mxu0 }
 0x777   : > { %v15462_v36 = vadd.f32 %v10393_v43, %v10392_v18 }
 0x778   : > { %11632 = vmatmul.mubr.bf16.gmra.mrb[12].mxu1 %v5084_v23  ;;  %6502 = vmatmul.mubr.bf16.gmra.mrb[108].mxu0 %v15452_v21  ;;  %v6198_v23 = vld [vmem:[#allocation2 + $0x172] sm:$0xff] }
 0x779   : > { %6509 = vmatprep.mubr.bf16.mxu0 %v6212_v6  ;;  %11651 = vmatprep.mubr.bf16.mxu1 %v15426_v22 }
 0x77b   : > { %v10395_v10 = vpop.f32.mrb[4].mxu0 }
 0x77c   : > { %v10396_v41 = vpop.f32.mrb[5].mxu0 }
 0x77d   : > { %v10398_v51 = vpop.f32.mrb[6].mxu0  ;;  %v15466_v60 = vadd.f32 %v10396_v41, %v10395_v10 }
 0x77e   : > { %v10399_v5 = vpop.f32.mrb[7].mxu0 }
 0x77f   : > { %v15468_v14 = vadd.f32 %v10399_v5, %v10398_v51  ;;  %v6218_v51 = vpack.c.bf16 %v6198_v23, %v6197_v63  ;;  %v12914_v63 = vld [vmem:[#allocation14 + $0x148] sm:$0xff]  }
 0x780   : > { %6510 = vmatmul.mubr.bf16.gmra.mrb[112].mxu0 %v6211_v17  ;;  %11652 = vmatmul.mubr.bf16.vlgmr.msra.gmra.mrb[80].mxu1 %v15432_v53  ;;  %v12915_v23 = vld [vmem:[#allocation14 + $0x108] sm:$0xff]  }
 0x781   : > { %6517 = vmatprep.mubr.bf16.mxu0 %v6213_v24  ;;  %11655 = vmatprep.mubr.bf16.mxu1 %v15437_v11  ;;  %v6216_v11 = vpack.c.bf16 %v6194_v16, %v6193_v39 }
 0x783   : > { %v10401_v3 = vpop.f32.mrb[8].mxu0 }
 0x784   : > { %v10402_v59 = vpop.f32.mrb[9].mxu0 }
 0x785   : > { %v10404_v55 = vpop.f32.mrb[10].mxu0  ;;  %v15472_v12 = vadd.f32 %v10402_v59, %v10401_v3  ;;  %v12911_v59 = vld [vmem:[#allocation14 + $0x100] sm:$0xff]  }
 0x786   : > { %v10405_v45 = vpop.f32.mrb[11].mxu0  ;;  %10781 = vmatprep.subr.bf16.mxu0 %v12911_v59 }
 0x787   : > { %v15474_v46 = vadd.f32 %v10405_v45, %v10404_v55  ;;  %v6199_v55 = vld [vmem:[#allocation2 + $0x182] sm:$0xff]  ;;  %10782 = vmatpush3.bf16.msra.mxu0 %v12912_v0 }
 0x788   : > { %6518 = vmatmul.mubr.bf16.gmra.mrb[116].mxu0 %v6212_v6  ;;  %11656 = vmatmul.mubr.bf16.gmra.mrb[84].mxu1 %v15443_v2 }
 0x789   : > { %6525 = vmatprep.mubr.bf16.mxu0 %v6214_v34  ;;  %11659 = vmatprep.mubr.bf16.mxu1 %v6209_v38 }
 0x78a   : > { %10783 = vmatprep.subr.bf16.mxu0 %v12915_v23 }
 0x78b   : > { %v10407_v27 = vpop.f32.mrb[12].mxu0 }
 0x78c   : > { %v10408_v15 = vpop.f32.mrb[13].mxu0 }
 0x78d   : > { %v10410_v48 = vpop.f32.mrb[14].mxu0  ;;  %v15477_v62 = vadd.f32 %v10408_v15, %v10407_v27 }
 0x78e   : > { %v10411_v58 = vpop.f32.mrb[15].mxu0 }
 0x78f   : > { %v15479_v22 = vadd.f32 %v10411_v58, %v10410_v48 }
 0x790   : > { %6526 = vmatmul.mubr.bf16.gmra.mrb[120].mxu0 %v6213_v24  ;;  %11660 = vmatmul.mubr.bf16.gmra.mrb[88].mxu1 %v15452_v21 }
 0x791   : > { %6533 = vmatprep.mubr.bf16.mxu0 %v6215_v29  ;;  %11663 = vmatprep.mubr.bf16.mxu1 %v6211_v17  ;;  %v6217_v17 = vpack.c.bf16 %v6196_v40, %v6195_v28 }
 0x793   : > { %v10525_v31 = vpop.f32.mrb[16].mxu1  ;;  %v10413_v7 = vpop.f32.mrb[16].mxu0 }
 0x794   : > { %v10526_v53 = vpop.f32.mrb[17].mxu1  ;;  %v10414_v13 = vpop.f32.mrb[17].mxu0 }
 0x795   : > { %v15482_v37 = vadd.f32 %v10526_v53, %v10525_v31  ;;  %v10528_v25 = vpop.f32.mrb[18].mxu1  ;;  %v10416_v49 = vpop.f32.mrb[18].mxu0  ;;  %v15484_v4 = vadd.f32 %v10414_v13, %v10413_v7 }
 0x796   : > { %v10529_v8 = vpop.f32.mrb[19].mxu1  ;;  %v10417_v20 = vpop.f32.mrb[19].mxu0 }
 0x797   : > { %v15486_v33 = vadd.f32 %v10529_v8, %v10528_v25  ;;  %v15488_v2 = vadd.f32 %v10417_v20, %v10416_v49  ;;  %v12913_v25 = vld [vmem:[#allocation14 + $0x140] sm:$0xff]  }
 0x798   : > { %6534 = vmatmul.mubr.bf16.gmra.mrb[124].mxu0 %v6214_v34  ;;  %11664 = vmatmul.mubr.bf16.gmra.mrb[92].mxu1 %v6212_v6  ;;  %v6201_v49 = vld [vmem:[#allocation2 + $0x19a] sm:$0xff] }
 0x799   : > { %6541 = vmatprep.mubr.bf16.mxu0 %v6216_v11  ;;  %11667 = vmatprep.mubr.bf16.mxu1 %v6213_v24 }
 0x79a   : > { %11683 = vmatprep.subr.bf16.mxu1 %v12913_v25 }
 0x79b   : > { %v10531_v9 = vpop.f32.mrb[20].mxu1  ;;  %v10419_v38 = vpop.f32.mrb[20].mxu0  ;;  %11684 = vmatpush3.bf16.msra.mxu1 %v12913_v25 }
 0x79c   : > { %v10532_v61 = vpop.f32.mrb[21].mxu1  ;;  %v10420_v32 = vpop.f32.mrb[21].mxu0  ;;  %11685 = vmatprep.subr.bf16.mxu1 %v12914_v63 }
 0x79d   : > { %v15490_v21 = vadd.f32 %v10532_v61, %v10531_v9  ;;  %v10534_v44 = vpop.f32.mrb[22].mxu1  ;;  %v10422_v26 = vpop.f32.mrb[22].mxu0  ;;  %v15492_v50 = vadd.f32 %v10420_v32, %v10419_v38 }
 0x79e   : > { %v10535_v52 = vpop.f32.mrb[23].mxu1  ;;  %v10423_v42 = vpop.f32.mrb[23].mxu0 }
 0x79f   : > { %v15494_v19 = vadd.f32 %v10535_v52, %v10534_v44  ;;  %v15496_v57 = vadd.f32 %v10423_v42, %v10422_v26  ;;  %11686 = vmatpush3.bf16.msra.mxu1 %v12914_v63 }
 0x7a0   : > { %6542 = vmatmul.mubr.bf16.gmra.mrb[128].mxu0 %v6215_v29  ;;  %11668 = vmatmul.mubr.bf16.gmra.mrb[0].mxu1 %v6214_v34  ;;  %v6200_v34 = vld [vmem:[#allocation2 + $0x18a] sm:$0xff] }
 0x7a1   : > { %6549 = vmatprep.mubr.bf16.mxu0 %v6217_v17  ;;  %11671 = vmatprep.mubr.bf16.mxu1 %v6215_v29  ;;  %v6219_v39 = vpack.c.bf16 %v6200_v34, %v6199_v55 }
 0x7a3   : > { %v10537_v18 = vpop.f32.mrb[24].mxu1  ;;  %v10425_v6 = vpop.f32.mrb[24].mxu0 }
 0x7a4   : > { %v10538_v43 = vpop.f32.mrb[25].mxu1  ;;  %v10426_v30 = vpop.f32.mrb[25].mxu0 }
 0x7a5   : > { %v15498_v56 = vadd.f32 %v10538_v43, %v10537_v18  ;;  %v10540_v10 = vpop.f32.mrb[26].mxu1  ;;  %v10428_v41 = vpop.f32.mrb[26].mxu0  ;;  %v15500_v24 = vadd.f32 %v10426_v30, %v10425_v6  ;;  %v12916_v43 = vld [vmem:[#allocation14 + $0xc8] sm:$0xff]  }
 0x7a6   : > { %v10541_v5 = vpop.f32.mrb[27].mxu1  ;;  %v10429_v1 = vpop.f32.mrb[27].mxu0  ;;  %10784 = vmatpush3.bf16.msra.mxu0 %v12916_v43 }
 0x7a7   : > { %v15502_v47 = vadd.f32 %v10541_v5, %v10540_v10  ;;  %v15504_v3 = vadd.f32 %v10429_v1, %v10428_v41 }
 0x7a8   : > { %6550 = vmatmul.mubr.bf16.gmra.mrb[132].mxu0 %v6216_v11  ;;  %11672 = vmatmul.mubr.bf16.gmra.mrb[4].mxu1 %v6216_v11  ;;  %v6202_v11 = vld [vmem:[#allocation2 + $0x1a2] sm:$0xff] }
 0x7a9   : > { %6557 = vmatprep.mubr.bf16.mxu0 %v6218_v51  ;;  %11675 = vmatprep.mubr.bf16.mxu1 %v6217_v17  ;;  %v6220_v9 = vpack.c.bf16 %v6202_v11, %v6201_v49  ;;  %v12919_v11 = vld [vmem:[#allocation14 + $0x110] sm:$0xff]  }
 0x7aa   : > { %10785 = vmatprep.subr.bf16.mxu0 %v12919_v11 }
 0x7ab   : > { %v10543_v45 = vpop.f32.mrb[28].mxu1  ;;  %v10431_v54 = vpop.f32.mrb[28].mxu0 }
 0x7ac   : > { %v10544_v27 = vpop.f32.mrb[29].mxu1  ;;  %v10432_v15 = vpop.f32.mrb[29].mxu0 }
 0x7ad   : > { %v15506_v48 = vadd.f32 %v10544_v27, %v10543_v45  ;;  %v10546_v29 = vpop.f32.mrb[30].mxu1  ;;  %v10434_v58 = vpop.f32.mrb[30].mxu0  ;;  %v15508_v16 = vadd.f32 %v10432_v15, %v10431_v54  ;;  %v12917_v54 = vld [vmem:[#allocation14 + $0x150] sm:$0xff]  }
 0x7ae   : > { %v10547_v31 = vpop.f32.mrb[31].mxu1  ;;  %v10435_v7 = vpop.f32.mrb[31].mxu0  ;;  %11687 = vmatprep.subr.bf16.mxu1 %v12917_v54 }
 0x7af   : > { %v15510_v53 = vadd.f32 %v10547_v31, %v10546_v29  ;;  %v15512_v13 = vadd.f32 %v10435_v7, %v10434_v58  ;;  %11688 = vmatpush3.bf16.msra.mxu1 %v12917_v54  ;;  %v12926_v54 = vld [vmem:[#allocation14 + $0xe0] sm:$0xff]  }
 0x7b0   : > { %6558 = vmatmul.mubr.bf16.gmra.mrb[136].mxu0 %v6217_v17  ;;  %11676 = vmatmul.mubr.bf16.gmra.mrb[8].mxu1 %v6218_v51 }
 0x7b1   : > { %6565 = vmatprep.mubr.bf16.mxu0 %v6219_v39  ;;  %11679 = vmatprep.mubr.bf16.mxu1 %v6219_v39 }
 0x7b3   : > { %v10549_v8 = vpop.f32.mrb[32].mxu1  ;;  %v10437_v20 = vpop.f32.mrb[32].mxu0 }
 0x7b4   : > { %v10550_v28 = vpop.f32.mrb[33].mxu1  ;;  %v10438_v40 = vpop.f32.mrb[33].mxu0 }
 0x7b5   : > { %v15514_v38 = vadd.f32 %v10550_v28, %v10549_v8  ;;  %v15516_v61 = vadd.f32 %v10438_v40, %v10437_v20  ;;  %v10552_v32 = vpop.f32.mrb[34].mxu1  ;;  %v10440_v44 = vpop.f32.mrb[34].mxu0  ;;  %v12918_v28 = vld [vmem:[#allocation14 + $0x158] sm:$0xff]   ;;  %v12920_v40 = vld [vmem:[#allocation14 + $0xd0] sm:$0xff]  }
 0x7b6   : > { %v10553_v26 = vpop.f32.mrb[35].mxu1  ;;  %v10441_v17 = vpop.f32.mrb[35].mxu0  ;;  %11689 = vmatprep.subr.bf16.mxu1 %v12918_v28  ;;  %10786 = vmatpush3.bf16.msra.mxu0 %v12920_v40 }
 0x7b7   : > { %v15518_v52 = vadd.f32 %v10553_v26, %v10552_v32  ;;  %v15520_v42 = vadd.f32 %v10441_v17, %v10440_v44  ;;  %11690 = vmatpush3.bf16.msra.mxu1 %v12918_v28  ;;  %v12923_v26 = vld [vmem:[#allocation14 + $0xd8] sm:$0xff]  }
 0x7b8   : > { %6566 = vmatmul.mubr.bf16.gmra.mrb[140].mxu0 %v6218_v51  ;;  %11680 = vmatmul.mubr.bf16.gmra.mrb[12].mxu1 %v6220_v9  ;;  %v12922_v9 = vld [vmem:[#allocation14 + $0x118] sm:$0xff]  }
 0x7b9   : > { %10787 = vmatprep.subr.bf16.mxu0 %v12922_v9 }
 0x7ba   : > { %10788 = vmatpush3.bf16.msra.mxu0 %v12923_v26 }
 0x7bb   : > { %v10555_v18 = vpop.f32.mrb[36].mxu1  ;;  %v10443_v6 = vpop.f32.mrb[36].mxu0 }
 0x7bc   : > { %v10556_v30 = vpop.f32.mrb[37].mxu1  ;;  %v10444_v10 = vpop.f32.mrb[37].mxu0 }
 0x7bd   : > { %v15522_v41 = vadd.f32 %v10556_v30, %v10555_v18  ;;  %v15524_v5 = vadd.f32 %v10444_v10, %v10443_v6  ;;  %v10558_v1 = vpop.f32.mrb[38].mxu1  ;;  %v10446_v59 = vpop.f32.mrb[38].mxu0 }
 0x7be   : > { %v10559_v55 = vpop.f32.mrb[39].mxu1  ;;  %v10447_v34 = vpop.f32.mrb[39].mxu0 }
 0x7bf   : > { %v15526_v45 = vadd.f32 %v10559_v55, %v10558_v1  ;;  %v15528_v51 = vadd.f32 %v10447_v34, %v10446_v59  ;;  %v12925_v1 = vld [vmem:[#allocation14 + $0x120] sm:$0xff]  }
 0x7c0   : > { %v12921_v34 = vld [vmem:[#allocation14 + $0x160] sm:$0xff]   ;;  %10789 = vmatprep.subr.bf16.mxu0 %v12925_v1 }
 0x7c1   : > { %11691 = vmatprep.subr.bf16.mxu1 %v12921_v34  ;;  %10790 = vmatpush3.bf16.msra.mxu0 %v12926_v54 }
 0x7c2   : > { %11692 = vmatpush3.bf16.msra.mxu1 %v12921_v34  ;;  %v12933_v34 = vld [vmem:[#allocation14 + $0xf8] sm:$0xff]  }
 0x7c3   : > { %v10561_v0 = vpop.f32.mrb[40].mxu1  ;;  %v10449_v27 = vpop.f32.mrb[40].mxu0 }
 0x7c4   : > { %v10562_v15 = vpop.f32.mrb[41].mxu1  ;;  %v10450_v29 = vpop.f32.mrb[41].mxu0 }
 0x7c5   : > { %v15530_v58 = vadd.f32 %v10562_v15, %v10561_v0  ;;  %v15532_v39 = vadd.f32 %v10450_v29, %v10449_v27  ;;  %v10564_v31 = vpop.f32.mrb[42].mxu1  ;;  %v10452_v7 = vpop.f32.mrb[42].mxu0  ;;  %v12927_v0 = vld [vmem:[#allocation14 + $0x128] sm:$0xff]  }
 0x7c6   : > { %v10565_v25 = vpop.f32.mrb[43].mxu1  ;;  %v10453_v49 = vpop.f32.mrb[43].mxu0  ;;  %v12928_v29 = vld [vmem:[#allocation14 + $0xe8] sm:$0xff]   ;;  %10791 = vmatprep.subr.bf16.mxu0 %v12927_v0 }
 0x7c7   : > { %v15534_v8 = vadd.f32 %v10565_v25, %v10564_v31  ;;  %v15536_v20 = vadd.f32 %v10453_v49, %v10452_v7  ;;  %10792 = vmatpush3.bf16.msra.mxu0 %v12928_v29 }
 0x7cb   : > { %v10567_v32 = vpop.f32.mrb[44].mxu1  ;;  %v10455_v44 = vpop.f32.mrb[44].mxu0 }
 0x7cc   : > { %v10568_v17 = vpop.f32.mrb[45].mxu1  ;;  %v10456_v63 = vpop.f32.mrb[45].mxu0 }
 0x7cd   : > { %v15538_v23 = vadd.f32 %v10568_v17, %v10567_v32  ;;  %v15540_v18 = vadd.f32 %v10456_v63, %v10455_v44  ;;  %v10570_v6 = vpop.f32.mrb[46].mxu1  ;;  %v10458_v43 = vpop.f32.mrb[46].mxu0  ;;  %v12930_v32 = vld [vmem:[#allocation14 + $0x130] sm:$0xff]  }
 0x7ce   : > { %v10571_v30 = vpop.f32.mrb[47].mxu1  ;;  %v10459_v10 = vpop.f32.mrb[47].mxu0  ;;  %v12931_v63 = vld [vmem:[#allocation14 + $0xf0] sm:$0xff]   ;;  %10793 = vmatprep.subr.bf16.mxu0 %v12930_v32 }
 0x7cf   : > { %v15542_v59 = vadd.f32 %v10571_v30, %v10570_v6  ;;  %v15544_v55 = vadd.f32 %v10459_v10, %v10458_v43  ;;  %v12924_v43 = vld [vmem:[#allocation14 + $0x168] sm:$0xff]   ;;  %10794 = vmatpush3.bf16.msra.mxu0 %v12931_v63  ;;  %v12932_v30 = vld [vmem:[#allocation14 + $0x138] sm:$0xff]  }
 0x7d0   : > { %11693 = vmatprep.subr.bf16.mxu1 %v12924_v43  ;;  %10795 = vmatprep.subr.bf16.mxu0 %v12932_v30 }
 0x7d1   : > { %11694 = vmatpush3.bf16.msra.mxu1 %v12924_v43 }
 0x7d3   : > { %v10573_v27 = vpop.f32.mrb[48].mxu1  ;;  %v10461_v15 = vpop.f32.mrb[48].mxu0  ;;  %10796 = vmatpush3.bf16.msra.mxu0 %v12933_v34 }
 0x7d4   : > { %v10574_v31 = vpop.f32.mrb[49].mxu1  ;;  %v10462_v7 = vpop.f32.mrb[49].mxu0 }
 0x7d5   : > { %v10575_v25 = vadd.f32 %v10574_v31, %v10573_v27  ;;  %v15546_v49 = vadd.f32 %v10462_v7, %v10461_v15  ;;  %v10576_v11 = vpop.f32.mrb[50].mxu1  ;;  %v10464_v28 = vpop.f32.mrb[50].mxu0  ;;  %v12929_v31 = vld [vmem:[#allocation14 + $0x170] sm:$0xff]  }
 0x7d6   : > { %v10577_v40 = vpop.f32.mrb[51].mxu1  ;;  %v10465_v9 = vpop.f32.mrb[51].mxu0  ;;  %11695 = vmatprep.subr.bf16.mxu1 %v12929_v31 }
 0x7d7   : > { %v15549_v44 = vadd.f32 %v10575_v25, %v15516_v61  ;;  %v10578_v26 = vadd.f32 %v10577_v40, %v10576_v11  ;;  %v15551_v17 = vadd.f32 %v10465_v9, %v10464_v28  ;;  %11696 = vmatpush3.bf16.msra.mxu1 %v12929_v31  ;;  %v12934_v9 = vld [vmem:[#allocation14 + $0x178] sm:$0xff]  }
 0x7d8   : > { %11697 = vmatprep.subr.bf16.mxu1 %v12934_v9 }
 0x7d9   : > { %v15554_v6 = vadd.f32 %v10578_v26, %v15520_v42 }
 0x7db   : > { %v10579_v10 = vpop.f32.mrb[52].mxu1  ;;  %v10467_v1 = vpop.f32.mrb[52].mxu0  ;;  %11698 = vmatpush3.bf16.msra.mxu1 %v12934_v9 }
 0x7dc   : > { %v10580_v54 = vpop.f32.mrb[53].mxu1  ;;  %v10468_v0 = vpop.f32.mrb[53].mxu0 }
 0x7dd   : > { %v10581_v61 = vadd.f32 %v10580_v54, %v10579_v10  ;;  %v15556_v27 = vadd.f32 %v10468_v0, %v10467_v1  ;;  %v10582_v15 = vpop.f32.mrb[54].mxu1  ;;  %v10470_v29 = vpop.f32.mrb[54].mxu0 }
 0x7de   : > { %v10583_v42 = vpop.f32.mrb[55].mxu1  ;;  %v10471_v7 = vpop.f32.mrb[55].mxu0 }
 0x7df   : > { %v15559_v25 = vadd.f32 %v10581_v61, %v15524_v5  ;;  %v10584_v11 = vadd.f32 %v10583_v42, %v10582_v15  ;;  %v15561_v28 = vadd.f32 %v10471_v7, %v10470_v29 }
 0x7e1   : > { %v15564_v40 = vadd.f32 %v10584_v11, %v15528_v51 }
 0x7e3   : > { %v10585_v32 = vpop.f32.mrb[56].mxu1  ;;  %v10473_v26 = vpop.f32.mrb[56].mxu0 }
 0x7e4   : > { %v10586_v63 = vpop.f32.mrb[57].mxu1  ;;  %v10474_v43 = vpop.f32.mrb[57].mxu0 }
 0x7e5   : > { %v10587_v30 = vadd.f32 %v10586_v63, %v10585_v32  ;;  %v15566_v10 = vadd.f32 %v10474_v43, %v10473_v26  ;;  %v10588_v5 = vpop.f32.mrb[58].mxu1  ;;  %v10476_v1 = vpop.f32.mrb[58].mxu0 }
 0x7e6   : > { %v10589_v34 = vpop.f32.mrb[59].mxu1  ;;  %v10477_v54 = vpop.f32.mrb[59].mxu0 }
 0x7e7   : > { %v15569_v0 = vadd.f32 %v10587_v30, %v15532_v39  ;;  %v10590_v61 = vadd.f32 %v10589_v34, %v10588_v5  ;;  %v15571_v51 = vadd.f32 %v10477_v54, %v10476_v1 }
 0x7e9   : > { %16544 = vst [vmem:[#allocation41_spill] sm:$0xff] %v15569_v0  ;;  %v15574_v15 = vadd.f32 %v10590_v61, %v15536_v20  ;;  %v15588_v0 = vld [vmem:[#allocation14 + $0x80] sm:$0xff]  }
 0x7ea   : > { %11731 = vmatprep.subr.bf16.mxu1 %v15588_v0 }
 0x7eb   : > { %16545 = vst [vmem:[#allocation42_spill] sm:$0xff] %v15574_v15  ;;  %v10591_v29 = vpop.f32.mrb[60].mxu1  ;;  %v10479_v31 = vpop.f32.mrb[60].mxu0 }
 0x7ec   : > { %v10592_v42 = vpop.f32.mrb[61].mxu1  ;;  %v10480_v7 = vpop.f32.mrb[61].mxu0 }
 0x7ed   : > { %v10593_v11 = vadd.f32 %v10592_v42, %v10591_v29  ;;  %v15576_v9 = vadd.f32 %v10480_v7, %v10479_v31  ;;  %v10594_v32 = vpop.f32.mrb[62].mxu1  ;;  %v10482_v26 = vpop.f32.mrb[62].mxu0 }
 0x7ee   : > { %v10595_v63 = vpop.f32.mrb[63].mxu1  ;;  %v10483_v43 = vpop.f32.mrb[63].mxu0 }
 0x7ef   : > { %v15579_v39 = vadd.f32 %v10593_v11, %v15540_v18  ;;  %v10596_v30 = vadd.f32 %v10595_v63, %v10594_v32  ;;  %v15581_v5 = vadd.f32 %v10483_v43, %v10482_v26 }
 0x7f1   : > { %v15584_v20 = vadd.f32 %v10596_v30, %v15544_v55 }
 0x7f3   : > { %v11557_v1 = vpop.f32.mrb[64].mxu0  ;;  %v10597_v34 = vpop.f32.mrb[64].mxu1 }
 0x7f4   : > { %v5583_v54 = vadd.f32 %v11557_v1, %v15466_v60  ;;  %v5574_v61 = vpop.f32.mrb[65].mxu0  ;;  %v10598_v29 = vpop.f32.mrb[65].mxu1 }
 0x7f5   : > { %v5575_v31 = vadd.f32 %v15460_v35, %v5574_v61  ;;  %v10599_v42 = vadd.f32 %v10598_v29, %v10597_v34  ;;  %v11558_v7 = vpop.f32.mrb[66].mxu0  ;;  %v10600_v15 = vpop.f32.mrb[66].mxu1 }
 0x7f6   : > { %v15591_v18 = vadd.f32 %v15490_v21, %v5583_v54  ;;  %v5586_v11 = vadd.f32 %v11558_v7, %v15468_v14  ;;  %v5577_v55 = vpop.f32.mrb[67].mxu0  ;;  %v10601_v32 = vpop.f32.mrb[67].mxu1 }
 0x7f7   : > { %v15595_v26 = vadd.f32 %v15482_v37, %v5575_v31  ;;  %v15598_v60 = vadd.f32 %v10599_v42, %v15546_v49  ;;  %v5578_v35 = vadd.f32 %v15462_v36, %v5577_v55  ;;  %v10602_v63 = vadd.f32 %v10601_v32, %v10600_v15 }
 0x7f8   : > { %v15603_v43 = vadd.f32 %v15494_v19, %v5586_v11 }
 0x7f9   : > { %v15606_v21 = vadd.f32 %v15486_v33, %v5578_v35  ;;  %v15609_v14 = vadd.f32 %v10602_v63, %v15551_v17 }
 0x7fb   : > { %v11561_v30 = vpop.f32.mrb[68].mxu0  ;;  %v10603_v37 = vpop.f32.mrb[68].mxu1 }
 0x7fc   : > { %v5599_v1 = vadd.f32 %v11561_v30, %v15477_v62  ;;  %v5590_v49 = vpop.f32.mrb[69].mxu0  ;;  %v10604_v34 = vpop.f32.mrb[69].mxu1 }
 0x7fd   : > { %v5591_v36 = vadd.f32 %v15472_v12, %v5590_v49  ;;  %v10605_v15 = vadd.f32 %v10604_v34, %v10603_v37  ;;  %v11562_v54 = vpop.f32.mrb[70].mxu0  ;;  %v10606_v61 = vpop.f32.mrb[70].mxu1 }
 0x7fe   : > { %v15614_v19 = vadd.f32 %v15506_v48, %v5599_v1  ;;  %v5602_v33 = vadd.f32 %v11562_v54, %v15479_v22  ;;  %v5593_v29 = vpop.f32.mrb[71].mxu0  ;;  %v10607_v31 = vpop.f32.mrb[71].mxu1 }
 0x7ff   : > { %v15618_v17 = vadd.f32 %v15498_v56, %v5591_v36  ;;  %v15621_v42 = vadd.f32 %v10605_v15, %v15556_v27  ;;  %v5594_v62 = vadd.f32 %v15474_v46, %v5593_v29  ;;  %v10608_v7 = vadd.f32 %v10607_v31, %v10606_v61 }
 0x800   : > { %v15625_v12 = vadd.f32 %v15510_v53, %v5602_v33 }
 0x801   : > { %v15628_v11 = vadd.f32 %v15502_v47, %v5594_v62  ;;  %v15631_v48 = vadd.f32 %v10608_v7, %v15561_v28 }
 0x803   : > { %v11565_v22 = vpop.f32.mrb[72].mxu0  ;;  %v10609_v55 = vpop.f32.mrb[72].mxu1 }
 0x804   : > { %v5615_v56 = vadd.f32 %v11565_v22, %v15492_v50  ;;  %v5606_v32 = vpop.f32.mrb[73].mxu0  ;;  %v10610_v35 = vpop.f32.mrb[73].mxu1 }
 0x805   : > { %v5607_v27 = vadd.f32 %v15484_v4, %v5606_v32  ;;  %v10611_v63 = vadd.f32 %v10610_v35, %v10609_v55  ;;  %v11566_v46 = vpop.f32.mrb[74].mxu0  ;;  %v10612_v30 = vpop.f32.mrb[74].mxu1 }
 0x806   : > { %v15636_v53 = vadd.f32 %v15522_v41, %v5615_v56  ;;  %v5618_v47 = vadd.f32 %v11566_v46, %v15496_v57  ;;  %v5609_v37 = vpop.f32.mrb[75].mxu0  ;;  %v10613_v1 = vpop.f32.mrb[75].mxu1 }
 0x807   : > { %v15640_v28 = vadd.f32 %v15514_v38, %v5607_v27  ;;  %v15643_v49 = vadd.f32 %v10611_v63, %v15566_v10  ;;  %v5610_v50 = vadd.f32 %v15488_v2, %v5609_v37  ;;  %v10614_v34 = vadd.f32 %v10613_v1, %v10612_v30  ;;  %v12943_v1 = vld [vmem:[#allocation14 + $0x40] sm:$0xff]  }
 0x808   : > { %v15647_v4 = vadd.f32 %v15526_v45, %v5618_v47  ;;  %10917 = vmatprep.subr.bf16.mxu0 %v12943_v1 }
 0x809   : > { %v15650_v36 = vadd.f32 %v15518_v52, %v5610_v50  ;;  %v15653_v41 = vadd.f32 %v10614_v34, %v15571_v51 }
 0x80b   : > { %v11569_v57 = vpop.f32.mrb[76].mxu0  ;;  %v10615_v15 = vpop.f32.mrb[76].mxu1 }
 0x80c   : > { %v5631_v38 = vadd.f32 %v11569_v57, %v15508_v16  ;;  %v5622_v54 = vpop.f32.mrb[77].mxu0  ;;  %v10616_v61 = vpop.f32.mrb[77].mxu1 }
 0x80d   : > { %v5623_v10 = vadd.f32 %v15500_v24, %v5622_v54  ;;  %v10617_v33 = vadd.f32 %v10616_v61, %v10615_v15  ;;  %v11570_v2 = vpop.f32.mrb[78].mxu0  ;;  %v10618_v29 = vpop.f32.mrb[78].mxu1 }
 0x80e   : > { %v15658_v45 = vadd.f32 %v15538_v23, %v5631_v38  ;;  %v5634_v52 = vadd.f32 %v11570_v2, %v15512_v13  ;;  %v5625_v31 = vpop.f32.mrb[79].mxu0  ;;  %v10619_v62 = vpop.f32.mrb[79].mxu1 }
 0x80f   : > { %v15662_v51 = vadd.f32 %v15530_v58, %v5623_v10  ;;  %v15665_v7 = vadd.f32 %v10617_v33, %v15576_v9  ;;  %v5626_v16 = vadd.f32 %v15504_v3, %v5625_v31  ;;  %v10620_v22 = vadd.f32 %v10619_v62, %v10618_v29 }
 0x810   : > { %v15669_v24 = vadd.f32 %v15542_v59, %v5634_v52 }
 0x811   : > { %v5931_v55 = vadd.f32 %v15534_v8, %v5626_v16  ;;  %v15673_v23 = vadd.f32 %v10620_v22, %v15581_v5 }
 0x813   : > { %v10661_v13 = vpop.f32.mrb[80].mxu0 }
 0x814   : > { %v10662_v56 = vpop.f32.mrb[81].mxu0 }
 0x815   : > { %v10663_v32 = vadd.f32 %v10662_v56, %v10661_v13  ;;  %v10664_v35 = vpop.f32.mrb[82].mxu0 }
 0x816   : > { %v10665_v58 = vpop.f32.mrb[83].mxu0 }
 0x817   : > { %v10666_v27 = vadd.f32 %v10665_v58, %v10664_v35  ;;  %v15676_v9 = vadd.f32 %v10663_v32, %v15595_v26 }
 0x819   : > { %v15679_v3 = vadd.f32 %v10666_v27, %v15606_v21 }
 0x81b   : > { %v10667_v63 = vpop.f32.mrb[84].mxu0 }
 0x81c   : > { %v10668_v59 = vpop.f32.mrb[85].mxu0 }
 0x81d   : > { %v10669_v46 = vadd.f32 %v10668_v59, %v10667_v63  ;;  %v10670_v30 = vpop.f32.mrb[86].mxu0 }
 0x81e   : > { %v10671_v8 = vpop.f32.mrb[87].mxu0 }
 0x81f   : > { %v10672_v47 = vadd.f32 %v10671_v8, %v10670_v30  ;;  %v12219_v5 = vadd.f32 %v10669_v46, %v15591_v18 }
 0x821   : > { %v12227_v37 = vadd.f32 %v10672_v47, %v15603_v43 }
 0x823   : > { %v10673_v50 = vpop.f32.mrb[88].mxu0 }
 0x824   : > { %v10674_v34 = vpop.f32.mrb[89].mxu0 }
 0x825   : > { %v10675_v57 = vadd.f32 %v10674_v34, %v10673_v50  ;;  %v10676_v26 = vpop.f32.mrb[90].mxu0 }
 0x826   : > { %v10677_v15 = vpop.f32.mrb[91].mxu0 }
 0x827   : > { %v10678_v38 = vadd.f32 %v10677_v15, %v10676_v26  ;;  %v15684_v21 = vadd.f32 %v10675_v57, %v15618_v17 }
 0x829   : > { %v15687_v54 = vadd.f32 %v10678_v38, %v15628_v11 }
 0x82b   : > { %v10679_v61 = vpop.f32.mrb[92].mxu0 }
 0x82c   : > { %v10680_v10 = vpop.f32.mrb[93].mxu0 }
 0x82d   : > { %v10681_v33 = vadd.f32 %v10680_v10, %v10679_v61  ;;  %v10682_v18 = vpop.f32.mrb[94].mxu0 }
 0x82e   : > { %v10683_v2 = vpop.f32.mrb[95].mxu0 }
 0x82f   : > { %v10684_v43 = vadd.f32 %v10683_v2, %v10682_v18  ;;  %v15690_v29 = vadd.f32 %v10681_v33, %v15614_v19  ;;  %v15718_v33 = vld [vmem:[#allocation12] ss:$0 sm:$0xff] }
 0x831   : > { %v15693_v52 = vadd.f32 %v10684_v43, %v15625_v12 }
 0x833   : > { %v10685_v31 = vpop.f32.mrb[96].mxu0 }
 0x834   : > { %v10686_v62 = vpop.f32.mrb[97].mxu0 }
 0x835   : > { %v10687_v16 = vadd.f32 %v10686_v62, %v10685_v31  ;;  %v10688_v17 = vpop.f32.mrb[98].mxu0 }
 0x836   : > { %v10689_v22 = vpop.f32.mrb[99].mxu0 }
 0x837   : > { %v10690_v13 = vadd.f32 %v10689_v22, %v10688_v17  ;;  %v15696_v11 = vadd.f32 %v10687_v16, %v15640_v28 }
 0x839   : > { %v15699_v56 = vadd.f32 %v10690_v13, %v15650_v36 }
 0x83b   : > { %v10691_v32 = vpop.f32.mrb[100].mxu0 }
 0x83c   : > { %v10692_v35 = vpop.f32.mrb[101].mxu0 }
 0x83d   : > { %v10693_v58 = vadd.f32 %v10692_v35, %v10691_v32  ;;  %v10694_v19 = vpop.f32.mrb[102].mxu0 }
 0x83e   : > { %v10695_v27 = vpop.f32.mrb[103].mxu0 }
 0x83f   : > { %v10696_v63 = vadd.f32 %v10695_v27, %v10694_v19  ;;  %v15702_v12 = vadd.f32 %v10693_v58, %v15636_v53 }
 0x841   : > { %v15705_v59 = vadd.f32 %v10696_v63, %v15647_v4  ;;  %v6972_v63 = vld [vmem:[#allocation3 + $0x1] sm:$0xff] }
 0x843   : > { %v10697_v46 = vpop.f32.mrb[104].mxu0 }
 0x844   : > { %v10698_v30 = vpop.f32.mrb[105].mxu0 }
 0x845   : > { %v10699_v8 = vadd.f32 %v10698_v30, %v10697_v46  ;;  %v10700_v28 = vpop.f32.mrb[106].mxu0  ;;  %v6973_v46 = vld [vmem:[#allocation3 + $0x9] sm:$0xff] }
 0x846   : > { %v10701_v47 = vpop.f32.mrb[107].mxu0 }
 0x847   : > { %v10702_v1 = vadd.f32 %v10701_v47, %v10700_v28  ;;  %v15708_v36 = vadd.f32 %v10699_v8, %v15662_v51 }
 0x849   : > { %v15710_v50 = vadd.f32 %v10702_v1, %v5931_v55 }
 0x84b   : > { %v10703_v34 = vpop.f32.mrb[108].mxu0 }
 0x84c   : > { %v10704_v57 = vpop.f32.mrb[109].mxu0 }
 0x84d   : > { %v10705_v26 = vadd.f32 %v10704_v57, %v10703_v34  ;;  %v10706_v15 = vpop.f32.mrb[110].mxu0  ;;  %v7008_v57 = vpack.c.bf16 %v6973_v46, %v6972_v63 }
 0x84e   : > { %v10707_v53 = vpop.f32.mrb[111].mxu0 }
 0x84f   : > { %v10708_v38 = vadd.f32 %v10707_v53, %v10706_v15  ;;  %v15713_v4 = vadd.f32 %v10705_v26, %v15658_v45 }
 0x851   : > { %v15716_v61 = vadd.f32 %v10708_v38, %v15669_v24 }
 0x853   : > { %v10709_v10 = vpop.f32.mrb[112].mxu0  ;;  %v11653_v18 = vpop.f32.mrb[80].mxu1 }
 0x854   : > { %v12220_v51 = vadd.f32 %v12219_v5, %v11653_v18  ;;  %v10710_v2 = vpop.f32.mrb[113].mxu0  ;;  %v6608_v55 = vpop.f32.mrb[81].mxu1 }
 0x855   : > { %v10711_v43 = vadd.f32 %v10710_v2, %v10709_v10  ;;  %v12224_v31 = vadd.f32 %v15676_v9, %v6608_v55  ;;  %v10712_v62 = vpop.f32.mrb[114].mxu0  ;;  %v11654_v16 = vpop.f32.mrb[82].mxu1  ;;  %v12944_v10 = vld [vmem:[#allocation14] sm:$0xff]  }
 0x856   : > { %v6775_v17 = vadd.f32 %v12220_v51, %v15718_v33  ;;  %v12228_v22 = vadd.f32 %v12227_v37, %v11654_v16  ;;  %v10713_v45 = vpop.f32.mrb[115].mxu0  ;;  %v6611_v13 = vpop.f32.mrb[83].mxu1 }
 0x857   : > { %v6773_v24 = vadd.f32 %v12224_v31, %v15718_v33  ;;  %v10714_v32 = vadd.f32 %v10713_v45, %v10712_v62  ;;  %v12232_v35 = vadd.f32 %v15679_v3, %v6611_v13  ;;  %v15725_v58 = vadd.f32 %v15549_v44, %v10711_v43  ;;  %v12950_v13 = vld [vmem:[#allocation14 + $0x8] sm:$0xff]  }
 0x858   : > { %v6807_v5 = vmax.f32 %v6775_v17, 0.0  ;;  %v6776_v19 = vadd.f32 %v12228_v22, %v15718_v33 }
 0x859   : > { %v6805_v27 = vmax.f32 %v6773_v24, 0.0  ;;  %v6774_v9 = vadd.f32 %v12232_v35, %v15718_v33  ;;  %v15730_v37 = vadd.f32 %v15554_v6, %v10714_v32  ;;  %v12955_v24 = vld [vmem:[#allocation14 + $0x50] sm:$0xff]  }
 0x85a   : > { %6839 = vst [vmem:[#allocation3 + $0x31] sm:$0xff] %v6807_v5  ;;  %v6808_v30 = vmax.f32 %v6776_v19, 0.0 }
 0x85b   : > { %6837 = vst [vmem:[#allocation3 + $0x19] sm:$0xff] %v6805_v27  ;;  %v6806_v8 = vmax.f32 %v6774_v9, 0.0  ;;  %v10715_v28 = vpop.f32.mrb[116].mxu0  ;;  %v11657_v3 = vpop.f32.mrb[84].mxu1 }
 0x85c   : > { %6840 = vst [vmem:[#allocation3 + $0x39] sm:$0xff] %v6808_v30  ;;  %v12236_v44 = vadd.f32 %v15690_v29, %v11657_v3  ;;  %v10716_v47 = vpop.f32.mrb[117].mxu0  ;;  %v6624_v1 = vpop.f32.mrb[85].mxu1  ;;  %v15733_v34 = vpack.c.bf16 %v6808_v30, %v6807_v5  ;;  %v12949_v29 = vld [vmem:[#allocation14 + $0x48] sm:$0xff]  }
 0x85d   : > { %6838 = vst [vmem:[#allocation3 + $0x21] sm:$0xff] %v6806_v8  ;;  %v10717_v26 = vadd.f32 %v10716_v47, %v10715_v28  ;;  %v12240_v15 = vadd.f32 %v15684_v21, %v6624_v1  ;;  %v10718_v6 = vpop.f32.mrb[118].mxu0  ;;  %v11658_v53 = vpop.f32.mrb[86].mxu1  ;;  %v7009_v38 = vpack.c.bf16 %v6806_v8, %v6805_v27  ;;  %v12956_v1 = vld [vmem:[#allocation14 + $0x10] sm:$0xff]  }
 0x85e   : > { %v6779_v18 = vadd.f32 %v12236_v44, %v15718_v33  ;;  %v12244_v51 = vadd.f32 %v15693_v52, %v11658_v53  ;;  %v10719_v2 = vpop.f32.mrb[119].mxu0  ;;  %v6627_v55 = vpop.f32.mrb[87].mxu1  ;;  %11699 = vmatprep.mubr.bf16.mxu1 %v15733_v34  ;;  %v12959_v53 = vld [vmem:[#allocation14 + $0x58] sm:$0xff]  }
 0x85f   : > { %v6777_v43 = vadd.f32 %v12240_v15, %v15718_v33  ;;  %v10720_v31 = vadd.f32 %v10719_v2, %v10718_v6  ;;  %v12248_v62 = vadd.f32 %v15687_v54, %v6627_v55  ;;  %7250 = vmatprep.mubr.bf16.mxu0 %v7009_v38  ;;  %v15742_v21 = vadd.f32 %v15559_v25, %v10717_v26 }
 0x860   : > { %v6811_v16 = vmax.f32 %v6779_v18, 0.0  ;;  %v6780_v17 = vadd.f32 %v12244_v51, %v15718_v33  ;;  %7251 = vmatmul.mubr.bf16.vlgmr.msra.gmra.mrb[144].mxu0 %v7008_v57 }
 0x861   : > { %v6809_v22 = vmax.f32 %v6777_v43, 0.0  ;;  %v6778_v52 = vadd.f32 %v12248_v62, %v15718_v33  ;;  %7258 = vmatprep.mubr.bf16.mxu0 %v15733_v34  ;;  %v15748_v45 = vadd.f32 %v15564_v40, %v10720_v31  ;;  %10918 = vmatpush3.bf16.msra.mxu0 %v12944_v10  ;;  %v12960_v43 = vld [vmem:[#allocation14 + $0x18] sm:$0xff]  }
 0x862   : > { %6843 = vst [vmem:[#allocation3 + $0x61] sm:$0xff] %v6811_v16  ;;  %v6812_v54 = vmax.f32 %v6780_v17, 0.0  ;;  %10919 = vmatprep.subr.bf16.mxu0 %v12949_v29  ;;  %v12937_v29 = vld [vmem:[#allocation14 + $0x90] sm:$0xff]  }
 0x863   : > { %6841 = vst [vmem:[#allocation3 + $0x49] sm:$0xff] %v6809_v22  ;;  %v6810_v25 = vmax.f32 %v6778_v52, 0.0  ;;  %v10721_v32 = vpop.f32.mrb[120].mxu0  ;;  %v11661_v35 = vpop.f32.mrb[88].mxu1 }
 0x864   : > { %6844 = vst [vmem:[#allocation3 + $0x69] sm:$0xff] %v6812_v54  ;;  %v12252_v5 = vadd.f32 %v15702_v12, %v11661_v35  ;;  %v10722_v19 = vpop.f32.mrb[121].mxu0  ;;  %v6640_v27 = vpop.f32.mrb[89].mxu1  ;;  %v15751_v9 = vpack.c.bf16 %v6812_v54, %v6811_v16  ;;  %v12936_v12 = vld [vmem:[#allocation14 + $0x88] sm:$0xff]  }
 0x865   : > { %6842 = vst [vmem:[#allocation3 + $0x51] sm:$0xff] %v6810_v25  ;;  %v10723_v40 = vadd.f32 %v10722_v19, %v10721_v32  ;;  %v12256_v63 = vadd.f32 %v15696_v11, %v6640_v27  ;;  %v10724_v46 = vpop.f32.mrb[122].mxu0  ;;  %v11662_v30 = vpop.f32.mrb[90].mxu1  ;;  %v15754_v8 = vpack.c.bf16 %v6810_v25, %v6809_v22  ;;  %10920 = vmatpush3.bf16.msra.mxu0 %v12950_v13  ;;  %v16546_v11 = vld [vmem:[#allocation41_spill] sm:$0xff]  ;;  %v12962_v27 = vld [vmem:[#allocation14 + $0x60] sm:$0xff]  }
 0x866   : > { %v6783_v28 = vadd.f32 %v12252_v5, %v15718_v33  ;;  %v12260_v3 = vadd.f32 %v15705_v59, %v11662_v30  ;;  %v10725_v44 = vpop.f32.mrb[123].mxu0  ;;  %v6643_v47 = vpop.f32.mrb[91].mxu1  ;;  %10921 = vmatprep.subr.bf16.mxu0 %v12955_v24  ;;  %v12964_v30 = vld [vmem:[#allocation14 + $0x20] sm:$0xff]  }
 0x867   : > { %v6781_v57 = vadd.f32 %v12256_v63, %v15718_v33  ;;  %v10726_v26 = vadd.f32 %v10725_v44, %v10724_v46  ;;  %v12264_v15 = vadd.f32 %v15699_v56, %v6643_v47  ;;  %11700 = vmatmul.mubr.bf16.vlgmr.msra.gmra.mrb[96].mxu1 %v15754_v8  ;;  %v15762_v6 = vadd.f32 %v16546_v11, %v10723_v40  ;;  %v16547_v56 = vld [vmem:[#allocation42_spill] sm:$0xff] }
 0x868   : > { %v6815_v10 = vmax.f32 %v6783_v28, 0.0  ;;  %v6784_v18 = vadd.f32 %v12260_v3, %v15718_v33  ;;  %7259 = vmatmul.mubr.bf16.gmra.mrb[148].mxu0 %v7009_v38  ;;  %11703 = vmatprep.mubr.bf16.mxu1 %v15751_v9  ;;  %v12965_v3 = vld [vmem:[#allocation14 + $0x68] sm:$0xff]  }
 0x869   : > { %v6813_v59 = vmax.f32 %v6781_v57, 0.0  ;;  %v6782_v51 = vadd.f32 %v12264_v15, %v15718_v33  ;;  %11732 = vmatpush3.bf16.msra.mxu1 %v15588_v0  ;;  %7266 = vmatprep.mubr.bf16.mxu0 %v15754_v8  ;;  %v15770_v2 = vadd.f32 %v16547_v56, %v10726_v26 }
 0x86a   : > { %6847 = vst [vmem:[#allocation3 + $0x91] sm:$0xff] %v6815_v10  ;;  %v6816_v55 = vmax.f32 %v6784_v18, 0.0  ;;  %11733 = vmatprep.subr.bf16.mxu1 %v12936_v12  ;;  %10922 = vmatpush3.bf16.msra.mxu0 %v12956_v1 }
 0x86b   : > { %6845 = vst [vmem:[#allocation3 + $0x79] sm:$0xff] %v6813_v59  ;;  %v6814_v38 = vmax.f32 %v6782_v51, 0.0  ;;  %v10727_v31 = vpop.f32.mrb[124].mxu0  ;;  %v11665_v62 = vpop.f32.mrb[92].mxu1  ;;  %10923 = vmatprep.subr.bf16.mxu0 %v12959_v53 }
 0x86c   : > { %6848 = vst [vmem:[#allocation3 + $0x99] sm:$0xff] %v6816_v55  ;;  %v12268_v16 = vadd.f32 %v15713_v4, %v11665_v62  ;;  %v10728_v0 = vpop.f32.mrb[125].mxu0  ;;  %v6656_v17 = vpop.f32.mrb[93].mxu1  ;;  %v15773_v22 = vpack.c.bf16 %v6816_v55, %v6815_v10  ;;  %v12938_v4 = vld [vmem:[#allocation14 + $0x98] sm:$0xff]  }
 0x86d   : > { %6846 = vst [vmem:[#allocation3 + $0x81] sm:$0xff] %v6814_v38  ;;  %v10729_v52 = vadd.f32 %v10728_v0, %v10727_v31  ;;  %v12272_v13 = vadd.f32 %v15708_v36, %v6656_v17  ;;  %v10730_v54 = vpop.f32.mrb[126].mxu0  ;;  %v11666_v24 = vpop.f32.mrb[94].mxu1  ;;  %v15776_v25 = vpack.c.bf16 %v6814_v38, %v6813_v59  ;;  %11734 = vmatpush3.bf16.msra.mxu1 %v12936_v12  ;;  %v12939_v12 = vld [vmem:[#allocation14 + $0xa0] sm:$0xff]   ;;  %v12966_v38 = vld [vmem:[#allocation14 + $0x28] sm:$0xff]   ;;  %v12968_v0 = vld [vmem:[#allocation14 + $0x70] sm:$0xff]  }
 0x86e   : > { %v6787_v32 = vadd.f32 %v12268_v16, %v15718_v33  ;;  %v12276_v35 = vadd.f32 %v15716_v61, %v11666_v24  ;;  %v10731_v5 = vpop.f32.mrb[127].mxu0  ;;  %v6659_v19 = vpop.f32.mrb[95].mxu1  ;;  %11735 = vmatprep.subr.bf16.mxu1 %v12937_v29  ;;  %10924 = vmatpush3.bf16.msra.mxu0 %v12960_v43  ;;  %v12940_v43 = vld [vmem:[#allocation14 + $0xa8] sm:$0xff]   ;;  %v12970_v24 = vld [vmem:[#allocation14 + $0x30] sm:$0xff]  }
 0x86f   : > { %v6785_v40 = vadd.f32 %v12272_v13, %v15718_v33  ;;  %v10732_v63 = vadd.f32 %v10731_v5, %v10730_v54  ;;  %v12280_v36 = vadd.f32 %v15710_v50, %v6659_v19  ;;  %11704 = vmatmul.mubr.bf16.gmra.mrb[100].mxu1 %v15776_v25  ;;  %v15784_v46 = vadd.f32 %v15579_v39, %v10729_v52  ;;  %v12941_v54 = vld [vmem:[#allocation14 + $0xb0] sm:$0xff]  }
 0x870   : > { %v6819_v28 = vmax.f32 %v6787_v32, 0.0  ;;  %v6788_v61 = vadd.f32 %v12276_v35, %v15718_v33  ;;  %7267 = vmatmul.mubr.bf16.gmra.mrb[152].mxu0 %v15733_v34  ;;  %11707 = vmatprep.mubr.bf16.mxu1 %v15773_v22 }
 0x871   : > { %v6817_v44 = vmax.f32 %v6785_v40, 0.0  ;;  %v6786_v47 = vadd.f32 %v12280_v36, %v15718_v33  ;;  %7274 = vmatprep.mubr.bf16.mxu0 %v15751_v9  ;;  %v15792_v50 = vadd.f32 %v15584_v20, %v10732_v63  ;;  %11736 = vmatpush3.bf16.msra.mxu1 %v12937_v29 }
 0x872   : > { %6851 = vst [vmem:[#allocation3 + $0xc1] sm:$0xff] %v6819_v28  ;;  %v6820_v39 = vmax.f32 %v6788_v61, 0.0  ;;  %11737 = vmatprep.subr.bf16.mxu1 %v12938_v4  ;;  %10925 = vmatprep.subr.bf16.mxu0 %v12962_v27 }
 0x873   : > { %6849 = vst [vmem:[#allocation3 + $0xa9] sm:$0xff] %v6817_v44  ;;  %v6818_v1 = vmax.f32 %v6786_v47, 0.0  ;;  %v10733_v34 = vpop.f32.mrb[128].mxu0  ;;  %v11669_v57 = vpop.f32.mrb[0].mxu1  ;;  %10926 = vmatpush3.bf16.msra.mxu0 %v12964_v30  ;;  %v12971_v47 = vld [vmem:[#allocation14 + $0x78] sm:$0xff]  }
 0x874   : > { %6852 = vst [vmem:[#allocation3 + $0xc9] sm:$0xff] %v6820_v39  ;;  %v12283_v26 = vadd.f32 %v15742_v21, %v11669_v57  ;;  %v10734_v15 = vpop.f32.mrb[129].mxu0  ;;  %v6672_v11 = vpop.f32.mrb[1].mxu1  ;;  %v15795_v53 = vpack.c.bf16 %v6820_v39, %v6819_v28  ;;  %10927 = vmatprep.subr.bf16.mxu0 %v12965_v3 }
 0x875   : > { %6850 = vst [vmem:[#allocation3 + $0xb1] sm:$0xff] %v6818_v1  ;;  %v10735_v20 = vadd.f32 %v10734_v15, %v10733_v34  ;;  %v12286_v10 = vadd.f32 %v15725_v58, %v6672_v11  ;;  %v10736_v18 = vpop.f32.mrb[130].mxu0  ;;  %v11670_v59 = vpop.f32.mrb[2].mxu1  ;;  %v15798_v51 = vpack.c.bf16 %v6818_v1, %v6817_v44  ;;  %11738 = vmatpush3.bf16.msra.mxu1 %v12938_v4  ;;  %v12972_v34 = vld [vmem:[#allocation14 + $0x38] sm:$0xff]  }
 0x876   : > { %v6791_v56 = vadd.f32 %v12283_v26, %v15718_v33  ;;  %v12289_v55 = vadd.f32 %v15748_v45, %v11670_v59  ;;  %v10737_v29 = vpop.f32.mrb[131].mxu0  ;;  %v6675_v21 = vpop.f32.mrb[3].mxu1  ;;  %11739 = vmatprep.subr.bf16.mxu1 %v12939_v12 }
 0x877   : > { %v6789_v31 = vadd.f32 %v12286_v10, %v15718_v33  ;;  %v10738_v62 = vadd.f32 %v10737_v29, %v10736_v18  ;;  %v12292_v16 = vadd.f32 %v15730_v37, %v6675_v21  ;;  %11708 = vmatmul.mubr.bf16.gmra.mrb[104].mxu1 %v15798_v51  ;;  %v15806_v58 = vadd.f32 %v15598_v60, %v10735_v20 }
 0x878   : > { %v6823_v17 = vmax.f32 %v6791_v56, 0.0  ;;  %v6792_v52 = vadd.f32 %v12289_v55, %v15718_v33  ;;  %7275 = vmatmul.mubr.bf16.gmra.mrb[156].mxu0 %v15754_v8  ;;  %11711 = vmatprep.mubr.bf16.mxu1 %v15795_v53 }
 0x879   : > { %v6821_v45 = vmax.f32 %v6789_v31, 0.0  ;;  %v6790_v13 = vadd.f32 %v12292_v16, %v15718_v33  ;;  %7282 = vmatprep.mubr.bf16.mxu0 %v15776_v25  ;;  %v15814_v37 = vadd.f32 %v15609_v14, %v10738_v62  ;;  %11740 = vmatpush3.bf16.msra.mxu1 %v12939_v12 }
 0x87a   : > { %6855 = vst [vmem:[#allocation3 + $0xf1] sm:$0xff] %v6823_v17  ;;  %v6824_v60 = vmax.f32 %v6792_v52, 0.0  ;;  %11741 = vmatprep.subr.bf16.mxu1 %v12940_v43  ;;  %10928 = vmatpush3.bf16.msra.mxu0 %v12966_v38 }
 0x87b   : > { %6853 = vst [vmem:[#allocation3 + $0xd9] sm:$0xff] %v6821_v45  ;;  %v6822_v32 = vmax.f32 %v6790_v13, 0.0  ;;  %v10739_v8 = vpop.f32.mrb[132].mxu0  ;;  %v11673_v35 = vpop.f32.mrb[4].mxu1  ;;  %10929 = vmatprep.subr.bf16.mxu0 %v12968_v0 }
 0x87c   : > { %6856 = vst [vmem:[#allocation3 + $0xf9] sm:$0xff] %v6824_v60  ;;  %v12295_v5 = vadd.f32 %v15784_v46, %v11673_v35  ;;  %v10740_v19 = vpop.f32.mrb[133].mxu0  ;;  %v6688_v4 = vpop.f32.mrb[5].mxu1  ;;  %v15817_v27 = vpack.c.bf16 %v6824_v60, %v6823_v17  ;;  %v12942_v46 = vld [vmem:[#allocation14 + $0xb8] sm:$0xff]  }
 0x87d   : > { %6854 = vst [vmem:[#allocation3 + $0xe1] sm:$0xff] %v6822_v32  ;;  %v10741_v14 = vadd.f32 %v10740_v19, %v10739_v8  ;;  %v12298_v40 = vadd.f32 %v15762_v6, %v6688_v4  ;;  %v10742_v63 = vpop.f32.mrb[134].mxu0  ;;  %v11674_v36 = vpop.f32.mrb[6].mxu1  ;;  %v15820_v30 = vpack.c.bf16 %v6822_v32, %v6821_v45  ;;  %11742 = vmatpush3.bf16.msra.mxu1 %v12940_v43 }
 0x87e   : > { %v6795_v28 = vadd.f32 %v12295_v5, %v15718_v33  ;;  %v12301_v61 = vadd.f32 %v15792_v50, %v11674_v36  ;;  %v10743_v3 = vpop.f32.mrb[135].mxu0  ;;  %v6691_v44 = vpop.f32.mrb[7].mxu1  ;;  %11743 = vmatprep.subr.bf16.mxu1 %v12941_v54  ;;  %10930 = vmatpush3.bf16.msra.mxu0 %v12970_v24 }
 0x87f   : > { %v6793_v39 = vadd.f32 %v12298_v40, %v15718_v33  ;;  %v10744_v12 = vadd.f32 %v10743_v3, %v10742_v63  ;;  %v12304_v6 = vadd.f32 %v15770_v2, %v6691_v44  ;;  %v12306_v1 = vadd.f32 %v15621_v42, %v10741_v14  ;;  %11712 = vmatmul.mubr.bf16.gmra.mrb[108].mxu1 %v15820_v30  ;;  %v12945_v2 = vld [vmem:[#allocation14 + $0x1c0] sm:$0xff]  }
 0x880   : > { %v6827_v57 = vmax.f32 %v6795_v28, 0.0  ;;  %v6796_v26 = vadd.f32 %v12301_v61, %v15718_v33  ;;  %7283 = vmatmul.mubr.bf16.gmra.mrb[160].mxu0 %v15751_v9  ;;  %11715 = vmatprep.mubr.bf16.mxu1 %v15817_v27 }
 0x881   : > { %v6825_v50 = vmax.f32 %v6793_v39, 0.0  ;;  %v6794_v15 = vadd.f32 %v12304_v6, %v15718_v33  ;;  %v12312_v11 = vadd.f32 %v15631_v48, %v10744_v12  ;;  %7290 = vmatprep.mubr.bf16.mxu0 %v15773_v22  ;;  %11744 = vmatpush3.bf16.msra.mxu1 %v12941_v54 }
 0x882   : > { %6859 = vst [vmem:[#allocation3 + $0x121] sm:$0xff] %v6827_v57  ;;  %v6828_v42 = vmax.f32 %v6796_v26, 0.0  ;;  %11745 = vmatprep.subr.bf16.mxu1 %v12942_v46  ;;  %10931 = vmatprep.subr.bf16.mxu0 %v12971_v47 }
 0x883   : > { %6857 = vst [vmem:[#allocation3 + $0x109] sm:$0xff] %v6825_v50  ;;  %v6826_v20 = vmax.f32 %v6794_v15, 0.0  ;;  %v10745_v10 = vpop.f32.mrb[136].mxu0  ;;  %v11677_v18 = vpop.f32.mrb[8].mxu1  ;;  %10932 = vmatpush3.bf16.msra.mxu0 %v12972_v34  ;;  %v7007_v15 = vld [vmem:[#allocation3 + $0x1a1] sm:$0xff] }
 0x884   : > { %6860 = vst [vmem:[#allocation3 + $0x129] sm:$0xff] %v6828_v42  ;;  %v12307_v9 = vadd.f32 %v12306_v1, %v11677_v18  ;;  %v10746_v59 = vpop.f32.mrb[137].mxu0  ;;  %v6704_v56 = vpop.f32.mrb[9].mxu1  ;;  %v15834_v55 = vpack.c.bf16 %v6828_v42, %v6827_v57  ;;  %v6876_v18 = vld [vmem:[#allocation3 + $0x48] sm:$0xff] }
 0x885   : > { %6858 = vst [vmem:[#allocation3 + $0x111] sm:$0xff] %v6826_v20  ;;  %v10747_v48 = vadd.f32 %v10746_v59, %v10745_v10  ;;  %v12310_v29 = vadd.f32 %v15806_v58, %v6704_v56  ;;  %v10748_v21 = vpop.f32.mrb[138].mxu0  ;;  %v11678_v43 = vpop.f32.mrb[10].mxu1  ;;  %v15837_v38 = vpack.c.bf16 %v6826_v20, %v6825_v50  ;;  %11746 = vmatpush3.bf16.msra.mxu1 %v12942_v46  ;;  %v6879_v10 = vld [vmem:[#allocation3 + $0x68] sm:$0xff]  ;;  %v6878_v59 = vld [vmem:[#allocation3 + $0x60] sm:$0xff] }
 0x886   : > { %v6799_v31 = vadd.f32 %v12307_v9, %v15718_v33  ;;  %v12313_v62 = vadd.f32 %v12312_v11, %v11678_v43  ;;  %v10749_v16 = vpop.f32.mrb[139].mxu0  ;;  %v6707_v0 = vpop.f32.mrb[11].mxu1  ;;  %11053 = vmatprep.subr.bf16.mxu1 %v12945_v2  ;;  %v6874_v2 = vld [vmem:[#allocation3 + $0x30] sm:$0xff]  ;;  %v12951_v43 = vld [vmem:[#allocation14 + $0x1d0] sm:$0xff]  }
 0x887   : > { %v6797_v17 = vadd.f32 %v12310_v29, %v15718_v33  ;;  %v10750_v52 = vadd.f32 %v10749_v16, %v10748_v21  ;;  %v12316_v45 = vadd.f32 %v15814_v37, %v6707_v0  ;;  %v12321_v13 = vadd.f32 %v15643_v49, %v10747_v48  ;;  %11716 = vmatmul.mubr.bf16.gmra.mrb[112].mxu1 %v15837_v38  ;;  %v12946_v56 = vld [vmem:[#allocation14 + $0x180] sm:$0xff]   ;;  %v12947_v29 = vld [vmem:[#allocation14 + $0x1c8] sm:$0xff]   ;;  %v6881_v21 = vld [vmem:[#allocation3 + $0x80] sm:$0xff] }
 0x888   : > { %v6831_v58 = vmax.f32 %v6799_v31, 0.0  ;;  %v6800_v60 = vadd.f32 %v12313_v62, %v15718_v33  ;;  %7291 = vmatmul.mubr.bf16.gmra.mrb[164].mxu0 %v15776_v25  ;;  %11719 = vmatprep.mubr.bf16.mxu1 %v15834_v55  ;;  %v15879_v48 = vpack.c.bf16 %v6879_v10, %v6878_v59  ;;  %v6883_v31 = vld [vmem:[#allocation3 + $0x98] sm:$0xff]  ;;  %v6882_v0 = vld [vmem:[#allocation3 + $0x90] sm:$0xff]  ;;  %v6905_v10 = vld [vmem:[#allocation3 + $0x1a0] sm:$0xff] }
 0x889   : > { %v6829_v54 = vmax.f32 %v6797_v17, 0.0  ;;  %v6798_v24 = vadd.f32 %v12316_v45, %v15718_v33  ;;  %v12327_v32 = vadd.f32 %v15653_v41, %v10750_v52  ;;  %7298 = vmatprep.mubr.bf16.mxu0 %v15798_v51  ;;  %v6880_v62 = vld [vmem:[#allocation3 + $0x78] sm:$0xff]  ;;  %v15887_v52 = vpack.c.bf16 %v6883_v31, %v6882_v0  ;;  %v12954_v45 = vld [vmem:[#allocation14 + $0x198] sm:$0xff]  }
 0x88a   : > { %6863 = vst [vmem:[#allocation3 + $0x151] sm:$0xff] %v6831_v58  ;;  %v6832_v37 = vmax.f32 %v6800_v60, 0.0  ;;  %v15885_v16 = vpack.c.bf16 %v6881_v21, %v6880_v62  ;;  %v12952_v17 = vld [vmem:[#allocation14 + $0x190] sm:$0xff]   ;;  %v6887_v60 = vld [vmem:[#allocation3 + $0xc8] sm:$0xff]  ;;  %v8010_v62 = vld [vmem:[#allocation3 + $0x32] sm:$0xff] }
 0x88b   : > { %6861 = vst [vmem:[#allocation3 + $0x139] sm:$0xff] %v6829_v54  ;;  %v6830_v49 = vmax.f32 %v6798_v24, 0.0  ;;  %v10751_v8 = vpop.f32.mrb[140].mxu0  ;;  %v11681_v35 = vpop.f32.mrb[12].mxu1  ;;  %v8007_v31 = vld [vmem:[#allocation3 + $0xa] sm:$0xff]  ;;  %v8011_v0 = vld [vmem:[#allocation3 + $0x3a] sm:$0xff] }
 0x88c   : > { %6864 = vst [vmem:[#allocation3 + $0x159] sm:$0xff] %v6832_v37  ;;  %v10752_v5 = vpop.f32.mrb[141].mxu0  ;;  %v6720_v19 = vpop.f32.mrb[13].mxu1  ;;  %v15850_v4 = vpack.c.bf16 %v6832_v37, %v6831_v58  ;;  %v12957_v58 = vld [vmem:[#allocation14 + $0x1e0] sm:$0xff]  }
 0x88d   : > { %6862 = vst [vmem:[#allocation3 + $0x141] sm:$0xff] %v6830_v49  ;;  %v10753_v25 = vadd.f32 %v10752_v5, %v10751_v8  ;;  %v12322_v14 = vadd.f32 %v12321_v13, %v6720_v19  ;;  %v10754_v40 = vpop.f32.mrb[142].mxu0  ;;  %v11682_v63 = vpop.f32.mrb[14].mxu1  ;;  %v15852_v36 = vpack.c.bf16 %v6830_v49, %v6829_v54  ;;  %v6885_v13 = vld [vmem:[#allocation3 + $0xb0] sm:$0xff]  ;;  %v6884_v54 = vld [vmem:[#allocation3 + $0xa8] sm:$0xff]  ;;  %v12967_v5 = vld [vmem:[#allocation14 + $0x1f0] sm:$0xff]  }
 0x88e   : > { %v10755_v41 = vpop.f32.mrb[143].mxu0  ;;  %v6723_v28 = vpop.f32.mrb[15].mxu1  ;;  %v15893_v24 = vpack.c.bf16 %v6885_v13, %v6884_v54  ;;  %v12958_v37 = vld [vmem:[#allocation14 + $0x1a0] sm:$0xff]   ;;  %v12963_v8 = vld [vmem:[#allocation14 + $0x1a8] sm:$0xff]   ;;  %v12978_v54 = vld [vmem:[#allocation14 + $0x218] sm:$0xff]  }
 0x88f   : > { %v12318_v61 = vadd.f32 %v15665_v7, %v10753_v25  ;;  %v6801_v3 = vadd.f32 %v12322_v14, %v15718_v33  ;;  %v10756_v44 = vadd.f32 %v10755_v41, %v10754_v40  ;;  %v12328_v46 = vadd.f32 %v12327_v32, %v6723_v28  ;;  %11720 = vmatmul.mubr.bf16.gmra.mrb[116].mxu1 %v15852_v36  ;;  %v6886_v32 = vld [vmem:[#allocation3 + $0xc0] sm:$0xff]  ;;  %v6891_v19 = vld [vmem:[#allocation3 + $0xf8] sm:$0xff]  ;;  %v6890_v40 = vld [vmem:[#allocation3 + $0xf0] sm:$0xff] }
 0x890   : > { %7299 = vmatmul.mubr.bf16.gmra.mrb[168].mxu0 %v15773_v22  ;;  %11723 = vmatprep.mubr.bf16.mxu1 %v15850_v4  ;;  %v15895_v49 = vpack.c.bf16 %v6887_v60, %v6886_v32  ;;  %v6888_v25 = vld [vmem:[#allocation3 + $0xd8] sm:$0xff]  ;;  %v15903_v41 = vpack.c.bf16 %v6891_v19, %v6890_v40  ;;  %v12974_v28 = vld [vmem:[#allocation14 + $0x1b8] sm:$0xff]   ;;  %v12979_v32 = vld [vmem:[#allocation14 + $0x220] sm:$0xff]  }
 0x891   : > { %v12319_v47 = vadd.f32 %v12318_v61, %v11681_v35  ;;  %v6833_v39 = vmax.f32 %v6801_v3, 0.0  ;;  %v12324_v12 = vadd.f32 %v15673_v23, %v10756_v44  ;;  %v6802_v6 = vadd.f32 %v12328_v46, %v15718_v33  ;;  %7306 = vmatprep.mubr.bf16.mxu0 %v15795_v53  ;;  %v7006_v23 = vld [vmem:[#allocation3 + $0x199] sm:$0xff]  ;;  %v6893_v61 = vld [vmem:[#allocation3 + $0x110] sm:$0xff]  ;;  %v6895_v44 = vld [vmem:[#allocation3 + $0x128] sm:$0xff] }
 0x892   : > { %v7025_v42 = vpack.c.bf16 %v7007_v15, %v7006_v23  ;;  %v6889_v35 = vld [vmem:[#allocation3 + $0xe0] sm:$0xff]  ;;  %v12975_v3 = vld [vmem:[#allocation14 + $0x200] sm:$0xff]  }
 0x893   : > { %v6803_v7 = vadd.f32 %v12319_v47, %v15718_v33  ;;  %6865 = vst [vmem:[#allocation3 + $0x169] sm:$0xff] %v6833_v39  ;;  %v12325_v1 = vadd.f32 %v12324_v12, %v11682_v63  ;;  %v6834_v34 = vmax.f32 %v6802_v6, 0.0  ;;  %v15901_v14 = vpack.c.bf16 %v6889_v35, %v6888_v25  ;;  %v12969_v63 = vld [vmem:[#allocation14 + $0x1b0] sm:$0xff]   ;;  %v6892_v46 = vld [vmem:[#allocation3 + $0x108] sm:$0xff]  ;;  %v12980_v35 = vld [vmem:[#allocation14 + $0x228] sm:$0xff]  }
 0x894   : > { %v15909_v47 = vpack.c.bf16 %v6893_v61, %v6892_v46  ;;  %v6899_v6 = vld [vmem:[#allocation3 + $0x158] sm:$0xff]  ;;  %v6873_v23 = vld [vmem:[#allocation3 + $0x20] sm:$0xff]  ;;  %v8012_v13 = vld [vmem:[#allocation3 + $0x4a] sm:$0xff] }
 0x895   : > { %v6835_v57 = vmax.f32 %v6803_v7, 0.0  ;;  %v6804_v26 = vadd.f32 %v12325_v1, %v15718_v33  ;;  %6866 = vst [vmem:[#allocation3 + $0x171] sm:$0xff] %v6834_v34  ;;  %v15864_v22 = vpack.c.bf16 %v6834_v34, %v6833_v39  ;;  %v6875_v33 = vld [vmem:[#allocation3 + $0x38] sm:$0xff]  ;;  %v6894_v39 = vld [vmem:[#allocation3 + $0x120] sm:$0xff]  ;;  %v6898_v34 = vld [vmem:[#allocation3 + $0x150] sm:$0xff] }
 0x896   : > { %v15872_v20 = vpack.c.bf16 %v6875_v33, %v6874_v2  ;;  %v15911_v12 = vpack.c.bf16 %v6895_v44, %v6894_v39  ;;  %v6896_v7 = vld [vmem:[#allocation3 + $0x138] sm:$0xff]  ;;  %v8017_v19 = vld [vmem:[#allocation3 + $0x82] sm:$0xff]  ;;  %v8023_v44 = vld [vmem:[#allocation3 + $0xca] sm:$0xff] }
 0x897   : > { %6867 = vst [vmem:[#allocation3 + $0x181] sm:$0xff] %v6835_v57  ;;  %v6836_v50 = vmax.f32 %v6804_v26, 0.0  ;;  %11724 = vmatmul.mubr.bf16.gmra.mrb[120].mxu1 %v15864_v22  ;;  %v6872_v2 = vld [vmem:[#allocation3 + $0x18] sm:$0xff]  ;;  %v12982_v40 = vld [vmem:[#allocation14 + $0x238] sm:$0xff]  }
 0x898   : > { %7307 = vmatmul.mubr.bf16.gmra.mrb[172].mxu0 %v15798_v51  ;;  %v6877_v51 = vld [vmem:[#allocation3 + $0x50] sm:$0xff]  ;;  %v8025_v39 = vld [vmem:[#allocation3 + $0xe2] sm:$0xff] }
 0x899   : > { %6868 = vst [vmem:[#allocation3 + $0x189] sm:$0xff] %v6836_v50  ;;  %7314 = vmatprep.mubr.bf16.mxu0 %v15820_v30  ;;  %v15869_v11 = vpack.c.bf16 %v6836_v50, %v6835_v57  ;;  %v15877_v9 = vpack.c.bf16 %v6877_v51, %v6876_v18  ;;  %v15919_v57 = vpack.c.bf16 %v6899_v6, %v6898_v34  ;;  %v6871_v18 = vld [vmem:[#allocation3 + $0x8] sm:$0xff]  ;;  %v8027_v6 = vld [vmem:[#allocation3 + $0xfa] sm:$0xff]  ;;  %v8029_v34 = vld [vmem:[#allocation3 + $0x112] sm:$0xff] }
 0x89a   : > { %v6900_v50 = vld [vmem:[#allocation3 + $0x168] sm:$0xff]  ;;  %v6907_v51 = vpack.c.bf16 %v6873_v23, %v6872_v2 }
 0x89b   : > { %11727 = vmatprep.mubr.bf16.mxu1 %v15869_v11 }
 0x89f   : > { %11728 = vmatmul.mubr.bf16.gmra.mrb[124].mxu1 %v7025_v42  ;;  %v6902_v42 = vld [vmem:[#allocation3 + $0x180] sm:$0xff] }
 0x8a0   : > { %7315 = vmatmul.mubr.bf16.gmra.mrb[176].mxu0 %v15795_v53  ;;  %11747 = vmatprep.mubr.bf16.mxu1 %v15872_v20  ;;  %v12948_v53 = vld [vmem:[#allocation14 + $0x188] sm:$0xff]   ;;  %v6903_v26 = vld [vmem:[#allocation3 + $0x188] sm:$0xff] }
 0x8a1   : > { %7322 = vmatprep.mubr.bf16.mxu0 %v15817_v27  ;;  %v15927_v33 = vpack.c.bf16 %v6903_v26, %v6902_v42  ;;  %v8030_v26 = vld [vmem:[#allocation3 + $0x122] sm:$0xff] }
 0x8a7   : > { %11748 = vmatmul.mubr.bf16.vlgmr.msra.gmra.mrb[96].mxu1 %v15877_v9 }
 0x8a8   : > { %7323 = vmatmul.mubr.bf16.gmra.mrb[180].mxu0 %v15820_v30  ;;  %11751 = vmatprep.mubr.bf16.mxu1 %v15879_v48  ;;  %v12953_v30 = vld [vmem:[#allocation14 + $0x1d8] sm:$0xff]  }
 0x8a9   : > { %11054 = vmatpush3.bf16.msra.mxu1 %v12946_v56  ;;  %7330 = vmatprep.mubr.bf16.mxu0 %v15837_v38  ;;  %v8008_v56 = vld [vmem:[#allocation3 + $0x1a] sm:$0xff] }
 0x8aa   : > { %11055 = vmatprep.subr.bf16.mxu1 %v12947_v29  ;;  %v8009_v29 = vld [vmem:[#allocation3 + $0x22] sm:$0xff] }
 0x8ab   : > { %v8043_v21 = vpack.c.bf16 %v8009_v29, %v8008_v56 }
 0x8ad   : > { %11056 = vmatpush3.bf16.msra.mxu1 %v12948_v53 }
 0x8ae   : > { %11057 = vmatprep.subr.bf16.mxu1 %v12951_v43  ;;  %v8006_v43 = vld [vmem:[#allocation3 + $0x2] sm:$0xff] }
 0x8af   : > { %11752 = vmatmul.mubr.bf16.gmra.mrb[100].mxu1 %v15885_v16 }
 0x8b0   : > { %7331 = vmatmul.mubr.bf16.gmra.mrb[184].mxu0 %v15817_v27  ;;  %11755 = vmatprep.mubr.bf16.mxu1 %v15887_v52  ;;  %v12961_v27 = vld [vmem:[#allocation14 + $0x1e8] sm:$0xff]  }
 0x8b1   : > { %7338 = vmatprep.mubr.bf16.mxu0 %v15834_v55  ;;  %11058 = vmatpush3.bf16.msra.mxu1 %v12952_v17  ;;  %v15933_v17 = vpack.c.bf16 %v8011_v0, %v8010_v62 }
 0x8b2   : > { %11059 = vmatprep.subr.bf16.mxu1 %v12953_v30  ;;  %v12976_v30 = vld [vmem:[#allocation14 + $0x208] sm:$0xff]  }
 0x8b5   : > { %11060 = vmatpush3.bf16.msra.mxu1 %v12954_v45  ;;  %v12977_v45 = vld [vmem:[#allocation14 + $0x210] sm:$0xff]  }
 0x8b6   : > { %11061 = vmatprep.subr.bf16.mxu1 %v12957_v58  ;;  %v8013_v58 = vld [vmem:[#allocation3 + $0x52] sm:$0xff] }
 0x8b7   : > { %11756 = vmatmul.mubr.bf16.gmra.mrb[104].mxu1 %v15893_v24  ;;  %v15937_v60 = vpack.c.bf16 %v8013_v58, %v8012_v13 }
 0x8b8   : > { %7339 = vmatmul.mubr.bf16.gmra.mrb[188].mxu0 %v15837_v38  ;;  %11759 = vmatprep.mubr.bf16.mxu1 %v15895_v49  ;;  %v12973_v38 = vld [vmem:[#allocation14 + $0x1f8] sm:$0xff]  }
 0x8b9   : > { %7346 = vmatprep.mubr.bf16.mxu0 %v15852_v36  ;;  %11062 = vmatpush3.bf16.msra.mxu1 %v12958_v37  ;;  %v8014_v37 = vld [vmem:[#allocation3 + $0x62] sm:$0xff] }
 0x8ba   : > { %11063 = vmatprep.subr.bf16.mxu1 %v12961_v27  ;;  %v8015_v27 = vld [vmem:[#allocation3 + $0x6a] sm:$0xff] }
 0x8bd   : > { %11064 = vmatpush3.bf16.msra.mxu1 %v12963_v8  ;;  %v15942_v8 = vpack.c.bf16 %v8015_v27, %v8014_v37 }
 0x8be   : > { %11065 = vmatprep.subr.bf16.mxu1 %v12967_v5  ;;  %v8016_v5 = vld [vmem:[#allocation3 + $0x7a] sm:$0xff] }
 0x8bf   : > { %11760 = vmatmul.mubr.bf16.gmra.mrb[108].mxu1 %v15901_v14  ;;  %v15948_v25 = vpack.c.bf16 %v8017_v19, %v8016_v5 }
 0x8c0   : > { %7347 = vmatmul.mubr.bf16.gmra.mrb[192].mxu0 %v15834_v55  ;;  %11763 = vmatprep.mubr.bf16.mxu1 %v15903_v41  ;;  %v6897_v55 = vld [vmem:[#allocation3 + $0x140] sm:$0xff] }
 0x8c1   : > { %7354 = vmatprep.mubr.bf16.mxu0 %v15850_v4  ;;  %11066 = vmatpush3.bf16.msra.mxu1 %v12969_v63  ;;  %v15917_v1 = vpack.c.bf16 %v6897_v55, %v6896_v7  ;;  %v8019_v63 = vld [vmem:[#allocation3 + $0x9a] sm:$0xff] }
 0x8c2   : > { %11067 = vmatprep.subr.bf16.mxu1 %v12973_v38 }
 0x8c5   : > { %11068 = vmatpush3.bf16.msra.mxu1 %v12974_v28  ;;  %v8021_v28 = vld [vmem:[#allocation3 + $0xb2] sm:$0xff] }
 0x8c6   : > { %11779 = vmatprep.subr.bf16.mxu1 %v12975_v3 }
 0x8c7   : > { %11764 = vmatmul.mubr.bf16.gmra.mrb[112].mxu1 %v15909_v47 }
 0x8c8   : > { %7355 = vmatmul.mubr.bf16.gmra.mrb[196].mxu0 %v15852_v36  ;;  %11767 = vmatprep.mubr.bf16.mxu1 %v15911_v12  ;;  %v6901_v36 = vld [vmem:[#allocation3 + $0x170] sm:$0xff] }
 0x8c9   : > { %7362 = vmatprep.mubr.bf16.mxu0 %v15864_v22  ;;  %v15925_v15 = vpack.c.bf16 %v6901_v36, %v6900_v50  ;;  %v8031_v50 = vld [vmem:[#allocation3 + $0x12a] sm:$0xff] }
 0x8ca   : > { %v15992_v2 = vpack.c.bf16 %v8031_v50, %v8030_v26 }
 0x8cf   : > { %11768 = vmatmul.mubr.bf16.gmra.mrb[116].mxu1 %v15917_v1 }
 0x8d0   : > { %7363 = vmatmul.mubr.bf16.gmra.mrb[200].mxu0 %v15850_v4  ;;  %11771 = vmatprep.mubr.bf16.mxu1 %v15919_v57  ;;  %v6904_v4 = vld [vmem:[#allocation3 + $0x198] sm:$0xff] }
 0x8d1   : > { %7370 = vmatprep.mubr.bf16.mxu0 %v15869_v11  ;;  %v6870_v11 = vld [vmem:[#allocation3] sm:$0xff]  ;;  %v6923_v59 = vpack.c.bf16 %v6905_v10, %v6904_v4 }
 0x8d2   : > { %v6906_v53 = vpack.c.bf16 %v6871_v18, %v6870_v11  ;;  %v8032_v10 = vld [vmem:[#allocation3 + $0x13a] sm:$0xff]  ;;  %v8033_v11 = vld [vmem:[#allocation3 + $0x142] sm:$0xff] }
 0x8d7   : > { %11772 = vmatmul.mubr.bf16.gmra.mrb[120].mxu1 %v15925_v15 }
 0x8d8   : > { %7371 = vmatmul.mubr.bf16.gmra.mrb[204].mxu0 %v15864_v22  ;;  %11775 = vmatprep.mubr.bf16.mxu1 %v15927_v33  ;;  %v8042_v22 = vpack.c.bf16 %v8007_v31, %v8006_v43  ;;  %v8034_v43 = vld [vmem:[#allocation3 + $0x152] sm:$0xff]  ;;  %v8035_v31 = vld [vmem:[#allocation3 + $0x15a] sm:$0xff] }
 0x8d9   : > { %7716 = vmatprep.mubr.bf16.mxu0 %v6907_v51 }
 0x8df   : > { %11776 = vmatmul.mubr.bf16.gmra.mrb[124].mxu1 %v6923_v59 }
 0x8e0   : > { %7717 = vmatmul.mubr.bf16.vlgmr.msra.gmra.mrb[208].mxu0 %v6906_v53  ;;  %8284 = vmatprep.mubr.bf16.mxu1 %v8043_v21  ;;  %v16002_v53 = vpack.c.bf16 %v8033_v11, %v8032_v10 }
 0x8e1   : > { %7724 = vmatprep.mubr.bf16.mxu0 %v15872_v20 }
 0x8e7   : > { %8285 = vmatmul.mubr.bf16.vlgmr.msra.gmra.mrb[128].mxu1 %v8042_v22 }
 0x8e8   : > { %7725 = vmatmul.mubr.bf16.gmra.mrb[212].mxu0 %v6907_v51  ;;  %8292 = vmatprep.mubr.bf16.mxu1 %v15933_v17 }
 0x8e9   : > { %11780 = vmatpush3.bf16.msra.mxu1 %v12975_v3  ;;  %7732 = vmatprep.mubr.bf16.mxu0 %v15877_v9  ;;  %v8022_v3 = vld [vmem:[#allocation3 + $0xc2] sm:$0xff] }
 0x8ea   : > { %11781 = vmatprep.subr.bf16.mxu1 %v12976_v30  ;;  %v15966_v46 = vpack.c.bf16 %v8023_v44, %v8022_v3 }
 0x8ed   : > { %11782 = vmatpush3.bf16.msra.mxu1 %v12976_v30 }
 0x8ee   : > { %11783 = vmatprep.subr.bf16.mxu1 %v12977_v45 }
 0x8ef   : > { %8293 = vmatmul.mubr.bf16.gmra.mrb[132].mxu1 %v8043_v21 }
 0x8f0   : > { %7733 = vmatmul.mubr.bf16.gmra.mrb[216].mxu0 %v15872_v20  ;;  %8300 = vmatprep.mubr.bf16.mxu1 %v15937_v60  ;;  %v12981_v20 = vld [vmem:[#allocation14 + $0x230] sm:$0xff]  }
 0x8f1   : > { %7740 = vmatprep.mubr.bf16.mxu0 %v15879_v48  ;;  %11784 = vmatpush3.bf16.msra.mxu1 %v12977_v45  ;;  %v16012_v45 = vpack.c.bf16 %v8035_v31, %v8034_v43 }
 0x8f2   : > { %11785 = vmatprep.subr.bf16.mxu1 %v12978_v54 }
 0x8f5   : > { %11786 = vmatpush3.bf16.msra.mxu1 %v12978_v54  ;;  %v8036_v54 = vld [vmem:[#allocation3 + $0x16a] sm:$0xff] }
 0x8f6   : > { %11787 = vmatprep.subr.bf16.mxu1 %v12979_v32 }
 0x8f7   : > { %8301 = vmatmul.mubr.bf16.gmra.mrb[136].mxu1 %v15933_v17 }
 0x8f8   : > { %7741 = vmatmul.mubr.bf16.gmra.mrb[220].mxu0 %v15877_v9  ;;  %8308 = vmatprep.mubr.bf16.mxu1 %v15942_v8  ;;  %v8018_v9 = vld [vmem:[#allocation3 + $0x92] sm:$0xff] }
 0x8f9   : > { %7748 = vmatprep.mubr.bf16.mxu0 %v15885_v16  ;;  %11788 = vmatpush3.bf16.msra.mxu1 %v12979_v32  ;;  %v15954_v38 = vpack.c.bf16 %v8019_v63, %v8018_v9  ;;  %v8037_v32 = vld [vmem:[#allocation3 + $0x172] sm:$0xff]  ;;  %v8039_v9 = vld [vmem:[#allocation3 + $0x18a] sm:$0xff] }
 0x8fa   : > { %11789 = vmatprep.subr.bf16.mxu1 %v12980_v35  ;;  %v16025_v5 = vpack.c.bf16 %v8037_v32, %v8036_v54 }
 0x8fd   : > { %11790 = vmatpush3.bf16.msra.mxu1 %v12980_v35 }
 0x8fe   : > { %11791 = vmatprep.subr.bf16.mxu1 %v12981_v20 }
 0x8ff   : > { %8309 = vmatmul.mubr.bf16.gmra.mrb[140].mxu1 %v15937_v60 }
 0x900   : > { %7749 = vmatmul.mubr.bf16.gmra.mrb[224].mxu0 %v15879_v48  ;;  %8316 = vmatprep.mubr.bf16.mxu1 %v15948_v25  ;;  %v8020_v48 = vld [vmem:[#allocation3 + $0xaa] sm:$0xff] }
 0x901   : > { %7756 = vmatprep.mubr.bf16.mxu0 %v15887_v52  ;;  %11792 = vmatpush3.bf16.msra.mxu1 %v12981_v20  ;;  %v15960_v61 = vpack.c.bf16 %v8021_v28, %v8020_v48 }
 0x902   : > { %11793 = vmatprep.subr.bf16.mxu1 %v12982_v40 }
 0x905   : > { %11794 = vmatpush3.bf16.msra.mxu1 %v12982_v40  ;;  %v8038_v40 = vld [vmem:[#allocation3 + $0x182] sm:$0xff] }
 0x906   : > { %v16035_v44 = vpack.c.bf16 %v8039_v9, %v8038_v40 }
 0x907   : > { %8317 = vmatmul.mubr.bf16.gmra.mrb[144].mxu1 %v15942_v8 }
 0x908   : > { %7757 = vmatmul.mubr.bf16.gmra.mrb[228].mxu0 %v15885_v16  ;;  %8324 = vmatprep.mubr.bf16.mxu1 %v15954_v38  ;;  %v8024_v16 = vld [vmem:[#allocation3 + $0xda] sm:$0xff] }
 0x909   : > { %7764 = vmatprep.mubr.bf16.mxu0 %v15893_v24  ;;  %v15972_v55 = vpack.c.bf16 %v8025_v39, %v8024_v16 }
 0x90f   : > { %8325 = vmatmul.mubr.bf16.gmra.mrb[148].mxu1 %v15948_v25 }
 0x910   : > { %7765 = vmatmul.mubr.bf16.gmra.mrb[232].mxu0 %v15887_v52  ;;  %8332 = vmatprep.mubr.bf16.mxu1 %v15960_v61  ;;  %v8026_v52 = vld [vmem:[#allocation3 + $0xf2] sm:$0xff] }
 0x911   : > { %7772 = vmatprep.mubr.bf16.mxu0 %v15895_v49  ;;  %v15978_v7 = vpack.c.bf16 %v8027_v6, %v8026_v52 }
 0x917   : > { %8333 = vmatmul.mubr.bf16.gmra.mrb[152].mxu1 %v15954_v38 }
 0x918   : > { %7773 = vmatmul.mubr.bf16.gmra.mrb[236].mxu0 %v15893_v24  ;;  %8340 = vmatprep.mubr.bf16.mxu1 %v15966_v46  ;;  %v8028_v24 = vld [vmem:[#allocation3 + $0x10a] sm:$0xff] }
 0x919   : > { %7780 = vmatprep.mubr.bf16.mxu0 %v15901_v14  ;;  %v15984_v36 = vpack.c.bf16 %v8029_v34, %v8028_v24 }
 0x91f   : > { %8341 = vmatmul.mubr.bf16.gmra.mrb[156].mxu1 %v15960_v61 }
 0x920   : > { %7781 = vmatmul.mubr.bf16.gmra.mrb[240].mxu0 %v15895_v49  ;;  %8348 = vmatprep.mubr.bf16.mxu1 %v15972_v55 }
 0x921   : > { %7788 = vmatprep.mubr.bf16.mxu0 %v15903_v41 }
 0x927   : > { %8349 = vmatmul.mubr.bf16.gmra.mrb[160].mxu1 %v15966_v46 }
 0x928   : > { %7789 = vmatmul.mubr.bf16.gmra.mrb[244].mxu0 %v15901_v14  ;;  %8356 = vmatprep.mubr.bf16.mxu1 %v15978_v7 }
 0x929   : > { %7796 = vmatprep.mubr.bf16.mxu0 %v15909_v47 }
 0x92f   : > { %8357 = vmatmul.mubr.bf16.gmra.mrb[164].mxu1 %v15972_v55 }
 0x930   : > { %7797 = vmatmul.mubr.bf16.gmra.mrb[248].mxu0 %v15903_v41  ;;  %8364 = vmatprep.mubr.bf16.mxu1 %v15984_v36 }
 0x931   : > { %7804 = vmatprep.mubr.bf16.mxu0 %v15911_v12 }
 0x933   : > { %v10797_v49 = vpop.f32.mrb[144].mxu0 }
 0x934   : > { %v10798_v14 = vpop.f32.mrb[145].mxu0 }
 0x935   : > { %v15990_v23 = vadd.f32 %v10798_v14, %v10797_v49  ;;  %v10800_v42 = vpop.f32.mrb[146].mxu0 }
 0x936   : > { %v10801_v51 = vpop.f32.mrb[147].mxu0 }
 0x937   : > { %8365 = vmatmul.mubr.bf16.gmra.mrb[168].mxu1 %v15978_v7  ;;  %v15995_v4 = vadd.f32 %v10801_v51, %v10800_v42  ;;  %v12985_v51 = vld [vmem:[%s16549_s3 + $0x10] sm:$0xff]  }
 0x938   : > { %7805 = vmatmul.mubr.bf16.gmra.mrb[252].mxu0 %v15909_v47  ;;  %8372 = vmatprep.mubr.bf16.mxu1 %v15992_v2 }
 0x939   : > { %7812 = vmatprep.mubr.bf16.mxu0 %v15917_v1 }
 0x93b   : > { %v10803_v41 = vpop.f32.mrb[148].mxu0 }
 0x93c   : > { %v10804_v18 = vpop.f32.mrb[149].mxu0 }
 0x93d   : > { %v16000_v59 = vadd.f32 %v10804_v18, %v10803_v41  ;;  %v10806_v56 = vpop.f32.mrb[150].mxu0 }
 0x93e   : > { %v10807_v29 = vpop.f32.mrb[151].mxu0 }
 0x93f   : > { %v16004_v21 = vadd.f32 %v10807_v29, %v10806_v56  ;;  %8373 = vmatmul.mubr.bf16.gmra.mrb[172].mxu1 %v15984_v36 }
 0x940   : > { %7813 = vmatmul.mubr.bf16.gmra.mrb[0].mxu0 %v15911_v12  ;;  %8380 = vmatprep.mubr.bf16.mxu1 %v16002_v53  ;;  %v12983_v12 = vld [vmem:[%s16548_s24] sm:$0xff]  }
 0x941   : > { %7820 = vmatprep.mubr.bf16.mxu0 %v15919_v57  ;;  %11827 = vmatprep.subr.bf16.mxu0 %v12983_v12 }
 0x942   : > { %11828 = vmatpush3.bf16.msra.mxu0 %v12983_v12 }
 0x943   : > { %v10809_v47 = vpop.f32.mrb[152].mxu0 }
 0x944   : > { %v10810_v22 = vpop.f32.mrb[153].mxu0 }
 0x945   : > { %v16010_v62 = vadd.f32 %v10810_v22, %v10809_v47  ;;  %v10812_v0 = vpop.f32.mrb[154].mxu0  ;;  %v12986_v22 = vld [vmem:[%s16549_s3 + $0x18] sm:$0xff]  }
 0x946   : > { %v10813_v30 = vpop.f32.mrb[155].mxu0 }
 0x947   : > { %v16014_v13 = vadd.f32 %v10813_v30, %v10812_v0  ;;  %8381 = vmatmul.mubr.bf16.gmra.mrb[176].mxu1 %v15992_v2 }
 0x948   : > { %7821 = vmatmul.mubr.bf16.gmra.mrb[4].mxu0 %v15917_v1  ;;  %8388 = vmatprep.mubr.bf16.mxu1 %v16012_v45 }
 0x949   : > { %7828 = vmatprep.mubr.bf16.mxu0 %v15925_v15 }
 0x94b   : > { %v10815_v58 = vpop.f32.mrb[156].mxu0 }
 0x94c   : > { %v10816_v37 = vpop.f32.mrb[157].mxu0 }
 0x94d   : > { %v16023_v27 = vadd.f32 %v10816_v37, %v10815_v58  ;;  %v10818_v35 = vpop.f32.mrb[158].mxu0 }
 0x94e   : > { %v10819_v20 = vpop.f32.mrb[159].mxu0 }
 0x94f   : > { %v16027_v19 = vadd.f32 %v10819_v20, %v10818_v35  ;;  %8389 = vmatmul.mubr.bf16.gmra.mrb[180].mxu1 %v16002_v53  ;;  %v12987_v20 = vld [vmem:[%s16549_s3 + $0x20] sm:$0xff]  }
 0x950   : > { %7829 = vmatmul.mubr.bf16.gmra.mrb[8].mxu0 %v15919_v57  ;;  %8396 = vmatprep.mubr.bf16.mxu1 %v16025_v5  ;;  %v12984_v57 = vld [vmem:[%s16549_s3 + $0x8] sm:$0xff]  }
 0x951   : > { %7836 = vmatprep.mubr.bf16.mxu0 %v15927_v33  ;;  %11829 = vmatprep.subr.bf16.mxu0 %v12984_v57 }
 0x952   : > { %11830 = vmatpush3.bf16.msra.mxu0 %v12984_v57 }
 0x953   : > { %v10821_v1 = vpop.f32.mrb[160].mxu0  ;;  %11831 = vmatprep.subr.bf16.mxu0 %v12985_v51 }
 0x954   : > { %v10822_v63 = vpop.f32.mrb[161].mxu0 }
 0x955   : > { %v16033_v48 = vadd.f32 %v10822_v63, %v10821_v1  ;;  %v10824_v28 = vpop.f32.mrb[162].mxu0 }
 0x956   : > { %v10825_v3 = vpop.f32.mrb[163].mxu0  ;;  %11832 = vmatpush3.bf16.msra.mxu0 %v12985_v51 }
 0x957   : > { %v16037_v16 = vadd.f32 %v10825_v3, %v10824_v28  ;;  %8397 = vmatmul.mubr.bf16.gmra.mrb[184].mxu1 %v16012_v45  ;;  %11833 = vmatprep.subr.bf16.mxu0 %v12986_v22 }
 0x958   : > { %7837 = vmatmul.mubr.bf16.gmra.mrb[12].mxu0 %v15925_v15  ;;  %8404 = vmatprep.mubr.bf16.mxu1 %v16035_v44 }
 0x95a   : > { %11834 = vmatpush3.bf16.msra.mxu0 %v12986_v22 }
 0x95b   : > { %v10827_v33 = vpop.f32.mrb[164].mxu0  ;;  %11835 = vmatprep.subr.bf16.mxu0 %v12987_v20 }
 0x95c   : > { %v10828_v39 = vpop.f32.mrb[165].mxu0 }
 0x95d   : > { %v16045_v52 = vadd.f32 %v10828_v39, %v10827_v33  ;;  %v10830_v6 = vpop.f32.mrb[166].mxu0  ;;  %v12988_v39 = vld [vmem:[%s16549_s3 + $0x28] sm:$0xff]  }
 0x95e   : > { %v10831_v24 = vpop.f32.mrb[167].mxu0  ;;  %11836 = vmatpush3.bf16.msra.mxu0 %v12987_v20 }
 0x95f   : > { %v16047_v34 = vadd.f32 %v10831_v24, %v10830_v6  ;;  %8405 = vmatmul.mubr.bf16.gmra.mrb[188].mxu1 %v16025_v5  ;;  %v8040_v6 = vld [vmem:[#allocation3 + $0x19a] sm:$0xff]  ;;  %11837 = vmatprep.subr.bf16.mxu0 %v12988_v39 }
 0x960   : > { %11795 = vmatprep.mubr.bf16.mxu1 %v15933_v17 }
 0x962   : > { %11838 = vmatpush3.bf16.msra.mxu0 %v12988_v39 }
 0x963   : > { %v10833_v49 = vpop.f32.mrb[168].mxu0 }
 0x964   : > { %v10834_v26 = vpop.f32.mrb[169].mxu0 }
 0x965   : > { %v16051_v50 = vadd.f32 %v10834_v26, %v10833_v49  ;;  %v10836_v15 = vpop.f32.mrb[170].mxu0 }
 0x966   : > { %v10837_v14 = vpop.f32.mrb[171].mxu0 }
 0x967   : > { %v16053_v42 = vadd.f32 %v10837_v14, %v10836_v15  ;;  %11796 = vmatmul.mubr.bf16.vlgmr.msra.gmra.mrb[96].mxu1 %v15937_v60 }
 0x968   : > { %11799 = vmatprep.mubr.bf16.mxu1 %v15942_v8 }
 0x96b   : > { %v10839_v41 = vpop.f32.mrb[172].mxu0 }
 0x96c   : > { %v10840_v17 = vpop.f32.mrb[173].mxu0 }
 0x96d   : > { %v16060_v10 = vadd.f32 %v10840_v17, %v10839_v41  ;;  %v10842_v11 = vpop.f32.mrb[174].mxu0 }
 0x96e   : > { %v10843_v18 = vpop.f32.mrb[175].mxu0 }
 0x96f   : > { %v16062_v56 = vadd.f32 %v10843_v18, %v10842_v11  ;;  %11800 = vmatmul.mubr.bf16.gmra.mrb[100].mxu1 %v15948_v25 }
 0x970   : > { %11803 = vmatprep.mubr.bf16.mxu1 %v15954_v38 }
 0x973   : > { %v10845_v60 = vpop.f32.mrb[176].mxu0 }
 0x974   : > { %v10846_v29 = vpop.f32.mrb[177].mxu0 }
 0x975   : > { %v16066_v47 = vadd.f32 %v10846_v29, %v10845_v60  ;;  %v10848_v43 = vpop.f32.mrb[178].mxu0  ;;  %v12989_v60 = vld [vmem:[%s16549_s3 + $0x30] sm:$0xff]  }
 0x976   : > { %v10849_v8 = vpop.f32.mrb[179].mxu0  ;;  %11839 = vmatprep.subr.bf16.mxu0 %v12989_v60 }
 0x977   : > { %v16068_v31 = vadd.f32 %v10849_v8, %v10848_v43  ;;  %11804 = vmatmul.mubr.bf16.gmra.mrb[104].mxu1 %v15960_v61  ;;  %11840 = vmatpush3.bf16.msra.mxu0 %v12989_v60 }
 0x978   : > { %11807 = vmatprep.mubr.bf16.mxu1 %v15966_v46 }
 0x97b   : > { %v10851_v25 = vpop.f32.mrb[180].mxu0 }
 0x97c   : > { %v10852_v38 = vpop.f32.mrb[181].mxu0 }
 0x97d   : > { %v16075_v0 = vadd.f32 %v10852_v38, %v10851_v25  ;;  %v10854_v30 = vpop.f32.mrb[182].mxu0 }
 0x97e   : > { %v10855_v12 = vpop.f32.mrb[183].mxu0 }
 0x97f   : > { %v16077_v58 = vadd.f32 %v10855_v12, %v10854_v30  ;;  %11808 = vmatmul.mubr.bf16.gmra.mrb[108].mxu1 %v15972_v55 }
 0x980   : > { %11811 = vmatprep.mubr.bf16.mxu1 %v15978_v7 }
 0x983   : > { %v10857_v61 = vpop.f32.mrb[184].mxu0 }
 0x984   : > { %v10858_v54 = vpop.f32.mrb[185].mxu0 }
 0x985   : > { %v16081_v32 = vadd.f32 %v10858_v54, %v10857_v61  ;;  %v10860_v37 = vpop.f32.mrb[186].mxu0 }
 0x986   : > { %v10861_v46 = vpop.f32.mrb[187].mxu0 }
 0x987   : > { %v16083_v35 = vadd.f32 %v10861_v46, %v10860_v37  ;;  %11812 = vmatmul.mubr.bf16.gmra.mrb[112].mxu1 %v15984_v36  ;;  %v12990_v46 = vld [vmem:[%s16549_s3 + $0x38] sm:$0xff]  }
 0x988   : > { %11815 = vmatprep.mubr.bf16.mxu1 %v15992_v2  ;;  %11841 = vmatprep.subr.bf16.mxu0 %v12990_v46 }
 0x989   : > { %11842 = vmatpush3.bf16.msra.mxu0 %v12990_v46 }
 0x98b   : > { %v10863_v55 = vpop.f32.mrb[188].mxu0 }
 0x98c   : > { %v10864_v7 = vpop.f32.mrb[189].mxu0 }
 0x98d   : > { %v16090_v1 = vadd.f32 %v10864_v7, %v10863_v55  ;;  %v10866_v40 = vpop.f32.mrb[190].mxu0 }
 0x98e   : > { %v10867_v9 = vpop.f32.mrb[191].mxu0 }
 0x98f   : > { %v16092_v63 = vadd.f32 %v10867_v9, %v10866_v40  ;;  %11816 = vmatmul.mubr.bf16.gmra.mrb[116].mxu1 %v16002_v53  ;;  %v8041_v53 = vld [vmem:[#allocation3 + $0x1a2] sm:$0xff] }
 0x990   : > { %11819 = vmatprep.mubr.bf16.mxu1 %v16012_v45  ;;  %v8059_v24 = vpack.c.bf16 %v8041_v53, %v8040_v6 }
 0x993   : > { %v10869_v36 = vpop.f32.mrb[192].mxu0 }
 0x994   : > { %v10870_v28 = vpop.f32.mrb[193].mxu0 }
 0x995   : > { %v16096_v3 = vadd.f32 %v10870_v28, %v10869_v36  ;;  %v10872_v57 = vpop.f32.mrb[194].mxu0 }
 0x996   : > { %v10873_v2 = vpop.f32.mrb[195].mxu0 }
 0x997   : > { %v16098_v33 = vadd.f32 %v10873_v2, %v10872_v57  ;;  %11820 = vmatmul.mubr.bf16.gmra.mrb[120].mxu1 %v16025_v5 }
 0x998   : > { %11823 = vmatprep.mubr.bf16.mxu1 %v16035_v44 }
 0x99b   : > { %v10875_v45 = vpop.f32.mrb[196].mxu0 }
 0x99c   : > { %v10876_v49 = vpop.f32.mrb[197].mxu0 }
 0x99d   : > { %v16105_v26 = vadd.f32 %v10876_v49, %v10875_v45  ;;  %v10878_v15 = vpop.f32.mrb[198].mxu0 }
 0x99e   : > { %v10879_v14 = vpop.f32.mrb[199].mxu0 }
 0x99f   : > { %v16107_v51 = vadd.f32 %v10879_v14, %v10878_v15  ;;  %11824 = vmatmul.mubr.bf16.gmra.mrb[124].mxu1 %v8059_v24 }
 0x9a3   : > { %v10881_v5 = vpop.f32.mrb[200].mxu0 }
 0x9a4   : > { %v10882_v41 = vpop.f32.mrb[201].mxu0 }
 0x9a5   : > { %v16109_v17 = vadd.f32 %v10882_v41, %v10881_v5  ;;  %v10884_v11 = vpop.f32.mrb[202].mxu0 }
 0x9a6   : > { %v10885_v44 = vpop.f32.mrb[203].mxu0 }
 0x9a7   : > { %v16111_v18 = vadd.f32 %v10885_v44, %v10884_v11 }
 0x9ab   : > { %v10887_v29 = vpop.f32.mrb[204].mxu0 }
 0x9ac   : > { %v10888_v43 = vpop.f32.mrb[205].mxu0 }
 0x9ad   : > { %v16116_v8 = vadd.f32 %v10888_v43, %v10887_v29  ;;  %v10890_v22 = vpop.f32.mrb[206].mxu0 }
 0x9ae   : > { %v10891_v25 = vpop.f32.mrb[207].mxu0 }
 0x9af   : > { %v16118_v38 = vadd.f32 %v10891_v25, %v10890_v22 }
 0x9b3   : > { %v10933_v30 = vpop.f32.mrb[208].mxu0 }
 0x9b4   : > { %v10934_v12 = vpop.f32.mrb[209].mxu0 }
 0x9b5   : > { %v10935_v61 = vadd.f32 %v10934_v12, %v10933_v30  ;;  %v10936_v54 = vpop.f32.mrb[210].mxu0 }
 0x9b6   : > { %v10937_v37 = vpop.f32.mrb[211].mxu0 }
 0x9b7   : > { %v12332_v20 = vadd.f32 %v10935_v61, %v15990_v23  ;;  %v10938_v55 = vadd.f32 %v10937_v37, %v10936_v54 }
 0x9b9   : > { %v12338_v7 = vadd.f32 %v10938_v55, %v15995_v4 }
 0x9ba   : > { %v11069_v40 = vpop.f32.mrb[128].mxu1 }
 0x9bb   : > { %v10939_v9 = vpop.f32.mrb[212].mxu0  ;;  %v11070_v36 = vpop.f32.mrb[129].mxu1 }
 0x9bc   : > { %v11071_v28 = vadd.f32 %v11070_v36, %v11069_v40  ;;  %v10940_v57 = vpop.f32.mrb[213].mxu0  ;;  %v11072_v2 = vpop.f32.mrb[130].mxu1 }
 0x9bd   : > { %v10941_v39 = vadd.f32 %v10940_v57, %v10939_v9  ;;  %v10942_v6 = vpop.f32.mrb[214].mxu0  ;;  %v11073_v53 = vpop.f32.mrb[131].mxu1 }
 0x9be   : > { %v11074_v45 = vadd.f32 %v11073_v53, %v11072_v2  ;;  %v10943_v24 = vpop.f32.mrb[215].mxu0  ;;  %v16125_v49 = vadd.f32 %v12332_v20, %v11071_v28 }
 0x9bf   : > { %v12329_v23 = vadd.f32 %v10941_v39, %v16000_v59  ;;  %v10944_v15 = vadd.f32 %v10943_v24, %v10942_v6 }
 0x9c0   : > { %v16128_v14 = vadd.f32 %v12338_v7, %v11074_v45 }
 0x9c1   : > { %v12335_v4 = vadd.f32 %v10944_v15, %v16004_v21 }
 0x9c2   : > { %v11075_v5 = vpop.f32.mrb[132].mxu1 }
 0x9c3   : > { %v10945_v41 = vpop.f32.mrb[216].mxu0  ;;  %v11076_v11 = vpop.f32.mrb[133].mxu1 }
 0x9c4   : > { %v11077_v44 = vadd.f32 %v11076_v11, %v11075_v5  ;;  %v10946_v60 = vpop.f32.mrb[217].mxu0  ;;  %v11078_v29 = vpop.f32.mrb[134].mxu1 }
 0x9c5   : > { %v10947_v43 = vadd.f32 %v10946_v60, %v10945_v41  ;;  %v10948_v22 = vpop.f32.mrb[218].mxu0  ;;  %v11079_v25 = vpop.f32.mrb[135].mxu1 }
 0x9c6   : > { %v11080_v30 = vadd.f32 %v11079_v25, %v11078_v29  ;;  %v10949_v12 = vpop.f32.mrb[219].mxu0  ;;  %v16131_v61 = vadd.f32 %v12329_v23, %v11077_v44 }
 0x9c7   : > { %v12344_v59 = vadd.f32 %v10947_v43, %v16010_v62  ;;  %v10950_v54 = vadd.f32 %v10949_v12, %v10948_v22 }
 0x9c8   : > { %v16134_v37 = vadd.f32 %v12335_v4, %v11080_v30 }
 0x9c9   : > { %v12350_v21 = vadd.f32 %v10950_v54, %v16014_v13 }
 0x9ca   : > { %v11081_v46 = vpop.f32.mrb[136].mxu1 }
 0x9cb   : > { %v10951_v20 = vpop.f32.mrb[220].mxu0  ;;  %v11082_v55 = vpop.f32.mrb[137].mxu1 }
 0x9cc   : > { %v11083_v7 = vadd.f32 %v11082_v55, %v11081_v46  ;;  %v10952_v40 = vpop.f32.mrb[221].mxu0  ;;  %v11084_v9 = vpop.f32.mrb[138].mxu1 }
 0x9cd   : > { %v10953_v36 = vadd.f32 %v10952_v40, %v10951_v20  ;;  %v10954_v28 = vpop.f32.mrb[222].mxu0  ;;  %v11085_v57 = vpop.f32.mrb[139].mxu1 }
 0x9ce   : > { %v11086_v2 = vadd.f32 %v11085_v57, %v11084_v9  ;;  %v10955_v39 = vpop.f32.mrb[223].mxu0  ;;  %v16137_v6 = vadd.f32 %v12344_v59, %v11083_v7 }
 0x9cf   : > { %v12341_v62 = vadd.f32 %v10953_v36, %v16023_v27  ;;  %v10956_v53 = vadd.f32 %v10955_v39, %v10954_v28 }
 0x9d0   : > { %v16140_v45 = vadd.f32 %v12350_v21, %v11086_v2 }
 0x9d1   : > { %v12347_v13 = vadd.f32 %v10956_v53, %v16027_v19 }
 0x9d2   : > { %v11087_v24 = vpop.f32.mrb[140].mxu1 }
 0x9d3   : > { %v10957_v23 = vpop.f32.mrb[224].mxu0  ;;  %v11088_v15 = vpop.f32.mrb[141].mxu1 }
 0x9d4   : > { %v11089_v4 = vadd.f32 %v11088_v15, %v11087_v24  ;;  %v10958_v5 = vpop.f32.mrb[225].mxu0  ;;  %v11090_v41 = vpop.f32.mrb[142].mxu1 }
 0x9d5   : > { %v10959_v11 = vadd.f32 %v10958_v5, %v10957_v23  ;;  %v10960_v44 = vpop.f32.mrb[226].mxu0  ;;  %v11091_v60 = vpop.f32.mrb[143].mxu1 }
 0x9d6   : > { %v11092_v29 = vadd.f32 %v11091_v60, %v11090_v41  ;;  %v10961_v43 = vpop.f32.mrb[227].mxu0  ;;  %v16143_v22 = vadd.f32 %v12341_v62, %v11089_v4 }
 0x9d7   : > { %v12356_v27 = vadd.f32 %v10959_v11, %v16033_v48  ;;  %v10962_v25 = vadd.f32 %v10961_v43, %v10960_v44 }
 0x9d8   : > { %v16146_v30 = vadd.f32 %v12347_v13, %v11092_v29 }
 0x9d9   : > { %v12362_v19 = vadd.f32 %v10962_v25, %v16037_v16 }
 0x9da   : > { %v11093_v12 = vpop.f32.mrb[144].mxu1 }
 0x9db   : > { %v10963_v59 = vpop.f32.mrb[228].mxu0  ;;  %v11094_v54 = vpop.f32.mrb[145].mxu1 }
 0x9dc   : > { %v11095_v21 = vadd.f32 %v11094_v54, %v11093_v12  ;;  %v10964_v46 = vpop.f32.mrb[229].mxu0  ;;  %v11096_v20 = vpop.f32.mrb[146].mxu1 }
 0x9dd   : > { %v10965_v55 = vadd.f32 %v10964_v46, %v10963_v59  ;;  %v10966_v7 = vpop.f32.mrb[230].mxu0  ;;  %v11097_v40 = vpop.f32.mrb[147].mxu1 }
 0x9de   : > { %v11098_v9 = vadd.f32 %v11097_v40, %v11096_v20  ;;  %v10967_v36 = vpop.f32.mrb[231].mxu0  ;;  %v16149_v28 = vadd.f32 %v12356_v27, %v11095_v21 }
 0x9df   : > { %v12353_v48 = vadd.f32 %v10965_v55, %v16045_v52  ;;  %v10968_v57 = vadd.f32 %v10967_v36, %v10966_v7 }
 0x9e0   : > { %v16152_v2 = vadd.f32 %v12362_v19, %v11098_v9 }
 0x9e1   : > { %v12359_v16 = vadd.f32 %v10968_v57, %v16047_v34 }
 0x9e2   : > { %v11099_v39 = vpop.f32.mrb[148].mxu1 }
 0x9e3   : > { %v10969_v62 = vpop.f32.mrb[232].mxu0  ;;  %v11100_v53 = vpop.f32.mrb[149].mxu1 }
 0x9e4   : > { %v11101_v13 = vadd.f32 %v11100_v53, %v11099_v39  ;;  %v10970_v24 = vpop.f32.mrb[233].mxu0  ;;  %v11102_v23 = vpop.f32.mrb[150].mxu1 }
 0x9e5   : > { %v10971_v15 = vadd.f32 %v10970_v24, %v10969_v62  ;;  %v10972_v4 = vpop.f32.mrb[234].mxu0  ;;  %v11103_v5 = vpop.f32.mrb[151].mxu1 }
 0x9e6   : > { %v11104_v41 = vadd.f32 %v11103_v5, %v11102_v23  ;;  %v10973_v11 = vpop.f32.mrb[235].mxu0  ;;  %v16155_v44 = vadd.f32 %v12353_v48, %v11101_v13 }
 0x9e7   : > { %v12368_v52 = vadd.f32 %v10971_v15, %v16051_v50  ;;  %v10974_v60 = vadd.f32 %v10973_v11, %v10972_v4 }
 0x9e8   : > { %v16158_v29 = vadd.f32 %v12359_v16, %v11104_v41 }
 0x9e9   : > { %v12374_v34 = vadd.f32 %v10974_v60, %v16053_v42 }
 0x9ea   : > { %v11105_v43 = vpop.f32.mrb[152].mxu1 }
 0x9eb   : > { %v10975_v27 = vpop.f32.mrb[236].mxu0  ;;  %v11106_v25 = vpop.f32.mrb[153].mxu1 }
 0x9ec   : > { %v11107_v19 = vadd.f32 %v11106_v25, %v11105_v43  ;;  %v10976_v12 = vpop.f32.mrb[237].mxu0  ;;  %v11108_v59 = vpop.f32.mrb[154].mxu1 }
 0x9ed   : > { %v10977_v54 = vadd.f32 %v10976_v12, %v10975_v27  ;;  %v10978_v21 = vpop.f32.mrb[238].mxu0  ;;  %v11109_v46 = vpop.f32.mrb[155].mxu1 }
 0x9ee   : > { %v11110_v20 = vadd.f32 %v11109_v46, %v11108_v59  ;;  %v10979_v55 = vpop.f32.mrb[239].mxu0  ;;  %v16161_v7 = vadd.f32 %v12368_v52, %v11107_v19 }
 0x9ef   : > { %v12365_v50 = vadd.f32 %v10977_v54, %v16060_v10  ;;  %v10980_v40 = vadd.f32 %v10979_v55, %v10978_v21 }
 0x9f0   : > { %v16164_v9 = vadd.f32 %v12374_v34, %v11110_v20 }
 0x9f1   : > { %v12371_v42 = vadd.f32 %v10980_v40, %v16062_v56 }
 0x9f2   : > { %v11111_v36 = vpop.f32.mrb[156].mxu1 }
 0x9f3   : > { %v10981_v48 = vpop.f32.mrb[240].mxu0  ;;  %v11112_v57 = vpop.f32.mrb[157].mxu1 }
 0x9f4   : > { %v11113_v16 = vadd.f32 %v11112_v57, %v11111_v36  ;;  %v10982_v39 = vpop.f32.mrb[241].mxu0  ;;  %v11114_v62 = vpop.f32.mrb[158].mxu1 }
 0x9f5   : > { %v10983_v53 = vadd.f32 %v10982_v39, %v10981_v48  ;;  %v10984_v13 = vpop.f32.mrb[242].mxu0  ;;  %v11115_v24 = vpop.f32.mrb[159].mxu1 }
 0x9f6   : > { %v11116_v23 = vadd.f32 %v11115_v24, %v11114_v62  ;;  %v10985_v15 = vpop.f32.mrb[243].mxu0  ;;  %v16167_v4 = vadd.f32 %v12365_v50, %v11113_v16 }
 0x9f7   : > { %v12380_v10 = vadd.f32 %v10983_v53, %v16066_v47  ;;  %v10986_v5 = vadd.f32 %v10985_v15, %v10984_v13 }
 0x9f8   : > { %v16170_v41 = vadd.f32 %v12371_v42, %v11116_v23 }
 0x9f9   : > { %v12386_v56 = vadd.f32 %v10986_v5, %v16068_v31 }
 0x9fa   : > { %v11117_v11 = vpop.f32.mrb[160].mxu1 }
 0x9fb   : > { %v10987_v52 = vpop.f32.mrb[244].mxu0  ;;  %v11118_v60 = vpop.f32.mrb[161].mxu1 }
 0x9fc   : > { %v11119_v34 = vadd.f32 %v11118_v60, %v11117_v11  ;;  %v10988_v43 = vpop.f32.mrb[245].mxu0  ;;  %v11120_v27 = vpop.f32.mrb[162].mxu1 }
 0x9fd   : > { %v10989_v25 = vadd.f32 %v10988_v43, %v10987_v52  ;;  %v10990_v19 = vpop.f32.mrb[246].mxu0  ;;  %v11121_v12 = vpop.f32.mrb[163].mxu1 }
 0x9fe   : > { %v11122_v59 = vadd.f32 %v11121_v12, %v11120_v27  ;;  %v10991_v54 = vpop.f32.mrb[247].mxu0  ;;  %v16173_v21 = vadd.f32 %v12380_v10, %v11119_v34 }
 0x9ff   : > { %v12377_v47 = vadd.f32 %v10989_v25, %v16075_v0  ;;  %v10992_v46 = vadd.f32 %v10991_v54, %v10990_v19 }
 0xa00   : > { %v16176_v20 = vadd.f32 %v12386_v56, %v11122_v59 }
 0xa01   : > { %v12383_v31 = vadd.f32 %v10992_v46, %v16077_v58 }
 0xa02   : > { %v11123_v55 = vpop.f32.mrb[164].mxu1 }
 0xa03   : > { %v10993_v50 = vpop.f32.mrb[248].mxu0  ;;  %v11124_v40 = vpop.f32.mrb[165].mxu1 }
 0xa04   : > { %v11125_v42 = vadd.f32 %v11124_v40, %v11123_v55  ;;  %v10994_v36 = vpop.f32.mrb[249].mxu0  ;;  %v11126_v48 = vpop.f32.mrb[166].mxu1 }
 0xa05   : > { %v10995_v57 = vadd.f32 %v10994_v36, %v10993_v50  ;;  %v10996_v16 = vpop.f32.mrb[250].mxu0  ;;  %v11127_v39 = vpop.f32.mrb[167].mxu1 }
 0xa06   : > { %v11128_v62 = vadd.f32 %v11127_v39, %v11126_v48  ;;  %v10997_v53 = vpop.f32.mrb[251].mxu0  ;;  %v16179_v13 = vadd.f32 %v12377_v47, %v11125_v42 }
 0xa07   : > { %v12392_v0 = vadd.f32 %v10995_v57, %v16081_v32  ;;  %v10998_v24 = vadd.f32 %v10997_v53, %v10996_v16 }
 0xa08   : > { %v16182_v23 = vadd.f32 %v12383_v31, %v11128_v62 }
 0xa09   : > { %v12398_v58 = vadd.f32 %v10998_v24, %v16083_v35 }
 0xa0a   : > { %v11129_v15 = vpop.f32.mrb[168].mxu1 }
 0xa0b   : > { %v10999_v10 = vpop.f32.mrb[252].mxu0  ;;  %v11130_v5 = vpop.f32.mrb[169].mxu1 }
 0xa0c   : > { %v11131_v56 = vadd.f32 %v11130_v5, %v11129_v15  ;;  %v11000_v11 = vpop.f32.mrb[253].mxu0  ;;  %v11132_v52 = vpop.f32.mrb[170].mxu1 }
 0xa0d   : > { %v11001_v60 = vadd.f32 %v11000_v11, %v10999_v10  ;;  %v11002_v34 = vpop.f32.mrb[254].mxu0  ;;  %v11133_v43 = vpop.f32.mrb[171].mxu1 }
 0xa0e   : > { %v11134_v27 = vadd.f32 %v11133_v43, %v11132_v52  ;;  %v11003_v25 = vpop.f32.mrb[255].mxu0  ;;  %v16185_v19 = vadd.f32 %v12392_v0, %v11131_v56 }
 0xa0f   : > { %v12389_v32 = vadd.f32 %v11001_v60, %v16090_v1  ;;  %v11004_v12 = vadd.f32 %v11003_v25, %v11002_v34 }
 0xa10   : > { %v16188_v59 = vadd.f32 %v12398_v58, %v11134_v27 }
 0xa11   : > { %v12395_v35 = vadd.f32 %v11004_v12, %v16092_v63 }
 0xa12   : > { %v11135_v54 = vpop.f32.mrb[172].mxu1 }
 0xa13   : > { %v11005_v47 = vpop.f32.mrb[0].mxu0  ;;  %v11136_v46 = vpop.f32.mrb[173].mxu1 }
 0xa14   : > { %v11137_v31 = vadd.f32 %v11136_v46, %v11135_v54  ;;  %v11006_v55 = vpop.f32.mrb[1].mxu0  ;;  %v11138_v50 = vpop.f32.mrb[174].mxu1 }
 0xa15   : > { %v11007_v40 = vadd.f32 %v11006_v55, %v11005_v47  ;;  %v11008_v42 = vpop.f32.mrb[2].mxu0  ;;  %v11139_v36 = vpop.f32.mrb[175].mxu1 }
 0xa16   : > { %v11140_v48 = vadd.f32 %v11139_v36, %v11138_v50  ;;  %v11009_v57 = vpop.f32.mrb[3].mxu0  ;;  %v16191_v16 = vadd.f32 %v12389_v32, %v11137_v31 }
 0xa17   : > { %v12404_v1 = vadd.f32 %v11007_v40, %v16096_v3  ;;  %v11010_v39 = vadd.f32 %v11009_v57, %v11008_v42 }
 0xa18   : > { %v16194_v62 = vadd.f32 %v12395_v35, %v11140_v48 }
 0xa19   : > { %v12410_v63 = vadd.f32 %v11010_v39, %v16098_v33 }
 0xa1a   : > { %v11141_v53 = vpop.f32.mrb[176].mxu1 }
 0xa1b   : > { %v11011_v0 = vpop.f32.mrb[4].mxu0  ;;  %v11142_v24 = vpop.f32.mrb[177].mxu1 }
 0xa1c   : > { %v11143_v58 = vadd.f32 %v11142_v24, %v11141_v53  ;;  %v11012_v15 = vpop.f32.mrb[5].mxu0  ;;  %v11144_v10 = vpop.f32.mrb[178].mxu1 }
 0xa1d   : > { %v11013_v5 = vadd.f32 %v11012_v15, %v11011_v0  ;;  %v11014_v56 = vpop.f32.mrb[6].mxu0  ;;  %v11145_v11 = vpop.f32.mrb[179].mxu1 }
 0xa1e   : > { %v11146_v52 = vadd.f32 %v11145_v11, %v11144_v10  ;;  %v11015_v60 = vpop.f32.mrb[7].mxu0  ;;  %v16197_v34 = vadd.f32 %v12404_v1, %v11143_v58 }
 0xa1f   : > { %v12401_v3 = vadd.f32 %v11013_v5, %v16105_v26  ;;  %v11016_v43 = vadd.f32 %v11015_v60, %v11014_v56 }
 0xa20   : > { %v16200_v27 = vadd.f32 %v12410_v63, %v11146_v52 }
 0xa21   : > { %v12407_v33 = vadd.f32 %v11016_v43, %v16107_v51 }
 0xa22   : > { %v11147_v25 = vpop.f32.mrb[180].mxu1 }
 0xa23   : > { %v11017_v32 = vpop.f32.mrb[8].mxu0  ;;  %v11148_v12 = vpop.f32.mrb[181].mxu1 }
 0xa24   : > { %v11149_v35 = vadd.f32 %v11148_v12, %v11147_v25  ;;  %v11018_v54 = vpop.f32.mrb[9].mxu0  ;;  %v11150_v47 = vpop.f32.mrb[182].mxu1 }
 0xa25   : > { %v11019_v46 = vadd.f32 %v11018_v54, %v11017_v32  ;;  %v11020_v31 = vpop.f32.mrb[10].mxu0  ;;  %v11151_v55 = vpop.f32.mrb[183].mxu1 }
 0xa26   : > { %v11152_v50 = vadd.f32 %v11151_v55, %v11150_v47  ;;  %v11021_v40 = vpop.f32.mrb[11].mxu0  ;;  %v16203_v42 = vadd.f32 %v12401_v3, %v11149_v35 }
 0xa27   : > { %v12416_v26 = vadd.f32 %v11019_v46, %v16109_v17  ;;  %v11022_v36 = vadd.f32 %v11021_v40, %v11020_v31 }
 0xa28   : > { %v16206_v48 = vadd.f32 %v12407_v33, %v11152_v50 }
 0xa29   : > { %v12422_v51 = vadd.f32 %v11022_v36, %v16111_v18 }
 0xa2a   : > { %v11153_v57 = vpop.f32.mrb[184].mxu1 }
 0xa2b   : > { %v11023_v1 = vpop.f32.mrb[12].mxu0  ;;  %v11154_v39 = vpop.f32.mrb[185].mxu1 }
 0xa2c   : > { %v11155_v63 = vadd.f32 %v11154_v39, %v11153_v57  ;;  %v11024_v53 = vpop.f32.mrb[13].mxu0  ;;  %v11156_v0 = vpop.f32.mrb[186].mxu1 }
 0xa2d   : > { %v11025_v24 = vadd.f32 %v11024_v53, %v11023_v1  ;;  %v11026_v58 = vpop.f32.mrb[14].mxu0  ;;  %v11157_v15 = vpop.f32.mrb[187].mxu1 }
 0xa2e   : > { %v11158_v10 = vadd.f32 %v11157_v15, %v11156_v0  ;;  %v11027_v5 = vpop.f32.mrb[15].mxu0  ;;  %v16209_v56 = vadd.f32 %v12416_v26, %v11155_v63 }
 0xa2f   : > { %v12413_v17 = vadd.f32 %v11025_v24, %v16116_v8  ;;  %v11028_v11 = vadd.f32 %v11027_v5, %v11026_v58  ;;  %v16220_v8 = vld [vmem:[#allocation15] ss:$0 sm:$0xff] }
 0xa30   : > { %v16212_v52 = vadd.f32 %v12422_v51, %v11158_v10 }
 0xa31   : > { %v12419_v18 = vadd.f32 %v11028_v11, %v16118_v38 }
 0xa32   : > { %v11159_v60 = vpop.f32.mrb[188].mxu1 }
 0xa33   : > { %v11160_v3 = vpop.f32.mrb[189].mxu1 }
 0xa34   : > { %v11161_v43 = vadd.f32 %v11160_v3, %v11159_v60  ;;  %v11162_v33 = vpop.f32.mrb[190].mxu1 }
 0xa35   : > { %v11163_v25 = vpop.f32.mrb[191].mxu1 }
 0xa36   : > { %v11164_v32 = vadd.f32 %v11163_v25, %v11162_v33  ;;  %v16215_v12 = vadd.f32 %v12413_v17, %v11161_v43 }
 0xa38   : > { %v16217_v35 = vadd.f32 %v12419_v18, %v11164_v32 }
 0xa3a   : > { %v11797_v54 = vpop.f32.mrb[96].mxu1 }
 0xa3b   : > { %v12331_v47 = vadd.f32 %v16131_v61, %v11797_v54  ;;  %v8447_v46 = vpop.f32.mrb[97].mxu1 }
 0xa3c   : > { %v12334_v31 = vadd.f32 %v16125_v49, %v8447_v46  ;;  %v11798_v55 = vpop.f32.mrb[98].mxu1 }
 0xa3d   : > { %v12337_v38 = vadd.f32 %v16134_v37, %v11798_v55  ;;  %v8450_v50 = vpop.f32.mrb[99].mxu1  ;;  %v8614_v26 = vadd.f32 %v12331_v47, %v16220_v8 }
 0xa3e   : > { %v12340_v40 = vadd.f32 %v16128_v14, %v8450_v50  ;;  %v8612_v51 = vadd.f32 %v12334_v31, %v16220_v8 }
 0xa3f   : > { %v8615_v36 = vadd.f32 %v12337_v38, %v16220_v8 }
 0xa40   : > { %v8613_v57 = vadd.f32 %v12340_v40, %v16220_v8 }
 0xa41   : > { %v8645_v61 = vpack.c.bf16 %v8615_v36, %v8614_v26 }
 0xa42   : > { %v11801_v1 = vpop.f32.mrb[100].mxu1  ;;  %v8644_v39 = vpack.c.bf16 %v8613_v57, %v8612_v51 }
 0xa43   : > { %v12343_v63 = vadd.f32 %v16143_v22, %v11801_v1  ;;  %v8463_v49 = vpop.f32.mrb[101].mxu1 }
 0xa44   : > { %v12346_v53 = vadd.f32 %v16137_v6, %v8463_v49  ;;  %v11802_v37 = vpop.f32.mrb[102].mxu1  ;;  %11843 = vmatprep.mubr.bf16.mxu0 %v8644_v39 }
 0xa45   : > { %v12349_v14 = vadd.f32 %v16146_v30, %v11802_v37  ;;  %v8466_v0 = vpop.f32.mrb[103].mxu1  ;;  %11844 = vmatmul.mubr.bf16.vlgmr.msra.gmra.mrb[16].mxu0 %v8645_v61  ;;  %v8618_v58 = vadd.f32 %v12343_v63, %v16220_v8 }
 0xa46   : > { %v12352_v24 = vadd.f32 %v16140_v45, %v8466_v0  ;;  %v8616_v10 = vadd.f32 %v12346_v53, %v16220_v8 }
 0xa47   : > { %v8619_v15 = vadd.f32 %v12349_v14, %v16220_v8 }
 0xa48   : > { %v8617_v5 = vadd.f32 %v12352_v24, %v16220_v8 }
 0xa49   : > { %v8647_v22 = vpack.c.bf16 %v8619_v15, %v8618_v58 }
 0xa4a   : > { %v11805_v17 = vpop.f32.mrb[104].mxu1  ;;  %v8646_v11 = vpack.c.bf16 %v8617_v5, %v8616_v10 }
 0xa4b   : > { %v12355_v6 = vadd.f32 %v16155_v44, %v11805_v17  ;;  %v8479_v18 = vpop.f32.mrb[105].mxu1 }
 0xa4c   : > { %v12358_v30 = vadd.f32 %v16149_v28, %v8479_v18  ;;  %v11806_v60 = vpop.f32.mrb[106].mxu1  ;;  %11847 = vmatprep.mubr.bf16.mxu0 %v8646_v11 }
 0xa4d   : > { %v12361_v45 = vadd.f32 %v16158_v29, %v11806_v60  ;;  %v8482_v3 = vpop.f32.mrb[107].mxu1  ;;  %11848 = vmatmul.mubr.bf16.gmra.mrb[20].mxu0 %v8647_v22  ;;  %v8622_v33 = vadd.f32 %v12355_v6, %v16220_v8 }
 0xa4e   : > { %v12364_v43 = vadd.f32 %v16152_v2, %v8482_v3  ;;  %v8620_v32 = vadd.f32 %v12358_v30, %v16220_v8 }
 0xa4f   : > { %v8623_v25 = vadd.f32 %v12361_v45, %v16220_v8 }
 0xa50   : > { %v8621_v54 = vadd.f32 %v12364_v43, %v16220_v8 }
 0xa51   : > { %v8649_v44 = vpack.c.bf16 %v8623_v25, %v8622_v33 }
 0xa52   : > { %v11809_v47 = vpop.f32.mrb[108].mxu1  ;;  %v8648_v46 = vpack.c.bf16 %v8621_v54, %v8620_v32 }
 0xa53   : > { %v12367_v28 = vadd.f32 %v16167_v4, %v11809_v47  ;;  %v8495_v31 = vpop.f32.mrb[109].mxu1 }
 0xa54   : > { %v12370_v29 = vadd.f32 %v16161_v7, %v8495_v31  ;;  %v11810_v55 = vpop.f32.mrb[110].mxu1  ;;  %11851 = vmatprep.mubr.bf16.mxu0 %v8648_v46 }
 0xa55   : > { %v12373_v2 = vadd.f32 %v16170_v41, %v11810_v55  ;;  %v8498_v38 = vpop.f32.mrb[111].mxu1  ;;  %11852 = vmatmul.mubr.bf16.gmra.mrb[24].mxu0 %v8649_v44  ;;  %v8626_v40 = vadd.f32 %v12367_v28, %v16220_v8 }
 0xa56   : > { %v12376_v50 = vadd.f32 %v16164_v9, %v8498_v38  ;;  %v8624_v36 = vadd.f32 %v12370_v29, %v16220_v8 }
 0xa57   : > { %v8627_v26 = vadd.f32 %v12373_v2, %v16220_v8 }
 0xa58   : > { %v8625_v51 = vadd.f32 %v12376_v50, %v16220_v8 }
 0xa59   : > { %v8651_v4 = vpack.c.bf16 %v8627_v26, %v8626_v40 }
 0xa5a   : > { %v11813_v57 = vpop.f32.mrb[112].mxu1  ;;  %v8650_v61 = vpack.c.bf16 %v8625_v51, %v8624_v36  ;;  %v8894_v36 = vld [vmem:[%s13779_s9 + $0x10] sm:$0xff] }
 0xa5b   : > { %v12379_v7 = vadd.f32 %v16179_v13, %v11813_v57  ;;  %v8511_v1 = vpop.f32.mrb[113].mxu1 }
 0xa5c   : > { %v12382_v41 = vadd.f32 %v16173_v21, %v8511_v1  ;;  %v11814_v39 = vpop.f32.mrb[114].mxu1  ;;  %11855 = vmatprep.mubr.bf16.mxu0 %v8650_v61  ;;  %v8895_v61 = vld [vmem:[%s13779_s9 + $0x18] sm:$0xff] }
 0xa5d   : > { %v12385_v9 = vadd.f32 %v16182_v23, %v11814_v39  ;;  %v8514_v63 = vpop.f32.mrb[115].mxu1  ;;  %11856 = vmatmul.mubr.bf16.gmra.mrb[28].mxu0 %v8651_v4  ;;  %v8630_v53 = vadd.f32 %v12379_v7, %v16220_v8  ;;  %v8892_v4 = vld [vmem:[%s13779_s9] sm:$0xff]  ;;  %v8893_v39 = vld [vmem:[%s13779_s9 + $0x8] sm:$0xff] }
 0xa5e   : > { %v12388_v49 = vadd.f32 %v16176_v20, %v8514_v63  ;;  %v8628_v14 = vadd.f32 %v12382_v41, %v16220_v8 }
 0xa5f   : > { %v8631_v37 = vadd.f32 %v12385_v9, %v16220_v8 }
 0xa60   : > { %v8629_v0 = vadd.f32 %v12388_v49, %v16220_v8 }
 0xa61   : > { %v8653_v13 = vpack.c.bf16 %v8631_v37, %v8630_v53 }
 0xa62   : > { %v11817_v24 = vpop.f32.mrb[116].mxu1  ;;  %v8652_v58 = vpack.c.bf16 %v8629_v0, %v8628_v14  ;;  %v8898_v14 = vld [vmem:[%s13779_s9 + $0x30] sm:$0xff] }
 0xa63   : > { %v12391_v21 = vadd.f32 %v16191_v16, %v11817_v24  ;;  %v8527_v15 = vpop.f32.mrb[117].mxu1  ;;  %v8896_v24 = vld [vmem:[%s13779_s9 + $0x20] sm:$0xff] }
 0xa64   : > { %v12394_v23 = vadd.f32 %v16185_v19, %v8527_v15  ;;  %v11818_v10 = vpop.f32.mrb[118].mxu1  ;;  %11859 = vmatprep.mubr.bf16.mxu0 %v8652_v58  ;;  %v8899_v15 = vld [vmem:[%s13779_s9 + $0x38] sm:$0xff] }
 0xa65   : > { %v12397_v20 = vadd.f32 %v16194_v62, %v11818_v10  ;;  %v8530_v5 = vpop.f32.mrb[119].mxu1  ;;  %11860 = vmatmul.mubr.bf16.gmra.mrb[32].mxu0 %v8653_v13  ;;  %v8634_v17 = vadd.f32 %v12391_v21, %v16220_v8 }
 0xa66   : > { %v12400_v22 = vadd.f32 %v16188_v59, %v8530_v5  ;;  %v8632_v6 = vadd.f32 %v12394_v23, %v16220_v8  ;;  %v8897_v5 = vld [vmem:[%s13779_s9 + $0x28] sm:$0xff] }
 0xa67   : > { %v8635_v11 = vadd.f32 %v12397_v20, %v16220_v8 }
 0xa68   : > { %v8633_v18 = vadd.f32 %v12400_v22, %v16220_v8 }
 0xa69   : > { %v8655_v16 = vpack.c.bf16 %v8635_v11, %v8634_v17 }
 0xa6a   : > { %v11821_v30 = vpop.f32.mrb[120].mxu1  ;;  %v8654_v60 = vpack.c.bf16 %v8633_v18, %v8632_v6 }
 0xa6b   : > { %v12403_v19 = vadd.f32 %v16203_v42, %v11821_v30  ;;  %v8543_v45 = vpop.f32.mrb[121].mxu1 }
 0xa6c   : > { %v12406_v62 = vadd.f32 %v16197_v34, %v8543_v45  ;;  %v11822_v3 = vpop.f32.mrb[122].mxu1  ;;  %11863 = vmatprep.mubr.bf16.mxu0 %v8654_v60 }
 0xa6d   : > { %v12409_v59 = vadd.f32 %v16206_v48, %v11822_v3  ;;  %v8546_v43 = vpop.f32.mrb[123].mxu1  ;;  %11864 = vmatmul.mubr.bf16.gmra.mrb[36].mxu0 %v8655_v16  ;;  %v8638_v25 = vadd.f32 %v12403_v19, %v16220_v8  ;;  %v8902_v16 = vld [vmem:[%s13779_s9 + $0x50] sm:$0xff]  ;;  %v8900_v19 = vld [vmem:[%s13779_s9 + $0x40] sm:$0xff]  ;;  %v8903_v3 = vld [vmem:[%s13779_s9 + $0x58] sm:$0xff] }
 0xa6e   : > { %v12412_v33 = vadd.f32 %v16200_v27, %v8546_v43  ;;  %v8636_v54 = vadd.f32 %v12406_v62, %v16220_v8 }
 0xa6f   : > { %v8639_v32 = vadd.f32 %v12409_v59, %v16220_v8 }
 0xa70   : > { %v8637_v44 = vadd.f32 %v12412_v33, %v16220_v8 }
 0xa71   : > { %v8657_v42 = vpack.c.bf16 %v8639_v32, %v8638_v25  ;;  %v8901_v25 = vld [vmem:[%s13779_s9 + $0x48] sm:$0xff] }
 0xa72   : > { %v11825_v47 = vpop.f32.mrb[124].mxu1  ;;  %v8656_v46 = vpack.c.bf16 %v8637_v44, %v8636_v54 }
 0xa73   : > { %v12415_v34 = vadd.f32 %v16215_v12, %v11825_v47  ;;  %v8559_v28 = vpop.f32.mrb[125].mxu1 }
 0xa74   : > { %v12418_v48 = vadd.f32 %v16209_v56, %v8559_v28  ;;  %v11826_v31 = vpop.f32.mrb[126].mxu1  ;;  %11867 = vmatprep.mubr.bf16.mxu0 %v8656_v46  ;;  %v8906_v46 = vld [vmem:[%s13779_s9 + $0x70] sm:$0xff] }
 0xa75   : > { %v12421_v27 = vadd.f32 %v16217_v35, %v11826_v31  ;;  %v8562_v29 = vpop.f32.mrb[127].mxu1  ;;  %11868 = vmatmul.mubr.bf16.gmra.mrb[40].mxu0 %v8657_v42  ;;  %v8642_v2 = vadd.f32 %v12415_v34, %v16220_v8  ;;  %v16285_v35 = vld [vmem:[#allocation17] ss:$0 sm:$0xff] }
 0xa76   : > { %v12424_v55 = vadd.f32 %v16212_v52, %v8562_v29  ;;  %v8640_v12 = vadd.f32 %v12418_v48, %v16220_v8  ;;  %v8904_v48 = vld [vmem:[%s13779_s9 + $0x60] sm:$0xff]  ;;  %v8907_v29 = vld [vmem:[%s13779_s9 + $0x78] sm:$0xff] }
 0xa77   : > { %v8643_v38 = vadd.f32 %v12421_v27, %v16220_v8 }
 0xa78   : > { %v8641_v50 = vadd.f32 %v12424_v55, %v16220_v8 }
 0xa79   : > { %v8659_v56 = vpack.c.bf16 %v8643_v38, %v8642_v2 }
 0xa7a   : > { %v8658_v40 = vpack.c.bf16 %v8641_v50, %v8640_v12  ;;  %v8905_v12 = vld [vmem:[%s13779_s9 + $0x68] sm:$0xff] }
 0xa7c   : > { %11871 = vmatprep.mubr.bf16.mxu0 %v8658_v40 }
 0xa7d   : > { %11872 = vmatmul.mubr.bf16.gmra.mrb[44].mxu0 %v8659_v56 }
 0xb18   : > { %v11845_v26 = vpop.f32.mrb[16].mxu0 }
 0xb19   : > { %v8774_v52 = vadd.f32 %v11845_v26, %v16285_v35  ;;  %v8765_v51 = vpop.f32.mrb[17].mxu0 }
 0xb1a   : > { %v8766_v8 = vadd.f32 %v16285_v35, %v8765_v51  ;;  %v11846_v57 = vpop.f32.mrb[18].mxu0 }
 0xb1b   : > { %v8926_v7 = vadd.f32 %v8894_v36, %v8774_v52  ;;  %v8777_v1 = vadd.f32 %v11846_v57, %v16285_v35  ;;  %v8768_v41 = vpop.f32.mrb[19].mxu0  ;;  %v8910_v52 = vld [vmem:[%s13779_s9 + $0x90] sm:$0xff] }
 0xb1c   : > { %v8924_v9 = vadd.f32 %v8892_v4, %v8766_v8  ;;  %v8769_v63 = vadd.f32 %v16285_v35, %v8768_v41  ;;  %v8908_v8 = vld [vmem:[%s13779_s9 + $0x80] sm:$0xff] }
 0xb1d   : > { %8959 = vst.msk [vmem:[%s13784_s30 + $0x10] sm:$0xff] %vm8956_vm2, %v8926_v7  ;;  %v8927_v49 = vadd.f32 %v8895_v61, %v8777_v1  ;;  %v8911_v7 = vld [vmem:[%s13779_s9 + $0x98] sm:$0xff] }
 0xb1e   : > { %8957 = vst.msk [vmem:[%s13784_s30] sm:$0xff] %vm8956_vm2, %v8924_v9  ;;  %v8925_v53 = vadd.f32 %v8893_v39, %v8769_v63  ;;  %v8909_v9 = vld [vmem:[%s13779_s9 + $0x88] sm:$0xff] }
 0xb1f   : > { %8960 = vst.msk [vmem:[%s13784_s30 + $0x18] sm:$0xff] %vm8956_vm2, %v8927_v49 }
 0xb20   : > { %8958 = vst.msk [vmem:[%s13784_s30 + $0x8] sm:$0xff] %vm8956_vm2, %v8925_v53  ;;  %v11849_v37 = vpop.f32.mrb[20].mxu0 }
 0xb21   : > { %v8790_v0 = vadd.f32 %v11849_v37, %v16285_v35  ;;  %v8781_v13 = vpop.f32.mrb[21].mxu0 }
 0xb22   : > { %v8782_v58 = vadd.f32 %v16285_v35, %v8781_v13  ;;  %v11850_v21 = vpop.f32.mrb[22].mxu0 }
 0xb23   : > { %v8930_v23 = vadd.f32 %v8898_v14, %v8790_v0  ;;  %v8793_v10 = vadd.f32 %v11850_v21, %v16285_v35  ;;  %v8784_v20 = vpop.f32.mrb[23].mxu0  ;;  %v8914_v0 = vld [vmem:[%s13779_s9 + $0xb0] sm:$0xff] }
 0xb24   : > { %v8928_v22 = vadd.f32 %v8896_v24, %v8782_v58  ;;  %v8785_v17 = vadd.f32 %v16285_v35, %v8784_v20  ;;  %v8912_v58 = vld [vmem:[%s13779_s9 + $0xa0] sm:$0xff] }
 0xb25   : > { %8963 = vst.msk [vmem:[%s13784_s30 + $0x30] sm:$0xff] %vm8956_vm2, %v8930_v23  ;;  %v8931_v11 = vadd.f32 %v8899_v15, %v8793_v10  ;;  %v8915_v23 = vld [vmem:[%s13779_s9 + $0xb8] sm:$0xff] }
 0xb26   : > { %8961 = vst.msk [vmem:[%s13784_s30 + $0x20] sm:$0xff] %vm8956_vm2, %v8928_v22  ;;  %v8929_v6 = vadd.f32 %v8897_v5, %v8785_v17  ;;  %v8913_v22 = vld [vmem:[%s13779_s9 + $0xa8] sm:$0xff] }
 0xb27   : > { %8964 = vst.msk [vmem:[%s13784_s30 + $0x38] sm:$0xff] %vm8956_vm2, %v8931_v11 }
 0xb28   : > { %8962 = vst.msk [vmem:[%s13784_s30 + $0x28] sm:$0xff] %vm8956_vm2, %v8929_v6  ;;  %v11853_v18 = vpop.f32.mrb[24].mxu0 }
 0xb29   : > { %v8806_v30 = vadd.f32 %v11853_v18, %v16285_v35  ;;  %v8797_v60 = vpop.f32.mrb[25].mxu0 }
 0xb2a   : > { %v8798_v45 = vadd.f32 %v16285_v35, %v8797_v60  ;;  %v11854_v62 = vpop.f32.mrb[26].mxu0 }
 0xb2b   : > { %v8934_v59 = vadd.f32 %v8902_v16, %v8806_v30  ;;  %v8809_v43 = vadd.f32 %v11854_v62, %v16285_v35  ;;  %v8800_v33 = vpop.f32.mrb[27].mxu0  ;;  %v8918_v30 = vld [vmem:[%s13779_s9 + $0xd0] sm:$0xff] }
 0xb2c   : > { %v8932_v32 = vadd.f32 %v8900_v19, %v8798_v45  ;;  %v8801_v54 = vadd.f32 %v16285_v35, %v8800_v33  ;;  %v8916_v45 = vld [vmem:[%s13779_s9 + $0xc0] sm:$0xff] }
 0xb2d   : > { %8967 = vst.msk [vmem:[%s13784_s30 + $0x50] sm:$0xff] %vm8956_vm2, %v8934_v59  ;;  %v8935_v44 = vadd.f32 %v8903_v3, %v8809_v43  ;;  %v8919_v59 = vld [vmem:[%s13779_s9 + $0xd8] sm:$0xff] }
 0xb2e   : > { %8965 = vst.msk [vmem:[%s13784_s30 + $0x40] sm:$0xff] %vm8956_vm2, %v8932_v32  ;;  %v8933_v42 = vadd.f32 %v8901_v25, %v8801_v54  ;;  %v8917_v32 = vld [vmem:[%s13779_s9 + $0xc8] sm:$0xff] }
 0xb2f   : > { %8968 = vst.msk [vmem:[%s13784_s30 + $0x58] sm:$0xff] %vm8956_vm2, %v8935_v44 }
 0xb30   : > { %8966 = vst.msk [vmem:[%s13784_s30 + $0x48] sm:$0xff] %vm8956_vm2, %v8933_v42  ;;  %v11857_v47 = vpop.f32.mrb[28].mxu0 }
 0xb31   : > { %v8822_v34 = vadd.f32 %v11857_v47, %v16285_v35  ;;  %v8813_v28 = vpop.f32.mrb[29].mxu0 }
 0xb32   : > { %v8814_v31 = vadd.f32 %v16285_v35, %v8813_v28  ;;  %v11858_v27 = vpop.f32.mrb[30].mxu0 }
 0xb33   : > { %v8938_v55 = vadd.f32 %v8906_v46, %v8822_v34  ;;  %v8825_v2 = vadd.f32 %v11858_v27, %v16285_v35  ;;  %v8816_v38 = vpop.f32.mrb[31].mxu0  ;;  %v8922_v34 = vld [vmem:[%s13779_s9 + $0xf0] sm:$0xff] }
 0xb34   : > { %v8936_v50 = vadd.f32 %v8904_v48, %v8814_v31  ;;  %v8817_v56 = vadd.f32 %v16285_v35, %v8816_v38  ;;  %v8920_v31 = vld [vmem:[%s13779_s9 + $0xe0] sm:$0xff] }
 0xb35   : > { %8971 = vst.msk [vmem:[%s13784_s30 + $0x70] sm:$0xff] %vm8956_vm2, %v8938_v55  ;;  %v8939_v40 = vadd.f32 %v8907_v29, %v8825_v2  ;;  %v8923_v55 = vld [vmem:[%s13779_s9 + $0xf8] sm:$0xff] }
 0xb36   : > { %8969 = vst.msk [vmem:[%s13784_s30 + $0x60] sm:$0xff] %vm8956_vm2, %v8936_v50  ;;  %v8937_v26 = vadd.f32 %v8905_v12, %v8817_v56  ;;  %v8921_v50 = vld [vmem:[%s13779_s9 + $0xe8] sm:$0xff] }
 0xb37   : > { %8972 = vst.msk [vmem:[%s13784_s30 + $0x78] sm:$0xff] %vm8956_vm2, %v8939_v40 }
 0xb38   : > { %8970 = vst.msk [vmem:[%s13784_s30 + $0x68] sm:$0xff] %vm8956_vm2, %v8937_v26  ;;  %v11861_v36 = vpop.f32.mrb[32].mxu0 }
 0xb39   : > { %v8838_v51 = vadd.f32 %v11861_v36, %v16285_v35  ;;  %v8829_v4 = vpop.f32.mrb[33].mxu0 }
 0xb3a   : > { %v8830_v57 = vadd.f32 %v16285_v35, %v8829_v4  ;;  %v11862_v61 = vpop.f32.mrb[34].mxu0 }
 0xb3b   : > { %v8942_v1 = vadd.f32 %v8910_v52, %v8838_v51  ;;  %v8841_v41 = vadd.f32 %v11862_v61, %v16285_v35  ;;  %v8832_v39 = vpop.f32.mrb[35].mxu0 }
 0xb3c   : > { %v8940_v63 = vadd.f32 %v8908_v8, %v8830_v57  ;;  %v8833_v49 = vadd.f32 %v16285_v35, %v8832_v39 }
 0xb3d   : > { %8975 = vst.msk [vmem:[%s13784_s30 + $0x90] sm:$0xff] %vm8956_vm2, %v8942_v1  ;;  %v8943_v53 = vadd.f32 %v8911_v7, %v8841_v41 }
 0xb3e   : > { %8973 = vst.msk [vmem:[%s13784_s30 + $0x80] sm:$0xff] %vm8956_vm2, %v8940_v63  ;;  %v8941_v37 = vadd.f32 %v8909_v9, %v8833_v49 }
 0xb3f   : > { %8976 = vst.msk [vmem:[%s13784_s30 + $0x98] sm:$0xff] %vm8956_vm2, %v8943_v53 }
 0xb40   : > { %8974 = vst.msk [vmem:[%s13784_s30 + $0x88] sm:$0xff] %vm8956_vm2, %v8941_v37  ;;  %v11865_v14 = vpop.f32.mrb[36].mxu0 }
 0xb41   : > { %v8854_v13 = vadd.f32 %v11865_v14, %v16285_v35  ;;  %v8845_v24 = vpop.f32.mrb[37].mxu0 }
 0xb42   : > { %v8846_v21 = vadd.f32 %v16285_v35, %v8845_v24  ;;  %v11866_v15 = vpop.f32.mrb[38].mxu0 }
 0xb43   : > { %v8946_v10 = vadd.f32 %v8914_v0, %v8854_v13  ;;  %v8857_v20 = vadd.f32 %v11866_v15, %v16285_v35  ;;  %v8848_v5 = vpop.f32.mrb[39].mxu0 }
 0xb44   : > { %v8944_v17 = vadd.f32 %v8912_v58, %v8846_v21  ;;  %v8849_v11 = vadd.f32 %v16285_v35, %v8848_v5 }
 0xb45   : > { %8979 = vst.msk [vmem:[%s13784_s30 + $0xb0] sm:$0xff] %vm8956_vm2, %v8946_v10  ;;  %v8947_v6 = vadd.f32 %v8915_v23, %v8857_v20 }
 0xb46   : > { %8977 = vst.msk [vmem:[%s13784_s30 + $0xa0] sm:$0xff] %vm8956_vm2, %v8944_v17  ;;  %v8945_v18 = vadd.f32 %v8913_v22, %v8849_v11 }
 0xb47   : > { %8980 = vst.msk [vmem:[%s13784_s30 + $0xb8] sm:$0xff] %vm8956_vm2, %v8947_v6 }
 0xb48   : > { %8978 = vst.msk [vmem:[%s13784_s30 + $0xa8] sm:$0xff] %vm8956_vm2, %v8945_v18  ;;  %v11869_v16 = vpop.f32.mrb[40].mxu0 }
 0xb49   : > { %v8870_v60 = vadd.f32 %v11869_v16, %v16285_v35  ;;  %v8861_v19 = vpop.f32.mrb[41].mxu0 }
 0xb4a   : > { %v8862_v62 = vadd.f32 %v16285_v35, %v8861_v19  ;;  %v11870_v3 = vpop.f32.mrb[42].mxu0 }
 0xb4b   : > { %v8950_v43 = vadd.f32 %v8918_v30, %v8870_v60  ;;  %v8873_v33 = vadd.f32 %v11870_v3, %v16285_v35  ;;  %v8864_v25 = vpop.f32.mrb[43].mxu0 }
 0xb4c   : > { %v8948_v54 = vadd.f32 %v8916_v45, %v8862_v62  ;;  %v8865_v44 = vadd.f32 %v16285_v35, %v8864_v25 }
 0xb4d   : > { %8983 = vst.msk [vmem:[%s13784_s30 + $0xd0] sm:$0xff] %vm8956_vm2, %v8950_v43  ;;  %v8951_v42 = vadd.f32 %v8919_v59, %v8873_v33 }
 0xb4e   : > { %8981 = vst.msk [vmem:[%s13784_s30 + $0xc0] sm:$0xff] %vm8956_vm2, %v8948_v54  ;;  %v8949_v47 = vadd.f32 %v8917_v32, %v8865_v44 }
 0xb4f   : > { %8984 = vst.msk [vmem:[%s13784_s30 + $0xd8] sm:$0xff] %vm8956_vm2, %v8951_v42 }
 0xb50   : > { %8982 = vst.msk [vmem:[%s13784_s30 + $0xc8] sm:$0xff] %vm8956_vm2, %v8949_v47  ;;  %v11873_v46 = vpop.f32.mrb[44].mxu0 }
 0xb51   : > { %v8886_v28 = vadd.f32 %v11873_v46, %v16285_v35  ;;  %v8877_v48 = vpop.f32.mrb[45].mxu0 }
 0xb52   : > { %v8878_v27 = vadd.f32 %v16285_v35, %v8877_v48  ;;  %v11874_v29 = vpop.f32.mrb[46].mxu0 }
 0xb53   : > { %v8954_v2 = vadd.f32 %v8922_v34, %v8886_v28  ;;  %v8889_v38 = vadd.f32 %v11874_v29, %v16285_v35  ;;  %v8880_v12 = vpop.f32.mrb[47].mxu0 }
 0xb54   : > { %v8952_v56 = vadd.f32 %v8920_v31, %v8878_v27  ;;  %v8881_v40 = vadd.f32 %v16285_v35, %v8880_v12 }
 0xb55   : > { %8987 = vst.msk [vmem:[%s13784_s30 + $0xf0] sm:$0xff] %vm8956_vm2, %v8954_v2  ;;  %v8955_v26 = vadd.f32 %v8923_v55, %v8889_v38 }
 0xb56   : > { %8985 = vst.msk [vmem:[%s13784_s30 + $0xe0] sm:$0xff] %vm8956_vm2, %v8952_v56  ;;  %v8953_v36 = vadd.f32 %v8921_v50, %v8881_v40 }
 0xb57   : > { %8988 = vst.msk [vmem:[%s13784_s30 + $0xf8] sm:$0xff] %vm8956_vm2, %v8955_v26 }
 0xb58   : > { %8986 = vst.msk [vmem:[%s13784_s30 + $0xe8] sm:$0xff] %vm8956_vm2, %v8953_v36 }
 0xb59 PF: > { %s26_s28 = sadd.s32 1, %s13333_s28   ;;  %s16550_s9 = sld [smem:[#allocation27_spill]] }
 0xb5a   : > { %p23_p7 = scmp.ge.s32.totalorder %s26_s28, 42   ;;  %s16551_s21 = smov %s13309_s22 }
 0xb5b   : > { %s16552_s22 = smov %s13313_s23  ;;  %s16553_s23 = smov %s13589_s29 }
 0xb5c   : > { %s16554_s24 = smov %s13325_s26  ;;  %s16555_s25 = smov %s13329_s27 }
 0xb5d   : > { %s16556_s26 = smov %s16559_s14  ;;  %25 = sbr.rel (!%p23_p7) target bundleno = 18 (0x12), region = 167 }
 0xb5f   : > { %s16557_s27 = smov %s16550_s9 }
 0xb64   :  { %9010 = vsyncpa [#allocation6], 1 }
 0xb65   :  { %9012 = vsyncpa [#allocation6 + $0x1], 1 }
 0xb66   :  { %9013 = vsyncpa [#allocation8], 1 }
 0xb67   :  { %9014 = vsyncpa [#allocation13], 1 }
 0xb68   :  { %9015 = vsyncpa [#allocation16], 1 }

</bundles_post_ra>
